<compile_context>
chip_gen: v7x
topology: tpu7x:2x2x1
jax: 0.10.0
libtpu: 0.0.40
codegen_flags: <defaults>
</compile_context>

<pallas_src>
import functools

import numpy as np
import jax
import jax.numpy as jnp
from jax.experimental import pallas as pl
from jax.experimental.pallas import tpu as pltpu


N_FFT = 1024
F_BINS = N_FFT // 2 + 1          # 513 (onesided rfft bins)
IN_EPS = 1e-5                    # InstanceNorm1d default eps
GRU_TIME_CHUNK = 8               # timesteps processed per grid step in kernel 2


def _round_up(x, m):
    return ((x + m - 1) // m) * m


# --------------------------------------------------------------------------
# Kernel 1: windowed DFT power spectrum + InstanceNorm1d + GRU input gates.
# Grid: (B,). Block = one batch element, all (padded) frames at once.
# --------------------------------------------------------------------------
def _spec_norm_gates_kernel(frames_ref, dft_ref, gamma_ref, beta_ref,
                            wih_ref, bih_ref, gx_ref, *, n_frames):
    f_pad = dft_ref.shape[1] // 2

    fr = frames_ref[0]                                   # (t_pad, N_FFT)
    # Real DFT with the Hann window folded into the (cos | sin) matrix.
    spec = jnp.dot(fr, dft_ref[...], preferred_element_type=jnp.float32)
    re = spec[:, :f_pad]
    im = spec[:, f_pad:]
    power = re * re + im * im                            # (t_pad, f_pad)

    # InstanceNorm1d over time.  Padded time rows are exactly zero, so the
    # one-pass sums below only see the n_frames valid rows; divide by the
    # true count (biased variance, matching PyTorch InstanceNorm1d).
    inv_t = 1.0 / n_frames
    mean = jnp.sum(power, axis=0, keepdims=True) * inv_t
    mean_sq = jnp.sum(power * power, axis=0, keepdims=True) * inv_t
    var = jnp.maximum(mean_sq - mean * mean, 0.0)
    xin = (power - mean) * jax.lax.rsqrt(var + IN_EPS)
    xin = xin * gamma_ref[...] + beta_ref[...]

    # GRU input projection for all timesteps: x @ W_ih^T + b_ih (gates r|z|n).
    gx_ref[0] = (jnp.dot(xin, wih_ref[...], preferred_element_type=jnp.float32)
                 + bih_ref[...])


def spec_norm_gates_pallas(frames, dft, gamma, beta, w_ih, b_ih, *, n_frames):
    b, t_pad, n_fft = frames.shape
    two_fp = dft.shape[1]
    f_pad = two_fp // 2
    g3 = w_ih.shape[1]
    kernel = functools.partial(_spec_norm_gates_kernel, n_frames=n_frames)
    return pl.pallas_call(
        kernel,
        out_shape=jax.ShapeDtypeStruct((b, t_pad, g3), jnp.float32),
        grid_spec=pltpu.PrefetchScalarGridSpec(
            num_scalar_prefetch=0,
            grid=(b,),
            in_specs=[
                pl.BlockSpec((1, t_pad, n_fft), lambda i: (i, 0, 0)),  # frames
                pl.BlockSpec((n_fft, two_fp), lambda i: (0, 0)),       # cos|sin
                pl.BlockSpec((1, f_pad), lambda i: (0, 0)),            # gamma
                pl.BlockSpec((1, f_pad), lambda i: (0, 0)),            # beta
                pl.BlockSpec((f_pad, g3), lambda i: (0, 0)),           # W_ih^T
                pl.BlockSpec((1, g3), lambda i: (0, 0)),               # b_ih
            ],
            out_specs=pl.BlockSpec((1, t_pad, g3), lambda i: (i, 0, 0)),
        ),
        compiler_params=pltpu.CompilerParams(
            dimension_semantics=("parallel",),
            vmem_limit_bytes=64 * 1024 * 1024),
    )(frames, dft, gamma, beta, w_ih, b_ih)


# --------------------------------------------------------------------------
# Kernel 2: GRU recurrence (gate order r | z | n, PyTorch semantics) with the
# final Linear fused into each step.  Grid: (T/tc,), sequential ("arbitrary"),
# hidden state carried in VMEM scratch across grid steps; tc timesteps are
# processed per grid step by an unrolled fori_loop to amortize grid overhead
# and keep input/output DMAs chunk-sized.
# --------------------------------------------------------------------------
def _gru_dense_kernel(gx_ref, whh_ref, bhh_ref, wd_ref, bd_ref, out_ref,
                      h_ref, *, tc):
    c = pl.program_id(0)

    @pl.when(c == 0)
    def _():
        h_ref[...] = jnp.zeros_like(h_ref)

    hp = whh_ref.shape[0]

    def step(t, h):
        gx = gx_ref[t]                                   # (B, 3*h_pad)
        gh = jnp.dot(h, whh_ref[...],
                     preferred_element_type=jnp.float32) + bhh_ref[...]
        r = jax.nn.sigmoid(gx[:, 0:hp] + gh[:, 0:hp])
        u = jax.nn.sigmoid(gx[:, hp:2 * hp] + gh[:, hp:2 * hp])
        n = jnp.tanh(gx[:, 2 * hp:3 * hp] + r * gh[:, 2 * hp:3 * hp])
        h_new = (1.0 - u) * n + u * h
        out_ref[t] = (jnp.dot(h_new, wd_ref[...],
                              preferred_element_type=jnp.float32)
                      + bd_ref[...])
        return h_new

    h_final = jax.lax.fori_loop(0, tc, step, h_ref[...], unroll=True)
    h_ref[...] = h_final


def gru_dense_pallas(gates_x, w_hh, b_hh, w_d, b_d, *, tc=GRU_TIME_CHUNK):
    t_pad, b, g3 = gates_x.shape
    assert t_pad % tc == 0, (t_pad, tc)
    h_pad = w_hh.shape[0]
    z_pad = w_d.shape[1]
    kernel = functools.partial(_gru_dense_kernel, tc=tc)
    return pl.pallas_call(
        kernel,
        out_shape=jax.ShapeDtypeStruct((t_pad, b, z_pad), jnp.float32),
        grid_spec=pltpu.PrefetchScalarGridSpec(
            num_scalar_prefetch=0,
            grid=(t_pad // tc,),
            in_specs=[
                pl.BlockSpec((tc, b, g3), lambda c: (c, 0, 0)),     # x-gates chunk
                pl.BlockSpec((h_pad, g3), lambda c: (0, 0)),        # W_hh^T
                pl.BlockSpec((1, g3), lambda c: (0, 0)),            # b_hh
                pl.BlockSpec((h_pad, z_pad), lambda c: (0, 0)),     # W_dense^T
                pl.BlockSpec((1, z_pad), lambda c: (0, 0)),         # b_dense
            ],
            out_specs=pl.BlockSpec((tc, b, z_pad), lambda c: (c, 0, 0)),
            scratch_shapes=[pltpu.VMEM((b, h_pad), jnp.float32)],
        ),
        compiler_params=pltpu.CompilerParams(
            dimension_semantics=("arbitrary",),
            vmem_limit_bytes=32 * 1024 * 1024),
    )(gates_x, w_hh, b_hh, w_d, b_d)


# --------------------------------------------------------------------------
# Parameter helpers
# --------------------------------------------------------------------------
def _pad_gate_cols(wt, h, h_pad):
    """(in, 3*h) -> (in, 3*h_pad), each gate block zero-padded to h_pad lanes."""
    parts = [jnp.pad(wt[:, g * h:(g + 1) * h], ((0, 0), (0, h_pad - h)))
             for g in range(3)]
    return jnp.concatenate(parts, axis=1)


def _make_windowed_dft(f_pad):
    """(N_FFT, 2*f_pad) matrix: [win*cos | win*sin], freq bins padded with 0."""
    n = np.arange(N_FFT)
    k = np.arange(F_BINS)
    ang = 2.0 * np.pi * ((np.outer(n, k) % N_FFT).astype(np.float64) / N_FFT)
    win = 0.5 * (1.0 - np.cos(2.0 * np.pi * n / N_FFT))   # periodic Hann
    cos_m = win[:, None] * np.cos(ang)
    sin_m = win[:, None] * np.sin(ang)
    pad = f_pad - F_BINS
    cos_m = np.pad(cos_m, ((0, 0), (0, pad)))
    sin_m = np.pad(sin_m, ((0, 0), (0, pad)))
    return jnp.asarray(np.concatenate([cos_m, sin_m], axis=1), jnp.float32)


# --------------------------------------------------------------------------
# Encoder wrapper
# --------------------------------------------------------------------------
class CepstralCoeffsEncoderPallas:
    def __init__(self, n_grains, hop_size, n_cc=30, hidden_size=512,
                 bidirectional=False, z_dim=128, l_grain=2048, *, key):
        if bidirectional:
            # TODO(synk): bidirectional GRU (reverse-time pass) not implemented.
            raise NotImplementedError("bidirectional GRU not supported")
        self.n_grains = n_grains
        self.l_grain = l_grain
        self.tar_l = int((n_grains + 3) / 4 * l_grain)
        self.hop_size = hop_size
        self.n_cc = n_cc
        self.hidden_size = hidden_size
        self.z_dim = z_dim

        h, z = hidden_size, z_dim
        self.f_pad = _round_up(F_BINS, 128)
        self.h_pad = _round_up(h, 128)
        self.z_pad = _round_up(z, 128)

        ks = jax.random.split(key, 8)
        sh = 1.0 / float(np.sqrt(h))
        # InstanceNorm1d affine params (random here to exercise the affine path).
        self.gamma = jax.random.uniform(ks[0], (F_BINS,), jnp.float32, 0.5, 1.5)
        self.beta = jax.random.uniform(ks[1], (F_BINS,), jnp.float32, -0.1, 0.1)
        # GRU params, PyTorch layout: weight_ih (3H, in), weight_hh (3H, H),
        # gate order r | z | n.
        self.w_ih = jax.random.uniform(ks[2], (3 * h, F_BINS), jnp.float32, -sh, sh)
        self.w_hh = jax.random.uniform(ks[3], (3 * h, h), jnp.float32, -sh, sh)
        self.b_ih = jax.random.uniform(ks[4], (3 * h,), jnp.float32, -sh, sh)
        self.b_hh = jax.random.uniform(ks[5], (3 * h,), jnp.float32, -sh, sh)
        # Dense: (z_dim, H) like nn.Linear.
        self.w_d = jax.random.uniform(ks[6], (z, h), jnp.float32, -sh, sh)
        self.b_d = jax.random.uniform(ks[7], (z,), jnp.float32, -sh, sh)

        # ---- padded, fused, lane-aligned kernel-side parameters ----
        self.dft = _make_windowed_dft(self.f_pad)                 # (1024, 2*640)
        self.gamma_p = jnp.pad(self.gamma, (0, self.f_pad - F_BINS),
                               constant_values=1.0).reshape(1, self.f_pad)
        self.beta_p = jnp.pad(self.beta, (0, self.f_pad - F_BINS)
                              ).reshape(1, self.f_pad)
        wih_t = _pad_gate_cols(self.w_ih.T, h, self.h_pad)        # (513, 3*hp)
        self.w_ih_p = jnp.pad(wih_t, ((0, self.f_pad - F_BINS), (0, 0)))
        self.b_ih_p = _pad_gate_cols(self.b_ih.reshape(1, -1), h, self.h_pad)
        whh_t = _pad_gate_cols(self.w_hh.T, h, self.h_pad)        # (H, 3*hp)
        self.w_hh_p = jnp.pad(whh_t, ((0, self.h_pad - h), (0, 0)))
        self.b_hh_p = _pad_gate_cols(self.b_hh.reshape(1, -1), h, self.h_pad)
        self.w_d_p = jnp.pad(self.w_d.T,
                             ((0, self.h_pad - h), (0, self.z_pad - z)))
        self.b_d_p = jnp.pad(self.b_d, (0, self.z_pad - z)).reshape(1, self.z_pad)

    @functools.partial(jax.jit, static_argnums=0)
    def forward(self, audio):
        b, length = audio.shape
        hop = self.hop_size
        n_frames = 1 + length // hop
        t_pad = _round_up(n_frames, max(8, GRU_TIME_CHUNK))

        # torch.stft(center=True) framing: reflect-pad by n_fft//2, hop frames.
        pad = N_FFT // 2
        xp = jnp.pad(audio, ((0, 0), (pad, pad)), mode="reflect")
        idx = jnp.arange(n_frames)[:, None] * hop + jnp.arange(N_FFT)[None, :]
        frames = xp[:, idx]                                   # (B, T, N_FFT)
        frames = jnp.pad(frames, ((0, 0), (0, t_pad - n_frames), (0, 0)))

        gx = spec_norm_gates_pallas(frames, self.dft, self.gamma_p, self.beta_p,
                                    self.w_ih_p, self.b_ih_p, n_frames=n_frames)
        gx_t = jnp.transpose(gx, (1, 0, 2))                   # (t_pad, B, 3*h_pad)
        zs = gru_dense_pallas(gx_t, self.w_hh_p, self.b_hh_p,
                              self.w_d_p, self.b_d_p)         # (t_pad, B, z_pad)
        zs = jnp.transpose(zs, (1, 0, 2))                     # (B, t_pad, z_pad)
        return zs[:, :n_frames, :self.z_dim]


# --------------------------------------------------------------------------
# Pure-JAX reference (no Pallas)
# --------------------------------------------------------------------------
def reference_forward(enc, audio, use_fft=True):
    b, length = audio.shape
    hop = enc.hop_size
    t = 1 + length // hop
    pad = N_FFT // 2
    xp = jnp.pad(audio, ((0, 0), (pad, pad)), mode="reflect")
    idx = jnp.arange(t)[:, None] * hop + jnp.arange(N_FFT)[None, :]
    frames = xp[:, idx]                                       # (B, T, N_FFT)

    if use_fft:
        n = jnp.arange(N_FFT)
        win = 0.5 * (1.0 - jnp.cos(2.0 * jnp.pi * n / N_FFT))
        spec = jnp.fft.rfft(frames * win, axis=-1)
        power = (jnp.abs(spec) ** 2).astype(jnp.float32)      # (B, T, 513)
    else:
        sp = jnp.einsum("btn,nf->btf", frames, enc.dft)
        re = sp[..., :F_BINS]
        im = sp[..., enc.f_pad:enc.f_pad + F_BINS]
        power = re * re + im * im

    # InstanceNorm1d(513, affine=True): per (batch, channel) over time, biased.
    mean = jnp.mean(power, axis=1, keepdims=True)
    var = jnp.var(power, axis=1, keepdims=True)
    zin = (power - mean) / jnp.sqrt(var + IN_EPS)
    zin = zin * enc.gamma[None, None, :] + enc.beta[None, None, :]

    h_dim = enc.hidden_size
    wih_t, whh_t = enc.w_ih.T, enc.w_hh.T

    def step(h, x_t):
        gi = x_t @ wih_t + enc.b_ih
        gh = h @ whh_t + enc.b_hh
        r = jax.nn.sigmoid(gi[:, :h_dim] + gh[:, :h_dim])
        u = jax.nn.sigmoid(gi[:, h_dim:2 * h_dim] + gh[:, h_dim:2 * h_dim])
        nn_ = jnp.tanh(gi[:, 2 * h_dim:] + r * gh[:, 2 * h_dim:])
        h_new = (1.0 - u) * nn_ + u * h
        return h_new, h_new

    h0 = jnp.zeros((b, h_dim), jnp.float32)
    _, hs = jax.lax.scan(step, h0, jnp.transpose(zin, (1, 0, 2)))
    hs = jnp.transpose(hs, (1, 0, 2))                         # (B, T, H)
    return hs @ enc.w_d.T + enc.b_d


# --------------------------------------------------------------------------
if __name__ == "__main__":
    key = jax.random.PRNGKey(0)
    k_param, k_audio = jax.random.split(key)

    # Scaled-down config (real module: hidden_size=512, z_dim=128).
    n_grains, l_grain = 5, 2048
    hop_size = l_grain // 4                    # 512
    enc = CepstralCoeffsEncoderPallas(
        n_grains=n_grains, hop_size=hop_size, n_cc=30, hidden_size=64,
        bidirectional=False, z_dim=32, l_grain=l_grain, key=k_param)

    B = 2
    audio = jax.random.normal(k_audio, (B, enc.tar_l), jnp.float32)  # (2, 4096)

    z = enc.forward(audio)
    jax.block_until_ready(z)

    n_frames = 1 + enc.tar_l // hop_size
    assert z.shape == (B, n_frames, enc.z_dim), z.shape

    # Tight check: same windowed-DFT math, XLA vs Pallas execution.
    z_ref_dft = reference_forward(enc, audio, use_fft=False)
    # Loose check: ground-truth reference via jnp.fft.rfft (torch.stft analog).
    z_ref_fft = reference_forward(enc, audio, use_fft=True)

    assert jnp.allclose(z, z_ref_dft, atol=5e-3, rtol=5e-3), \
        float(jnp.max(jnp.abs(z - z_ref_dft)))
    assert jnp.allclose(z, z_ref_fft, atol=5e-2, rtol=5e-2), \
        float(jnp.max(jnp.abs(z - z_ref_fft)))

    print("KERNEL_OK")
</pallas_src>

<mosaic_0001>
module attributes {stable_mosaic.version = 11 : i64} {
  func.func private @main(%arg0: i32) attributes {dimension_semantics = [#tpu.dimension_semantics<core_parallel>], iteration_bounds = array<i64: 2>, tpu.core_type = #tpu.core_type<sc_scalar_subcore>, window_params = []} {
    return
  }
}

module attributes {stable_mosaic.version = 11 : i64} {
  func.func private @main(%arg0: i32) attributes {dimension_semantics = [#tpu.dimension_semantics<core_parallel>], iteration_bounds = array<i64: 2>, tpu.core_type = #tpu.core_type<sc_scalar_subcore>, window_params = []} {
    return
  }
}

module attributes {stable_mosaic.version = 11 : i64} {
  func.func @_spec_norm_gates_kernel(%arg0: i32, %arg1: memref<1x16x1024xf32, #tpu.memory_space<vmem>>, %arg2: memref<1024x1280xf32, #tpu.memory_space<vmem>>, %arg3: memref<1x640xf32, #tpu.memory_space<vmem>>, %arg4: memref<1x640xf32, #tpu.memory_space<vmem>>, %arg5: memref<640x384xf32, #tpu.memory_space<vmem>>, %arg6: memref<1x384xf32, #tpu.memory_space<vmem>>, %arg7: memref<1x16x384xf32, #tpu.memory_space<vmem>>) attributes {dimension_semantics = [#tpu.dimension_semantics<parallel>], iteration_bounds = array<i64: 2>, scalar_prefetch = 0 : i64, scratch_operands = 0 : i64, tpu.core_type = #tpu.core_type<tc>, window_params = [{transform_indices = @transform_0, window_bounds = array<i64: 1, 16, 1024>}, {pipeline_mode = #tpu.pipeline_mode<synchronous>, transform_indices = @transform_1, window_bounds = array<i64: 1024, 1280>}, {pipeline_mode = #tpu.pipeline_mode<synchronous>, transform_indices = @transform_2, window_bounds = array<i64: 1, 640>}, {pipeline_mode = #tpu.pipeline_mode<synchronous>, transform_indices = @transform_3, window_bounds = array<i64: 1, 640>}, {pipeline_mode = #tpu.pipeline_mode<synchronous>, transform_indices = @transform_4, window_bounds = array<i64: 640, 384>}, {pipeline_mode = #tpu.pipeline_mode<synchronous>, transform_indices = @transform_5, window_bounds = array<i64: 1, 384>}, {transform_indices = @transform_6, window_bounds = array<i64: 1, 16, 384>}]} {
    %c0 = arith.constant 0 : index
    %c0_0 = arith.constant 0 : index
    %c0_1 = arith.constant 0 : index
    %0 = vector.load %arg1[%c0, %c0_0, %c0_1] : memref<1x16x1024xf32, #tpu.memory_space<vmem>>, vector<1x16x1024xf32>
    %1 = vector.shape_cast %0 : vector<1x16x1024xf32> to vector<16x1024xf32>
    %c0_2 = arith.constant 0 : index
    %c0_3 = arith.constant 0 : index
    %2 = vector.load %arg2[%c0_2, %c0_3] : memref<1024x1280xf32, #tpu.memory_space<vmem>>, vector<1024x1280xf32>
    %cst = arith.constant dense<0.000000e+00> : vector<16x1280xf32>
    %3 = tpu.matmul %1, %2, %cst {dimension_numbers = #tpu.dot_dimension_numbers<[1], [0], [0], [1], [0, 0, 1, 1], [], []>} : vector<16x1024xf32>, vector<1024x1280xf32>, vector<16x1280xf32> -> vector<16x1280xf32>
    %4 = vector.extract_strided_slice %3 {offsets = [0, 0], sizes = [16, 640], strides = [1, 1]} : vector<16x1280xf32> to vector<16x640xf32>
    %5 = vector.extract_strided_slice %3 {offsets = [0, 640], sizes = [16, 640], strides = [1, 1]} : vector<16x1280xf32> to vector<16x640xf32>
    %6 = arith.mulf %4, %4 : vector<16x640xf32>
    %7 = arith.mulf %5, %5 : vector<16x640xf32>
    %8 = arith.addf %6, %7 : vector<16x640xf32>
    %cst_4 = arith.constant dense<0.000000e+00> : vector<640xf32>
    %9 = vector.multi_reduction <add>, %8, %cst_4 [0] : vector<16x640xf32> to vector<640xf32>
    %10 = vector.shape_cast %9 : vector<640xf32> to vector<1x640xf32>
    %cst_5 = arith.constant 0.111111112 : f32
    %11 = vector.broadcast %cst_5 : f32 to vector<1x640xf32>
    %12 = arith.mulf %10, %11 : vector<1x640xf32>
    %13 = arith.mulf %8, %8 : vector<16x640xf32>
    %cst_6 = arith.constant dense<0.000000e+00> : vector<640xf32>
    %14 = vector.multi_reduction <add>, %13, %cst_6 [0] : vector<16x640xf32> to vector<640xf32>
    %15 = vector.shape_cast %14 : vector<640xf32> to vector<1x640xf32>
    %cst_7 = arith.constant 0.111111112 : f32
    %16 = vector.broadcast %cst_7 : f32 to vector<1x640xf32>
    %17 = arith.mulf %15, %16 : vector<1x640xf32>
    %18 = arith.mulf %12, %12 : vector<1x640xf32>
    %19 = arith.subf %17, %18 : vector<1x640xf32>
    %cst_8 = arith.constant 0.000000e+00 : f32
    %20 = vector.broadcast %cst_8 : f32 to vector<1x640xf32>
    %21 = arith.maximumf %19, %20 : vector<1x640xf32>
    %22 = vector.broadcast %12 : vector<1x640xf32> to vector<16x640xf32>
    %23 = arith.subf %8, %22 : vector<16x640xf32>
    %cst_9 = arith.constant 9.99999974E-6 : f32
    %24 = vector.broadcast %cst_9 : f32 to vector<1x640xf32>
    %25 = arith.addf %21, %24 : vector<1x640xf32>
    %26 = math.rsqrt %25 : vector<1x640xf32>
    %27 = vector.broadcast %26 : vector<1x640xf32> to vector<16x640xf32>
    %28 = arith.mulf %23, %27 : vector<16x640xf32>
    %c0_10 = arith.constant 0 : index
    %c0_11 = arith.constant 0 : index
    %29 = vector.load %arg3[%c0_10, %c0_11] : memref<1x640xf32, #tpu.memory_space<vmem>>, vector<1x640xf32>
    %30 = vector.broadcast %29 : vector<1x640xf32> to vector<16x640xf32>
    %31 = arith.mulf %28, %30 : vector<16x640xf32>
    %c0_12 = arith.constant 0 : index
    %c0_13 = arith.constant 0 : index
    %32 = vector.load %arg4[%c0_12, %c0_13] : memref<1x640xf32, #tpu.memory_space<vmem>>, vector<1x640xf32>
    %33 = vector.broadcast %32 : vector<1x640xf32> to vector<16x640xf32>
    %34 = arith.addf %31, %33 : vector<16x640xf32>
    %c0_14 = arith.constant 0 : index
    %c0_15 = arith.constant 0 : index
    %35 = vector.load %arg5[%c0_14, %c0_15] : memref<640x384xf32, #tpu.memory_space<vmem>>, vector<640x384xf32>
    %cst_16 = arith.constant dense<0.000000e+00> : vector<16x384xf32>
    %36 = tpu.matmul %34, %35, %cst_16 {dimension_numbers = #tpu.dot_dimension_numbers<[1], [0], [0], [1], [0, 0, 1, 1], [], []>} : vector<16x640xf32>, vector<640x384xf32>, vector<16x384xf32> -> vector<16x384xf32>
    %c0_17 = arith.constant 0 : index
    %c0_18 = arith.constant 0 : index
    %37 = vector.load %arg6[%c0_17, %c0_18] : memref<1x384xf32, #tpu.memory_space<vmem>>, vector<1x384xf32>
    %38 = vector.broadcast %37 : vector<1x384xf32> to vector<16x384xf32>
    %39 = arith.addf %36, %38 : vector<16x384xf32>
    %c0_19 = arith.constant 0 : index
    %c0_20 = arith.constant 0 : index
    %c0_21 = arith.constant 0 : index
    %40 = vector.load %arg7[%c0_19, %c0_20, %c0_21] : memref<1x16x384xf32, #tpu.memory_space<vmem>>, vector<1x16x384xf32>
    %41 = vector.shape_cast %40 : vector<1x16x384xf32> to vector<16x384xf32>
    %42 = vector.shape_cast %39 : vector<16x384xf32> to vector<1x16x384xf32>
    tpu.vector_store %arg7[%c0_19, %c0_20, %c0_21], %42 {strides = array<i32>} : memref<1x16x384xf32, #tpu.memory_space<vmem>>, vector<1x16x384xf32>,
    return
  }
  func.func @transform_0(%arg0: i32) -> (i32, i32, i32) {
    %c0_i32 = arith.constant 0 : i32
    %c0_i32_0 = arith.constant 0 : i32
    %c0_i32_1 = arith.constant 0 : i32
    return %arg0, %c0_i32, %c0_i32_0 : i32, i32, i32
  }
  func.func @transform_1(%arg0: i32) -> (i32, i32) {
    %c0_i32 = arith.constant 0 : i32
    %c0_i32_0 = arith.constant 0 : i32
    %c0_i32_1 = arith.constant 0 : i32
    return %c0_i32, %c0_i32_0 : i32, i32
  }
  func.func @transform_2(%arg0: i32) -> (i32, i32) {
    %c0_i32 = arith.constant 0 : i32
    %c0_i32_0 = arith.constant 0 : i32
    %c0_i32_1 = arith.constant 0 : i32
    return %c0_i32, %c0_i32_0 : i32, i32
  }
  func.func @transform_3(%arg0: i32) -> (i32, i32) {
    %c0_i32 = arith.constant 0 : i32
    %c0_i32_0 = arith.constant 0 : i32
    %c0_i32_1 = arith.constant 0 : i32
    return %c0_i32, %c0_i32_0 : i32, i32
  }
  func.func @transform_4(%arg0: i32) -> (i32, i32) {
    %c0_i32 = arith.constant 0 : i32
    %c0_i32_0 = arith.constant 0 : i32
    %c0_i32_1 = arith.constant 0 : i32
    return %c0_i32, %c0_i32_0 : i32, i32
  }
  func.func @transform_5(%arg0: i32) -> (i32, i32) {
    %c0_i32 = arith.constant 0 : i32
    %c0_i32_0 = arith.constant 0 : i32
    %c0_i32_1 = arith.constant 0 : i32
    return %c0_i32, %c0_i32_0 : i32, i32
  }
  func.func @transform_6(%arg0: i32) -> (i32, i32, i32) {
    %c0_i32 = arith.constant 0 : i32
    %c0_i32_0 = arith.constant 0 : i32
    %c0_i32_1 = arith.constant 0 : i32
    return %arg0, %c0_i32, %c0_i32_0 : i32, i32, i32
  }
}

module attributes {stable_mosaic.version = 11 : i64} {
  func.func @_gru_dense_kernel(%arg0: i32, %arg1: memref<8x2x384xf32, #tpu.memory_space<vmem>>, %arg2: memref<128x384xf32, #tpu.memory_space<vmem>>, %arg3: memref<1x384xf32, #tpu.memory_space<vmem>>, %arg4: memref<128x128xf32, #tpu.memory_space<vmem>>, %arg5: memref<1x128xf32, #tpu.memory_space<vmem>>, %arg6: memref<8x2x128xf32, #tpu.memory_space<vmem>>, %arg7: memref<2x128xf32, #tpu.memory_space<vmem>>) attributes {dimension_semantics = [#tpu.dimension_semantics<arbitrary>], iteration_bounds = array<i64: 2>, scalar_prefetch = 0 : i64, scratch_operands = 1 : i64, tpu.core_type = #tpu.core_type<tc>, window_params = [{transform_indices = @transform_0, window_bounds = array<i64: 8, 2, 384>}, {pipeline_mode = #tpu.pipeline_mode<synchronous>, transform_indices = @transform_1, window_bounds = array<i64: 128, 384>}, {pipeline_mode = #tpu.pipeline_mode<synchronous>, transform_indices = @transform_2, window_bounds = array<i64: 1, 384>}, {pipeline_mode = #tpu.pipeline_mode<synchronous>, transform_indices = @transform_3, window_bounds = array<i64: 128, 128>}, {pipeline_mode = #tpu.pipeline_mode<synchronous>, transform_indices = @transform_4, window_bounds = array<i64: 1, 128>}, {transform_indices = @transform_5, window_bounds = array<i64: 8, 2, 128>}]} {
    %c0_i32 = arith.constant 0 : i32
    %0 = arith.cmpi eq, %arg0, %c0_i32 : i32
    %1 = arith.extui %0 : i1 to i32
    %c0_i32_0 = arith.constant 0 : i32
    %2 = arith.cmpi ne, %1, %c0_i32_0 : i32
    scf.if %2 {
      %cst_140 = arith.constant 0.000000e+00 : f32
      %349 = vector.broadcast %cst_140 : f32 to vector<2x128xf32>
      %c0_141 = arith.constant 0 : index
      %c0_142 = arith.constant 0 : index
      %350 = vector.load %arg7[%c0_141, %c0_142] : memref<2x128xf32, #tpu.memory_space<vmem>>, vector<2x128xf32>
      tpu.vector_store %arg7[%c0_141, %c0_142], %349 {strides = array<i32>} : memref<2x128xf32, #tpu.memory_space<vmem>>, vector<2x128xf32>,
    } else {
    }
    %c0 = arith.constant 0 : index
    %c0_1 = arith.constant 0 : index
    %3 = vector.load %arg7[%c0, %c0_1] : memref<2x128xf32, #tpu.memory_space<vmem>>, vector<2x128xf32>
    %c0_i32_2 = arith.constant 0 : i32
    %4 = arith.index_cast %c0_i32_2 : i32 to index
    %c0_3 = arith.constant 0 : index
    %c0_4 = arith.constant 0 : index
    %5 = vector.load %arg1[%4, %c0_3, %c0_4] : memref<8x2x384xf32, #tpu.memory_space<vmem>>, vector<1x2x384xf32>
    %6 = vector.shape_cast %5 : vector<1x2x384xf32> to vector<2x384xf32>
    %c0_5 = arith.constant 0 : index
    %c0_6 = arith.constant 0 : index
    %7 = vector.load %arg2[%c0_5, %c0_6] : memref<128x384xf32, #tpu.memory_space<vmem>>, vector<128x384xf32>
    %cst = arith.constant dense<0.000000e+00> : vector<2x384xf32>
    %8 = tpu.matmul %3, %7, %cst {dimension_numbers = #tpu.dot_dimension_numbers<[1], [0], [0], [1], [0, 0, 1, 1], [], []>} : vector<2x128xf32>, vector<128x384xf32>, vector<2x384xf32> -> vector<2x384xf32>
    %c0_7 = arith.constant 0 : index
    %c0_8 = arith.constant 0 : index
    %9 = vector.load %arg3[%c0_7, %c0_8] : memref<1x384xf32, #tpu.memory_space<vmem>>, vector<1x384xf32>
    %10 = vector.broadcast %9 : vector<1x384xf32> to vector<2x384xf32>
    %11 = arith.addf %8, %10 : vector<2x384xf32>
    %12 = vector.extract_strided_slice %6 {offsets = [0, 0], sizes = [2, 128], strides = [1, 1]} : vector<2x384xf32> to vector<2x128xf32>
    %13 = vector.extract_strided_slice %11 {offsets = [0, 0], sizes = [2, 128], strides = [1, 1]} : vector<2x384xf32> to vector<2x128xf32>
    %14 = arith.addf %12, %13 : vector<2x128xf32>
    %15 = arith.negf %14 : vector<2x128xf32>
    %16 = math.exp %15 : vector<2x128xf32>
    %cst_9 = arith.constant 1.000000e+00 : f32
    %17 = vector.broadcast %cst_9 : f32 to vector<2x128xf32>
    %18 = arith.addf %17, %16 : vector<2x128xf32>
    %19 = arith.divf %17, %18 : vector<2x128xf32>
    %20 = vector.extract_strided_slice %6 {offsets = [0, 128], sizes = [2, 128], strides = [1, 1]} : vector<2x384xf32> to vector<2x128xf32>
    %21 = vector.extract_strided_slice %11 {offsets = [0, 128], sizes = [2, 128], strides = [1, 1]} : vector<2x384xf32> to vector<2x128xf32>
    %22 = arith.addf %20, %21 : vector<2x128xf32>
    %23 = arith.negf %22 : vector<2x128xf32>
    %24 = math.exp %23 : vector<2x128xf32>
    %cst_10 = arith.constant 1.000000e+00 : f32
    %25 = vector.broadcast %cst_10 : f32 to vector<2x128xf32>
    %26 = arith.addf %25, %24 : vector<2x128xf32>
    %27 = arith.divf %25, %26 : vector<2x128xf32>
    %28 = vector.extract_strided_slice %6 {offsets = [0, 256], sizes = [2, 128], strides = [1, 1]} : vector<2x384xf32> to vector<2x128xf32>
    %29 = vector.extract_strided_slice %11 {offsets = [0, 256], sizes = [2, 128], strides = [1, 1]} : vector<2x384xf32> to vector<2x128xf32>
    %30 = arith.mulf %19, %29 : vector<2x128xf32>
    %31 = arith.addf %28, %30 : vector<2x128xf32>
    %32 = math.tanh %31 : vector<2x128xf32>
    %cst_11 = arith.constant 1.000000e+00 : f32
    %33 = vector.broadcast %cst_11 : f32 to vector<2x128xf32>
    %34 = arith.subf %33, %27 : vector<2x128xf32>
    %35 = arith.mulf %34, %32 : vector<2x128xf32>
    %36 = arith.mulf %27, %3 : vector<2x128xf32>
    %37 = arith.addf %35, %36 : vector<2x128xf32>
    %c0_12 = arith.constant 0 : index
    %c0_13 = arith.constant 0 : index
    %38 = vector.load %arg4[%c0_12, %c0_13] : memref<128x128xf32, #tpu.memory_space<vmem>>, vector<128x128xf32>
    %cst_14 = arith.constant dense<0.000000e+00> : vector<2x128xf32>
    %39 = tpu.matmul %37, %38, %cst_14 {dimension_numbers = #tpu.dot_dimension_numbers<[1], [0], [0], [1], [0, 0, 1, 1], [], []>} : vector<2x128xf32>, vector<128x128xf32>, vector<2x128xf32> -> vector<2x128xf32>
    %c0_15 = arith.constant 0 : index
    %c0_16 = arith.constant 0 : index
    %40 = vector.load %arg5[%c0_15, %c0_16] : memref<1x128xf32, #tpu.memory_space<vmem>>, vector<1x128xf32>
    %41 = vector.broadcast %40 : vector<1x128xf32> to vector<2x128xf32>
    %42 = arith.addf %39, %41 : vector<2x128xf32>
    %43 = arith.index_cast %c0_i32_2 : i32 to index
    %c0_17 = arith.constant 0 : index
    %c0_18 = arith.constant 0 : index
    %44 = vector.load %arg6[%43, %c0_17, %c0_18] : memref<8x2x128xf32, #tpu.memory_space<vmem>>, vector<1x2x128xf32>
    %45 = vector.shape_cast %44 : vector<1x2x128xf32> to vector<2x128xf32>
    %46 = vector.shape_cast %42 : vector<2x128xf32> to vector<1x2x128xf32>
    tpu.vector_store %arg6[%43, %c0_17, %c0_18], %46 {strides = array<i32>} : memref<8x2x128xf32, #tpu.memory_space<vmem>>, vector<1x2x128xf32>,
    %c1_i32 = arith.constant 1 : i32
    %47 = arith.index_cast %c1_i32 : i32 to index
    %c0_19 = arith.constant 0 : index
    %c0_20 = arith.constant 0 : index
    %48 = vector.load %arg1[%47, %c0_19, %c0_20] : memref<8x2x384xf32, #tpu.memory_space<vmem>>, vector<1x2x384xf32>
    %49 = vector.shape_cast %48 : vector<1x2x384xf32> to vector<2x384xf32>
    %c0_21 = arith.constant 0 : index
    %c0_22 = arith.constant 0 : index
    %50 = vector.load %arg2[%c0_21, %c0_22] : memref<128x384xf32, #tpu.memory_space<vmem>>, vector<128x384xf32>
    %cst_23 = arith.constant dense<0.000000e+00> : vector<2x384xf32>
    %51 = tpu.matmul %37, %50, %cst_23 {dimension_numbers = #tpu.dot_dimension_numbers<[1], [0], [0], [1], [0, 0, 1, 1], [], []>} : vector<2x128xf32>, vector<128x384xf32>, vector<2x384xf32> -> vector<2x384xf32>
    %c0_24 = arith.constant 0 : index
    %c0_25 = arith.constant 0 : index
    %52 = vector.load %arg3[%c0_24, %c0_25] : memref<1x384xf32, #tpu.memory_space<vmem>>, vector<1x384xf32>
    %53 = vector.broadcast %52 : vector<1x384xf32> to vector<2x384xf32>
    %54 = arith.addf %51, %53 : vector<2x384xf32>
    %55 = vector.extract_strided_slice %49 {offsets = [0, 0], sizes = [2, 128], strides = [1, 1]} : vector<2x384xf32> to vector<2x128xf32>
    %56 = vector.extract_strided_slice %54 {offsets = [0, 0], sizes = [2, 128], strides = [1, 1]} : vector<2x384xf32> to vector<2x128xf32>
    %57 = arith.addf %55, %56 : vector<2x128xf32>
    %58 = arith.negf %57 : vector<2x128xf32>
    %59 = math.exp %58 : vector<2x128xf32>
    %cst_26 = arith.constant 1.000000e+00 : f32
    %60 = vector.broadcast %cst_26 : f32 to vector<2x128xf32>
    %61 = arith.addf %60, %59 : vector<2x128xf32>
    %62 = arith.divf %60, %61 : vector<2x128xf32>
    %63 = vector.extract_strided_slice %49 {offsets = [0, 128], sizes = [2, 128], strides = [1, 1]} : vector<2x384xf32> to vector<2x128xf32>
    %64 = vector.extract_strided_slice %54 {offsets = [0, 128], sizes = [2, 128], strides = [1, 1]} : vector<2x384xf32> to vector<2x128xf32>
    %65 = arith.addf %63, %64 : vector<2x128xf32>
    %66 = arith.negf %65 : vector<2x128xf32>
    %67 = math.exp %66 : vector<2x128xf32>
    %cst_27 = arith.constant 1.000000e+00 : f32
    %68 = vector.broadcast %cst_27 : f32 to vector<2x128xf32>
    %69 = arith.addf %68, %67 : vector<2x128xf32>
    %70 = arith.divf %68, %69 : vector<2x128xf32>
    %71 = vector.extract_strided_slice %49 {offsets = [0, 256], sizes = [2, 128], strides = [1, 1]} : vector<2x384xf32> to vector<2x128xf32>
    %72 = vector.extract_strided_slice %54 {offsets = [0, 256], sizes = [2, 128], strides = [1, 1]} : vector<2x384xf32> to vector<2x128xf32>
    %73 = arith.mulf %62, %72 : vector<2x128xf32>
    %74 = arith.addf %71, %73 : vector<2x128xf32>
    %75 = math.tanh %74 : vector<2x128xf32>
    %cst_28 = arith.constant 1.000000e+00 : f32
    %76 = vector.broadcast %cst_28 : f32 to vector<2x128xf32>
    %77 = arith.subf %76, %70 : vector<2x128xf32>
    %78 = arith.mulf %77, %75 : vector<2x128xf32>
    %79 = arith.mulf %70, %37 : vector<2x128xf32>
    %80 = arith.addf %78, %79 : vector<2x128xf32>
    %c0_29 = arith.constant 0 : index
    %c0_30 = arith.constant 0 : index
    %81 = vector.load %arg4[%c0_29, %c0_30] : memref<128x128xf32, #tpu.memory_space<vmem>>, vector<128x128xf32>
    %cst_31 = arith.constant dense<0.000000e+00> : vector<2x128xf32>
    %82 = tpu.matmul %80, %81, %cst_31 {dimension_numbers = #tpu.dot_dimension_numbers<[1], [0], [0], [1], [0, 0, 1, 1], [], []>} : vector<2x128xf32>, vector<128x128xf32>, vector<2x128xf32> -> vector<2x128xf32>
    %c0_32 = arith.constant 0 : index
    %c0_33 = arith.constant 0 : index
    %83 = vector.load %arg5[%c0_32, %c0_33] : memref<1x128xf32, #tpu.memory_space<vmem>>, vector<1x128xf32>
    %84 = vector.broadcast %83 : vector<1x128xf32> to vector<2x128xf32>
    %85 = arith.addf %82, %84 : vector<2x128xf32>
    %86 = arith.index_cast %c1_i32 : i32 to index
    %c0_34 = arith.constant 0 : index
    %c0_35 = arith.constant 0 : index
    %87 = vector.load %arg6[%86, %c0_34, %c0_35] : memref<8x2x128xf32, #tpu.memory_space<vmem>>, vector<1x2x128xf32>
    %88 = vector.shape_cast %87 : vector<1x2x128xf32> to vector<2x128xf32>
    %89 = vector.shape_cast %85 : vector<2x128xf32> to vector<1x2x128xf32>
    tpu.vector_store %arg6[%86, %c0_34, %c0_35], %89 {strides = array<i32>} : memref<8x2x128xf32, #tpu.memory_space<vmem>>, vector<1x2x128xf32>,
    %c2_i32 = arith.constant 2 : i32
    %90 = arith.index_cast %c2_i32 : i32 to index
    %c0_36 = arith.constant 0 : index
    %c0_37 = arith.constant 0 : index
    %91 = vector.load %arg1[%90, %c0_36, %c0_37] : memref<8x2x384xf32, #tpu.memory_space<vmem>>, vector<1x2x384xf32>
    %92 = vector.shape_cast %91 : vector<1x2x384xf32> to vector<2x384xf32>
    %c0_38 = arith.constant 0 : index
    %c0_39 = arith.constant 0 : index
    %93 = vector.load %arg2[%c0_38, %c0_39] : memref<128x384xf32, #tpu.memory_space<vmem>>, vector<128x384xf32>
    %cst_40 = arith.constant dense<0.000000e+00> : vector<2x384xf32>
    %94 = tpu.matmul %80, %93, %cst_40 {dimension_numbers = #tpu.dot_dimension_numbers<[1], [0], [0], [1], [0, 0, 1, 1], [], []>} : vector<2x128xf32>, vector<128x384xf32>, vector<2x384xf32> -> vector<2x384xf32>
    %c0_41 = arith.constant 0 : index
    %c0_42 = arith.constant 0 : index
    %95 = vector.load %arg3[%c0_41, %c0_42] : memref<1x384xf32, #tpu.memory_space<vmem>>, vector<1x384xf32>
    %96 = vector.broadcast %95 : vector<1x384xf32> to vector<2x384xf32>
    %97 = arith.addf %94, %96 : vector<2x384xf32>
    %98 = vector.extract_strided_slice %92 {offsets = [0, 0], sizes = [2, 128], strides = [1, 1]} : vector<2x384xf32> to vector<2x128xf32>
    %99 = vector.extract_strided_slice %97 {offsets = [0, 0], sizes = [2, 128], strides = [1, 1]} : vector<2x384xf32> to vector<2x128xf32>
    %100 = arith.addf %98, %99 : vector<2x128xf32>
    %101 = arith.negf %100 : vector<2x128xf32>
    %102 = math.exp %101 : vector<2x128xf32>
    %cst_43 = arith.constant 1.000000e+00 : f32
    %103 = vector.broadcast %cst_43 : f32 to vector<2x128xf32>
    %104 = arith.addf %103, %102 : vector<2x128xf32>
    %105 = arith.divf %103, %104 : vector<2x128xf32>
    %106 = vector.extract_strided_slice %92 {offsets = [0, 128], sizes = [2, 128], strides = [1, 1]} : vector<2x384xf32> to vector<2x128xf32>
    %107 = vector.extract_strided_slice %97 {offsets = [0, 128], sizes = [2, 128], strides = [1, 1]} : vector<2x384xf32> to vector<2x128xf32>
    %108 = arith.addf %106, %107 : vector<2x128xf32>
    %109 = arith.negf %108 : vector<2x128xf32>
    %110 = math.exp %109 : vector<2x128xf32>
    %cst_44 = arith.constant 1.000000e+00 : f32
    %111 = vector.broadcast %cst_44 : f32 to vector<2x128xf32>
    %112 = arith.addf %111, %110 : vector<2x128xf32>
    %113 = arith.divf %111, %112 : vector<2x128xf32>
    %114 = vector.extract_strided_slice %92 {offsets = [0, 256], sizes = [2, 128], strides = [1, 1]} : vector<2x384xf32> to vector<2x128xf32>
    %115 = vector.extract_strided_slice %97 {offsets = [0, 256], sizes = [2, 128], strides = [1, 1]} : vector<2x384xf32> to vector<2x128xf32>
    %116 = arith.mulf %105, %115 : vector<2x128xf32>
    %117 = arith.addf %114, %116 : vector<2x128xf32>
    %118 = math.tanh %117 : vector<2x128xf32>
    %cst_45 = arith.constant 1.000000e+00 : f32
    %119 = vector.broadcast %cst_45 : f32 to vector<2x128xf32>
    %120 = arith.subf %119, %113 : vector<2x128xf32>
    %121 = arith.mulf %120, %118 : vector<2x128xf32>
    %122 = arith.mulf %113, %80 : vector<2x128xf32>
    %123 = arith.addf %121, %122 : vector<2x128xf32>
    %c0_46 = arith.constant 0 : index
    %c0_47 = arith.constant 0 : index
    %124 = vector.load %arg4[%c0_46, %c0_47] : memref<128x128xf32, #tpu.memory_space<vmem>>, vector<128x128xf32>
    %cst_48 = arith.constant dense<0.000000e+00> : vector<2x128xf32>
    %125 = tpu.matmul %123, %124, %cst_48 {dimension_numbers = #tpu.dot_dimension_numbers<[1], [0], [0], [1], [0, 0, 1, 1], [], []>} : vector<2x128xf32>, vector<128x128xf32>, vector<2x128xf32> -> vector<2x128xf32>
    %c0_49 = arith.constant 0 : index
    %c0_50 = arith.constant 0 : index
    %126 = vector.load %arg5[%c0_49, %c0_50] : memref<1x128xf32, #tpu.memory_space<vmem>>, vector<1x128xf32>
    %127 = vector.broadcast %126 : vector<1x128xf32> to vector<2x128xf32>
    %128 = arith.addf %125, %127 : vector<2x128xf32>
    %129 = arith.index_cast %c2_i32 : i32 to index
    %c0_51 = arith.constant 0 : index
    %c0_52 = arith.constant 0 : index
    %130 = vector.load %arg6[%129, %c0_51, %c0_52] : memref<8x2x128xf32, #tpu.memory_space<vmem>>, vector<1x2x128xf32>
    %131 = vector.shape_cast %130 : vector<1x2x128xf32> to vector<2x128xf32>
    %132 = vector.shape_cast %128 : vector<2x128xf32> to vector<1x2x128xf32>
    tpu.vector_store %arg6[%129, %c0_51, %c0_52], %132 {strides = array<i32>} : memref<8x2x128xf32, #tpu.memory_space<vmem>>, vector<1x2x128xf32>,
    %c3_i32 = arith.constant 3 : i32
    %133 = arith.index_cast %c3_i32 : i32 to index
    %c0_53 = arith.constant 0 : index
    %c0_54 = arith.constant 0 : index
    %134 = vector.load %arg1[%133, %c0_53, %c0_54] : memref<8x2x384xf32, #tpu.memory_space<vmem>>, vector<1x2x384xf32>
    %135 = vector.shape_cast %134 : vector<1x2x384xf32> to vector<2x384xf32>
    %c0_55 = arith.constant 0 : index
    %c0_56 = arith.constant 0 : index
    %136 = vector.load %arg2[%c0_55, %c0_56] : memref<128x384xf32, #tpu.memory_space<vmem>>, vector<128x384xf32>
    %cst_57 = arith.constant dense<0.000000e+00> : vector<2x384xf32>
    %137 = tpu.matmul %123, %136, %cst_57 {dimension_numbers = #tpu.dot_dimension_numbers<[1], [0], [0], [1], [0, 0, 1, 1], [], []>} : vector<2x128xf32>, vector<128x384xf32>, vector<2x384xf32> -> vector<2x384xf32>
    %c0_58 = arith.constant 0 : index
    %c0_59 = arith.constant 0 : index
    %138 = vector.load %arg3[%c0_58, %c0_59] : memref<1x384xf32, #tpu.memory_space<vmem>>, vector<1x384xf32>
    %139 = vector.broadcast %138 : vector<1x384xf32> to vector<2x384xf32>
    %140 = arith.addf %137, %139 : vector<2x384xf32>
    %141 = vector.extract_strided_slice %135 {offsets = [0, 0], sizes = [2, 128], strides = [1, 1]} : vector<2x384xf32> to vector<2x128xf32>
    %142 = vector.extract_strided_slice %140 {offsets = [0, 0], sizes = [2, 128], strides = [1, 1]} : vector<2x384xf32> to vector<2x128xf32>
    %143 = arith.addf %141, %142 : vector<2x128xf32>
    %144 = arith.negf %143 : vector<2x128xf32>
    %145 = math.exp %144 : vector<2x128xf32>
    %cst_60 = arith.constant 1.000000e+00 : f32
    %146 = vector.broadcast %cst_60 : f32 to vector<2x128xf32>
    %147 = arith.addf %146, %145 : vector<2x128xf32>
    %148 = arith.divf %146, %147 : vector<2x128xf32>
    %149 = vector.extract_strided_slice %135 {offsets = [0, 128], sizes = [2, 128], strides = [1, 1]} : vector<2x384xf32> to vector<2x128xf32>
    %150 = vector.extract_strided_slice %140 {offsets = [0, 128], sizes = [2, 128], strides = [1, 1]} : vector<2x384xf32> to vector<2x128xf32>
    %151 = arith.addf %149, %150 : vector<2x128xf32>
    %152 = arith.negf %151 : vector<2x128xf32>
    %153 = math.exp %152 : vector<2x128xf32>
    %cst_61 = arith.constant 1.000000e+00 : f32
    %154 = vector.broadcast %cst_61 : f32 to vector<2x128xf32>
    %155 = arith.addf %154, %153 : vector<2x128xf32>
    %156 = arith.divf %154, %155 : vector<2x128xf32>
    %157 = vector.extract_strided_slice %135 {offsets = [0, 256], sizes = [2, 128], strides = [1, 1]} : vector<2x384xf32> to vector<2x128xf32>
    %158 = vector.extract_strided_slice %140 {offsets = [0, 256], sizes = [2, 128], strides = [1, 1]} : vector<2x384xf32> to vector<2x128xf32>
    %159 = arith.mulf %148, %158 : vector<2x128xf32>
    %160 = arith.addf %157, %159 : vector<2x128xf32>
    %161 = math.tanh %160 : vector<2x128xf32>
    %cst_62 = arith.constant 1.000000e+00 : f32
    %162 = vector.broadcast %cst_62 : f32 to vector<2x128xf32>
    %163 = arith.subf %162, %156 : vector<2x128xf32>
    %164 = arith.mulf %163, %161 : vector<2x128xf32>
    %165 = arith.mulf %156, %123 : vector<2x128xf32>
    %166 = arith.addf %164, %165 : vector<2x128xf32>
    %c0_63 = arith.constant 0 : index
    %c0_64 = arith.constant 0 : index
    %167 = vector.load %arg4[%c0_63, %c0_64] : memref<128x128xf32, #tpu.memory_space<vmem>>, vector<128x128xf32>
    %cst_65 = arith.constant dense<0.000000e+00> : vector<2x128xf32>
    %168 = tpu.matmul %166, %167, %cst_65 {dimension_numbers = #tpu.dot_dimension_numbers<[1], [0], [0], [1], [0, 0, 1, 1], [], []>} : vector<2x128xf32>, vector<128x128xf32>, vector<2x128xf32> -> vector<2x128xf32>
    %c0_66 = arith.constant 0 : index
    %c0_67 = arith.constant 0 : index
    %169 = vector.load %arg5[%c0_66, %c0_67] : memref<1x128xf32, #tpu.memory_space<vmem>>, vector<1x128xf32>
    %170 = vector.broadcast %169 : vector<1x128xf32> to vector<2x128xf32>
    %171 = arith.addf %168, %170 : vector<2x128xf32>
    %172 = arith.index_cast %c3_i32 : i32 to index
    %c0_68 = arith.constant 0 : index
    %c0_69 = arith.constant 0 : index
    %173 = vector.load %arg6[%172, %c0_68, %c0_69] : memref<8x2x128xf32, #tpu.memory_space<vmem>>, vector<1x2x128xf32>
    %174 = vector.shape_cast %173 : vector<1x2x128xf32> to vector<2x128xf32>
    %175 = vector.shape_cast %171 : vector<2x128xf32> to vector<1x2x128xf32>
    tpu.vector_store %arg6[%172, %c0_68, %c0_69], %175 {strides = array<i32>} : memref<8x2x128xf32, #tpu.memory_space<vmem>>, vector<1x2x128xf32>,
    %c4_i32 = arith.constant 4 : i32
    %176 = arith.index_cast %c4_i32 : i32 to index
    %c0_70 = arith.constant 0 : index
    %c0_71 = arith.constant 0 : index
    %177 = vector.load %arg1[%176, %c0_70, %c0_71] : memref<8x2x384xf32, #tpu.memory_space<vmem>>, vector<1x2x384xf32>
    %178 = vector.shape_cast %177 : vector<1x2x384xf32> to vector<2x384xf32>
    %c0_72 = arith.constant 0 : index
    %c0_73 = arith.constant 0 : index
    %179 = vector.load %arg2[%c0_72, %c0_73] : memref<128x384xf32, #tpu.memory_space<vmem>>, vector<128x384xf32>
    %cst_74 = arith.constant dense<0.000000e+00> : vector<2x384xf32>
    %180 = tpu.matmul %166, %179, %cst_74 {dimension_numbers = #tpu.dot_dimension_numbers<[1], [0], [0], [1], [0, 0, 1, 1], [], []>} : vector<2x128xf32>, vector<128x384xf32>, vector<2x384xf32> -> vector<2x384xf32>
    %c0_75 = arith.constant 0 : index
    %c0_76 = arith.constant 0 : index
    %181 = vector.load %arg3[%c0_75, %c0_76] : memref<1x384xf32, #tpu.memory_space<vmem>>, vector<1x384xf32>
    %182 = vector.broadcast %181 : vector<1x384xf32> to vector<2x384xf32>
    %183 = arith.addf %180, %182 : vector<2x384xf32>
    %184 = vector.extract_strided_slice %178 {offsets = [0, 0], sizes = [2, 128], strides = [1, 1]} : vector<2x384xf32> to vector<2x128xf32>
    %185 = vector.extract_strided_slice %183 {offsets = [0, 0], sizes = [2, 128], strides = [1, 1]} : vector<2x384xf32> to vector<2x128xf32>
    %186 = arith.addf %184, %185 : vector<2x128xf32>
    %187 = arith.negf %186 : vector<2x128xf32>
    %188 = math.exp %187 : vector<2x128xf32>
    %cst_77 = arith.constant 1.000000e+00 : f32
    %189 = vector.broadcast %cst_77 : f32 to vector<2x128xf32>
    %190 = arith.addf %189, %188 : vector<2x128xf32>
    %191 = arith.divf %189, %190 : vector<2x128xf32>
    %192 = vector.extract_strided_slice %178 {offsets = [0, 128], sizes = [2, 128], strides = [1, 1]} : vector<2x384xf32> to vector<2x128xf32>
    %193 = vector.extract_strided_slice %183 {offsets = [0, 128], sizes = [2, 128], strides = [1, 1]} : vector<2x384xf32> to vector<2x128xf32>
    %194 = arith.addf %192, %193 : vector<2x128xf32>
    %195 = arith.negf %194 : vector<2x128xf32>
    %196 = math.exp %195 : vector<2x128xf32>
    %cst_78 = arith.constant 1.000000e+00 : f32
    %197 = vector.broadcast %cst_78 : f32 to vector<2x128xf32>
    %198 = arith.addf %197, %196 : vector<2x128xf32>
    %199 = arith.divf %197, %198 : vector<2x128xf32>
    %200 = vector.extract_strided_slice %178 {offsets = [0, 256], sizes = [2, 128], strides = [1, 1]} : vector<2x384xf32> to vector<2x128xf32>
    %201 = vector.extract_strided_slice %183 {offsets = [0, 256], sizes = [2, 128], strides = [1, 1]} : vector<2x384xf32> to vector<2x128xf32>
    %202 = arith.mulf %191, %201 : vector<2x128xf32>
    %203 = arith.addf %200, %202 : vector<2x128xf32>
    %204 = math.tanh %203 : vector<2x128xf32>
    %cst_79 = arith.constant 1.000000e+00 : f32
    %205 = vector.broadcast %cst_79 : f32 to vector<2x128xf32>
    %206 = arith.subf %205, %199 : vector<2x128xf32>
    %207 = arith.mulf %206, %204 : vector<2x128xf32>
    %208 = arith.mulf %199, %166 : vector<2x128xf32>
    %209 = arith.addf %207, %208 : vector<2x128xf32>
    %c0_80 = arith.constant 0 : index
    %c0_81 = arith.constant 0 : index
    %210 = vector.load %arg4[%c0_80, %c0_81] : memref<128x128xf32, #tpu.memory_space<vmem>>, vector<128x128xf32>
    %cst_82 = arith.constant dense<0.000000e+00> : vector<2x128xf32>
    %211 = tpu.matmul %209, %210, %cst_82 {dimension_numbers = #tpu.dot_dimension_numbers<[1], [0], [0], [1], [0, 0, 1, 1], [], []>} : vector<2x128xf32>, vector<128x128xf32>, vector<2x128xf32> -> vector<2x128xf32>
    %c0_83 = arith.constant 0 : index
    %c0_84 = arith.constant 0 : index
    %212 = vector.load %arg5[%c0_83, %c0_84] : memref<1x128xf32, #tpu.memory_space<vmem>>, vector<1x128xf32>
    %213 = vector.broadcast %212 : vector<1x128xf32> to vector<2x128xf32>
    %214 = arith.addf %211, %213 : vector<2x128xf32>
    %215 = arith.index_cast %c4_i32 : i32 to index
    %c0_85 = arith.constant 0 : index
    %c0_86 = arith.constant 0 : index
    %216 = vector.load %arg6[%215, %c0_85, %c0_86] : memref<8x2x128xf32, #tpu.memory_space<vmem>>, vector<1x2x128xf32>
    %217 = vector.shape_cast %216 : vector<1x2x128xf32> to vector<2x128xf32>
    %218 = vector.shape_cast %214 : vector<2x128xf32> to vector<1x2x128xf32>
    tpu.vector_store %arg6[%215, %c0_85, %c0_86], %218 {strides = array<i32>} : memref<8x2x128xf32, #tpu.memory_space<vmem>>, vector<1x2x128xf32>,
    %c5_i32 = arith.constant 5 : i32
    %219 = arith.index_cast %c5_i32 : i32 to index
    %c0_87 = arith.constant 0 : index
    %c0_88 = arith.constant 0 : index
    %220 = vector.load %arg1[%219, %c0_87, %c0_88] : memref<8x2x384xf32, #tpu.memory_space<vmem>>, vector<1x2x384xf32>
    %221 = vector.shape_cast %220 : vector<1x2x384xf32> to vector<2x384xf32>
    %c0_89 = arith.constant 0 : index
    %c0_90 = arith.constant 0 : index
    %222 = vector.load %arg2[%c0_89, %c0_90] : memref<128x384xf32, #tpu.memory_space<vmem>>, vector<128x384xf32>
    %cst_91 = arith.constant dense<0.000000e+00> : vector<2x384xf32>
    %223 = tpu.matmul %209, %222, %cst_91 {dimension_numbers = #tpu.dot_dimension_numbers<[1], [0], [0], [1], [0, 0, 1, 1], [], []>} : vector<2x128xf32>, vector<128x384xf32>, vector<2x384xf32> -> vector<2x384xf32>
    %c0_92 = arith.constant 0 : index
    %c0_93 = arith.constant 0 : index
    %224 = vector.load %arg3[%c0_92, %c0_93] : memref<1x384xf32, #tpu.memory_space<vmem>>, vector<1x384xf32>
    %225 = vector.broadcast %224 : vector<1x384xf32> to vector<2x384xf32>
    %226 = arith.addf %223, %225 : vector<2x384xf32>
    %227 = vector.extract_strided_slice %221 {offsets = [0, 0], sizes = [2, 128], strides = [1, 1]} : vector<2x384xf32> to vector<2x128xf32>
    %228 = vector.extract_strided_slice %226 {offsets = [0, 0], sizes = [2, 128], strides = [1, 1]} : vector<2x384xf32> to vector<2x128xf32>
    %229 = arith.addf %227, %228 : vector<2x128xf32>
    %230 = arith.negf %229 : vector<2x128xf32>
    %231 = math.exp %230 : vector<2x128xf32>
    %cst_94 = arith.constant 1.000000e+00 : f32
    %232 = vector.broadcast %cst_94 : f32 to vector<2x128xf32>
    %233 = arith.addf %232, %231 : vector<2x128xf32>
    %234 = arith.divf %232, %233 : vector<2x128xf32>
    %235 = vector.extract_strided_slice %221 {offsets = [0, 128], sizes = [2, 128], strides = [1, 1]} : vector<2x384xf32> to vector<2x128xf32>
    %236 = vector.extract_strided_slice %226 {offsets = [0, 128], sizes = [2, 128], strides = [1, 1]} : vector<2x384xf32> to vector<2x128xf32>
    %237 = arith.addf %235, %236 : vector<2x128xf32>
    %238 = arith.negf %237 : vector<2x128xf32>
    %239 = math.exp %238 : vector<2x128xf32>
    %cst_95 = arith.constant 1.000000e+00 : f32
    %240 = vector.broadcast %cst_95 : f32 to vector<2x128xf32>
    %241 = arith.addf %240, %239 : vector<2x128xf32>
    %242 = arith.divf %240, %241 : vector<2x128xf32>
    %243 = vector.extract_strided_slice %221 {offsets = [0, 256], sizes = [2, 128], strides = [1, 1]} : vector<2x384xf32> to vector<2x128xf32>
    %244 = vector.extract_strided_slice %226 {offsets = [0, 256], sizes = [2, 128], strides = [1, 1]} : vector<2x384xf32> to vector<2x128xf32>
    %245 = arith.mulf %234, %244 : vector<2x128xf32>
    %246 = arith.addf %243, %245 : vector<2x128xf32>
    %247 = math.tanh %246 : vector<2x128xf32>
    %cst_96 = arith.constant 1.000000e+00 : f32
    %248 = vector.broadcast %cst_96 : f32 to vector<2x128xf32>
    %249 = arith.subf %248, %242 : vector<2x128xf32>
    %250 = arith.mulf %249, %247 : vector<2x128xf32>
    %251 = arith.mulf %242, %209 : vector<2x128xf32>
    %252 = arith.addf %250, %251 : vector<2x128xf32>
    %c0_97 = arith.constant 0 : index
    %c0_98 = arith.constant 0 : index
    %253 = vector.load %arg4[%c0_97, %c0_98] : memref<128x128xf32, #tpu.memory_space<vmem>>, vector<128x128xf32>
    %cst_99 = arith.constant dense<0.000000e+00> : vector<2x128xf32>
    %254 = tpu.matmul %252, %253, %cst_99 {dimension_numbers = #tpu.dot_dimension_numbers<[1], [0], [0], [1], [0, 0, 1, 1], [], []>} : vector<2x128xf32>, vector<128x128xf32>, vector<2x128xf32> -> vector<2x128xf32>
    %c0_100 = arith.constant 0 : index
    %c0_101 = arith.constant 0 : index
    %255 = vector.load %arg5[%c0_100, %c0_101] : memref<1x128xf32, #tpu.memory_space<vmem>>, vector<1x128xf32>
    %256 = vector.broadcast %255 : vector<1x128xf32> to vector<2x128xf32>
    %257 = arith.addf %254, %256 : vector<2x128xf32>
    %258 = arith.index_cast %c5_i32 : i32 to index
    %c0_102 = arith.constant 0 : index
    %c0_103 = arith.constant 0 : index
    %259 = vector.load %arg6[%258, %c0_102, %c0_103] : memref<8x2x128xf32, #tpu.memory_space<vmem>>, vector<1x2x128xf32>
    %260 = vector.shape_cast %259 : vector<1x2x128xf32> to vector<2x128xf32>
    %261 = vector.shape_cast %257 : vector<2x128xf32> to vector<1x2x128xf32>
    tpu.vector_store %arg6[%258, %c0_102, %c0_103], %261 {strides = array<i32>} : memref<8x2x128xf32, #tpu.memory_space<vmem>>, vector<1x2x128xf32>,
    %c6_i32 = arith.constant 6 : i32
    %262 = arith.index_cast %c6_i32 : i32 to index
    %c0_104 = arith.constant 0 : index
    %c0_105 = arith.constant 0 : index
    %263 = vector.load %arg1[%262, %c0_104, %c0_105] : memref<8x2x384xf32, #tpu.memory_space<vmem>>, vector<1x2x384xf32>
    %264 = vector.shape_cast %263 : vector<1x2x384xf32> to vector<2x384xf32>
    %c0_106 = arith.constant 0 : index
    %c0_107 = arith.constant 0 : index
    %265 = vector.load %arg2[%c0_106, %c0_107] : memref<128x384xf32, #tpu.memory_space<vmem>>, vector<128x384xf32>
    %cst_108 = arith.constant dense<0.000000e+00> : vector<2x384xf32>
    %266 = tpu.matmul %252, %265, %cst_108 {dimension_numbers = #tpu.dot_dimension_numbers<[1], [0], [0], [1], [0, 0, 1, 1], [], []>} : vector<2x128xf32>, vector<128x384xf32>, vector<2x384xf32> -> vector<2x384xf32>
    %c0_109 = arith.constant 0 : index
    %c0_110 = arith.constant 0 : index
    %267 = vector.load %arg3[%c0_109, %c0_110] : memref<1x384xf32, #tpu.memory_space<vmem>>, vector<1x384xf32>
    %268 = vector.broadcast %267 : vector<1x384xf32> to vector<2x384xf32>
    %269 = arith.addf %266, %268 : vector<2x384xf32>
    %270 = vector.extract_strided_slice %264 {offsets = [0, 0], sizes = [2, 128], strides = [1, 1]} : vector<2x384xf32> to vector<2x128xf32>
    %271 = vector.extract_strided_slice %269 {offsets = [0, 0], sizes = [2, 128], strides = [1, 1]} : vector<2x384xf32> to vector<2x128xf32>
    %272 = arith.addf %270, %271 : vector<2x128xf32>
    %273 = arith.negf %272 : vector<2x128xf32>
    %274 = math.exp %273 : vector<2x128xf32>
    %cst_111 = arith.constant 1.000000e+00 : f32
    %275 = vector.broadcast %cst_111 : f32 to vector<2x128xf32>
    %276 = arith.addf %275, %274 : vector<2x128xf32>
    %277 = arith.divf %275, %276 : vector<2x128xf32>
    %278 = vector.extract_strided_slice %264 {offsets = [0, 128], sizes = [2, 128], strides = [1, 1]} : vector<2x384xf32> to vector<2x128xf32>
    %279 = vector.extract_strided_slice %269 {offsets = [0, 128], sizes = [2, 128], strides = [1, 1]} : vector<2x384xf32> to vector<2x128xf32>
    %280 = arith.addf %278, %279 : vector<2x128xf32>
    %281 = arith.negf %280 : vector<2x128xf32>
    %282 = math.exp %281 : vector<2x128xf32>
    %cst_112 = arith.constant 1.000000e+00 : f32
    %283 = vector.broadcast %cst_112 : f32 to vector<2x128xf32>
    %284 = arith.addf %283, %282 : vector<2x128xf32>
    %285 = arith.divf %283, %284 : vector<2x128xf32>
    %286 = vector.extract_strided_slice %264 {offsets = [0, 256], sizes = [2, 128], strides = [1, 1]} : vector<2x384xf32> to vector<2x128xf32>
    %287 = vector.extract_strided_slice %269 {offsets = [0, 256], sizes = [2, 128], strides = [1, 1]} : vector<2x384xf32> to vector<2x128xf32>
    %288 = arith.mulf %277, %287 : vector<2x128xf32>
    %289 = arith.addf %286, %288 : vector<2x128xf32>
    %290 = math.tanh %289 : vector<2x128xf32>
    %cst_113 = arith.constant 1.000000e+00 : f32
    %291 = vector.broadcast %cst_113 : f32 to vector<2x128xf32>
    %292 = arith.subf %291, %285 : vector<2x128xf32>
    %293 = arith.mulf %292, %290 : vector<2x128xf32>
    %294 = arith.mulf %285, %252 : vector<2x128xf32>
    %295 = arith.addf %293, %294 : vector<2x128xf32>
    %c0_114 = arith.constant 0 : index
    %c0_115 = arith.constant 0 : index
    %296 = vector.load %arg4[%c0_114, %c0_115] : memref<128x128xf32, #tpu.memory_space<vmem>>, vector<128x128xf32>
    %cst_116 = arith.constant dense<0.000000e+00> : vector<2x128xf32>
    %297 = tpu.matmul %295, %296, %cst_116 {dimension_numbers = #tpu.dot_dimension_numbers<[1], [0], [0], [1], [0, 0, 1, 1], [], []>} : vector<2x128xf32>, vector<128x128xf32>, vector<2x128xf32> -> vector<2x128xf32>
    %c0_117 = arith.constant 0 : index
    %c0_118 = arith.constant 0 : index
    %298 = vector.load %arg5[%c0_117, %c0_118] : memref<1x128xf32, #tpu.memory_space<vmem>>, vector<1x128xf32>
    %299 = vector.broadcast %298 : vector<1x128xf32> to vector<2x128xf32>
    %300 = arith.addf %297, %299 : vector<2x128xf32>
    %301 = arith.index_cast %c6_i32 : i32 to index
    %c0_119 = arith.constant 0 : index
    %c0_120 = arith.constant 0 : index
    %302 = vector.load %arg6[%301, %c0_119, %c0_120] : memref<8x2x128xf32, #tpu.memory_space<vmem>>, vector<1x2x128xf32>
    %303 = vector.shape_cast %302 : vector<1x2x128xf32> to vector<2x128xf32>
    %304 = vector.shape_cast %300 : vector<2x128xf32> to vector<1x2x128xf32>
    tpu.vector_store %arg6[%301, %c0_119, %c0_120], %304 {strides = array<i32>} : memref<8x2x128xf32, #tpu.memory_space<vmem>>, vector<1x2x128xf32>,
    %c7_i32 = arith.constant 7 : i32
    %305 = arith.index_cast %c7_i32 : i32 to index
    %c0_121 = arith.constant 0 : index
    %c0_122 = arith.constant 0 : index
    %306 = vector.load %arg1[%305, %c0_121, %c0_122] : memref<8x2x384xf32, #tpu.memory_space<vmem>>, vector<1x2x384xf32>
    %307 = vector.shape_cast %306 : vector<1x2x384xf32> to vector<2x384xf32>
    %c0_123 = arith.constant 0 : index
    %c0_124 = arith.constant 0 : index
    %308 = vector.load %arg2[%c0_123, %c0_124] : memref<128x384xf32, #tpu.memory_space<vmem>>, vector<128x384xf32>
    %cst_125 = arith.constant dense<0.000000e+00> : vector<2x384xf32>
    %309 = tpu.matmul %295, %308, %cst_125 {dimension_numbers = #tpu.dot_dimension_numbers<[1], [0], [0], [1], [0, 0, 1, 1], [], []>} : vector<2x128xf32>, vector<128x384xf32>, vector<2x384xf32> -> vector<2x384xf32>
    %c0_126 = arith.constant 0 : index
    %c0_127 = arith.constant 0 : index
    %310 = vector.load %arg3[%c0_126, %c0_127] : memref<1x384xf32, #tpu.memory_space<vmem>>, vector<1x384xf32>
    %311 = vector.broadcast %310 : vector<1x384xf32> to vector<2x384xf32>
    %312 = arith.addf %309, %311 : vector<2x384xf32>
    %313 = vector.extract_strided_slice %307 {offsets = [0, 0], sizes = [2, 128], strides = [1, 1]} : vector<2x384xf32> to vector<2x128xf32>
    %314 = vector.extract_strided_slice %312 {offsets = [0, 0], sizes = [2, 128], strides = [1, 1]} : vector<2x384xf32> to vector<2x128xf32>
    %315 = arith.addf %313, %314 : vector<2x128xf32>
    %316 = arith.negf %315 : vector<2x128xf32>
    %317 = math.exp %316 : vector<2x128xf32>
    %cst_128 = arith.constant 1.000000e+00 : f32
    %318 = vector.broadcast %cst_128 : f32 to vector<2x128xf32>
    %319 = arith.addf %318, %317 : vector<2x128xf32>
    %320 = arith.divf %318, %319 : vector<2x128xf32>
    %321 = vector.extract_strided_slice %307 {offsets = [0, 128], sizes = [2, 128], strides = [1, 1]} : vector<2x384xf32> to vector<2x128xf32>
    %322 = vector.extract_strided_slice %312 {offsets = [0, 128], sizes = [2, 128], strides = [1, 1]} : vector<2x384xf32> to vector<2x128xf32>
    %323 = arith.addf %321, %322 : vector<2x128xf32>
    %324 = arith.negf %323 : vector<2x128xf32>
    %325 = math.exp %324 : vector<2x128xf32>
    %cst_129 = arith.constant 1.000000e+00 : f32
    %326 = vector.broadcast %cst_129 : f32 to vector<2x128xf32>
    %327 = arith.addf %326, %325 : vector<2x128xf32>
    %328 = arith.divf %326, %327 : vector<2x128xf32>
    %329 = vector.extract_strided_slice %307 {offsets = [0, 256], sizes = [2, 128], strides = [1, 1]} : vector<2x384xf32> to vector<2x128xf32>
    %330 = vector.extract_strided_slice %312 {offsets = [0, 256], sizes = [2, 128], strides = [1, 1]} : vector<2x384xf32> to vector<2x128xf32>
    %331 = arith.mulf %320, %330 : vector<2x128xf32>
    %332 = arith.addf %329, %331 : vector<2x128xf32>
    %333 = math.tanh %332 : vector<2x128xf32>
    %cst_130 = arith.constant 1.000000e+00 : f32
    %334 = vector.broadcast %cst_130 : f32 to vector<2x128xf32>
    %335 = arith.subf %334, %328 : vector<2x128xf32>
    %336 = arith.mulf %335, %333 : vector<2x128xf32>
    %337 = arith.mulf %328, %295 : vector<2x128xf32>
    %338 = arith.addf %336, %337 : vector<2x128xf32>
    %c0_131 = arith.constant 0 : index
    %c0_132 = arith.constant 0 : index
    %339 = vector.load %arg4[%c0_131, %c0_132] : memref<128x128xf32, #tpu.memory_space<vmem>>, vector<128x128xf32>
    %cst_133 = arith.constant dense<0.000000e+00> : vector<2x128xf32>
    %340 = tpu.matmul %338, %339, %cst_133 {dimension_numbers = #tpu.dot_dimension_numbers<[1], [0], [0], [1], [0, 0, 1, 1], [], []>} : vector<2x128xf32>, vector<128x128xf32>, vector<2x128xf32> -> vector<2x128xf32>
    %c0_134 = arith.constant 0 : index
    %c0_135 = arith.constant 0 : index
    %341 = vector.load %arg5[%c0_134, %c0_135] : memref<1x128xf32, #tpu.memory_space<vmem>>, vector<1x128xf32>
    %342 = vector.broadcast %341 : vector<1x128xf32> to vector<2x128xf32>
    %343 = arith.addf %340, %342 : vector<2x128xf32>
    %344 = arith.index_cast %c7_i32 : i32 to index
    %c0_136 = arith.constant 0 : index
    %c0_137 = arith.constant 0 : index
    %345 = vector.load %arg6[%344, %c0_136, %c0_137] : memref<8x2x128xf32, #tpu.memory_space<vmem>>, vector<1x2x128xf32>
    %346 = vector.shape_cast %345 : vector<1x2x128xf32> to vector<2x128xf32>
    %347 = vector.shape_cast %343 : vector<2x128xf32> to vector<1x2x128xf32>
    tpu.vector_store %arg6[%344, %c0_136, %c0_137], %347 {strides = array<i32>} : memref<8x2x128xf32, #tpu.memory_space<vmem>>, vector<1x2x128xf32>,
    %c8_i32 = arith.constant 8 : i32
    %c0_138 = arith.constant 0 : index
    %c0_139 = arith.constant 0 : index
    %348 = vector.load %arg7[%c0_138, %c0_139] : memref<2x128xf32, #tpu.memory_space<vmem>>, vector<2x128xf32>
    tpu.vector_store %arg7[%c0_138, %c0_139], %338 {strides = array<i32>} : memref<2x128xf32, #tpu.memory_space<vmem>>, vector<2x128xf32>,
    return
  }
  func.func @transform_0(%arg0: i32) -> (i32, i32, i32) {
    %c0_i32 = arith.constant 0 : i32
    %c0_i32_0 = arith.constant 0 : i32
    %c0_i32_1 = arith.constant 0 : i32
    return %arg0, %c0_i32, %c0_i32_0 : i32, i32, i32
  }
  func.func @transform_1(%arg0: i32) -> (i32, i32) {
    %c0_i32 = arith.constant 0 : i32
    %c0_i32_0 = arith.constant 0 : i32
    %c0_i32_1 = arith.constant 0 : i32
    return %c0_i32, %c0_i32_0 : i32, i32
  }
  func.func @transform_2(%arg0: i32) -> (i32, i32) {
    %c0_i32 = arith.constant 0 : i32
    %c0_i32_0 = arith.constant 0 : i32
    %c0_i32_1 = arith.constant 0 : i32
    return %c0_i32, %c0_i32_0 : i32, i32
  }
  func.func @transform_3(%arg0: i32) -> (i32, i32) {
    %c0_i32 = arith.constant 0 : i32
    %c0_i32_0 = arith.constant 0 : i32
    %c0_i32_1 = arith.constant 0 : i32
    return %c0_i32, %c0_i32_0 : i32, i32
  }
  func.func @transform_4(%arg0: i32) -> (i32, i32) {
    %c0_i32 = arith.constant 0 : i32
    %c0_i32_0 = arith.constant 0 : i32
    %c0_i32_1 = arith.constant 0 : i32
    return %c0_i32, %c0_i32_0 : i32, i32
  }
  func.func @transform_5(%arg0: i32) -> (i32, i32, i32) {
    %c0_i32 = arith.constant 0 : i32
    %c0_i32_0 = arith.constant 0 : i32
    %c0_i32_1 = arith.constant 0 : i32
    return %arg0, %c0_i32, %c0_i32_0 : i32, i32, i32
  }
}

</mosaic_0001>

<bundles_post_ra>
// kernel: forward.3
= control target key start
LH: loop header
LB: loop body
LE: loop exit
PB: predicated region body
PF: predicated region fallthrough
CT: control target
= control target key end

     0   :  { %10 = vsyncpa [#allocation4], 0  ;;  %s5727_s0 = inlined_call_operand.vmem [shape: f32[16,2,384], index: 0, kind: input, shape index: {}]   ;;  %s5728_s1 = inlined_call_operand.hbm [shape: f32[128,384], index: 1, kind: input, shape index: {}]   ;;  %s5729_s2 = inlined_call_operand.hbm [shape: f32[1,384], index: 2, kind: input, shape index: {}]   ;;  %s5730_s3 = inlined_call_operand.hbm [shape: f32[128,128], index: 3, kind: input, shape index: {}]   ;;  %s5731_s4 = inlined_call_operand.hbm [shape: f32[1,128], index: 4, kind: input, shape index: {}]   ;;  %s5732_s5 = inlined_call_operand.vmem [shape: f32[16,2,128], index: 5, kind: output, shape index: {}]  }
   0x1   :  { %11 = vsyncpa [#allocation6], 0 }
   0x2   :  { %12 = vsyncpa [#allocation9], 0  ;;  %s4862_s18 = smov 0  }
   0x3 LB: > { %s4820_s19 = smov [#allocation5]   ;;  %s4868_s21 = sadd.s32 4294967295, %s4818_s18   ;;  %s4818_s18 = sphi %s4862_s18, %s18_s18  }
   0x4   : > { %s185_s20 = sshll.u32 %s4820_s19, 4  ;;  %p3022_p0 = scmp.ge.s32.totalorder %s4818_s18, 1  ;;  %s186_s20 = int_to_ptr.vmem [resolvable:$true] %s185_s20 }
   0x5   : > { %p159_p1 = scmp.lt.s32.totalorder %s4818_s18, 3  ;;  %p5733_p3 = scmp.eq.s32.totalorder %s4868_s21, 0 }
   0x6   : > { %s4821_s23 = smov [#allocation3]   ;;  %s4822_s26 = smov [#allocation7]  }
   0x7   : > { %p4874_p4 = pnand %p3022_p0, %p159_p1  ;;  %s171_s24 = sshll.u32 %s4821_s23, 4  ;;  %s4880_s24 = int_to_ptr.vmem [resolvable:$true] %s171_s24 }
   0x8   : > { %s195_s27 = sshll.u32 %s4822_s26, 4  ;;  %s4688_s30 = scalar_lea.hbm %s5729_s2, 48  ;;  %s4888_s27 = int_to_ptr.vmem [resolvable:$true] %s195_s27 }
   0x9   : > { %s5735_s22 = scalar_select %p4874_p4, 1, 0 }
   0xa   : > { %p4567_p5 = pneg %p4874_p4  ;;  %p4689_p7 = scmp.ne.s32.totalorder %s5729_s2, %s4688_s30 }
   0xb   : > { %p4695_p11 = scmp.lt.u32.totalorder %s4688_s30, %s5729_s2 }
   0xc   : > { %p4884_p6 = pnand %p5733_p3, %p4567_p5 }
   0xe   : > { %p4898_p8 = pneg %p4884_p6 }
  0x10   : > { %p4691_p9 = pnand %p4898_p8, %p4689_p7 }
  0x12   : > { %p4692_p10 = pneg %p4691_p9 }
  0x14   : > { %p4697_p12 = pnand %p4695_p11, %p4692_p10 }
  0x16   : > { %4700 = shalt.err (!%p4697_p12)
}
  0x17   : > { %s4701_s11 = scalar_lea.vmem %s186_s20, 48  ;;  %s4708_s12 = scalar_lea.vmem %s186_s20, 64 }
  0x18   : > { %p4702_p13 = scmp.ne.s32.totalorder %s186_s20, %s4701_s11  ;;  %p4709_p5 = scmp.lt.s32.totalorder %s186_s20, %s186_s20 }
  0x19   : > { %p4710_p2 = scmp.lt.s32.totalorder %s4708_s12, %s4701_s11 }
  0x1a   : > { %p4704_p0 = pnand %p4702_p13, %p4898_p8 }
  0x1b   : > { %p4711_p3 = por %p4710_p2, %p4709_p5 }
  0x1c   : > { %p4705_p1 = pneg %p4704_p0 }
  0x1e   : > { %p4712_p4 = pnand %p4711_p3, %p4705_p1 }
  0x20   : > { %4715 = shalt.err (!%p4712_p4)
}
  0x21   : > { %4573 = dma.hbm_to_vmem [thread:$0]  (!%p4884_p6), %s5729_s2, 48, %s186_s20, [#allocation6]  }
  0x22   : > { %s4716_s17 = scalar_lea.hbm %s5728_s1, 6144 }
  0x23   : > { %p4717_p7 = scmp.ne.s32.totalorder %s5728_s1, %s4716_s17  ;;  %p4723_p3 = scmp.lt.u32.totalorder %s4716_s17, %s5728_s1 }
  0x25   : > { %p4719_p9 = pnand %p4717_p7, %p4898_p8 }
  0x27   : > { %p4720_p2 = pneg %p4719_p9 }
  0x29   : > { %p4725_p4 = pnand %p4723_p3, %p4720_p2 }
  0x2b   : > { %4728 = shalt.err (!%p4725_p4)
}
  0x2c   : > { %s4729_s20 = scalar_lea.vmem %s4880_s24, 6144  ;;  %p4737_p13 = scmp.lt.s32.totalorder %s4880_s24, %s4880_s24 }
  0x2d   : > { %p4730_p10 = scmp.ne.s32.totalorder %s4880_s24, %s4729_s20  ;;  %p4738_p0 = scmp.lt.s32.totalorder %s4729_s20, %s4729_s20 }
  0x2f   : > { %p4732_p11 = pnand %p4730_p10, %p4898_p8  ;;  %p4739_p1 = por %p4738_p0, %p4737_p13 }
  0x31   : > { %p4733_p12 = pneg %p4732_p11 }
  0x33   : > { %p4740_p5 = pnand %p4739_p1, %p4733_p12 }
  0x35   : > { %4743 = shalt.err (!%p4740_p5)
}
  0x36   : > { %s4823_s29 = smov 384   ;;  %s4824_s30 = smov 24  }
  0x37   : > { %4570 = dma.hbm_to_vmem [thread:$0]  (!%p4884_p6), %s5728_s1, 6144, %s4880_s24, [#allocation4], %s4823_s29, %s4823_s29, %s4824_s30  }
  0x38   : > { %s4744_s11 = scalar_lea.hbm %s5730_s3, 2048 }
  0x39   : > { %p4745_p7 = scmp.ne.s32.totalorder %s5730_s3, %s4744_s11  ;;  %p4751_p3 = scmp.lt.u32.totalorder %s4744_s11, %s5730_s3 }
  0x3b   : > { %p4747_p9 = pnand %p4745_p7, %p4898_p8 }
  0x3d   : > { %p4748_p2 = pneg %p4747_p9 }
  0x3f   : > { %p4753_p4 = pnand %p4751_p3, %p4748_p2 }
  0x41   : > { %4756 = shalt.err (!%p4753_p4)
}
  0x42   : > { %s4757_s24 = scalar_lea.vmem %s4888_s27, 2048  ;;  %p4765_p13 = scmp.lt.s32.totalorder %s4888_s27, %s4888_s27 }
  0x43   : > { %p4758_p10 = scmp.ne.s32.totalorder %s4888_s27, %s4757_s24  ;;  %p4766_p0 = scmp.lt.s32.totalorder %s4757_s24, %s4757_s24 }
  0x45   : > { %p4760_p11 = pnand %p4758_p10, %p4898_p8  ;;  %p4767_p1 = por %p4766_p0, %p4765_p13 }
  0x47   : > { %p4761_p12 = pneg %p4760_p11 }
  0x49   : > { %p4768_p5 = pnand %p4767_p1, %p4761_p12 }
  0x4b   : > { %4771 = shalt.err (!%p4768_p5)
}
  0x4c   : > { %s4825_s16 = smov 128   ;;  %s4826_s17 = smov 8  }
  0x4d   : > { %4576 = dma.hbm_to_vmem [thread:$0]  (!%p4884_p6), %s5730_s3, 2048, %s4888_s27, [#allocation6], %s4825_s16, %s4825_s16, %s4826_s17  }
  0x4e   : > { %s4827_s26 = smov [#allocation8]   ;;  %s4772_s30 = scalar_lea.hbm %s5731_s4, 16 }
  0x4f   : > { %s209_s28 = sshll.u32 %s4827_s26, 4  ;;  %p4773_p7 = scmp.ne.s32.totalorder %s5731_s4, %s4772_s30  ;;  %s210_s28 = int_to_ptr.vmem [resolvable:$true] %s209_s28 }
  0x50   : > { %p4779_p3 = scmp.lt.u32.totalorder %s4772_s30, %s5731_s4 }
  0x51   : > { %p4775_p9 = pnand %p4773_p7, %p4898_p8 }
  0x53   : > { %p4776_p2 = pneg %p4775_p9 }
  0x55   : > { %p4781_p4 = pnand %p4779_p3, %p4776_p2 }
  0x57   : > { %4784 = shalt.err (!%p4781_p4)
}
  0x58   : > { %s4785_s27 = scalar_lea.vmem %s210_s28, 16  ;;  %s4792_s11 = scalar_lea.vmem %s210_s28, 32 }
  0x59   : > { %p4786_p10 = scmp.ne.s32.totalorder %s210_s28, %s4785_s27  ;;  %p4793_p13 = scmp.lt.s32.totalorder %s210_s28, %s210_s28 }
  0x5a   : > { %p4794_p0 = scmp.lt.s32.totalorder %s4792_s11, %s4785_s27 }
  0x5b   : > { %p4788_p11 = pnand %p4786_p10, %p4898_p8 }
  0x5c   : > { %p4795_p1 = por %p4794_p0, %p4793_p13 }
  0x5d   : > { %p4789_p12 = pneg %p4788_p11 }
  0x5f   : > { %p4796_p5 = pnand %p4795_p1, %p4789_p12 }
  0x61   : > { %4799 = shalt.err (!%p4796_p5)
}
  0x62   : > { %4579 = dma.hbm_to_vmem [thread:$0]  (!%p4884_p6), %s5731_s4, 16, %s210_s28, [#allocation9]  }
  0x63   : > { %p5738_p7 = scmp.ne.s32.totalorder %s5735_s22, 0 }
  0x64   : > { %p5739_p9 = scmp.eq.s32.totalorder (!%p5738_p7), %s4868_s21, 0 }
  0x65   : > { %232 = sbr.rel (%p5738_p7) target bundleno = 2491 (0x9bb), region = 40 }
  0x6c   : > { %4805 = dma.done.wait (%p5739_p9), [#allocation4], 6144   ;;  %p5740_p8 = pmov %p5739_p9 }
  0x6e   : > { %4807 = vsyncadd (%p5740_p8), [#allocation4], 4294961152  ;;  %p5741_p2 = pmov %p5740_p8 }
  0x70   : > { %4809 = dma.done.wait (%p5741_p2), [#allocation6], 2096   ;;  %p5742_p3 = pmov %p5741_p2 }
  0x71   : > { %p5743_p4 = pmov %p5741_p2 }
  0x72   : > { %4811 = vsyncadd (%p5742_p3), [#allocation6], 4294965200 }
  0x73   : > { %4813 = dma.done.wait (%p5743_p4), [#allocation9], 16   ;;  %p5744_p6 = pmov %p5741_p2 }
  0x74   : > { %s3033_s22 = sshll.u32 %s4868_s21, 3  ;;  %p5745_p11 = scmp.ne.s32.totalorder %s4868_s21, 0 }
  0x75   : > { %4815 = vsyncadd (%p5744_p6), [#allocation9], 4294967280  ;;  %p274_p10 = scmp.lt.s32.totalorder %s3033_s22, 15  ;;  %v4828_v0 = vmov (!%p5745_p11), 0.0  }
  0x76   : > { %289 = sbr.rel (%p5745_p11) target bundleno = 125 (0x7d), region = 60  ;;  %290 = vst [vmem:[#allocation2] sm:$0x3] (!%p5745_p11), %v4828_v0 }
  0x77   : > { %s5747_s22 = smov (!%p274_p10, %s3033_s22), 15 }
  0x78   : > { %s4550_s25 = smul.u32 6, %s5747_s22  ;;  %s3036_s8 = sshll.u32 %s5747_s22, 1 }
  0x79   : > { %s4996_s24 = scalar_lea.vmem %s5732_s5, %s3036_s8 }
  0x7a   : > { %s5001_s19 = scalar_lea.vmem %s5727_s0, %s4550_s25 }
  0x7d PF: > { %v294_v1 = vld [vmem:[#allocation3 + $0x8] sm:$0xff]  ;;  %v297_v2 = vld [vmem:[#allocation3 + $0x20] sm:$0xff]  ;;  %v296_v5 = vld [vmem:[#allocation3 + $0x18] sm:$0xff]  ;;  %v4829_v8 = vmov 0.0|0.0   ;;  %v4830_v9 = vmov 0.0   ;;  %vm4831_vm0 = vmmov 0  }
  0x7e   : > { %v293_v3 = vld [vmem:[#allocation3] sm:$0xff]  ;;  %v5005_v4 = vpack.c.bf16 %v297_v2, %v294_v1  ;;  %v300_v6 = vld [vmem:[#allocation3 + $0x38] sm:$0xff]  ;;  %v303_v7 = vld [vmem:[#allocation3 + $0x50] sm:$0xff]  ;;  %3942 = vmatprep.subr.bf16.mxu1 %v4829_v8  ;;  %422 = vmatprep.mubr.f32.mxu0 %v4830_v9 }
  0x7f   : > { %v5009_v10 = vpack.c.bf16 %v296_v5, %v293_v3  ;;  %v5011_v11 = vpack.c.bf16 %v303_v7, %v300_v6  ;;  %v299_v12 = vld [vmem:[#allocation3 + $0x30] sm:$0xff]  ;;  %v302_v13 = vld [vmem:[#allocation3 + $0x48] sm:$0xff]  ;;  %3382 = vmatprep.mubr.msk.f32.mxu1 %vm4831_vm0, %v4830_v9  ;;  %v309_v15 = vld [vmem:[#allocation3 + $0x80] sm:$0xff] }
  0x80   : > { %v306_v14 = vld [vmem:[#allocation3 + $0x68] sm:$0xff]  ;;  %3911 = vmatprep.subr.bf16.mxu0 %v5005_v4  ;;  %v5017_v16 = vpack.c.bf16 %v302_v13, %v299_v12  ;;  %v305_v18 = vld [vmem:[#allocation3 + $0x60] sm:$0xff]  ;;  %v308_v19 = vld [vmem:[#allocation3 + $0x78] sm:$0xff] }
  0x81   : > { %3913 = vmatpush1.bf16.msra.mxu0 %v5009_v10  ;;  %v5020_v17 = vpack.c.bf16 %v309_v15, %v306_v14  ;;  %v312_v20 = vld [vmem:[#allocation3 + $0x98] sm:$0xff]  ;;  %v315_v21 = vld [vmem:[#allocation3 + $0xb0] sm:$0xff]  ;;  %v5023_v22 = vpack.c.bf16 %v308_v19, %v305_v18  ;;  %v314_v25 = vld [vmem:[#allocation3 + $0xa8] sm:$0xff] }
  0x82   : > { %3915 = vmatprep.subr.bf16.mxu0 %v5011_v11  ;;  %v5026_v23 = vpack.c.bf16 %v315_v21, %v312_v20  ;;  %v311_v24 = vld [vmem:[#allocation3 + $0x90] sm:$0xff]  ;;  %v318_v26 = vld [vmem:[#allocation3 + $0xc8] sm:$0xff]  ;;  %v321_v27 = vld [vmem:[#allocation3 + $0xe0] sm:$0xff] }
  0x83   : > { %v295_v28 = vld [vmem:[#allocation3 + $0x10] sm:$0xff]  ;;  %v298_v29 = vld [vmem:[#allocation3 + $0x28] sm:$0xff]  ;;  %v301_v31 = vld [vmem:[#allocation3 + $0x40] sm:$0xff]  ;;  %v5031_v32 = vpack.c.bf16 %v314_v25, %v311_v24  ;;  %v5034_v34 = vpack.c.bf16 %v321_v27, %v318_v26 }
  0x84   : > { %v5028_v30 = vpack.c.bf16 %v298_v29, %v295_v28  ;;  %v304_v33 = vld [vmem:[#allocation3 + $0x58] sm:$0xff]  ;;  %v317_v35 = vld [vmem:[#allocation3 + $0xc0] sm:$0xff]  ;;  %v327_v39 = vld [vmem:[#allocation3 + $0x110] sm:$0xff] }
  0x85   : > { %3917 = vmatpush1.bf16.msra.mxu0 %v5017_v16  ;;  %v320_v36 = vld [vmem:[#allocation3 + $0xd8] sm:$0xff]  ;;  %v5037_v38 = vpack.c.bf16 %v304_v33, %v301_v31  ;;  %v307_v40 = vld [vmem:[#allocation3 + $0x70] sm:$0xff]  ;;  %v310_v41 = vld [vmem:[#allocation3 + $0x88] sm:$0xff] }
  0x86   : > { %3919 = vmatprep.subr.bf16.mxu0 %v5020_v17  ;;  %v324_v37 = vld [vmem:[#allocation3 + $0xf8] sm:$0xff]  ;;  %3944 = vmatpush3.bf16.msra.mxu1 %v5028_v30  ;;  %v5041_v42 = vpack.c.bf16 %v320_v36, %v317_v35  ;;  %v323_v44 = vld [vmem:[#allocation3 + $0xf0] sm:$0xff]  ;;  %v326_v45 = vld [vmem:[#allocation3 + $0x108] sm:$0xff]  ;;  %v5047_v47 = vpack.c.bf16 %v310_v41, %v307_v40 }
  0x87   : > { %3945 = vmatprep.subr.bf16.mxu1 %v4829_v8  ;;  %v5044_v43 = vpack.c.bf16 %v327_v39, %v324_v37  ;;  %v330_v46 = vld [vmem:[#allocation3 + $0x128] sm:$0xff]  ;;  %v333_v48 = vld [vmem:[#allocation3 + $0x140] sm:$0xff]  ;;  %v316_v50 = vld [vmem:[#allocation3 + $0xb8] sm:$0xff]  ;;  %v5051_v51 = vpack.c.bf16 %v326_v45, %v323_v44 }
  0x88   : > { %v313_v49 = vld [vmem:[#allocation3 + $0xa0] sm:$0xff]  ;;  %v5054_v52 = vpack.c.bf16 %v333_v48, %v330_v46  ;;  %v332_v54 = vld [vmem:[#allocation3 + $0x138] sm:$0xff]  ;;  %v339_v57 = vld [vmem:[#allocation3 + $0x170] sm:$0xff] }
  0x89   : > { %3921 = vmatpush1.bf16.msra.mxu0 %v5023_v22  ;;  %v329_v53 = vld [vmem:[#allocation3 + $0x120] sm:$0xff]  ;;  %v336_v55 = vld [vmem:[#allocation3 + $0x158] sm:$0xff]  ;;  %v5057_v56 = vpack.c.bf16 %v316_v50, %v313_v49  ;;  %v319_v58 = vld [vmem:[#allocation3 + $0xd0] sm:$0xff] }
  0x8a   : > { %3923 = vmatprep.subr.bf16.mxu0 %v5026_v23  ;;  %3947 = vmatpush3.bf16.msra.mxu1 %v5037_v38  ;;  %v322_v59 = vld [vmem:[#allocation3 + $0xe8] sm:$0xff]  ;;  %v5061_v60 = vpack.c.bf16 %v332_v54, %v329_v53  ;;  %v5064_v61 = vpack.c.bf16 %v339_v57, %v336_v55  ;;  %v335_v62 = vld [vmem:[#allocation3 + $0x150] sm:$0xff]  ;;  %v325_v1 = vld [vmem:[#allocation3 + $0x100] sm:$0xff]  ;;  %v343_v54 = vlaneseq }
  0x8b   : > { %3948 = vmatprep.subr.bf16.mxu1 %v4829_v8  ;;  %v338_v63 = vld [vmem:[#allocation3 + $0x168] sm:$0xff]  ;;  %v5067_v0 = vpack.c.bf16 %v322_v59, %v319_v58  ;;  %v328_v2 = vld [vmem:[#allocation3 + $0x118] sm:$0xff]  ;;  %v331_v6 = vld [vmem:[#allocation3 + $0x130] sm:$0xff] }
  0x8c   : > { %v5071_v3 = vpack.c.bf16 %v338_v63, %v335_v62  ;;  %v5075_v5 = vpack.c.bf16 %v328_v2, %v325_v1  ;;  %v334_v7 = vld [vmem:[#allocation3 + $0x148] sm:$0xff]  ;;  %v5079_v12 = vld [vmem:[#allocation2] sm:$0x3]  ;;  %v337_v14 = vld [vmem:[#allocation3 + $0x160] sm:$0xff]  ;;  %v344_v55 = vshrl.u32 %v343_v54, 7 }
  0x8d   : > { %3925 = vmatpush1.bf16.msra.mxu0 %v5031_v32  ;;  %v5082_v13 = vpack.c.bf16 %v334_v7, %v331_v6  ;;  %v340_v15 = vld [vmem:[#allocation3 + $0x178] sm:$0xff]  ;;  %v525_v19 = vld [vmem:[#allocation7] sm:$0xff]  ;;  %v526_v20 = vld [vmem:[#allocation7 + $0x8] sm:$0xff] }
  0x8e   : > { %3927 = vmatprep.subr.bf16.mxu0 %v5034_v34  ;;  %3950 = vmatpush3.bf16.msra.mxu1 %v5047_v47  ;;  %v5090_v18 = vpack.c.bf16 %v340_v15, %v337_v14  ;;  %v5113_v21 = vpack.c.bf16 %v526_v20, %v525_v19  ;;  %v527_v24 = vld [vmem:[#allocation7 + $0x10] sm:$0xff]  ;;  %v528_v25 = vld [vmem:[#allocation7 + $0x18] sm:$0xff]  ;;  %v529_v27 = vld [vmem:[#allocation7 + $0x20] sm:$0xff]  ;;  %v5145_v57 = vsub.s32 0, %v344_v55  ;;  %v5147_v59 = vsub.s32 1, %v344_v55 }
  0x8f   : > { %3951 = vmatprep.subr.bf16.mxu1 %v4829_v8  ;;  %v5117_v26 = vpack.c.bf16 %v528_v25, %v527_v24  ;;  %v530_v28 = vld [vmem:[#allocation7 + $0x28] sm:$0xff]  ;;  %v531_v31 = vld [vmem:[#allocation7 + $0x30] sm:$0xff]  ;;  %v532_v33 = vld [vmem:[#allocation7 + $0x38] sm:$0xff] }
  0x90   : > { %v5120_v29 = vpack.c.bf16 %v530_v28, %v529_v27  ;;  %v5125_v35 = vpack.c.bf16 %v532_v33, %v531_v31  ;;  %v533_v36 = vld [vmem:[#allocation7 + $0x40] sm:$0xff]  ;;  %v534_v37 = vld [vmem:[#allocation7 + $0x48] sm:$0xff]  ;;  %v535_v40 = vld [vmem:[#allocation7 + $0x50] sm:$0xff] }
  0x91   : > { %3929 = vmatpush1.bf16.msra.mxu0 %v5041_v42  ;;  %v5129_v39 = vpack.c.bf16 %v534_v37, %v533_v36  ;;  %v536_v41 = vld [vmem:[#allocation7 + $0x58] sm:$0xff]  ;;  %v537_v44 = vld [vmem:[#allocation7 + $0x60] sm:$0xff]  ;;  %v538_v46 = vld [vmem:[#allocation7 + $0x68] sm:$0xff]  ;;  %v5152_v36 = vsub.s32 2, %v344_v55 }
  0x92   : > { %3931 = vmatprep.subr.bf16.mxu0 %v5044_v43  ;;  %3953 = vmatpush3.bf16.msra.mxu1 %v5057_v56  ;;  %v5133_v45 = vpack.c.bf16 %v536_v41, %v535_v40  ;;  %v5136_v48 = vpack.c.bf16 %v538_v46, %v537_v44  ;;  %v539_v49 = vld [vmem:[#allocation7 + $0x70] sm:$0xff]  ;;  %v540_v50 = vld [vmem:[#allocation7 + $0x78] sm:$0xff] }
  0x93   : > { %3954 = vmatprep.subr.bf16.mxu1 %v4829_v8  ;;  %v5140_v53 = vpack.c.bf16 %v540_v50, %v539_v49  ;;  %v341_v58 = vld [vmem:[#allocation5] sm:$0x7] }
  0x94   : > { %v346_v62 = vrot.slane %v341_v58, %v5145_v57  ;;  %v350_v63 = vrot.slane %v341_v58, %v5147_v59  ;;  %v292_v1 = vld [vmem:[%s5001_s19] sm:$0x3f]  ;;  %v354_v37 = vrot.slane %v341_v58, %v5152_v36 }
  0x95   : > { %3933 = vmatpush1.bf16.msra.mxu0 %v5051_v51  ;;  %v507_v15 = vrot.slane %v292_v1, 2  ;;  %v517_v46 = vrot.slane %v292_v1, 4 }
  0x96   : > { %3935 = vmatprep.subr.bf16.mxu0 %v5054_v52  ;;  %3956 = vmatpush3.bf16.msra.mxu1 %v5067_v0 }
  0x97   : > { %3957 = vmatprep.subr.bf16.mxu1 %v4829_v8 }
  0x99   : > { %3937 = vmatpush1.bf16.msra.mxu0 %v5061_v60 }
  0x9a   : > { %3939 = vmatprep.subr.bf16.mxu0 %v5064_v61  ;;  %3959 = vmatpush3.bf16.msra.mxu1 %v5075_v5 }
  0x9b   : > { %3960 = vmatprep.subr.bf16.mxu1 %v4829_v8 }
  0x9d   : > { %3941 = vmatpush1.bf16.msra.mxu0 %v5071_v3 }
  0x9e   : > { %3966 = vmatprep.subr.bf16.mxu0 %v4829_v8  ;;  %3962 = vmatpush3.bf16.msra.mxu1 %v5082_v13 }
  0x9f   : > { %3963 = vmatprep.subr.bf16.mxu1 %v4829_v8 }
  0xa0   : > { %423 = vmatmul.mubr.f32.vlgmr.msra.gmra.mrb[0].mxu0 %v5079_v12 }
  0xa1   : > { %3417 = vmatprep.mubr.msk.f32.mxu0 %vm4831_vm0, %v4830_v9  ;;  %3968 = vmatpush3.bf16.msra.mxu0 %v5113_v21 }
  0xa2   : > { %3965 = vmatpush3.bf16.msra.mxu1 %v5090_v18  ;;  %3969 = vmatprep.subr.bf16.mxu0 %v4829_v8 }
  0xa3   : > { %3991 = vmatprep.subr.bf16.mxu1 %v5005_v4 }
  0xa5   : > { %3383 = vmatmul.mubr.f32.vlgmr.msra.gmra.mrb[0].mxu1 %v5079_v12  ;;  %3971 = vmatpush3.bf16.msra.mxu0 %v5117_v26 }
  0xa6   : > { %3993 = vmatpush1.bf16.msra.mxu1 %v5009_v10  ;;  %750 = vmatprep.mubr.f32.mxu1 %v4830_v9 }
  0xa7   : > { %3995 = vmatprep.subr.bf16.mxu1 %v5011_v11  ;;  %3972 = vmatprep.subr.bf16.mxu0 %v4829_v8 }
  0xa9   : > { %3974 = vmatpush3.bf16.msra.mxu0 %v5120_v29 }
  0xaa   : > { %3997 = vmatpush1.bf16.msra.mxu1 %v5017_v16  ;;  %3975 = vmatprep.subr.bf16.mxu0 %v4829_v8 }
  0xab   : > { %3999 = vmatprep.subr.bf16.mxu1 %v5020_v17 }
  0xad   : > { %3977 = vmatpush3.bf16.msra.mxu0 %v5125_v35 }
  0xae   : > { %4001 = vmatpush1.bf16.msra.mxu1 %v5023_v22  ;;  %3978 = vmatprep.subr.bf16.mxu0 %v4829_v8 }
  0xaf   : > { %4003 = vmatprep.subr.bf16.mxu1 %v5026_v23 }
  0xb1   : > { %3980 = vmatpush3.bf16.msra.mxu0 %v5129_v39 }
  0xb2   : > { %4005 = vmatpush1.bf16.msra.mxu1 %v5031_v32  ;;  %3981 = vmatprep.subr.bf16.mxu0 %v4829_v8 }
  0xb3   : > { %4007 = vmatprep.subr.bf16.mxu1 %v5034_v34 }
  0xb5   : > { %3983 = vmatpush3.bf16.msra.mxu0 %v5133_v45 }
  0xb6   : > { %4009 = vmatpush1.bf16.msra.mxu1 %v5041_v42  ;;  %3984 = vmatprep.subr.bf16.mxu0 %v4829_v8 }
  0xb7   : > { %4011 = vmatprep.subr.bf16.mxu1 %v5044_v43 }
  0xb9   : > { %3986 = vmatpush3.bf16.msra.mxu0 %v5136_v48 }
  0xba   : > { %4013 = vmatpush1.bf16.msra.mxu1 %v5051_v51  ;;  %3987 = vmatprep.subr.bf16.mxu0 %v4829_v8 }
  0xbb   : > { %4015 = vmatprep.subr.bf16.mxu1 %v5054_v52 }
  0xbd   : > { %3989 = vmatpush3.bf16.msra.mxu0 %v5140_v53 }
  0xbe   : > { %4017 = vmatpush1.bf16.msra.mxu1 %v5061_v60  ;;  %4022 = vmatprep.subr.bf16.mxu0 %v4829_v8 }
  0xbf   : > { %4019 = vmatprep.subr.bf16.mxu1 %v5064_v61 }
  0xc2   : > { %4021 = vmatpush1.bf16.msra.mxu1 %v5071_v3 }
  0xc3   : > { %4046 = vmatprep.subr.bf16.mxu1 %v4829_v8 }
 0x173   : > { %v424_v2 = vpop.f32.mrb[0].mxu0 }
 0x174   : > { %v425_v6 = vadd.f32 %v424_v2, %v346_v62  ;;  %v426_v7 = vpop.f32.mrb[1].mxu0 }
 0x175   : > { %v427_v14 = vadd.f32 %v426_v7, %v350_v63 }
 0x176   : > { %v499_v19 = vadd.f32 %v425_v6, %v292_v1 }
 0x177   : > { %v509_v24 = vadd.f32 %v507_v15, %v427_v14 }
 0x178   : > { %v3038_v20 = vmul.f32 -1.442695, %v499_v19  ;;  %v495_v25 = vpop.f32.mrb[0].mxu1 }
 0x179   : > { %v3039_v27 = vmul.f32 -1.442695, %v509_v24  ;;  %v3384_v28 = vpop.f32.mrb[1].mxu1  ;;  %v496_v44 = vadd.f32 %v495_v25, %v354_v37 }
 0x17a   : > { %4608 = vpow2.f32 %v3038_v20 }
 0x17b   : > { %4610 = vpow2.f32 %v3039_v27 }
 0x184   : > { %v4609_v31 = vpop.eup %4608 }
 0x185   : > { %v503_v33 = vadd.f32 1.0, %v4609_v31  ;;  %v4611_v40 = vpop.eup %4610 }
 0x186   : > { %v513_v41 = vadd.f32 1.0, %v4611_v40 }
 0x187   : > { %4612 = vrcp.f32 %v503_v33 }
 0x188   : > { %4614 = vrcp.f32 %v513_v41 }
 0x191   : > { %v4613_v49 = vpop.eup %4612 }
 0x192   : > { %v516_v50 = vmul.f32 %v4613_v49, %v496_v44  ;;  %v4615_v62 = vpop.eup %4614 }
 0x193   : > { %v521_v63 = vsub.f32 1.0, %v4615_v62  ;;  %v523_v7 = vmul.f32 %v4615_v62, %v5079_v12  ;;  %v1298_v62 = vld [vmem:[#allocation3 + $0x98] sm:$0xff] }
 0x194   : > { %v519_v54 = vadd.f32 %v517_v46, %v516_v50  ;;  %v1294_v50 = vld [vmem:[#allocation3 + $0x78] sm:$0xff] }
 0x196   : > { %4616 = vtanh.f32 %v519_v54 }
 0x1a0   : > { %v4617_v2 = vpop.eup %4616 }
 0x1a1   : > { %v522_v6 = vmul.f32 %v4617_v2, %v521_v63  ;;  %v1301_v63 = vld [vmem:[#allocation3 + $0xb0] sm:$0xff] }
 0x1a2   : > { %v5282_v2 = vpack.c.bf16 %v1301_v63, %v1298_v62 }
 0x1a3   : > { %v5156_v55 = vadd.f32 %v523_v7, %v522_v6  ;;  %v1297_v6 = vld [vmem:[#allocation3 + $0x90] sm:$0xff]  ;;  %v1300_v7 = vld [vmem:[#allocation3 + $0xa8] sm:$0xff] }
 0x1a5   : > { %3418 = vmatmul.mubr.f32.vlgmr.msra.gmra.mrb[2].mxu0 %v5156_v55  ;;  %751 = vmatmul.mubr.f32.vlgmr.msra.gmra.mrb[2].mxu1 %v5156_v55 }
 0x1a6   : > { %4024 = vmatpush3.bf16.msra.mxu0 %v5028_v30  ;;  %3452 = vmatprep.mubr.msk.f32.mxu0 %vm4831_vm0, %v4830_v9 }
 0x1a7   : > { %4025 = vmatprep.subr.bf16.mxu0 %v4829_v8  ;;  %4048 = vmatpush3.bf16.msra.mxu1 %v5113_v21 }
 0x1a8   : > { %4049 = vmatprep.subr.bf16.mxu1 %v4829_v8  ;;  %3487 = vmatprep.mubr.msk.f32.mxu1 %vm4831_vm0, %v4830_v9 }
 0x1aa   : > { %4027 = vmatpush3.bf16.msra.mxu0 %v5037_v38 }
 0x1ab   : > { %4028 = vmatprep.subr.bf16.mxu0 %v4829_v8  ;;  %4051 = vmatpush3.bf16.msra.mxu1 %v5117_v26 }
 0x1ac   : > { %4052 = vmatprep.subr.bf16.mxu1 %v4829_v8 }
 0x1ae   : > { %4030 = vmatpush3.bf16.msra.mxu0 %v5047_v47 }
 0x1af   : > { %4031 = vmatprep.subr.bf16.mxu0 %v4829_v8  ;;  %4054 = vmatpush3.bf16.msra.mxu1 %v5120_v29 }
 0x1b0   : > { %4055 = vmatprep.subr.bf16.mxu1 %v4829_v8 }
 0x1b2   : > { %4033 = vmatpush3.bf16.msra.mxu0 %v5057_v56 }
 0x1b3   : > { %4034 = vmatprep.subr.bf16.mxu0 %v4829_v8  ;;  %4057 = vmatpush3.bf16.msra.mxu1 %v5125_v35 }
 0x1b4   : > { %4058 = vmatprep.subr.bf16.mxu1 %v4829_v8 }
 0x1b6   : > { %4036 = vmatpush3.bf16.msra.mxu0 %v5067_v0 }
 0x1b7   : > { %4037 = vmatprep.subr.bf16.mxu0 %v4829_v8  ;;  %4060 = vmatpush3.bf16.msra.mxu1 %v5129_v39 }
 0x1b8   : > { %4061 = vmatprep.subr.bf16.mxu1 %v4829_v8 }
 0x1ba   : > { %4039 = vmatpush3.bf16.msra.mxu0 %v5075_v5 }
 0x1bb   : > { %4040 = vmatprep.subr.bf16.mxu0 %v4829_v8  ;;  %4063 = vmatpush3.bf16.msra.mxu1 %v5133_v45 }
 0x1bc   : > { %4064 = vmatprep.subr.bf16.mxu1 %v4829_v8 }
 0x1be   : > { %4042 = vmatpush3.bf16.msra.mxu0 %v5082_v13 }
 0x1bf   : > { %4043 = vmatprep.subr.bf16.mxu0 %v4829_v8  ;;  %4066 = vmatpush3.bf16.msra.mxu1 %v5136_v48 }
 0x1c0   : > { %4067 = vmatprep.subr.bf16.mxu1 %v4829_v8 }
 0x1c2   : > { %4045 = vmatpush3.bf16.msra.mxu0 %v5090_v18 }
 0x1c3   : > { %4071 = vmatprep.subr.bf16.mxu0 %v5005_v4  ;;  %4069 = vmatpush3.bf16.msra.mxu1 %v5140_v53  ;;  %v669_v4 = vld [vmem:[#allocation5] sm:$0x7] }
 0x1c4   : > { %4102 = vmatprep.subr.bf16.mxu1 %v4829_v8  ;;  %v682_v15 = vrot.slane %v669_v4, %v5152_v36 }
 0x1c5   : > { %3453 = vmatmul.mubr.f32.vlgmr.msra.gmra.mrb[4].mxu0 %v5156_v55 }
 0x1c6   : > { %4073 = vmatpush1.bf16.msra.mxu0 %v5009_v10  ;;  %1079 = vmatprep.mubr.f32.mxu0 %v4830_v9  ;;  %v674_v10 = vrot.slane %v669_v4, %v5145_v57 }
 0x1c7   : > { %4075 = vmatprep.subr.bf16.mxu0 %v5011_v11  ;;  %v5215_v11 = vld [vmem:[#allocation8] ss:$0 sm:$0xff] }
 0x1ca   : > { %4077 = vmatpush1.bf16.msra.mxu0 %v5017_v16 }
 0x1cb   : > { %4079 = vmatprep.subr.bf16.mxu0 %v5020_v17  ;;  %v3041_v17 = vld [vmem:[%s5001_s19 + $0x6] sm:$0x3f] }
 0x1cc   : > { %v845_v25 = vrot.slane %v3041_v17, 4 }
 0x1ce   : > { %4081 = vmatpush1.bf16.msra.mxu0 %v5023_v22 }
 0x1cf   : > { %4083 = vmatprep.subr.bf16.mxu0 %v5026_v23 }
 0x1d2   : > { %4085 = vmatpush1.bf16.msra.mxu0 %v5031_v32 }
 0x1d3   : > { %4087 = vmatprep.subr.bf16.mxu0 %v5034_v34 }
 0x1d6   : > { %4089 = vmatpush1.bf16.msra.mxu0 %v5041_v42 }
 0x1d7   : > { %4091 = vmatprep.subr.bf16.mxu0 %v5044_v43  ;;  %v678_v43 = vrot.slane %v669_v4, %v5147_v59  ;;  %v1304_v4 = vld [vmem:[#allocation3 + $0xc8] sm:$0xff] }
 0x1da   : > { %4093 = vmatpush1.bf16.msra.mxu0 %v5051_v51 }
 0x1db   : > { %4095 = vmatprep.subr.bf16.mxu0 %v5054_v52 }
 0x1de   : > { %4097 = vmatpush1.bf16.msra.mxu0 %v5061_v60 }
 0x1df   : > { %4099 = vmatprep.subr.bf16.mxu0 %v5064_v61  ;;  %v835_v61 = vrot.slane %v3041_v17, 2 }
 0x1e2   : > { %4101 = vmatpush1.bf16.msra.mxu0 %v5071_v3 }
 0x1e3   : > { %4126 = vmatprep.subr.bf16.mxu0 %v4829_v8 }
 0x278   : > { %v614_v16 = vpop.f32.mrb[2].mxu0  ;;  %v752_v22 = vpop.f32.mrb[2].mxu1 }
 0x279   : > { %v615_v23 = vadd.f32 %v5215_v11, %v614_v16  ;;  %v753_v32 = vadd.f32 %v752_v22, %v674_v10  ;;  %v3419_v34 = vpop.f32.mrb[3].mxu0  ;;  %v754_v42 = vpop.f32.mrb[3].mxu1  ;;  %v1307_v10 = vld [vmem:[#allocation3 + $0xe0] sm:$0xff]  ;;  %v1306_v22 = vld [vmem:[#allocation3 + $0xd8] sm:$0xff] }
 0x27a   : > { %v755_v60 = vadd.f32 %v754_v42, %v678_v43  ;;  %v5288_v16 = vpack.c.bf16 %v1307_v10, %v1304_v4  ;;  %v1313_v34 = vld [vmem:[#allocation3 + $0x110] sm:$0xff] }
 0x27b   : > { %618 = vst [vmem:[%s4996_s24] sm:$0x3] %v615_v23  ;;  %v827_v51 = vadd.f32 %v3041_v17, %v753_v32  ;;  %v1303_v17 = vld [vmem:[#allocation3 + $0xc0] sm:$0xff]  ;;  %v1310_v32 = vld [vmem:[#allocation3 + $0xf8] sm:$0xff]  ;;  %v1309_v42 = vld [vmem:[#allocation3 + $0xf0] sm:$0xff] }
 0x27c   : > { %v837_v3 = vadd.f32 %v835_v61, %v755_v60  ;;  %v5290_v23 = vpack.c.bf16 %v1306_v22, %v1303_v17  ;;  %v5294_v43 = vpack.c.bf16 %v1313_v34, %v1310_v32  ;;  %v1319_v60 = vld [vmem:[#allocation3 + $0x140] sm:$0xff]  ;;  %v1281_v34 = vld [vmem:[#allocation3 + $0x10] sm:$0xff] }
 0x27d   : > { %v3042_v52 = vmul.f32 -1.442695, %v827_v51  ;;  %v1312_v51 = vld [vmem:[#allocation3 + $0x108] sm:$0xff] }
 0x27e   : > { %v3043_v12 = vmul.f32 -1.442695, %v837_v3  ;;  %v5296_v61 = vpack.c.bf16 %v1312_v51, %v1309_v42  ;;  %v1284_v42 = vld [vmem:[#allocation3 + $0x28] sm:$0xff] }
 0x27f   : > { %4618 = vpow2.f32 %v3042_v52  ;;  %v1316_v52 = vld [vmem:[#allocation3 + $0x128] sm:$0xff] }
 0x280   : > { %4620 = vpow2.f32 %v3043_v12  ;;  %v5298_v3 = vpack.c.bf16 %v1319_v60, %v1316_v52  ;;  %v1315_v12 = vld [vmem:[#allocation3 + $0x120] sm:$0xff] }
 0x289   : > { %v4619_v58 = vpop.eup %4618 }
 0x28a   : > { %v831_v1 = vadd.f32 1.0, %v4619_v58  ;;  %v4621_v14 = vpop.eup %4620  ;;  %v1318_v58 = vld [vmem:[#allocation3 + $0x138] sm:$0xff] }
 0x28b   : > { %v841_v19 = vadd.f32 1.0, %v4621_v14  ;;  %v1325_v14 = vld [vmem:[#allocation3 + $0x170] sm:$0xff] }
 0x28c   : > { %4622 = vrcp.f32 %v831_v1  ;;  %v1322_v1 = vld [vmem:[#allocation3 + $0x158] sm:$0xff] }
 0x28d   : > { %4624 = vrcp.f32 %v841_v19  ;;  %v5305_v19 = vpack.c.bf16 %v1325_v14, %v1322_v1  ;;  %v1287_v1 = vld [vmem:[#allocation3 + $0x40] sm:$0xff]  ;;  %v1290_v14 = vld [vmem:[#allocation3 + $0x58] sm:$0xff] }
 0x296   : > { %v4623_v28 = vpop.eup %4622 }
 0x297   : > { %v4625_v37 = vpop.eup %4624 }
 0x298   : > { %v823_v20 = vpop.f32.mrb[4].mxu0  ;;  %v849_v40 = vsub.f32 1.0, %v4625_v37  ;;  %v851_v46 = vmul.f32 %v4625_v37, %v5156_v55  ;;  %v5284_v55 = vpack.c.bf16 %v1300_v7, %v1297_v6 }
 0x299   : > { %v824_v24 = vadd.f32 %v823_v20, %v682_v15  ;;  %v3454_v27 = vpop.f32.mrb[5].mxu0  ;;  %v5302_v15 = vpack.c.bf16 %v1318_v58, %v1315_v12  ;;  %v1321_v20 = vld [vmem:[#allocation3 + $0x150] sm:$0xff]  ;;  %v5320_v12 = vpack.c.bf16 %v1284_v42, %v1281_v34 }
 0x29a   : > { %v998_v27 = vld [vmem:[#allocation5] sm:$0x7]  ;;  %v1521_v42 = vld [vmem:[#allocation7 + $0x50] sm:$0xff] }
 0x29b   : > { %v844_v31 = vmul.f32 %v4623_v28, %v824_v24  ;;  %v1324_v24 = vld [vmem:[#allocation3 + $0x168] sm:$0xff]  ;;  %v1003_v28 = vrot.slane %v998_v27, %v5145_v57 }
 0x29d   : > { %v847_v33 = vadd.f32 %v845_v25, %v844_v31  ;;  %v5308_v25 = vpack.c.bf16 %v1324_v24, %v1321_v20  ;;  %v5327_v20 = vpack.c.bf16 %v1290_v14, %v1287_v1  ;;  %v1296_v24 = vld [vmem:[#allocation3 + $0x88] sm:$0xff] }
 0x29e   : > { %v1524_v1 = vld [vmem:[#allocation7 + $0x68] sm:$0xff] }
 0x29f   : > { %4626 = vtanh.f32 %v847_v33  ;;  %v3046_v33 = vld [vmem:[%s5001_s19 + $0xc] sm:$0x3f] }
 0x2a0   : > { %v1174_v6 = vrot.slane %v3046_v33, 4 }
 0x2a9   : > { %v4627_v41 = vpop.eup %4626 }
 0x2aa   : > { %v850_v44 = vmul.f32 %v4627_v41, %v849_v40 }
 0x2ac   : > { %v5223_v49 = vadd.f32 %v851_v46, %v850_v44 }
 0x2ae   : > { %3488 = vmatmul.mubr.f32.vlgmr.msra.gmra.mrb[4].mxu1 %v5223_v49  ;;  %1080 = vmatmul.mubr.f32.vlgmr.msra.gmra.mrb[6].mxu0 %v5223_v49 }
 0x2af   : > { %4104 = vmatpush3.bf16.msra.mxu1 %v5028_v30  ;;  %3522 = vmatprep.mubr.msk.f32.mxu1 %vm4831_vm0, %v4830_v9  ;;  %v1280_v30 = vld [vmem:[#allocation3 + $0x8] sm:$0xff] }
 0x2b0   : > { %4105 = vmatprep.subr.bf16.mxu1 %v4829_v8  ;;  %4128 = vmatpush3.bf16.msra.mxu0 %v5113_v21  ;;  %v1289_v21 = vld [vmem:[#allocation3 + $0x50] sm:$0xff] }
 0x2b1   : > { %4129 = vmatprep.subr.bf16.mxu0 %v4829_v8  ;;  %3557 = vmatprep.mubr.msk.f32.mxu0 %vm4831_vm0, %v4830_v9 }
 0x2b3   : > { %4107 = vmatpush3.bf16.msra.mxu1 %v5037_v38  ;;  %v1283_v38 = vld [vmem:[#allocation3 + $0x20] sm:$0xff] }
 0x2b4   : > { %4108 = vmatprep.subr.bf16.mxu1 %v4829_v8  ;;  %4131 = vmatpush3.bf16.msra.mxu0 %v5117_v26  ;;  %v1285_v26 = vld [vmem:[#allocation3 + $0x30] sm:$0xff] }
 0x2b5   : > { %4132 = vmatprep.subr.bf16.mxu0 %v4829_v8 }
 0x2b7   : > { %4110 = vmatpush3.bf16.msra.mxu1 %v5047_v47  ;;  %v5264_v47 = vpack.c.bf16 %v1283_v38, %v1280_v30  ;;  %v1007_v30 = vrot.slane %v998_v27, %v5147_v59 }
 0x2b8   : > { %4111 = vmatprep.subr.bf16.mxu1 %v4829_v8  ;;  %4134 = vmatpush3.bf16.msra.mxu0 %v5120_v29  ;;  %v1288_v29 = vld [vmem:[#allocation3 + $0x48] sm:$0xff] }
 0x2b9   : > { %4135 = vmatprep.subr.bf16.mxu0 %v4829_v8 }
 0x2bb   : > { %4113 = vmatpush3.bf16.msra.mxu1 %v5057_v56  ;;  %v1279_v56 = vld [vmem:[#allocation3] sm:$0xff] }
 0x2bc   : > { %4114 = vmatprep.subr.bf16.mxu1 %v4829_v8  ;;  %4137 = vmatpush3.bf16.msra.mxu0 %v5125_v35  ;;  %v1292_v35 = vld [vmem:[#allocation3 + $0x68] sm:$0xff] }
 0x2bd   : > { %4138 = vmatprep.subr.bf16.mxu0 %v4829_v8 }
 0x2bf   : > { %4116 = vmatpush3.bf16.msra.mxu1 %v5067_v0  ;;  %v1282_v0 = vld [vmem:[#allocation3 + $0x18] sm:$0xff] }
 0x2c0   : > { %4117 = vmatprep.subr.bf16.mxu1 %v4829_v8  ;;  %4140 = vmatpush3.bf16.msra.mxu0 %v5129_v39  ;;  %v1295_v39 = vld [vmem:[#allocation3 + $0x80] sm:$0xff] }
 0x2c1   : > { %4141 = vmatprep.subr.bf16.mxu0 %v4829_v8 }
 0x2c3   : > { %4119 = vmatpush3.bf16.msra.mxu1 %v5075_v5  ;;  %v5266_v5 = vpack.c.bf16 %v1282_v0, %v1279_v56 }
 0x2c4   : > { %4120 = vmatprep.subr.bf16.mxu1 %v4829_v8  ;;  %4143 = vmatpush3.bf16.msra.mxu0 %v5133_v45  ;;  %v5272_v45 = vpack.c.bf16 %v1288_v29, %v1285_v26 }
 0x2c5   : > { %4144 = vmatprep.subr.bf16.mxu0 %v4829_v8 }
 0x2c7   : > { %4122 = vmatpush3.bf16.msra.mxu1 %v5082_v13  ;;  %v1286_v13 = vld [vmem:[#allocation3 + $0x38] sm:$0xff] }
 0x2c8   : > { %4123 = vmatprep.subr.bf16.mxu1 %v4829_v8  ;;  %4146 = vmatpush3.bf16.msra.mxu0 %v5136_v48  ;;  %v5275_v48 = vpack.c.bf16 %v1295_v39, %v1292_v35 }
 0x2c9   : > { %4147 = vmatprep.subr.bf16.mxu0 %v4829_v8 }
 0x2cb   : > { %4125 = vmatpush3.bf16.msra.mxu1 %v5090_v18  ;;  %v5269_v18 = vpack.c.bf16 %v1289_v21, %v1286_v13  ;;  %v1164_v13 = vrot.slane %v3046_v33, 2 }
 0x2cc   : > { %4149 = vmatpush3.bf16.msra.mxu0 %v5140_v53  ;;  %4151 = vmatprep.subr.bf16.mxu1 %v5264_v47  ;;  %v1291_v53 = vld [vmem:[#allocation3 + $0x60] sm:$0xff] }
 0x2cd   : > { %4182 = vmatprep.subr.bf16.mxu0 %v4829_v8  ;;  %v5278_v54 = vpack.c.bf16 %v1294_v50, %v1291_v53  ;;  %v1011_v53 = vrot.slane %v998_v27, %v5152_v36 }
 0x2ce   : > { %3523 = vmatmul.mubr.f32.vlgmr.msra.gmra.mrb[6].mxu1 %v5223_v49 }
 0x2cf   : > { %1408 = vmatprep.mubr.f32.mxu1 %v4830_v9  ;;  %4153 = vmatpush1.bf16.msra.mxu1 %v5266_v5 }
 0x2d0   : > { %4155 = vmatprep.subr.bf16.mxu1 %v5269_v18 }
 0x2d3   : > { %4157 = vmatpush1.bf16.msra.mxu1 %v5272_v45 }
 0x2d4   : > { %4159 = vmatprep.subr.bf16.mxu1 %v5275_v48 }
 0x2d7   : > { %4161 = vmatpush1.bf16.msra.mxu1 %v5278_v54 }
 0x2d8   : > { %4163 = vmatprep.subr.bf16.mxu1 %v5282_v2 }
 0x2db   : > { %4165 = vmatpush1.bf16.msra.mxu1 %v5284_v55 }
 0x2dc   : > { %4167 = vmatprep.subr.bf16.mxu1 %v5288_v16 }
 0x2df   : > { %4169 = vmatpush1.bf16.msra.mxu1 %v5290_v23 }
 0x2e0   : > { %4171 = vmatprep.subr.bf16.mxu1 %v5294_v43 }
 0x2e3   : > { %4173 = vmatpush1.bf16.msra.mxu1 %v5296_v61 }
 0x2e4   : > { %4175 = vmatprep.subr.bf16.mxu1 %v5298_v3 }
 0x2e7   : > { %4177 = vmatpush1.bf16.msra.mxu1 %v5302_v15 }
 0x2e8   : > { %4179 = vmatprep.subr.bf16.mxu1 %v5305_v19 }
 0x2eb   : > { %4181 = vmatpush1.bf16.msra.mxu1 %v5308_v25 }
 0x2ec   : > { %4206 = vmatprep.subr.bf16.mxu1 %v4829_v8 }
 0x381   : > { %v942_v31 = vpop.f32.mrb[4].mxu1  ;;  %v1081_v37 = vpop.f32.mrb[6].mxu0 }
 0x382   : > { %v943_v40 = vadd.f32 %v5215_v11, %v942_v31  ;;  %v1082_v41 = vadd.f32 %v1081_v37, %v1003_v28  ;;  %v3489_v44 = vpop.f32.mrb[5].mxu1  ;;  %v1083_v46 = vpop.f32.mrb[7].mxu0  ;;  %v1299_v28 = vld [vmem:[#allocation3 + $0xa0] sm:$0xff]  ;;  %v1302_v31 = vld [vmem:[#allocation3 + $0xb8] sm:$0xff]  ;;  %v1305_v37 = vld [vmem:[#allocation3 + $0xd0] sm:$0xff] }
 0x383   : > { %v1084_v0 = vadd.f32 %v1083_v46, %v1007_v30  ;;  %v1311_v44 = vld [vmem:[#allocation3 + $0x100] sm:$0xff]  ;;  %v1314_v46 = vld [vmem:[#allocation3 + $0x118] sm:$0xff] }
 0x384   : > { %3045 = vst [vmem:[%s4996_s24 + $0x2] sm:$0x3] %v943_v40  ;;  %v1156_v38 = vadd.f32 %v3046_v33, %v1082_v41  ;;  %v5339_v33 = vpack.c.bf16 %v1302_v31, %v1299_v28  ;;  %v1308_v40 = vld [vmem:[#allocation3 + $0xe8] sm:$0xff]  ;;  %v5347_v30 = vpack.c.bf16 %v1314_v46, %v1311_v44  ;;  %v1327_v31 = vld [vmem:[#allocation5] sm:$0x7] }
 0x385   : > { %v1166_v21 = vadd.f32 %v1164_v13, %v1084_v0  ;;  %v5343_v41 = vpack.c.bf16 %v1308_v40, %v1305_v37  ;;  %v1323_v13 = vld [vmem:[#allocation3 + $0x160] sm:$0xff]  ;;  %v1332_v37 = vrot.slane %v1327_v31, %v5145_v57  ;;  %v3051_v44 = vld [vmem:[%s5001_s19 + $0x12] sm:$0x3f] }
 0x386   : > { %v3047_v56 = vmul.f32 -1.442695, %v1156_v38  ;;  %v1317_v38 = vld [vmem:[#allocation3 + $0x130] sm:$0xff] }
 0x387   : > { %v3048_v26 = vmul.f32 -1.442695, %v1166_v21  ;;  %v1326_v21 = vld [vmem:[#allocation3 + $0x178] sm:$0xff] }
 0x388   : > { %4628 = vpow2.f32 %v3047_v56  ;;  %v1320_v56 = vld [vmem:[#allocation3 + $0x148] sm:$0xff] }
 0x389   : > { %4630 = vpow2.f32 %v3048_v26  ;;  %v5351_v0 = vpack.c.bf16 %v1320_v56, %v1317_v38  ;;  %v5355_v26 = vpack.c.bf16 %v1326_v21, %v1323_v13 }
 0x392   : > { %v4629_v29 = vpop.eup %4628 }
 0x393   : > { %v1160_v35 = vadd.f32 1.0, %v4629_v29  ;;  %v4631_v39 = vpop.eup %4630  ;;  %v1511_v29 = vld [vmem:[#allocation7] sm:$0xff] }
 0x394   : > { %v1170_v50 = vadd.f32 1.0, %v4631_v39 }
 0x395   : > { %4632 = vrcp.f32 %v1160_v35  ;;  %v1512_v35 = vld [vmem:[#allocation7 + $0x8] sm:$0xff] }
 0x396   : > { %4634 = vrcp.f32 %v1170_v50  ;;  %v5378_v39 = vpack.c.bf16 %v1512_v35, %v1511_v29  ;;  %v1514_v50 = vld [vmem:[#allocation7 + $0x18] sm:$0xff]  ;;  %v1336_v29 = vrot.slane %v1327_v31, %v5147_v59 }
 0x39f   : > { %v4633_v4 = vpop.eup %4632 }
 0x3a0   : > { %v4635_v22 = vpop.eup %4634 }
 0x3a1   : > { %v1152_v62 = vpop.f32.mrb[6].mxu1  ;;  %v1178_v32 = vsub.f32 1.0, %v4635_v22  ;;  %v1180_v60 = vmul.f32 %v4635_v22, %v5223_v49  ;;  %v1293_v49 = vld [vmem:[#allocation3 + $0x70] sm:$0xff]  ;;  %v1519_v22 = vld [vmem:[#allocation7 + $0x40] sm:$0xff] }
 0x3a2   : > { %v1153_v63 = vadd.f32 %v1152_v62, %v1011_v53  ;;  %v3524_v7 = vpop.f32.mrb[7].mxu1  ;;  %v5335_v27 = vpack.c.bf16 %v1296_v24, %v1293_v49  ;;  %v1513_v53 = vld [vmem:[#allocation7 + $0x10] sm:$0xff]  ;;  %v1526_v24 = vld [vmem:[#allocation7 + $0x78] sm:$0xff] }
 0x3a3   : > { %v5381_v62 = vpack.c.bf16 %v1514_v50, %v1513_v53  ;;  %v1525_v49 = vld [vmem:[#allocation7 + $0x70] sm:$0xff] }
 0x3a4   : > { %v1173_v10 = vmul.f32 %v4633_v4, %v1153_v63  ;;  %v1515_v63 = vld [vmem:[#allocation7 + $0x20] sm:$0xff]  ;;  %v1517_v4 = vld [vmem:[#allocation7 + $0x30] sm:$0xff]  ;;  %v5405_v28 = vpack.c.bf16 %v1526_v24, %v1525_v49 }
 0x3a6   : > { %v1176_v17 = vadd.f32 %v1174_v6, %v1173_v10  ;;  %v1516_v6 = vld [vmem:[#allocation7 + $0x28] sm:$0xff]  ;;  %v1518_v10 = vld [vmem:[#allocation7 + $0x38] sm:$0xff] }
 0x3a7   : > { %v5385_v7 = vpack.c.bf16 %v1516_v6, %v1515_v63  ;;  %v1493_v63 = vrot.slane %v3051_v44, 2 }
 0x3a8   : > { %4636 = vtanh.f32 %v1176_v17  ;;  %v5390_v17 = vpack.c.bf16 %v1518_v10, %v1517_v4 }
 0x3b2   : > { %v4637_v51 = vpop.eup %4636 }
 0x3b3   : > { %v1179_v52 = vmul.f32 %v4637_v51, %v1178_v32  ;;  %v1520_v32 = vld [vmem:[#allocation7 + $0x48] sm:$0xff]  ;;  %v1522_v51 = vld [vmem:[#allocation7 + $0x58] sm:$0xff] }
 0x3b4   : > { %v5394_v34 = vpack.c.bf16 %v1520_v32, %v1519_v22 }
 0x3b5   : > { %v5322_v58 = vadd.f32 %v1180_v60, %v1179_v52  ;;  %v1523_v52 = vld [vmem:[#allocation7 + $0x60] sm:$0xff]  ;;  %v5398_v60 = vpack.c.bf16 %v1522_v51, %v1521_v42 }
 0x3b6   : > { %v5401_v14 = vpack.c.bf16 %v1524_v1, %v1523_v52  ;;  %v1503_v1 = vrot.slane %v3051_v44, 4 }
 0x3b7   : > { %3558 = vmatmul.mubr.f32.vlgmr.msra.gmra.mrb[8].mxu0 %v5322_v58  ;;  %1409 = vmatmul.mubr.f32.vlgmr.msra.gmra.mrb[8].mxu1 %v5322_v58 }
 0x3b8   : > { %4184 = vmatpush3.bf16.msra.mxu0 %v5320_v12  ;;  %3592 = vmatprep.mubr.msk.f32.mxu0 %vm4831_vm0, %v4830_v9 }
 0x3b9   : > { %4185 = vmatprep.subr.bf16.mxu0 %v4829_v8  ;;  %3627 = vmatprep.mubr.msk.f32.mxu1 %vm4831_vm0, %v4830_v9 }
 0x3ba   : > { %4208 = vmatpush3.bf16.msra.mxu1 %v5378_v39 }
 0x3bb   : > { %4209 = vmatprep.subr.bf16.mxu1 %v4829_v8 }
 0x3bc   : > { %4187 = vmatpush3.bf16.msra.mxu0 %v5327_v20 }
 0x3bd   : > { %4188 = vmatprep.subr.bf16.mxu0 %v4829_v8 }
 0x3be   : > { %4211 = vmatpush3.bf16.msra.mxu1 %v5381_v62 }
 0x3bf   : > { %4212 = vmatprep.subr.bf16.mxu1 %v4829_v8 }
 0x3c0   : > { %4190 = vmatpush3.bf16.msra.mxu0 %v5335_v27 }
 0x3c1   : > { %4191 = vmatprep.subr.bf16.mxu0 %v4829_v8 }
 0x3c2   : > { %4214 = vmatpush3.bf16.msra.mxu1 %v5385_v7 }
 0x3c3   : > { %4215 = vmatprep.subr.bf16.mxu1 %v4829_v8 }
 0x3c4   : > { %4193 = vmatpush3.bf16.msra.mxu0 %v5339_v33 }
 0x3c5   : > { %4194 = vmatprep.subr.bf16.mxu0 %v4829_v8 }
 0x3c6   : > { %4217 = vmatpush3.bf16.msra.mxu1 %v5390_v17 }
 0x3c7   : > { %4218 = vmatprep.subr.bf16.mxu1 %v4829_v8 }
 0x3c8   : > { %4196 = vmatpush3.bf16.msra.mxu0 %v5343_v41 }
 0x3c9   : > { %4197 = vmatprep.subr.bf16.mxu0 %v4829_v8 }
 0x3ca   : > { %4220 = vmatpush3.bf16.msra.mxu1 %v5394_v34 }
 0x3cb   : > { %4221 = vmatprep.subr.bf16.mxu1 %v4829_v8 }
 0x3cc   : > { %4199 = vmatpush3.bf16.msra.mxu0 %v5347_v30 }
 0x3cd   : > { %4200 = vmatprep.subr.bf16.mxu0 %v4829_v8 }
 0x3ce   : > { %4223 = vmatpush3.bf16.msra.mxu1 %v5398_v60 }
 0x3cf   : > { %4224 = vmatprep.subr.bf16.mxu1 %v4829_v8 }
 0x3d0   : > { %4202 = vmatpush3.bf16.msra.mxu0 %v5351_v0 }
 0x3d1   : > { %4203 = vmatprep.subr.bf16.mxu0 %v4829_v8 }
 0x3d2   : > { %4226 = vmatpush3.bf16.msra.mxu1 %v5401_v14 }
 0x3d3   : > { %4227 = vmatprep.subr.bf16.mxu1 %v4829_v8 }
 0x3d4   : > { %4205 = vmatpush3.bf16.msra.mxu0 %v5355_v26 }
 0x3d5   : > { %4231 = vmatprep.subr.bf16.mxu0 %v5264_v47 }
 0x3d6   : > { %4229 = vmatpush3.bf16.msra.mxu1 %v5405_v28 }
 0x3d7   : > { %3593 = vmatmul.mubr.f32.vlgmr.msra.gmra.mrb[10].mxu0 %v5322_v58  ;;  %4262 = vmatprep.subr.bf16.mxu1 %v4829_v8 }
 0x3d8   : > { %4233 = vmatpush1.bf16.msra.mxu0 %v5266_v5  ;;  %1737 = vmatprep.mubr.f32.mxu0 %v4830_v9 }
 0x3d9   : > { %4235 = vmatprep.subr.bf16.mxu0 %v5269_v18 }
 0x3dc   : > { %4237 = vmatpush1.bf16.msra.mxu0 %v5272_v45 }
 0x3dd   : > { %4239 = vmatprep.subr.bf16.mxu0 %v5275_v48 }
 0x3e0   : > { %4241 = vmatpush1.bf16.msra.mxu0 %v5278_v54 }
 0x3e1   : > { %4243 = vmatprep.subr.bf16.mxu0 %v5282_v2 }
 0x3e4   : > { %4245 = vmatpush1.bf16.msra.mxu0 %v5284_v55 }
 0x3e5   : > { %4247 = vmatprep.subr.bf16.mxu0 %v5288_v16 }
 0x3e8   : > { %4249 = vmatpush1.bf16.msra.mxu0 %v5290_v23 }
 0x3e9   : > { %4251 = vmatprep.subr.bf16.mxu0 %v5294_v43 }
 0x3ec   : > { %4253 = vmatpush1.bf16.msra.mxu0 %v5296_v61 }
 0x3ed   : > { %4255 = vmatprep.subr.bf16.mxu0 %v5298_v3 }
 0x3f0   : > { %4257 = vmatpush1.bf16.msra.mxu0 %v5302_v15 }
 0x3f1   : > { %4259 = vmatprep.subr.bf16.mxu0 %v5305_v19 }
 0x3f4   : > { %4261 = vmatpush1.bf16.msra.mxu0 %v5308_v25 }
 0x3f5   : > { %4286 = vmatprep.subr.bf16.mxu0 %v4829_v8 }
 0x48a   : > { %v1271_v40 = vpop.f32.mrb[8].mxu0  ;;  %v1410_v46 = vpop.f32.mrb[8].mxu1 }
 0x48b   : > { %v1272_v38 = vadd.f32 %v5215_v11, %v1271_v40  ;;  %v1411_v56 = vadd.f32 %v1410_v46, %v1332_v37  ;;  %v3559_v13 = vpop.f32.mrb[9].mxu0  ;;  %v1412_v21 = vpop.f32.mrb[9].mxu1  ;;  %v1340_v11 = vrot.slane %v1327_v31, %v5152_v36 }
 0x48c   : > { %v1413_v50 = vadd.f32 %v1412_v21, %v1336_v29 }
 0x48d   : > { %3050 = vst [vmem:[%s4996_s24 + $0x4] sm:$0x3] %v1272_v38  ;;  %v1485_v35 = vadd.f32 %v3051_v44, %v1411_v56 }
 0x48e   : > { %v1495_v6 = vadd.f32 %v1493_v63, %v1413_v50 }
 0x48f   : > { %v3052_v53 = vmul.f32 -1.442695, %v1485_v35 }
 0x490   : > { %v3053_v4 = vmul.f32 -1.442695, %v1495_v6 }
 0x491   : > { %4638 = vpow2.f32 %v3052_v53 }
 0x492   : > { %4640 = vpow2.f32 %v3053_v4 }
 0x49b   : > { %v4639_v10 = vpop.eup %4638 }
 0x49c   : > { %v1489_v22 = vadd.f32 1.0, %v4639_v10  ;;  %v4641_v32 = vpop.eup %4640 }
 0x49d   : > { %v1499_v42 = vadd.f32 1.0, %v4641_v32 }
 0x49e   : > { %4642 = vrcp.f32 %v1489_v22 }
 0x49f   : > { %4644 = vrcp.f32 %v1499_v42 }
 0x4a8   : > { %v4643_v24 = vpop.eup %4642 }
 0x4a9   : > { %v4645_v46 = vpop.eup %4644 }
 0x4aa   : > { %v1481_v51 = vpop.f32.mrb[10].mxu0  ;;  %v1507_v38 = vsub.f32 1.0, %v4645_v46  ;;  %v1509_v21 = vmul.f32 %v4645_v46, %v5322_v58  ;;  %v2285_v46 = vld [vmem:[#allocation3 + $0x98] sm:$0xff] }
 0x4ab   : > { %v1482_v52 = vadd.f32 %v1481_v51, %v1340_v11  ;;  %v3594_v49 = vpop.f32.mrb[11].mxu0 }
 0x4ad   : > { %v1502_v37 = vmul.f32 %v4643_v24, %v1482_v52 }
 0x4af   : > { %v1505_v40 = vadd.f32 %v1503_v1, %v1502_v37  ;;  %v2281_v37 = vld [vmem:[#allocation3 + $0x78] sm:$0xff] }
 0x4b1   : > { %4646 = vtanh.f32 %v1505_v40 }
 0x4bb   : > { %v4647_v56 = vpop.eup %4646 }
 0x4bc   : > { %v1508_v13 = vmul.f32 %v4647_v56, %v1507_v38  ;;  %v2288_v38 = vld [vmem:[#allocation3 + $0xb0] sm:$0xff] }
 0x4bd   : > { %v5543_v56 = vpack.c.bf16 %v2288_v38, %v2285_v46 }
 0x4be   : > { %v5417_v29 = vadd.f32 %v1509_v21, %v1508_v13  ;;  %v2284_v13 = vld [vmem:[#allocation3 + $0x90] sm:$0xff]  ;;  %v2287_v21 = vld [vmem:[#allocation3 + $0xa8] sm:$0xff] }
 0x4c0   : > { %3628 = vmatmul.mubr.f32.vlgmr.msra.gmra.mrb[10].mxu1 %v5417_v29  ;;  %1738 = vmatmul.mubr.f32.vlgmr.msra.gmra.mrb[12].mxu0 %v5417_v29 }
 0x4c1   : > { %4264 = vmatpush3.bf16.msra.mxu1 %v5320_v12  ;;  %3662 = vmatprep.mubr.msk.f32.mxu1 %vm4831_vm0, %v4830_v9 }
 0x4c2   : > { %4265 = vmatprep.subr.bf16.mxu1 %v4829_v8  ;;  %4288 = vmatpush3.bf16.msra.mxu0 %v5378_v39 }
 0x4c3   : > { %4289 = vmatprep.subr.bf16.mxu0 %v4829_v8  ;;  %3697 = vmatprep.mubr.msk.f32.mxu0 %vm4831_vm0, %v4830_v9 }
 0x4c5   : > { %4267 = vmatpush3.bf16.msra.mxu1 %v5327_v20 }
 0x4c6   : > { %4268 = vmatprep.subr.bf16.mxu1 %v4829_v8  ;;  %4291 = vmatpush3.bf16.msra.mxu0 %v5381_v62 }
 0x4c7   : > { %4292 = vmatprep.subr.bf16.mxu0 %v4829_v8 }
 0x4c9   : > { %4270 = vmatpush3.bf16.msra.mxu1 %v5335_v27 }
 0x4ca   : > { %4271 = vmatprep.subr.bf16.mxu1 %v4829_v8  ;;  %4294 = vmatpush3.bf16.msra.mxu0 %v5385_v7 }
 0x4cb   : > { %4295 = vmatprep.subr.bf16.mxu0 %v4829_v8 }
 0x4cd   : > { %4273 = vmatpush3.bf16.msra.mxu1 %v5339_v33 }
 0x4ce   : > { %4274 = vmatprep.subr.bf16.mxu1 %v4829_v8  ;;  %4297 = vmatpush3.bf16.msra.mxu0 %v5390_v17 }
 0x4cf   : > { %4298 = vmatprep.subr.bf16.mxu0 %v4829_v8 }
 0x4d1   : > { %4276 = vmatpush3.bf16.msra.mxu1 %v5343_v41 }
 0x4d2   : > { %4277 = vmatprep.subr.bf16.mxu1 %v4829_v8  ;;  %4300 = vmatpush3.bf16.msra.mxu0 %v5394_v34 }
 0x4d3   : > { %4301 = vmatprep.subr.bf16.mxu0 %v4829_v8 }
 0x4d5   : > { %4279 = vmatpush3.bf16.msra.mxu1 %v5347_v30 }
 0x4d6   : > { %4280 = vmatprep.subr.bf16.mxu1 %v4829_v8  ;;  %4303 = vmatpush3.bf16.msra.mxu0 %v5398_v60 }
 0x4d7   : > { %4304 = vmatprep.subr.bf16.mxu0 %v4829_v8 }
 0x4d9   : > { %4282 = vmatpush3.bf16.msra.mxu1 %v5351_v0 }
 0x4da   : > { %4283 = vmatprep.subr.bf16.mxu1 %v4829_v8  ;;  %4306 = vmatpush3.bf16.msra.mxu0 %v5401_v14 }
 0x4db   : > { %4307 = vmatprep.subr.bf16.mxu0 %v4829_v8 }
 0x4dd   : > { %4285 = vmatpush3.bf16.msra.mxu1 %v5355_v26 }
 0x4de   : > { %4311 = vmatprep.subr.bf16.mxu1 %v5264_v47  ;;  %4309 = vmatpush3.bf16.msra.mxu0 %v5405_v28  ;;  %v1656_v47 = vld [vmem:[#allocation5] sm:$0x7] }
 0x4df   : > { %4342 = vmatprep.subr.bf16.mxu0 %v4829_v8  ;;  %v1669_v53 = vrot.slane %v1656_v47, %v5152_v36 }
 0x4e0   : > { %3663 = vmatmul.mubr.f32.vlgmr.msra.gmra.mrb[12].mxu1 %v5417_v29 }
 0x4e1   : > { %4313 = vmatpush1.bf16.msra.mxu1 %v5266_v5  ;;  %2066 = vmatprep.mubr.f32.mxu1 %v4830_v9  ;;  %v1661_v5 = vrot.slane %v1656_v47, %v5145_v57 }
 0x4e2   : > { %4315 = vmatprep.subr.bf16.mxu1 %v5269_v18  ;;  %v5476_v18 = vld [vmem:[#allocation8] ss:$0 sm:$0xff] }
 0x4e5   : > { %4317 = vmatpush1.bf16.msra.mxu1 %v5272_v45 }
 0x4e6   : > { %4319 = vmatprep.subr.bf16.mxu1 %v5275_v48  ;;  %v3056_v48 = vld [vmem:[%s5001_s19 + $0x18] sm:$0x3f] }
 0x4e7   : > { %v1832_v4 = vrot.slane %v3056_v48, 4 }
 0x4e9   : > { %4321 = vmatpush1.bf16.msra.mxu1 %v5278_v54 }
 0x4ea   : > { %4323 = vmatprep.subr.bf16.mxu1 %v5282_v2 }
 0x4ed   : > { %4325 = vmatpush1.bf16.msra.mxu1 %v5284_v55 }
 0x4ee   : > { %4327 = vmatprep.subr.bf16.mxu1 %v5288_v16 }
 0x4f1   : > { %4329 = vmatpush1.bf16.msra.mxu1 %v5290_v23 }
 0x4f2   : > { %4331 = vmatprep.subr.bf16.mxu1 %v5294_v43  ;;  %v1665_v43 = vrot.slane %v1656_v47, %v5147_v59  ;;  %v2291_v47 = vld [vmem:[#allocation3 + $0xc8] sm:$0xff] }
 0x4f5   : > { %4333 = vmatpush1.bf16.msra.mxu1 %v5296_v61 }
 0x4f6   : > { %4335 = vmatprep.subr.bf16.mxu1 %v5298_v3 }
 0x4f9   : > { %4337 = vmatpush1.bf16.msra.mxu1 %v5302_v15 }
 0x4fa   : > { %4339 = vmatprep.subr.bf16.mxu1 %v5305_v19  ;;  %v1822_v19 = vrot.slane %v3056_v48, 2 }
 0x4fd   : > { %4341 = vmatpush1.bf16.msra.mxu1 %v5308_v25 }
 0x4fe   : > { %4366 = vmatprep.subr.bf16.mxu1 %v4829_v8 }
 0x593   : > { %v1600_v45 = vpop.f32.mrb[10].mxu1  ;;  %v1739_v54 = vpop.f32.mrb[12].mxu0 }
 0x594   : > { %v1601_v2 = vadd.f32 %v5476_v18, %v1600_v45  ;;  %v1740_v55 = vadd.f32 %v1739_v54, %v1661_v5  ;;  %v3629_v16 = vpop.f32.mrb[11].mxu1  ;;  %v1741_v23 = vpop.f32.mrb[13].mxu0  ;;  %v2294_v5 = vld [vmem:[#allocation3 + $0xe0] sm:$0xff]  ;;  %v2293_v54 = vld [vmem:[#allocation3 + $0xd8] sm:$0xff] }
 0x595   : > { %v1742_v15 = vadd.f32 %v1741_v23, %v1665_v43  ;;  %v5549_v45 = vpack.c.bf16 %v2294_v5, %v2291_v47  ;;  %v2300_v16 = vld [vmem:[#allocation3 + $0x110] sm:$0xff] }
 0x596   : > { %3055 = vst [vmem:[%s4996_s24 + $0x6] sm:$0x3] %v1601_v2  ;;  %v1814_v61 = vadd.f32 %v3056_v48, %v1740_v55  ;;  %v2290_v48 = vld [vmem:[#allocation3 + $0xc0] sm:$0xff]  ;;  %v2297_v55 = vld [vmem:[#allocation3 + $0xf8] sm:$0xff]  ;;  %v2296_v23 = vld [vmem:[#allocation3 + $0xf0] sm:$0xff] }
 0x597   : > { %v1824_v25 = vadd.f32 %v1822_v19, %v1742_v15  ;;  %v5551_v2 = vpack.c.bf16 %v2293_v54, %v2290_v48  ;;  %v5555_v43 = vpack.c.bf16 %v2300_v16, %v2297_v55  ;;  %v2306_v15 = vld [vmem:[#allocation3 + $0x140] sm:$0xff]  ;;  %v2268_v16 = vld [vmem:[#allocation3 + $0x10] sm:$0xff] }
 0x598   : > { %v3057_v3 = vmul.f32 -1.442695, %v1814_v61  ;;  %v2299_v61 = vld [vmem:[#allocation3 + $0x108] sm:$0xff] }
 0x599   : > { %v3058_v58 = vmul.f32 -1.442695, %v1824_v25  ;;  %v5557_v19 = vpack.c.bf16 %v2299_v61, %v2296_v23  ;;  %v2271_v23 = vld [vmem:[#allocation3 + $0x28] sm:$0xff] }
 0x59a   : > { %4648 = vpow2.f32 %v3057_v3  ;;  %v2303_v3 = vld [vmem:[#allocation3 + $0x128] sm:$0xff] }
 0x59b   : > { %4650 = vpow2.f32 %v3058_v58  ;;  %v5559_v25 = vpack.c.bf16 %v2306_v15, %v2303_v3  ;;  %v2302_v58 = vld [vmem:[#allocation3 + $0x120] sm:$0xff] }
 0x5a4   : > { %v4649_v31 = vpop.eup %4648 }
 0x5a5   : > { %v1818_v44 = vadd.f32 1.0, %v4649_v31  ;;  %v4651_v35 = vpop.eup %4650  ;;  %v2305_v31 = vld [vmem:[#allocation3 + $0x138] sm:$0xff] }
 0x5a6   : > { %v1828_v50 = vadd.f32 1.0, %v4651_v35  ;;  %v2312_v35 = vld [vmem:[#allocation3 + $0x170] sm:$0xff] }
 0x5a7   : > { %4652 = vrcp.f32 %v1818_v44  ;;  %v2309_v44 = vld [vmem:[#allocation3 + $0x158] sm:$0xff] }
 0x5a8   : > { %4654 = vrcp.f32 %v1828_v50  ;;  %v5566_v50 = vpack.c.bf16 %v2312_v35, %v2309_v44  ;;  %v2274_v44 = vld [vmem:[#allocation3 + $0x40] sm:$0xff]  ;;  %v2277_v35 = vld [vmem:[#allocation3 + $0x58] sm:$0xff] }
 0x5b1   : > { %v4653_v22 = vpop.eup %4652 }
 0x5b2   : > { %v4655_v42 = vpop.eup %4654 }
 0x5b3   : > { %v1810_v63 = vpop.f32.mrb[12].mxu1  ;;  %v1836_v51 = vsub.f32 1.0, %v4655_v42  ;;  %v1838_v49 = vmul.f32 %v4655_v42, %v5417_v29  ;;  %v5545_v29 = vpack.c.bf16 %v2287_v21, %v2284_v13 }
 0x5b4   : > { %v1811_v6 = vadd.f32 %v1810_v63, %v1669_v53  ;;  %v3664_v10 = vpop.f32.mrb[13].mxu1  ;;  %v5563_v53 = vpack.c.bf16 %v2305_v31, %v2302_v58  ;;  %v2308_v63 = vld [vmem:[#allocation3 + $0x150] sm:$0xff]  ;;  %v5581_v58 = vpack.c.bf16 %v2271_v23, %v2268_v16 }
 0x5b5   : > { %v1985_v10 = vld [vmem:[#allocation5] sm:$0x7] }
 0x5b6   : > { %v1831_v32 = vmul.f32 %v4653_v22, %v1811_v6  ;;  %v2311_v6 = vld [vmem:[#allocation3 + $0x168] sm:$0xff]  ;;  %v1990_v22 = vrot.slane %v1985_v10, %v5145_v57 }
 0x5b8   : > { %v1834_v11 = vadd.f32 %v1832_v4, %v1831_v32  ;;  %v5569_v4 = vpack.c.bf16 %v2311_v6, %v2308_v63  ;;  %v5588_v63 = vpack.c.bf16 %v2277_v35, %v2274_v44  ;;  %v2283_v6 = vld [vmem:[#allocation3 + $0x88] sm:$0xff] }
 0x5ba   : > { %4656 = vtanh.f32 %v1834_v11  ;;  %v3061_v11 = vld [vmem:[%s5001_s19 + $0x1e] sm:$0x3f] }
 0x5bb   : > { %v2161_v13 = vrot.slane %v3061_v11, 4 }
 0x5c4   : > { %v4657_v52 = vpop.eup %4656 }
 0x5c5   : > { %v1837_v1 = vmul.f32 %v4657_v52, %v1836_v51 }
 0x5c7   : > { %v5484_v24 = vadd.f32 %v1838_v49, %v1837_v1 }
 0x5c9   : > { %3698 = vmatmul.mubr.f32.vlgmr.msra.gmra.mrb[14].mxu0 %v5484_v24  ;;  %2067 = vmatmul.mubr.f32.vlgmr.msra.gmra.mrb[14].mxu1 %v5484_v24 }
 0x5ca   : > { %4344 = vmatpush3.bf16.msra.mxu0 %v5320_v12  ;;  %3732 = vmatprep.mubr.msk.f32.mxu0 %vm4831_vm0, %v4830_v9  ;;  %v2267_v12 = vld [vmem:[#allocation3 + $0x8] sm:$0xff] }
 0x5cb   : > { %4345 = vmatprep.subr.bf16.mxu0 %v4829_v8  ;;  %4368 = vmatpush3.bf16.msra.mxu1 %v5378_v39  ;;  %v2276_v39 = vld [vmem:[#allocation3 + $0x50] sm:$0xff] }
 0x5cc   : > { %4369 = vmatprep.subr.bf16.mxu1 %v4829_v8  ;;  %3767 = vmatprep.mubr.msk.f32.mxu1 %vm4831_vm0, %v4830_v9 }
 0x5ce   : > { %4347 = vmatpush3.bf16.msra.mxu0 %v5327_v20  ;;  %v2270_v20 = vld [vmem:[#allocation3 + $0x20] sm:$0xff] }
 0x5cf   : > { %4348 = vmatprep.subr.bf16.mxu0 %v4829_v8  ;;  %4371 = vmatpush3.bf16.msra.mxu1 %v5381_v62  ;;  %v2272_v62 = vld [vmem:[#allocation3 + $0x30] sm:$0xff] }
 0x5d0   : > { %4372 = vmatprep.subr.bf16.mxu1 %v4829_v8 }
 0x5d2   : > { %4350 = vmatpush3.bf16.msra.mxu0 %v5335_v27  ;;  %v5525_v27 = vpack.c.bf16 %v2270_v20, %v2267_v12  ;;  %v1994_v12 = vrot.slane %v1985_v10, %v5147_v59 }
 0x5d3   : > { %4351 = vmatprep.subr.bf16.mxu0 %v4829_v8  ;;  %4374 = vmatpush3.bf16.msra.mxu1 %v5385_v7  ;;  %v2275_v7 = vld [vmem:[#allocation3 + $0x48] sm:$0xff] }
 0x5d4   : > { %4375 = vmatprep.subr.bf16.mxu1 %v4829_v8 }
 0x5d6   : > { %4353 = vmatpush3.bf16.msra.mxu0 %v5339_v33  ;;  %v2266_v33 = vld [vmem:[#allocation3] sm:$0xff] }
 0x5d7   : > { %4354 = vmatprep.subr.bf16.mxu0 %v4829_v8  ;;  %4377 = vmatpush3.bf16.msra.mxu1 %v5390_v17  ;;  %v2279_v17 = vld [vmem:[#allocation3 + $0x68] sm:$0xff] }
 0x5d8   : > { %4378 = vmatprep.subr.bf16.mxu1 %v4829_v8 }
 0x5da   : > { %4356 = vmatpush3.bf16.msra.mxu0 %v5343_v41  ;;  %v2269_v41 = vld [vmem:[#allocation3 + $0x18] sm:$0xff] }
 0x5db   : > { %4357 = vmatprep.subr.bf16.mxu0 %v4829_v8  ;;  %4380 = vmatpush3.bf16.msra.mxu1 %v5394_v34  ;;  %v2282_v34 = vld [vmem:[#allocation3 + $0x80] sm:$0xff] }
 0x5dc   : > { %4381 = vmatprep.subr.bf16.mxu1 %v4829_v8 }
 0x5de   : > { %4359 = vmatpush3.bf16.msra.mxu0 %v5347_v30  ;;  %v5527_v30 = vpack.c.bf16 %v2269_v41, %v2266_v33 }
 0x5df   : > { %4360 = vmatprep.subr.bf16.mxu0 %v4829_v8  ;;  %4383 = vmatpush3.bf16.msra.mxu1 %v5398_v60  ;;  %v5533_v60 = vpack.c.bf16 %v2275_v7, %v2272_v62 }
 0x5e0   : > { %4384 = vmatprep.subr.bf16.mxu1 %v4829_v8 }
 0x5e2   : > { %4362 = vmatpush3.bf16.msra.mxu0 %v5351_v0  ;;  %v2273_v0 = vld [vmem:[#allocation3 + $0x38] sm:$0xff] }
 0x5e3   : > { %4363 = vmatprep.subr.bf16.mxu0 %v4829_v8  ;;  %4386 = vmatpush3.bf16.msra.mxu1 %v5401_v14  ;;  %v5536_v14 = vpack.c.bf16 %v2282_v34, %v2279_v17 }
 0x5e4   : > { %4387 = vmatprep.subr.bf16.mxu1 %v4829_v8 }
 0x5e6   : > { %4365 = vmatpush3.bf16.msra.mxu0 %v5355_v26  ;;  %v5530_v26 = vpack.c.bf16 %v2276_v39, %v2273_v0  ;;  %v2151_v0 = vrot.slane %v3061_v11, 2 }
 0x5e7   : > { %4389 = vmatpush3.bf16.msra.mxu1 %v5405_v28  ;;  %4391 = vmatprep.subr.bf16.mxu0 %v5525_v27  ;;  %v2278_v28 = vld [vmem:[#allocation3 + $0x60] sm:$0xff] }
 0x5e8   : > { %4422 = vmatprep.subr.bf16.mxu1 %v4829_v8  ;;  %v5539_v40 = vpack.c.bf16 %v2281_v37, %v2278_v28  ;;  %v1998_v28 = vrot.slane %v1985_v10, %v5152_v36 }
 0x5e9   : > { %3733 = vmatmul.mubr.f32.vlgmr.msra.gmra.mrb[16].mxu0 %v5484_v24 }
 0x5ea   : > { %2395 = vmatprep.mubr.f32.mxu0 %v4830_v9  ;;  %4393 = vmatpush1.bf16.msra.mxu0 %v5527_v30 }
 0x5eb   : > { %4395 = vmatprep.subr.bf16.mxu0 %v5530_v26 }
 0x5ee   : > { %4397 = vmatpush1.bf16.msra.mxu0 %v5533_v60 }
 0x5ef   : > { %4399 = vmatprep.subr.bf16.mxu0 %v5536_v14 }
 0x5f2   : > { %4401 = vmatpush1.bf16.msra.mxu0 %v5539_v40 }
 0x5f3   : > { %4403 = vmatprep.subr.bf16.mxu0 %v5543_v56 }
 0x5f6   : > { %4405 = vmatpush1.bf16.msra.mxu0 %v5545_v29 }
 0x5f7   : > { %4407 = vmatprep.subr.bf16.mxu0 %v5549_v45 }
 0x5fa   : > { %4409 = vmatpush1.bf16.msra.mxu0 %v5551_v2 }
 0x5fb   : > { %4411 = vmatprep.subr.bf16.mxu0 %v5555_v43 }
 0x5fe   : > { %4413 = vmatpush1.bf16.msra.mxu0 %v5557_v19 }
 0x5ff   : > { %4415 = vmatprep.subr.bf16.mxu0 %v5559_v25 }
 0x602   : > { %4417 = vmatpush1.bf16.msra.mxu0 %v5563_v53 }
 0x603   : > { %4419 = vmatprep.subr.bf16.mxu0 %v5566_v50 }
 0x606   : > { %4421 = vmatpush1.bf16.msra.mxu0 %v5569_v4 }
 0x607   : > { %4446 = vmatprep.subr.bf16.mxu0 %v4829_v8 }
 0x69c   : > { %v1929_v32 = vpop.f32.mrb[14].mxu0  ;;  %v2068_v42 = vpop.f32.mrb[14].mxu1 }
 0x69d   : > { %v1930_v51 = vadd.f32 %v5476_v18, %v1929_v32  ;;  %v2069_v52 = vadd.f32 %v2068_v42, %v1990_v22  ;;  %v3699_v1 = vpop.f32.mrb[15].mxu0  ;;  %v2070_v49 = vpop.f32.mrb[15].mxu1  ;;  %v2286_v22 = vld [vmem:[#allocation3 + $0xa0] sm:$0xff]  ;;  %v2289_v32 = vld [vmem:[#allocation3 + $0xb8] sm:$0xff]  ;;  %v2292_v42 = vld [vmem:[#allocation3 + $0xd0] sm:$0xff] }
 0x69e   : > { %v2071_v41 = vadd.f32 %v2070_v49, %v1994_v12  ;;  %v2298_v1 = vld [vmem:[#allocation3 + $0x100] sm:$0xff]  ;;  %v2301_v49 = vld [vmem:[#allocation3 + $0x118] sm:$0xff] }
 0x69f   : > { %3060 = vst [vmem:[%s4996_s24 + $0x8] sm:$0x3] %v1930_v51  ;;  %v2143_v20 = vadd.f32 %v3061_v11, %v2069_v52  ;;  %v5600_v11 = vpack.c.bf16 %v2289_v32, %v2286_v22  ;;  %v2295_v51 = vld [vmem:[#allocation3 + $0xe8] sm:$0xff]  ;;  %v5608_v12 = vpack.c.bf16 %v2301_v49, %v2298_v1 }
 0x6a0   : > { %v2153_v39 = vadd.f32 %v2151_v0, %v2071_v41  ;;  %v5604_v52 = vpack.c.bf16 %v2295_v51, %v2292_v42  ;;  %v2310_v0 = vld [vmem:[#allocation3 + $0x160] sm:$0xff] }
 0x6a1   : > { %v3062_v33 = vmul.f32 -1.442695, %v2143_v20  ;;  %v2304_v20 = vld [vmem:[#allocation3 + $0x130] sm:$0xff] }
 0x6a2   : > { %v3063_v62 = vmul.f32 -1.442695, %v2153_v39  ;;  %v2313_v39 = vld [vmem:[#allocation3 + $0x178] sm:$0xff] }
 0x6a3   : > { %4658 = vpow2.f32 %v3062_v33  ;;  %v2307_v33 = vld [vmem:[#allocation3 + $0x148] sm:$0xff] }
 0x6a4   : > { %4660 = vpow2.f32 %v3063_v62  ;;  %v5612_v41 = vpack.c.bf16 %v2307_v33, %v2304_v20  ;;  %v5616_v62 = vpack.c.bf16 %v2313_v39, %v2310_v0 }
 0x6ad   : > { %v4659_v7 = vpop.eup %4658 }
 0x6ae   : > { %v2147_v17 = vadd.f32 1.0, %v4659_v7  ;;  %v4661_v34 = vpop.eup %4660  ;;  %v2509_v7 = vld [vmem:[#allocation7 + $0x58] sm:$0xff] }
 0x6af   : > { %v2157_v37 = vadd.f32 1.0, %v4661_v34 }
 0x6b0   : > { %4662 = vrcp.f32 %v2147_v17  ;;  %v2510_v17 = vld [vmem:[#allocation7 + $0x60] sm:$0xff] }
 0x6b1   : > { %4664 = vrcp.f32 %v2157_v37 }
 0x6ba   : > { %v4663_v47 = vpop.eup %4662 }
 0x6bb   : > { %v4665_v54 = vpop.eup %4664 }
 0x6bc   : > { %v2139_v46 = vpop.f32.mrb[16].mxu0  ;;  %v2165_v55 = vsub.f32 1.0, %v4665_v54  ;;  %v2167_v15 = vmul.f32 %v4665_v54, %v5484_v24  ;;  %v2280_v24 = vld [vmem:[#allocation3 + $0x70] sm:$0xff] }
 0x6bd   : > { %v2140_v38 = vadd.f32 %v2139_v46, %v1998_v28  ;;  %v3734_v21 = vpop.f32.mrb[17].mxu0  ;;  %v5596_v10 = vpack.c.bf16 %v2283_v6, %v2280_v24  ;;  %v2511_v28 = vld [vmem:[#allocation7 + $0x68] sm:$0xff]  ;;  %v2512_v46 = vld [vmem:[#allocation7 + $0x70] sm:$0xff] }
 0x6be   : > { %v5662_v37 = vpack.c.bf16 %v2511_v28, %v2510_v17  ;;  %v2314_v21 = vld [vmem:[#allocation5] sm:$0x7] }
 0x6bf   : > { %v2160_v5 = vmul.f32 %v4663_v47, %v2140_v38  ;;  %v2513_v38 = vld [vmem:[#allocation7 + $0x78] sm:$0xff]  ;;  %v2319_v47 = vrot.slane %v2314_v21, %v5145_v57 }
 0x6c1   : > { %v2163_v48 = vadd.f32 %v2161_v13, %v2160_v5  ;;  %v5666_v13 = vpack.c.bf16 %v2513_v38, %v2512_v46 }
 0x6c3   : > { %4666 = vtanh.f32 %v2163_v48  ;;  %v3066_v48 = vld [vmem:[%s5001_s19 + $0x24] sm:$0x3f] }
 0x6c4   : > { %v2480_v24 = vrot.slane %v3066_v48, 2  ;;  %v2490_v33 = vrot.slane %v3066_v48, 4 }
 0x6cd   : > { %v4667_v61 = vpop.eup %4666 }
 0x6ce   : > { %v2166_v3 = vmul.f32 %v4667_v61, %v2165_v55 }
 0x6d0   : > { %v5583_v31 = vadd.f32 %v2167_v15, %v2166_v3  ;;  %v2323_v3 = vrot.slane %v2314_v21, %v5147_v59 }
 0x6d2   : > { %3768 = vmatmul.mubr.f32.vlgmr.msra.gmra.mrb[16].mxu1 %v5583_v31  ;;  %2396 = vmatmul.mubr.f32.vlgmr.msra.gmra.mrb[18].mxu0 %v5583_v31 }
 0x6d3   : > { %4424 = vmatpush3.bf16.msra.mxu1 %v5581_v58  ;;  %3802 = vmatprep.mubr.msk.f32.mxu1 %vm4831_vm0, %v4830_v9 }
 0x6d4   : > { %4425 = vmatprep.subr.bf16.mxu1 %v4829_v8  ;;  %3837 = vmatprep.mubr.msk.f32.mxu0 %vm4831_vm0, %v4830_v9 }
 0x6d7   : > { %4427 = vmatpush3.bf16.msra.mxu1 %v5588_v63 }
 0x6d8   : > { %4428 = vmatprep.subr.bf16.mxu1 %v4829_v8 }
 0x6db   : > { %4430 = vmatpush3.bf16.msra.mxu1 %v5596_v10 }
 0x6dc   : > { %4431 = vmatprep.subr.bf16.mxu1 %v4829_v8 }
 0x6df   : > { %4433 = vmatpush3.bf16.msra.mxu1 %v5600_v11 }
 0x6e0   : > { %4434 = vmatprep.subr.bf16.mxu1 %v4829_v8 }
 0x6e3   : > { %4436 = vmatpush3.bf16.msra.mxu1 %v5604_v52 }
 0x6e4   : > { %4437 = vmatprep.subr.bf16.mxu1 %v4829_v8 }
 0x6e7   : > { %4439 = vmatpush3.bf16.msra.mxu1 %v5608_v12 }
 0x6e8   : > { %4440 = vmatprep.subr.bf16.mxu1 %v4829_v8 }
 0x6eb   : > { %4442 = vmatpush3.bf16.msra.mxu1 %v5612_v41 }
 0x6ec   : > { %4443 = vmatprep.subr.bf16.mxu1 %v4829_v8 }
 0x6ef   : > { %4445 = vmatpush3.bf16.msra.mxu1 %v5616_v62 }
 0x6f0   : > { %4471 = vmatprep.subr.bf16.mxu1 %v5525_v27  ;;  %v2498_v27 = vld [vmem:[#allocation7] sm:$0xff] }
 0x6f2   : > { %3803 = vmatmul.mubr.f32.vlgmr.msra.gmra.mrb[18].mxu1 %v5583_v31 }
 0x6f3   : > { %4473 = vmatpush1.bf16.msra.mxu1 %v5527_v30  ;;  %2724 = vmatprep.mubr.f32.mxu1 %v4830_v9  ;;  %v2499_v30 = vld [vmem:[#allocation7 + $0x8] sm:$0xff] }
 0x6f4   : > { %4475 = vmatprep.subr.bf16.mxu1 %v5530_v26  ;;  %v5639_v26 = vpack.c.bf16 %v2499_v30, %v2498_v27 }
 0x6f6   : > { %4448 = vmatpush3.bf16.msra.mxu0 %v5639_v26 }
 0x6f7   : > { %4477 = vmatpush1.bf16.msra.mxu1 %v5533_v60  ;;  %v2500_v60 = vld [vmem:[#allocation7 + $0x10] sm:$0xff]  ;;  %4449 = vmatprep.subr.bf16.mxu0 %v4829_v8 }
 0x6f8   : > { %4479 = vmatprep.subr.bf16.mxu1 %v5536_v14  ;;  %v2501_v14 = vld [vmem:[#allocation7 + $0x18] sm:$0xff] }
 0x6fb   : > { %4481 = vmatpush1.bf16.msra.mxu1 %v5539_v40  ;;  %v5642_v40 = vpack.c.bf16 %v2501_v14, %v2500_v60 }
 0x6fc   : > { %4483 = vmatprep.subr.bf16.mxu1 %v5543_v56  ;;  %v2502_v56 = vld [vmem:[#allocation7 + $0x20] sm:$0xff] }
 0x6fd   : > { %4451 = vmatpush3.bf16.msra.mxu0 %v5642_v40 }
 0x6fe   : > { %4452 = vmatprep.subr.bf16.mxu0 %v4829_v8 }
 0x6ff   : > { %4485 = vmatpush1.bf16.msra.mxu1 %v5545_v29  ;;  %v2503_v29 = vld [vmem:[#allocation7 + $0x28] sm:$0xff] }
 0x700   : > { %4487 = vmatprep.subr.bf16.mxu1 %v5549_v45  ;;  %v5646_v45 = vpack.c.bf16 %v2503_v29, %v2502_v56 }
 0x702   : > { %4454 = vmatpush3.bf16.msra.mxu0 %v5646_v45 }
 0x703   : > { %4489 = vmatpush1.bf16.msra.mxu1 %v5551_v2  ;;  %4455 = vmatprep.subr.bf16.mxu0 %v4829_v8  ;;  %v2504_v2 = vld [vmem:[#allocation7 + $0x30] sm:$0xff] }
 0x704   : > { %4491 = vmatprep.subr.bf16.mxu1 %v5555_v43  ;;  %v2505_v43 = vld [vmem:[#allocation7 + $0x38] sm:$0xff] }
 0x707   : > { %4493 = vmatpush1.bf16.msra.mxu1 %v5557_v19  ;;  %v5651_v19 = vpack.c.bf16 %v2505_v43, %v2504_v2 }
 0x708   : > { %4495 = vmatprep.subr.bf16.mxu1 %v5559_v25  ;;  %v2506_v25 = vld [vmem:[#allocation7 + $0x40] sm:$0xff] }
 0x709   : > { %4457 = vmatpush3.bf16.msra.mxu0 %v5651_v19 }
 0x70a   : > { %4458 = vmatprep.subr.bf16.mxu0 %v4829_v8 }
 0x70b   : > { %4497 = vmatpush1.bf16.msra.mxu1 %v5563_v53  ;;  %v2507_v53 = vld [vmem:[#allocation7 + $0x48] sm:$0xff] }
 0x70c   : > { %4499 = vmatprep.subr.bf16.mxu1 %v5566_v50  ;;  %v5655_v50 = vpack.c.bf16 %v2507_v53, %v2506_v25 }
 0x70e   : > { %4460 = vmatpush3.bf16.msra.mxu0 %v5655_v50 }
 0x70f   : > { %4501 = vmatpush1.bf16.msra.mxu1 %v5569_v4  ;;  %4461 = vmatprep.subr.bf16.mxu0 %v4829_v8  ;;  %v2508_v4 = vld [vmem:[#allocation7 + $0x50] sm:$0xff] }
 0x710   : > { %4526 = vmatprep.subr.bf16.mxu1 %v4829_v8  ;;  %v5659_v34 = vpack.c.bf16 %v2509_v7, %v2508_v4 }
 0x712   : > { %4463 = vmatpush3.bf16.msra.mxu0 %v5659_v34 }
 0x713   : > { %4464 = vmatprep.subr.bf16.mxu0 %v4829_v8 }
 0x716   : > { %4466 = vmatpush3.bf16.msra.mxu0 %v5662_v37 }
 0x717   : > { %4467 = vmatprep.subr.bf16.mxu0 %v4829_v8 }
 0x71a   : > { %4469 = vmatpush3.bf16.msra.mxu0 %v5666_v13 }
 0x71b   : > { %4502 = vmatprep.subr.bf16.mxu0 %v4829_v8 }
 0x7a5   : > { %v2258_v5 = vpop.f32.mrb[16].mxu1  ;;  %v2397_v54 = vpop.f32.mrb[18].mxu0 }
 0x7a6   : > { %v2259_v55 = vadd.f32 %v5476_v18, %v2258_v5  ;;  %v2398_v16 = vadd.f32 %v2397_v54, %v2319_v47  ;;  %v3769_v23 = vpop.f32.mrb[17].mxu1  ;;  %v2399_v61 = vpop.f32.mrb[19].mxu0  ;;  %v2327_v18 = vrot.slane %v2314_v21, %v5152_v36 }
 0x7a7   : > { %v2400_v35 = vadd.f32 %v2399_v61, %v2323_v3 }
 0x7a8   : > { %3065 = vst [vmem:[%s4996_s24 + $0xa] sm:$0x3] %v2259_v55  ;;  %v2472_v15 = vadd.f32 %v3066_v48, %v2398_v16 }
 0x7a9   : > { %v2482_v6 = vadd.f32 %v2480_v24, %v2400_v35 }
 0x7aa   : > { %v3067_v44 = vmul.f32 -1.442695, %v2472_v15 }
 0x7ab   : > { %v3068_v22 = vmul.f32 -1.442695, %v2482_v6 }
 0x7ac   : > { %4668 = vpow2.f32 %v3067_v44 }
 0x7ad   : > { %4670 = vpow2.f32 %v3068_v22 }
 0x7b6   : > { %v4669_v32 = vpop.eup %4668 }
 0x7b7   : > { %v2476_v42 = vadd.f32 1.0, %v4669_v32  ;;  %v4671_v51 = vpop.eup %4670 }
 0x7b8   : > { %v2486_v1 = vadd.f32 1.0, %v4671_v51 }
 0x7b9   : > { %4672 = vrcp.f32 %v2476_v42 }
 0x7ba   : > { %4674 = vrcp.f32 %v2486_v1 }
 0x7c3   : > { %v4673_v39 = vpop.eup %4672 }
 0x7c4   : > { %v4675_v60 = vpop.eup %4674 }
 0x7c5   : > { %v2468_v49 = vpop.f32.mrb[18].mxu1  ;;  %v2494_v14 = vsub.f32 1.0, %v4675_v60  ;;  %v2496_v2 = vmul.f32 %v4675_v60, %v5583_v31  ;;  %v3069_v31 = vld [vmem:[#allocation8] ss:$0 sm:$0xff] }
 0x7c6   : > { %v2469_v20 = vadd.f32 %v2468_v49, %v2327_v18  ;;  %v3804_v0 = vpop.f32.mrb[19].mxu1 }
 0x7c8   : > { %v2489_v27 = vmul.f32 %v4673_v39, %v2469_v20 }
 0x7ca   : > { %v2492_v30 = vadd.f32 %v2490_v33, %v2489_v27 }
 0x7cc   : > { %4676 = vtanh.f32 %v2492_v30 }
 0x7d6   : > { %v4677_v56 = vpop.eup %4676 }
 0x7d7   : > { %v2495_v29 = vmul.f32 %v4677_v56, %v2494_v14 }
 0x7d9   : > { %v5678_v43 = vadd.f32 %v2496_v2, %v2495_v29 }
 0x7db   : > { %3838 = vmatmul.mubr.f32.vlgmr.msra.gmra.mrb[20].mxu0 %v5678_v43  ;;  %2725 = vmatmul.mubr.f32.vlgmr.msra.gmra.mrb[20].mxu1 %v5678_v43 }
 0x7dc   : > { %4504 = vmatpush3.bf16.msra.mxu0 %v5581_v58  ;;  %3872 = vmatprep.mubr.msk.f32.mxu0 %vm4831_vm0, %v4830_v9 }
 0x7dd   : > { %4505 = vmatprep.subr.bf16.mxu0 %v4829_v8  ;;  %4528 = vmatpush3.bf16.msra.mxu1 %v5639_v26 }
 0x7de   : > { %4529 = vmatprep.subr.bf16.mxu1 %v4829_v8  ;;  %3907 = vmatprep.mubr.msk.f32.mxu1 %vm4831_vm0, %v4830_v9  ;;  %v2643_v9 = vld [vmem:[#allocation5] sm:$0x7] }
 0x7df   : > { %v2648_v58 = vrot.slane %v2643_v9, %v5145_v57  ;;  %v2656_v7 = vrot.slane %v2643_v9, %v5152_v36 }
 0x7e0   : > { %4507 = vmatpush3.bf16.msra.mxu0 %v5588_v63 }
 0x7e1   : > { %4508 = vmatprep.subr.bf16.mxu0 %v4829_v8  ;;  %4531 = vmatpush3.bf16.msra.mxu1 %v5642_v40  ;;  %v2652_v40 = vrot.slane %v2643_v9, %v5147_v59 }
 0x7e2   : > { %4532 = vmatprep.subr.bf16.mxu1 %v4829_v8 }
 0x7e4   : > { %4510 = vmatpush3.bf16.msra.mxu0 %v5596_v10  ;;  %v3071_v10 = vld [vmem:[%s5001_s19 + $0x2a] sm:$0x3f] }
 0x7e5   : > { %4511 = vmatprep.subr.bf16.mxu0 %v4829_v8  ;;  %4534 = vmatpush3.bf16.msra.mxu1 %v5646_v45 }
 0x7e6   : > { %4535 = vmatprep.subr.bf16.mxu1 %v4829_v8 }
 0x7e8   : > { %4513 = vmatpush3.bf16.msra.mxu0 %v5600_v11 }
 0x7e9   : > { %4514 = vmatprep.subr.bf16.mxu0 %v4829_v8  ;;  %4537 = vmatpush3.bf16.msra.mxu1 %v5651_v19  ;;  %v2809_v19 = vrot.slane %v3071_v10, 2 }
 0x7ea   : > { %4538 = vmatprep.subr.bf16.mxu1 %v4829_v8 }
 0x7ec   : > { %4516 = vmatpush3.bf16.msra.mxu0 %v5604_v52 }
 0x7ed   : > { %4517 = vmatprep.subr.bf16.mxu0 %v4829_v8  ;;  %4540 = vmatpush3.bf16.msra.mxu1 %v5655_v50 }
 0x7ee   : > { %4541 = vmatprep.subr.bf16.mxu1 %v4829_v8 }
 0x7f0   : > { %4519 = vmatpush3.bf16.msra.mxu0 %v5608_v12 }
 0x7f1   : > { %4520 = vmatprep.subr.bf16.mxu0 %v4829_v8  ;;  %4543 = vmatpush3.bf16.msra.mxu1 %v5659_v34 }
 0x7f2   : > { %4544 = vmatprep.subr.bf16.mxu1 %v4829_v8 }
 0x7f4   : > { %4522 = vmatpush3.bf16.msra.mxu0 %v5612_v41 }
 0x7f5   : > { %4523 = vmatprep.subr.bf16.mxu0 %v4829_v8  ;;  %4546 = vmatpush3.bf16.msra.mxu1 %v5662_v37  ;;  %v2819_v37 = vrot.slane %v3071_v10, 4 }
 0x7f6   : > { %4547 = vmatprep.subr.bf16.mxu1 %v4829_v8 }
 0x7f8   : > { %4525 = vmatpush3.bf16.msra.mxu0 %v5616_v62 }
 0x7f9   : > { %4549 = vmatpush3.bf16.msra.mxu1 %v5666_v13 }
 0x7fb   : > { %3873 = vmatmul.mubr.f32.vlgmr.msra.gmra.mrb[22].mxu0 %v5678_v43 }
 0x8ae   : > { %v2587_v63 = vpop.f32.mrb[20].mxu0  ;;  %v2726_v11 = vpop.f32.mrb[20].mxu1 }
 0x8af   : > { %v2588_v52 = vadd.f32 %v3069_v31, %v2587_v63  ;;  %v2727_v12 = vadd.f32 %v2726_v11, %v2648_v58  ;;  %v3839_v41 = vpop.f32.mrb[21].mxu0  ;;  %v2728_v26 = vpop.f32.mrb[21].mxu1 }
 0x8b0   : > { %v2729_v45 = vadd.f32 %v2728_v26, %v2652_v40 }
 0x8b1   : > { %3070 = vst [vmem:[%s4996_s24 + $0xc] sm:$0x3] %v2588_v52  ;;  %v2801_v8 = vadd.f32 %v3071_v10, %v2727_v12 }
 0x8b2   : > { %v2811_v25 = vadd.f32 %v2809_v19, %v2729_v45 }
 0x8b3   : > { %v3072_v62 = vmul.f32 -1.442695, %v2801_v8 }
 0x8b4   : > { %v3073_v53 = vmul.f32 -1.442695, %v2811_v25 }
 0x8b5   : > { %4678 = vpow2.f32 %v3072_v62 }
 0x8b6   : > { %4680 = vpow2.f32 %v3073_v53 }
 0x8bf   : > { %v4679_v50 = vpop.eup %4678 }
 0x8c0   : > { %v2805_v57 = vadd.f32 1.0, %v4679_v50  ;;  %v4681_v4 = vpop.eup %4680 }
 0x8c1   : > { %v2815_v17 = vadd.f32 1.0, %v4681_v4 }
 0x8c2   : > { %4682 = vrcp.f32 %v2805_v57 }
 0x8c3   : > { %4684 = vrcp.f32 %v2815_v17 }
 0x8cc   : > { %v4683_v46 = vpop.eup %4682 }
 0x8cd   : > { %v4685_v21 = vpop.eup %4684 }
 0x8ce   : > { %v2797_v34 = vpop.f32.mrb[22].mxu0  ;;  %v2823_v47 = vsub.f32 1.0, %v4685_v21  ;;  %v2825_v54 = vmul.f32 %v4685_v21, %v5678_v43 }
 0x8cf   : > { %v2798_v28 = vadd.f32 %v2797_v34, %v2656_v7  ;;  %v3874_v59 = vpop.f32.mrb[23].mxu0 }
 0x8d1   : > { %v2818_v38 = vmul.f32 %v4683_v46, %v2798_v28 }
 0x8d3   : > { %v2821_v13 = vadd.f32 %v2819_v37, %v2818_v38 }
 0x8d5   : > { %4686 = vtanh.f32 %v2821_v13 }
 0x8df   : > { %v4687_v5 = vpop.eup %4686 }
 0x8e0   : > { %v2824_v48 = vmul.f32 %v4687_v5, %v2823_v47 }
 0x8e2   : > { %v2826_v55 = vadd.f32 %v2825_v54, %v2824_v48 }
 0x8e4   : > { %3908 = vmatmul.mubr.f32.vlgmr.msra.gmra.mrb[22].mxu1 %v2826_v55  ;;  %2922 = vst [vmem:[#allocation2] sm:$0x3] %v2826_v55 }
 0x9b7   : > { %v2916_v36 = vpop.f32.mrb[22].mxu1 }
 0x9b8   : > { %v2917_v16 = vadd.f32 %v3069_v31, %v2916_v36  ;;  %v3909_v23 = vpop.f32.mrb[23].mxu1 }
 0x9ba   : > { %3075 = vst [vmem:[%s4996_s24 + $0xe] sm:$0x3] %v2917_v16 }
 0x9bb PF: > { %s18_s18 = sadd.s32 1, %s4818_s18  }
 0x9bc   : > { %p15_p12 = scmp.ge.s32.totalorder %s18_s18, 4  }
 0x9be   :  { %17 = sbr.rel (!%p15_p12) target bundleno = 3 (0x3), region = 105 }
 0x9c5   :  { %2945 = vsyncpa [#allocation4], 1 }
 0x9c6   :  { %2947 = vsyncpa [#allocation4 + $0x1], 1 }
 0x9c7   :  { %2948 = vsyncpa [#allocation6], 1 }
 0x9c8   :  { %2949 = vsyncpa [#allocation9], 1 }

// kernel: forward.2
= control target key start
LH: loop header
LB: loop body
LE: loop exit
PB: predicated region body
PF: predicated region fallthrough
CT: control target
= control target key end

     0   :  { %11 = vsyncpa [#allocation3], 0  ;;  %s7041_s0 = inlined_call_operand.hbm [shape: f32[2,16,1024], index: 0, kind: input, shape index: {}]   ;;  %s7042_s1 = inlined_call_operand.hbm [shape: f32[1024,1280], index: 1, kind: input, shape index: {}]   ;;  %s7043_s2 = inlined_call_operand.hbm [shape: f32[1,640], index: 2, kind: input, shape index: {}]   ;;  %s7044_s3 = inlined_call_operand.hbm [shape: f32[1,640], index: 3, kind: input, shape index: {}]   ;;  %s7045_s4 = inlined_call_operand.hbm [shape: f32[640,384], index: 4, kind: input, shape index: {}]   ;;  %s7046_s5 = inlined_call_operand.hbm [shape: f32[1,384], index: 5, kind: input, shape index: {}]   ;;  %s7047_s6 = inlined_call_operand.hbm [shape: f32[2,16,384], index: 6, kind: output, shape index: {}]  }
   0x1   :  { %13 = vsyncpa [#allocation3 + $0x1], 0 }
   0x2   :  { %14 = vsyncpa [#allocation6], 0 }
   0x3   :  { %15 = vsyncpa [#allocation9], 0 }
   0x4   :  { %16 = vsyncpa [#allocation12], 0 }
   0x5   :  { %17 = vsyncpa [#allocation4], 0 }
   0x6   :  { %19 = vsyncpa [#allocation4 + $0x1], 0  ;;  %s6476_s21 = smov 0   ;;  %s6478_s22 = smov 0  }
   0x7   :  { %s6480_s23 = smov 0   ;;  %s6482_s24 = smov 0  }
   0x8 LB: > { %s6425_s25 = smov [#allocation5]   ;;  %s6497_s27 = sadd.s32 4294967295, %s6423_s24   ;;  %s6423_s24 = sphi %s6482_s24, %s7072_s24   ;;  %s6419_s23 = sphi %s6480_s23, %s7071_s23   ;;  %s6415_s22 = sphi %s6478_s22, %s7070_s22   ;;  %s6411_s21 = sphi %s6476_s21, %s7069_s21  }
   0x9   : > { %s199_s26 = sshll.u32 %s6425_s25, 4  ;;  %p4267_p0 = scmp.ge.s32.totalorder %s6423_s24, 1  ;;  %s6502_s26 = int_to_ptr.vmem [resolvable:$true] %s199_s26 }
   0xa   : > { %p7048_p1 = scmp.eq.s32.totalorder %s6497_s27, 0  ;;  %p187_p2 = scmp.lt.s32.totalorder %s6423_s24, 3 }
   0xb   : > { %s6426_s29 = smov [#allocation8]   ;;  %s6427_s8 = smov [#allocation7]  }
   0xc   : > { %p6504_p3 = pnand %p4267_p0, %p187_p2  ;;  %s224_s30 = sshll.u32 %s6426_s29, 4  ;;  %s6517_s30 = int_to_ptr.vmem [resolvable:$true] %s224_s30 }
   0xd   : > { %s213_s9 = sshll.u32 %s6427_s8, 4  ;;  %s6175_s12 = scalar_lea.hbm %s7042_s1, 163840  ;;  %s6519_s9 = int_to_ptr.vmem [resolvable:$true] %s213_s9 }
   0xe   : > { %s7051_s28 = scalar_select %p6504_p3, 1, 0 }
   0xf   : > { %p6051_p5 = pneg %p6504_p3  ;;  %p6176_p7 = scmp.ne.s32.totalorder %s7042_s1, %s6175_s12 }
  0x10   : > { %p6182_p11 = scmp.lt.u32.totalorder %s6175_s12, %s7042_s1 }
  0x11   : > { %p6513_p6 = pnand %p6051_p5, %p7048_p1 }
  0x13   : > { %p6529_p8 = pneg %p6513_p6 }
  0x15   : > { %p6178_p9 = pnand %p6529_p8, %p6176_p7 }
  0x17   : > { %p6179_p10 = pneg %p6178_p9 }
  0x19   : > { %p6184_p12 = pnand %p6182_p11, %p6179_p10 }
  0x1b   : > { %6187 = shalt.err (!%p6184_p12)
}
  0x1c   : > { %s6188_s18 = scalar_lea.vmem %s6502_s26, 163840  ;;  %p6196_p5 = scmp.lt.s32.totalorder %s6502_s26, %s6502_s26 }
  0x1d   : > { %p6189_p13 = scmp.ne.s32.totalorder %s6502_s26, %s6188_s18  ;;  %p6197_p4 = scmp.lt.s32.totalorder %s6188_s18, %s6188_s18 }
  0x1f   : > { %p6191_p0 = pnand %p6189_p13, %p6529_p8  ;;  %p6198_p7 = por %p6197_p4, %p6196_p5 }
  0x21   : > { %p6192_p2 = pneg %p6191_p0 }
  0x23   : > { %p6199_p9 = pnand %p6198_p7, %p6192_p2 }
  0x25   : > { %6202 = shalt.err (!%p6199_p9)
}
  0x26   : > { %s6428_s19 = smov 1280   ;;  %s6429_s20 = smov 80  }
  0x27   : > { %6054 = dma.hbm_to_vmem [thread:$0]  (!%p6513_p6), %s7042_s1, 163840, %s6502_s26, [#allocation6], %s6428_s19, %s6428_s19, %s6429_s20  }
  0x28   : > { %s6203_s11 = scalar_lea.hbm %s7044_s3, 80 }
  0x29   : > { %p6204_p4 = scmp.ne.s32.totalorder %s7044_s3, %s6203_s11  ;;  %p6210_p12 = scmp.lt.u32.totalorder %s6203_s11, %s7044_s3 }
  0x2b   : > { %p6206_p10 = pnand %p6204_p4, %p6529_p8 }
  0x2d   : > { %p6207_p11 = pneg %p6206_p10 }
  0x2f   : > { %p6212_p13 = pnand %p6210_p12, %p6207_p11 }
  0x31   : > { %6215 = shalt.err (!%p6212_p13)
}
  0x32   : > { %s6216_s26 = scalar_lea.vmem %s6517_s30, 80  ;;  %s6223_s17 = scalar_lea.vmem %s6517_s30, 96 }
  0x33   : > { %p6217_p0 = scmp.ne.s32.totalorder %s6517_s30, %s6216_s26  ;;  %p6224_p7 = scmp.lt.s32.totalorder %s6517_s30, %s6517_s30 }
  0x34   : > { %p6225_p9 = scmp.lt.s32.totalorder %s6223_s17, %s6216_s26 }
  0x35   : > { %p6219_p2 = pnand %p6217_p0, %p6529_p8 }
  0x36   : > { %p6226_p4 = por %p6225_p9, %p6224_p7 }
  0x37   : > { %p6220_p5 = pneg %p6219_p2 }
  0x39   : > { %p6227_p10 = pnand %p6226_p4, %p6220_p5 }
  0x3b   : > { %6230 = shalt.err (!%p6227_p10)
}
  0x3c   : > { %6060 = dma.hbm_to_vmem [thread:$0]  (!%p6513_p6), %s7044_s3, 80, %s6517_s30, [#allocation9]  }
  0x3d   : > { %s6231_s29 = scalar_lea.hbm %s7043_s2, 80 }
  0x3e   : > { %p6232_p11 = scmp.ne.s32.totalorder %s7043_s2, %s6231_s29  ;;  %p6238_p0 = scmp.lt.u32.totalorder %s6231_s29, %s7043_s2 }
  0x40   : > { %p6234_p12 = pnand %p6232_p11, %p6529_p8 }
  0x42   : > { %p6235_p13 = pneg %p6234_p12 }
  0x44   : > { %p6240_p2 = pnand %p6238_p0, %p6235_p13 }
  0x46   : > { %6243 = shalt.err (!%p6240_p2)
}
  0x47   : > { %s6244_s30 = scalar_lea.vmem %s6519_s9, 80  ;;  %s6251_s13 = scalar_lea.vmem %s6519_s9, 96 }
  0x48   : > { %p6245_p5 = scmp.ne.s32.totalorder %s6519_s9, %s6244_s30  ;;  %p6252_p4 = scmp.lt.s32.totalorder %s6519_s9, %s6519_s9 }
  0x49   : > { %p6253_p10 = scmp.lt.s32.totalorder %s6251_s13, %s6244_s30 }
  0x4a   : > { %p6247_p7 = pnand %p6245_p5, %p6529_p8 }
  0x4b   : > { %p6254_p11 = por %p6253_p10, %p6252_p4 }
  0x4c   : > { %p6248_p9 = pneg %p6247_p7 }
  0x4e   : > { %p6255_p12 = pnand %p6254_p11, %p6248_p9 }
  0x50   : > { %6258 = shalt.err (!%p6255_p12)
}
  0x51   : > { %6057 = dma.hbm_to_vmem [thread:$0]  (!%p6513_p6), %s7043_s2, 80, %s6519_s9, [#allocation6]  }
  0x52   : > { %s6430_s26 = smov [#allocation10]   ;;  %s6259_s20 = scalar_lea.hbm %s7045_s4, 30720 }
  0x53   : > { %s234_s17 = sshll.u32 %s6430_s26, 4  ;;  %p6260_p13 = scmp.ne.s32.totalorder %s7045_s4, %s6259_s20  ;;  %s235_s17 = int_to_ptr.vmem [resolvable:$true] %s234_s17 }
  0x54   : > { %p6266_p5 = scmp.lt.u32.totalorder %s6259_s20, %s7045_s4 }
  0x55   : > { %p6262_p0 = pnand %p6260_p13, %p6529_p8 }
  0x57   : > { %p6263_p2 = pneg %p6262_p0 }
  0x59   : > { %p6268_p7 = pnand %p6266_p5, %p6263_p2 }
  0x5b   : > { %6271 = shalt.err (!%p6268_p7)
}
  0x5c   : > { %s6272_s9 = scalar_lea.vmem %s235_s17, 30720  ;;  %p6280_p11 = scmp.lt.s32.totalorder %s235_s17, %s235_s17 }
  0x5d   : > { %p6273_p9 = scmp.ne.s32.totalorder %s235_s17, %s6272_s9  ;;  %p6281_p12 = scmp.lt.s32.totalorder %s6272_s9, %s6272_s9 }
  0x5f   : > { %p6275_p4 = pnand %p6273_p9, %p6529_p8  ;;  %p6282_p1 = por %p6281_p12, %p6280_p11 }
  0x61   : > { %p6276_p10 = pneg %p6275_p4 }
  0x63   : > { %p6283_p3 = pnand %p6282_p1, %p6276_p10 }
  0x65   : > { %6286 = shalt.err (!%p6283_p3)
}
  0x66   : > { %s6431_s11 = smov 384   ;;  %s6432_s12 = smov 24  }
  0x67   : > { %6063 = dma.hbm_to_vmem [thread:$0]  (!%p6513_p6), %s7045_s4, 30720, %s235_s17, [#allocation9], %s6431_s11, %s6431_s11, %s6432_s12  }
  0x68   : > { %s6433_s14 = smov [#allocation11]   ;;  %s6287_s19 = scalar_lea.hbm %s7046_s5, 48 }
  0x69   : > { %s248_s16 = sshll.u32 %s6433_s14, 4  ;;  %p6288_p1 = scmp.ne.s32.totalorder %s7046_s5, %s6287_s19  ;;  %s249_s16 = int_to_ptr.vmem [resolvable:$true] %s248_s16 }
  0x6a   : > { %p6294_p0 = scmp.lt.u32.totalorder %s6287_s19, %s7046_s5 }
  0x6b   : > { %p6290_p3 = pnand %p6288_p1, %p6529_p8 }
  0x6d   : > { %p6291_p13 = pneg %p6290_p3 }
  0x6f   : > { %p6296_p2 = pnand %p6294_p0, %p6291_p13 }
  0x71   : > { %6299 = shalt.err (!%p6296_p2)
}
  0x72   : > { %s6300_s17 = scalar_lea.vmem %s249_s16, 48  ;;  %s6307_s10 = scalar_lea.vmem %s249_s16, 64 }
  0x73   : > { %p6301_p5 = scmp.ne.s32.totalorder %s249_s16, %s6300_s17  ;;  %p6308_p4 = scmp.lt.s32.totalorder %s249_s16, %s249_s16 }
  0x74   : > { %p6309_p10 = scmp.lt.s32.totalorder %s6307_s10, %s6300_s17 }
  0x75   : > { %p6303_p7 = pnand %p6301_p5, %p6529_p8 }
  0x76   : > { %p6310_p11 = por %p6309_p10, %p6308_p4 }
  0x77   : > { %p6304_p9 = pneg %p6303_p7 }
  0x79   : > { %p6311_p12 = pnand %p6310_p11, %p6304_p9 }
  0x7b   : > { %6314 = shalt.err (!%p6311_p12)
}
  0x7c   : > { %6066 = dma.hbm_to_vmem [thread:$0]  (!%p6513_p6), %s7046_s5, 48, %s249_s16, [#allocation12]  }
  0x7d   : > { %s4266_s15 = sadd.s32 4294967294, %s6423_s24   ;;  %s6636_s7 = sadd.s32 1, %s6423_s24  }
  0x7e   : > { %s32_s12 = sadd.s32 1, %s6419_s23  ;;  %s29_s30 = ssub.s32 %s6423_s24, %s6636_s7 }
  0x7f   : > { %p39_p8 = scmp.ne.s32.totalorder %s6419_s23, %s6415_s22  ;;  %p30_p1 = scmp.eq.s32.totalorder %s29_s30, 0 }
  0x80   : > { %p40_p3 = scmp.eq.s32.totalorder %s6423_s24, 0  ;;  %p45_p13 = scmp.ne.s32.totalorder %s6415_s22, %s6411_s21 }
  0x81   : > { %p174_p0 = scmp.eq.s32.totalorder %s6497_s27, 1  ;;  %p7054_p5 = scmp.eq.s32.totalorder %s6497_s27, 0 }
  0x82   : > { %s6648_s13 = scalar_select %p30_p1, %s6419_s23, %s32_s12  }
  0x83   : > { %p41_p2 = por %p40_p3, %p39_p8  ;;  %p6652_p7 = por %p7054_p5, %p45_p13 }
  0x84   : > { %p6656_p6 = por %p174_p0, %p39_p8  ;;  %p180_p9 = scmp.eq.s32.totalorder %s4266_s15, 1 }
  0x85   : > { %p6080_p4 = scmp.lt.s32.totalorder %s6423_s24, 2  ;;  %s259_s26 = sand.u32 1, %s6419_s23  }
  0x86   : > { %s7056_s16 = scalar_select %p6656_p6, 1, 0 }
  0x87   : > { %p6662_p10 = por %p180_p9, %p45_p13  ;;  %s4274_s19 = sshll.u32 %s259_s26, 7 }
  0x88   : > { %s4287_s20 = sshll.u32 %s6423_s24, 11  ;;  %s263_s17 = scalar_lea.vmem [#allocation2], %s4274_s19 }
  0x89   : > { %s7057_s18 = scalar_select %p6662_p10, 1, 0 }
  0x8a   : > { %s6670_s8 = scalar_lea.hbm %s7041_s0, %s4287_s20  ;;  %s270_s10 = sshll.u32 %s263_s17, 4  ;;  %s6676_s10 = int_to_ptr.vmem [resolvable:$true] %s270_s10 }
  0x8b   : > { %p6672_p11 = pnand %p6080_p4, %p41_p2  ;;  %s6678_s11 = scalar_lea.sflag [#allocation3], %s259_s26 }
  0x8c   : > { %s6315_s15 = scalar_lea.hbm %s6670_s8, 2048  ;;  %s6320_s19 = scalar_lea.hbm %s7041_s0, 4096 }
  0x8d   : > { %p6316_p12 = scmp.ne.s32.totalorder %s6670_s8, %s6315_s15  ;;  %p6317_p8 = pneg %p6672_p11 }
  0x8e   : > { %p6321_p13 = scmp.lt.u32.totalorder %s6670_s8, %s7041_s0  ;;  %p6322_p0 = scmp.lt.u32.totalorder %s6320_s19, %s6315_s15 }
  0x8f   : > { %p6318_p1 = pnand %p6317_p8, %p6316_p12  ;;  %p6324_p5 = scmp.lt.u32.totalorder %s6315_s15, %s6670_s8 }
  0x90   : > { %p6323_p2 = por %p6322_p0, %p6321_p13 }
  0x91   : > { %p6319_p3 = pneg %p6318_p1 }
  0x92   : > { %p6325_p9 = por %p6324_p5, %p6323_p2 }
  0x94   : > { %p6326_p4 = pnand %p6325_p9, %p6319_p3 }
  0x96   : > { %6329 = shalt.err (!%p6326_p4)
}
  0x97   : > { %s6330_s26 = scalar_lea.vmem %s6676_s10, 2048  ;;  %s6434_s29 = smov [#allocation2]  }
  0x98   : > { %p6331_p12 = scmp.ne.s32.totalorder %s6676_s10, %s6330_s26  ;;  %s6335_s17 = sshll.u32 %s6434_s29, 4  ;;  %s6336_s17 = int_to_ptr.vmem [resolvable:$false] %s6335_s17 }
  0x99   : > { %s6337_s12 = scalar_lea.vmem %s6336_s17, 4096  ;;  %p6338_p6 = scmp.lt.s32.totalorder %s6676_s10, %s6336_s17 }
  0x9a   : > { %p6333_p1 = pnand %p6331_p12, %p6317_p8  ;;  %p6339_p13 = scmp.lt.s32.totalorder %s6337_s12, %s6330_s26 }
  0x9c   : > { %p6334_p10 = pneg %p6333_p1  ;;  %p6340_p0 = por %p6339_p13, %p6338_p6 }
  0x9e   : > { %p6341_p2 = pnand %p6340_p0, %p6334_p10 }
  0xa0   : > { %6344 = shalt.err (!%p6341_p2)
}
  0xa1   : > { %s6435_s15 = smov 1024   ;;  %s6436_s30 = smov 64  }
  0xa2   : > { %6070 = dma.hbm_to_vmem [thread:$0]  (!%p6672_p11), %s6670_s8, 2048, %s6676_s10, %s6678_s11, %s6435_s15, %s6435_s15, %s6436_s30  }
  0xa3   : > { %p7059_p8 = scmp.ne.s32.totalorder %s7051_s28, 0 }
  0xa4   : > { %s6709_s19 = sand.u32 (!%p7059_p8), 1, %s6415_s22  }
  0xa5   : > { %282 = sbr.rel (%p7059_p8) target bundleno = 1575 (0x627), region = 44  ;;  %s4278_s20 = sshll.u32 (!%p7059_p8), %s6709_s19, 7 }
  0xa6   : > { %s285_s25 = scalar_lea.sflag (!%p7059_p8), [#allocation3], %s6709_s19  ;;  %s6713_s26 = scalar_lea.vmem (!%p7059_p8), [#allocation2], %s4278_s20 }
  0xac   : > { %6390 = dma.done.wait (%p6652_p7), %s285_s25, 2048  }
  0xad   : > { %6392 = vsyncadd (%p6652_p7), %s285_s25, 4294965248  ;;  %p7060_p6 = scmp.eq.s32.totalorder %s6497_s27, 0 }
  0xaf   : > { %6394 = dma.done.wait (%p7060_p6), [#allocation6], 163920   ;;  %p7061_p10 = pmov %p7060_p6 }
  0xb0   : > { %p7062_p11 = pmov %p7060_p6 }
  0xb1   : > { %6396 = vsyncadd (%p7061_p10), [#allocation6], 4294803376 }
  0xb2   : > { %6398 = dma.done.wait (%p7062_p11), [#allocation9], 30800   ;;  %p7063_p3 = pmov %p7060_p6 }
  0xb4   : > { %6400 = vsyncadd (%p7063_p3), [#allocation9], 4294936496  ;;  %p7064_p5 = pmov %p7063_p3 }
  0xb5   : > { %p7065_p9 = pmov %p7063_p3 }
  0xb6   : > { %6402 = dma.done.wait (%p7064_p5), [#allocation12], 48  }
  0xb7   : > { %6404 = vsyncadd (%p7065_p9), [#allocation12], 4294967248  ;;  %v354_v0 = vld [vmem:[#allocation5 + $0x8] sm:$0xff]  ;;  %v364_v1 = vld [vmem:[#allocation5 + $0x58] sm:$0xff]  ;;  %s6025_s28 = smul.u32 48, %s6709_s19  ;;  %s4132_s17 = scalar_lea.sflag [#allocation4], %s6709_s19 }
  0xb8   : > { %v356_v2 = vld [vmem:[#allocation5 + $0x18] sm:$0xff]  ;;  %v4417_v3 = vpack.c.bf16 %v364_v1, %v354_v0  ;;  %v366_v4 = vld [vmem:[#allocation5 + $0x68] sm:$0xff]  ;;  %v353_v5 = vld [vmem:[#allocation5] sm:$0xff]  ;;  %s6026_s10 = smul.u32 768, %s6497_s27  ;;  %p7066_p4 = scmp.ne.s32.totalorder %s7056_s16, 0 }
  0xb9   : > { %v363_v6 = vld [vmem:[#allocation5 + $0x50] sm:$0xff]  ;;  %v4673_v7 = vpack.c.bf16 %v366_v4, %v356_v2  ;;  %v365_v10 = vld [vmem:[#allocation5 + $0x60] sm:$0xff]  ;;  %v374_v11 = vld [vmem:[#allocation5 + $0xa8] sm:$0xff]  ;;  %s6981_s14 = scalar_lea.vmem [#allocation13], %s6025_s28  ;;  %s6438_s27 = smov [#allocation13]  }
  0xba   : > { %v4419_v8 = vpack.c.bf16 %v363_v6, %v353_v5  ;;  %v355_v9 = vld [vmem:[#allocation5 + $0x10] sm:$0xff]  ;;  %4418 = vmatprep.subr.bf16.mxu0 %v4417_v3  ;;  %v384_v13 = vld [vmem:[#allocation5 + $0xf8] sm:$0xff]  ;;  %v386_v15 = vld [vmem:[#allocation5 + $0x108] sm:$0xff]  ;;  %s4145_s8 = sshll.u32 %s6981_s14, 4  ;;  %s6995_s29 = scalar_lea.hbm %s7047_s6, %s6026_s10  ;;  %s6990_s8 = int_to_ptr.vmem [resolvable:$true] %s4145_s8 }
  0xbb   : > { %v4675_v12 = vpack.c.bf16 %v365_v10, %v355_v9  ;;  %v376_v14 = vld [vmem:[#allocation5 + $0xb8] sm:$0xff]  ;;  %4674 = vmatprep.subr.bf16.mxu1 %v4673_v7  ;;  %v4421_v16 = vpack.c.bf16 %v384_v13, %v374_v11  ;;  %v373_v18 = vld [vmem:[#allocation5 + $0xa0] sm:$0xff]  ;;  %v383_v19 = vld [vmem:[#allocation5 + $0xf0] sm:$0xff]  ;;  %s6345_s12 = scalar_lea.vmem %s6990_s8, 768  ;;  %s6349_s15 = sshll.u32 %s6438_s27, 4  ;;  %s6350_s15 = int_to_ptr.vmem [resolvable:$false] %s6349_s15 }
  0xbc   : > { %4420 = vmatpush1.bf16.msra.mxu0 %v4419_v8  ;;  %v4677_v17 = vpack.c.bf16 %v386_v15, %v376_v14  ;;  %v375_v20 = vld [vmem:[#allocation5 + $0xb0] sm:$0xff]  ;;  %v4423_v21 = vpack.c.bf16 %v383_v19, %v373_v18  ;;  %v385_v22 = vld [vmem:[#allocation5 + $0x100] sm:$0xff]  ;;  %v394_v23 = vld [vmem:[#allocation5 + $0x148] sm:$0xff]  ;;  %p6346_p7 = scmp.ne.s32.totalorder %s6990_s8, %s6345_s12  ;;  %s6351_s30 = scalar_lea.vmem %s6350_s15, 1536 }
  0xbd   : > { %4676 = vmatpush1.bf16.msra.mxu1 %v4675_v12  ;;  %v404_v24 = vld [vmem:[#allocation5 + $0x198] sm:$0xff]  ;;  %4422 = vmatprep.subr.bf16.mxu0 %v4421_v16  ;;  %v4679_v25 = vpack.c.bf16 %v385_v22, %v375_v20  ;;  %v406_v28 = vld [vmem:[#allocation5 + $0x1a8] sm:$0xff]  ;;  %v393_v29 = vld [vmem:[#allocation5 + $0x140] sm:$0xff]  ;;  %p6352_p13 = scmp.lt.s32.totalorder %s6990_s8, %s6350_s15  ;;  %p6353_p0 = scmp.lt.s32.totalorder %s6351_s30, %s6345_s12 }
  0xbe   : > { %4678 = vmatprep.subr.bf16.mxu1 %v4677_v17  ;;  %v4425_v26 = vpack.c.bf16 %v404_v24, %v394_v23  ;;  %v396_v27 = vld [vmem:[#allocation5 + $0x158] sm:$0xff]  ;;  %v403_v31 = vld [vmem:[#allocation5 + $0x190] sm:$0xff]  ;;  %v405_v33 = vld [vmem:[#allocation5 + $0x1a0] sm:$0xff]  ;;  %p6347_p12 = pnand %p6346_p7, %p7066_p4 }
  0xbf   : > { %v4681_v30 = vpack.c.bf16 %v406_v28, %v396_v27  ;;  %v395_v32 = vld [vmem:[#allocation5 + $0x150] sm:$0xff]  ;;  %v4427_v34 = vpack.c.bf16 %v403_v31, %v393_v29  ;;  %v414_v35 = vld [vmem:[#allocation5 + $0x1e8] sm:$0xff]  ;;  %v424_v36 = vld [vmem:[#allocation5 + $0x238] sm:$0xff]  ;;  %p6354_p2 = por %p6353_p0, %p6352_p13 }
  0xc0   : > { %4424 = vmatpush1.bf16.msra.mxu0 %v4423_v21  ;;  %v416_v37 = vld [vmem:[#allocation5 + $0x1f8] sm:$0xff]  ;;  %v4683_v38 = vpack.c.bf16 %v405_v33, %v395_v32  ;;  %v4429_v39 = vpack.c.bf16 %v424_v36, %v414_v35  ;;  %v426_v40 = vld [vmem:[#allocation5 + $0x248] sm:$0xff]  ;;  %v413_v41 = vld [vmem:[#allocation5 + $0x1e0] sm:$0xff]  ;;  %p6348_p1 = pneg %p6347_p12 }
  0xc1   : > { %4680 = vmatpush1.bf16.msra.mxu1 %v4679_v25  ;;  %4426 = vmatprep.subr.bf16.mxu0 %v4425_v26  ;;  %v423_v42 = vld [vmem:[#allocation5 + $0x230] sm:$0xff]  ;;  %v4685_v43 = vpack.c.bf16 %v426_v40, %v416_v37  ;;  %v425_v45 = vld [vmem:[#allocation5 + $0x240] sm:$0xff]  ;;  %v434_v46 = vld [vmem:[#allocation5 + $0x288] sm:$0xff] }
  0xc2   : > { %4682 = vmatprep.subr.bf16.mxu1 %v4681_v30  ;;  %v415_v44 = vld [vmem:[#allocation5 + $0x1f0] sm:$0xff]  ;;  %v444_v47 = vld [vmem:[#allocation5 + $0x2d8] sm:$0xff]  ;;  %v446_v49 = vld [vmem:[#allocation5 + $0x2e8] sm:$0xff]  ;;  %v4431_v50 = vpack.c.bf16 %v423_v42, %v413_v41  ;;  %p6355_p8 = pnand %p6354_p2, %p6348_p1 }
  0xc3   : > { %v436_v48 = vld [vmem:[#allocation5 + $0x298] sm:$0xff]  ;;  %v4687_v51 = vpack.c.bf16 %v425_v45, %v415_v44  ;;  %v4433_v52 = vpack.c.bf16 %v444_v47, %v434_v46  ;;  %v433_v53 = vld [vmem:[#allocation5 + $0x280] sm:$0xff]  ;;  %v443_v54 = vld [vmem:[#allocation5 + $0x2d0] sm:$0xff] }
  0xc4   : > { %4428 = vmatpush1.bf16.msra.mxu0 %v4427_v34  ;;  %v435_v55 = vld [vmem:[#allocation5 + $0x290] sm:$0xff]  ;;  %v4689_v56 = vpack.c.bf16 %v446_v49, %v436_v48  ;;  %v445_v57 = vld [vmem:[#allocation5 + $0x2e0] sm:$0xff]  ;;  %v454_v58 = vld [vmem:[#allocation5 + $0x328] sm:$0xff]  ;;  %v4435_v62 = vpack.c.bf16 %v443_v54, %v433_v53 }
  0xc5   : > { %4684 = vmatpush1.bf16.msra.mxu1 %v4683_v38  ;;  %4430 = vmatprep.subr.bf16.mxu0 %v4429_v39  ;;  %v464_v59 = vld [vmem:[#allocation5 + $0x378] sm:$0xff]  ;;  %v466_v61 = vld [vmem:[#allocation5 + $0x388] sm:$0xff]  ;;  %v4691_v63 = vpack.c.bf16 %v445_v57, %v435_v55  ;;  %v453_v1 = vld [vmem:[#allocation5 + $0x320] sm:$0xff] }
  0xc6   : > { %4686 = vmatprep.subr.bf16.mxu1 %v4685_v43  ;;  %v456_v60 = vld [vmem:[#allocation5 + $0x338] sm:$0xff]  ;;  %v4437_v0 = vpack.c.bf16 %v464_v59, %v454_v58  ;;  %v463_v2 = vld [vmem:[#allocation5 + $0x370] sm:$0xff]  ;;  %v465_v5 = vld [vmem:[#allocation5 + $0x380] sm:$0xff] }
  0xc7   : > { %v455_v3 = vld [vmem:[#allocation5 + $0x330] sm:$0xff]  ;;  %v4693_v4 = vpack.c.bf16 %v466_v61, %v456_v60  ;;  %v474_v6 = vld [vmem:[#allocation5 + $0x3c8] sm:$0xff]  ;;  %v484_v7 = vld [vmem:[#allocation5 + $0x418] sm:$0xff]  ;;  %v4439_v10 = vpack.c.bf16 %v463_v2, %v453_v1 }
  0xc8   : > { %4432 = vmatpush1.bf16.msra.mxu0 %v4431_v50  ;;  %v476_v8 = vld [vmem:[#allocation5 + $0x3d8] sm:$0xff]  ;;  %v486_v9 = vld [vmem:[#allocation5 + $0x428] sm:$0xff]  ;;  %v4695_v11 = vpack.c.bf16 %v465_v5, %v455_v3  ;;  %v4441_v12 = vpack.c.bf16 %v484_v7, %v474_v6  ;;  %v473_v13 = vld [vmem:[#allocation5 + $0x3c0] sm:$0xff] }
  0xc9   : > { %4688 = vmatpush1.bf16.msra.mxu1 %v4687_v51  ;;  %4434 = vmatprep.subr.bf16.mxu0 %v4433_v52  ;;  %v483_v14 = vld [vmem:[#allocation5 + $0x410] sm:$0xff]  ;;  %v4697_v16 = vpack.c.bf16 %v486_v9, %v476_v8  ;;  %v485_v17 = vld [vmem:[#allocation5 + $0x420] sm:$0xff]  ;;  %v494_v18 = vld [vmem:[#allocation5 + $0x468] sm:$0xff] }
  0xca   : > { %4690 = vmatprep.subr.bf16.mxu1 %v4689_v56  ;;  %v475_v15 = vld [vmem:[#allocation5 + $0x3d0] sm:$0xff]  ;;  %v504_v19 = vld [vmem:[#allocation5 + $0x4b8] sm:$0xff]  ;;  %v506_v21 = vld [vmem:[#allocation5 + $0x4c8] sm:$0xff]  ;;  %v4443_v22 = vpack.c.bf16 %v483_v14, %v473_v13 }
  0xcb   : > { %v496_v20 = vld [vmem:[#allocation5 + $0x478] sm:$0xff]  ;;  %v4699_v23 = vpack.c.bf16 %v485_v17, %v475_v15  ;;  %v4445_v24 = vpack.c.bf16 %v504_v19, %v494_v18  ;;  %v493_v25 = vld [vmem:[#allocation5 + $0x460] sm:$0xff]  ;;  %v503_v26 = vld [vmem:[#allocation5 + $0x4b0] sm:$0xff] }
  0xcc   : > { %4436 = vmatpush1.bf16.msra.mxu0 %v4435_v62  ;;  %v495_v27 = vld [vmem:[#allocation5 + $0x470] sm:$0xff]  ;;  %v4701_v28 = vpack.c.bf16 %v506_v21, %v496_v20  ;;  %v505_v29 = vld [vmem:[#allocation5 + $0x4c0] sm:$0xff]  ;;  %v514_v30 = vld [vmem:[#allocation5 + $0x508] sm:$0xff]  ;;  %v4447_v34 = vpack.c.bf16 %v503_v26, %v493_v25 }
  0xcd   : > { %4692 = vmatpush1.bf16.msra.mxu1 %v4691_v63  ;;  %4438 = vmatprep.subr.bf16.mxu0 %v4437_v0  ;;  %v524_v31 = vld [vmem:[#allocation5 + $0x558] sm:$0xff]  ;;  %v526_v33 = vld [vmem:[#allocation5 + $0x568] sm:$0xff]  ;;  %v4703_v35 = vpack.c.bf16 %v505_v29, %v495_v27  ;;  %v513_v37 = vld [vmem:[#allocation5 + $0x500] sm:$0xff] }
  0xce   : > { %4694 = vmatprep.subr.bf16.mxu1 %v4693_v4  ;;  %v516_v32 = vld [vmem:[#allocation5 + $0x518] sm:$0xff]  ;;  %v4449_v36 = vpack.c.bf16 %v524_v31, %v514_v30  ;;  %v523_v38 = vld [vmem:[#allocation5 + $0x550] sm:$0xff]  ;;  %v525_v41 = vld [vmem:[#allocation5 + $0x560] sm:$0xff] }
  0xcf   : > { %v515_v39 = vld [vmem:[#allocation5 + $0x510] sm:$0xff]  ;;  %v4705_v40 = vpack.c.bf16 %v526_v33, %v516_v32  ;;  %v534_v42 = vld [vmem:[#allocation5 + $0x5a8] sm:$0xff]  ;;  %v544_v43 = vld [vmem:[#allocation5 + $0x5f8] sm:$0xff]  ;;  %v4451_v46 = vpack.c.bf16 %v523_v38, %v513_v37 }
  0xd0   : > { %4440 = vmatpush1.bf16.msra.mxu0 %v4439_v10  ;;  %v536_v44 = vld [vmem:[#allocation5 + $0x5b8] sm:$0xff]  ;;  %v546_v45 = vld [vmem:[#allocation5 + $0x608] sm:$0xff]  ;;  %v4707_v47 = vpack.c.bf16 %v525_v41, %v515_v39  ;;  %v4453_v48 = vpack.c.bf16 %v544_v43, %v534_v42  ;;  %v533_v49 = vld [vmem:[#allocation5 + $0x5a0] sm:$0xff] }
  0xd1   : > { %4696 = vmatpush1.bf16.msra.mxu1 %v4695_v11  ;;  %4442 = vmatprep.subr.bf16.mxu0 %v4441_v12  ;;  %v543_v50 = vld [vmem:[#allocation5 + $0x5f0] sm:$0xff]  ;;  %v4709_v52 = vpack.c.bf16 %v546_v45, %v536_v44  ;;  %v545_v53 = vld [vmem:[#allocation5 + $0x600] sm:$0xff]  ;;  %v554_v54 = vld [vmem:[#allocation5 + $0x648] sm:$0xff] }
  0xd2   : > { %4698 = vmatprep.subr.bf16.mxu1 %v4697_v16  ;;  %v535_v51 = vld [vmem:[#allocation5 + $0x5b0] sm:$0xff]  ;;  %v564_v55 = vld [vmem:[#allocation5 + $0x698] sm:$0xff]  ;;  %v566_v57 = vld [vmem:[#allocation5 + $0x6a8] sm:$0xff]  ;;  %v4455_v58 = vpack.c.bf16 %v543_v50, %v533_v49 }
  0xd3   : > { %v556_v56 = vld [vmem:[#allocation5 + $0x658] sm:$0xff]  ;;  %v4711_v59 = vpack.c.bf16 %v545_v53, %v535_v51  ;;  %v4457_v60 = vpack.c.bf16 %v564_v55, %v554_v54  ;;  %v553_v61 = vld [vmem:[#allocation5 + $0x640] sm:$0xff]  ;;  %v563_v62 = vld [vmem:[#allocation5 + $0x690] sm:$0xff] }
  0xd4   : > { %4444 = vmatpush1.bf16.msra.mxu0 %v4443_v22  ;;  %v555_v63 = vld [vmem:[#allocation5 + $0x650] sm:$0xff]  ;;  %v4713_v0 = vpack.c.bf16 %v566_v57, %v556_v56  ;;  %v565_v1 = vld [vmem:[#allocation5 + $0x6a0] sm:$0xff]  ;;  %v574_v2 = vld [vmem:[#allocation5 + $0x6e8] sm:$0xff]  ;;  %v4459_v6 = vpack.c.bf16 %v563_v62, %v553_v61 }
  0xd5   : > { %4700 = vmatpush1.bf16.msra.mxu1 %v4699_v23  ;;  %4446 = vmatprep.subr.bf16.mxu0 %v4445_v24  ;;  %v584_v3 = vld [vmem:[#allocation5 + $0x738] sm:$0xff]  ;;  %v586_v5 = vld [vmem:[#allocation5 + $0x748] sm:$0xff]  ;;  %v573_v7 = vld [vmem:[#allocation5 + $0x6e0] sm:$0xff]  ;;  %v4715_v8 = vpack.c.bf16 %v565_v1, %v555_v63 }
  0xd6   : > { %4702 = vmatprep.subr.bf16.mxu1 %v4701_v28  ;;  %v576_v4 = vld [vmem:[#allocation5 + $0x6f8] sm:$0xff]  ;;  %v4461_v9 = vpack.c.bf16 %v584_v3, %v574_v2  ;;  %v583_v10 = vld [vmem:[#allocation5 + $0x730] sm:$0xff]  ;;  %v585_v12 = vld [vmem:[#allocation5 + $0x740] sm:$0xff] }
  0xd7   : > { %v575_v11 = vld [vmem:[#allocation5 + $0x6f0] sm:$0xff]  ;;  %v4717_v13 = vpack.c.bf16 %v586_v5, %v576_v4  ;;  %v594_v14 = vld [vmem:[#allocation5 + $0x788] sm:$0xff]  ;;  %v604_v15 = vld [vmem:[#allocation5 + $0x7d8] sm:$0xff]  ;;  %v4463_v19 = vpack.c.bf16 %v583_v10, %v573_v7 }
  0xd8   : > { %4448 = vmatpush1.bf16.msra.mxu0 %v4447_v34  ;;  %v338_v16 = vld [vmem:[%s6713_s26 + $0x8] sm:$0xff]  ;;  %v596_v17 = vld [vmem:[#allocation5 + $0x798] sm:$0xff]  ;;  %v4719_v20 = vpack.c.bf16 %v585_v12, %v575_v11  ;;  %v4465_v21 = vpack.c.bf16 %v604_v15, %v594_v14  ;;  %v593_v22 = vld [vmem:[#allocation5 + $0x780] sm:$0xff] }
  0xd9   : > { %4704 = vmatpush1.bf16.msra.mxu1 %v4703_v35  ;;  %4450 = vmatprep.subr.bf16.mxu0 %v4449_v36  ;;  %v606_v18 = vld [vmem:[#allocation5 + $0x7e8] sm:$0xff]  ;;  %v603_v23 = vld [vmem:[#allocation5 + $0x7d0] sm:$0xff]  ;;  %v605_v26 = vld [vmem:[#allocation5 + $0x7e0] sm:$0xff] }
  0xda   : > { %4706 = vmatprep.subr.bf16.mxu1 %v4705_v40  ;;  %1697 = vmatprep.mubr.f32.mxu0 %v338_v16  ;;  %v595_v24 = vld [vmem:[#allocation5 + $0x790] sm:$0xff]  ;;  %v4721_v25 = vpack.c.bf16 %v606_v18, %v596_v17  ;;  %v614_v27 = vld [vmem:[#allocation5 + $0x828] sm:$0xff]  ;;  %v624_v28 = vld [vmem:[#allocation5 + $0x878] sm:$0xff]  ;;  %v4467_v31 = vpack.c.bf16 %v603_v23, %v593_v22 }
  0xdb   : > { %2005 = vmatprep.mubr.f32.mxu1 %v338_v16  ;;  %v616_v29 = vld [vmem:[#allocation5 + $0x838] sm:$0xff]  ;;  %v626_v30 = vld [vmem:[#allocation5 + $0x888] sm:$0xff]  ;;  %v4723_v32 = vpack.c.bf16 %v605_v26, %v595_v24  ;;  %v4469_v33 = vpack.c.bf16 %v624_v28, %v614_v27  ;;  %v613_v34 = vld [vmem:[#allocation5 + $0x820] sm:$0xff] }
  0xdc   : > { %4452 = vmatpush1.bf16.msra.mxu0 %v4451_v46  ;;  %v623_v35 = vld [vmem:[#allocation5 + $0x870] sm:$0xff]  ;;  %v4725_v37 = vpack.c.bf16 %v626_v30, %v616_v29  ;;  %v625_v38 = vld [vmem:[#allocation5 + $0x880] sm:$0xff]  ;;  %v634_v39 = vld [vmem:[#allocation5 + $0x8c8] sm:$0xff] }
  0xdd   : > { %4708 = vmatpush1.bf16.msra.mxu1 %v4707_v47  ;;  %4454 = vmatprep.subr.bf16.mxu0 %v4453_v48  ;;  %v615_v36 = vld [vmem:[#allocation5 + $0x830] sm:$0xff]  ;;  %v644_v40 = vld [vmem:[#allocation5 + $0x918] sm:$0xff]  ;;  %v646_v42 = vld [vmem:[#allocation5 + $0x928] sm:$0xff]  ;;  %v4471_v43 = vpack.c.bf16 %v623_v35, %v613_v34 }
  0xde   : > { %4710 = vmatprep.subr.bf16.mxu1 %v4709_v52  ;;  %v636_v41 = vld [vmem:[#allocation5 + $0x8d8] sm:$0xff]  ;;  %v4727_v44 = vpack.c.bf16 %v625_v38, %v615_v36  ;;  %v4473_v45 = vpack.c.bf16 %v644_v40, %v634_v39  ;;  %v633_v46 = vld [vmem:[#allocation5 + $0x8c0] sm:$0xff]  ;;  %v643_v47 = vld [vmem:[#allocation5 + $0x910] sm:$0xff] }
  0xdf   : > { %v635_v48 = vld [vmem:[#allocation5 + $0x8d0] sm:$0xff]  ;;  %v4729_v49 = vpack.c.bf16 %v646_v42, %v636_v41  ;;  %v645_v50 = vld [vmem:[#allocation5 + $0x920] sm:$0xff]  ;;  %v654_v51 = vld [vmem:[#allocation5 + $0x968] sm:$0xff]  ;;  %v4475_v55 = vpack.c.bf16 %v643_v47, %v633_v46 }
  0xe0   : > { %4456 = vmatpush1.bf16.msra.mxu0 %v4455_v58  ;;  %v664_v52 = vld [vmem:[#allocation5 + $0x9b8] sm:$0xff]  ;;  %v666_v54 = vld [vmem:[#allocation5 + $0x9c8] sm:$0xff]  ;;  %v4731_v56 = vpack.c.bf16 %v645_v50, %v635_v48  ;;  %v653_v58 = vld [vmem:[#allocation5 + $0x960] sm:$0xff] }
  0xe1   : > { %4712 = vmatpush1.bf16.msra.mxu1 %v4711_v59  ;;  %4458 = vmatprep.subr.bf16.mxu0 %v4457_v60  ;;  %v656_v53 = vld [vmem:[#allocation5 + $0x978] sm:$0xff]  ;;  %v4477_v57 = vpack.c.bf16 %v664_v52, %v654_v51  ;;  %v663_v59 = vld [vmem:[#allocation5 + $0x9b0] sm:$0xff]  ;;  %v665_v62 = vld [vmem:[#allocation5 + $0x9c0] sm:$0xff] }
  0xe2   : > { %4714 = vmatprep.subr.bf16.mxu1 %v4713_v0  ;;  %v655_v60 = vld [vmem:[#allocation5 + $0x970] sm:$0xff]  ;;  %v4733_v61 = vpack.c.bf16 %v666_v54, %v656_v53  ;;  %v674_v63 = vld [vmem:[#allocation5 + $0xa08] sm:$0xff]  ;;  %v684_v0 = vld [vmem:[#allocation5 + $0xa58] sm:$0xff]  ;;  %v4479_v3 = vpack.c.bf16 %v663_v59, %v653_v58 }
  0xe3   : > { %v676_v1 = vld [vmem:[#allocation5 + $0xa18] sm:$0xff]  ;;  %v686_v2 = vld [vmem:[#allocation5 + $0xa68] sm:$0xff]  ;;  %v4735_v4 = vpack.c.bf16 %v665_v62, %v655_v60  ;;  %v4481_v5 = vpack.c.bf16 %v684_v0, %v674_v63  ;;  %v683_v7 = vld [vmem:[#allocation5 + $0xa50] sm:$0xff] }
  0xe4   : > { %4460 = vmatpush1.bf16.msra.mxu0 %v4459_v6  ;;  %v673_v6 = vld [vmem:[#allocation5 + $0xa00] sm:$0xff]  ;;  %v694_v11 = vld [vmem:[#allocation5 + $0xaa8] sm:$0xff]  ;;  %v704_v12 = vld [vmem:[#allocation5 + $0xaf8] sm:$0xff] }
  0xe5   : > { %4716 = vmatpush1.bf16.msra.mxu1 %v4715_v8  ;;  %4462 = vmatprep.subr.bf16.mxu0 %v4461_v9  ;;  %v675_v8 = vld [vmem:[#allocation5 + $0xa10] sm:$0xff]  ;;  %v4737_v9 = vpack.c.bf16 %v686_v2, %v676_v1  ;;  %v685_v10 = vld [vmem:[#allocation5 + $0xa60] sm:$0xff]  ;;  %v706_v14 = vld [vmem:[#allocation5 + $0xb08] sm:$0xff]  ;;  %v4483_v16 = vpack.c.bf16 %v683_v7, %v673_v6  ;;  %v4485_v18 = vpack.c.bf16 %v704_v12, %v694_v11 }
  0xe6   : > { %4718 = vmatprep.subr.bf16.mxu1 %v4717_v13  ;;  %v696_v13 = vld [vmem:[#allocation5 + $0xab8] sm:$0xff]  ;;  %v337_v15 = vld [vmem:[%s6713_s26] sm:$0xff]  ;;  %v4739_v17 = vpack.c.bf16 %v685_v10, %v675_v8  ;;  %v714_v24 = vld [vmem:[#allocation5 + $0xb48] sm:$0xff] }
  0xe7   : > { %v4741_v22 = vpack.c.bf16 %v706_v14, %v696_v13  ;;  %v705_v23 = vld [vmem:[#allocation5 + $0xb00] sm:$0xff]  ;;  %v716_v26 = vld [vmem:[#allocation5 + $0xb58] sm:$0xff]  ;;  %v726_v27 = vld [vmem:[#allocation5 + $0xba8] sm:$0xff] }
  0xe8   : > { %4464 = vmatpush1.bf16.msra.mxu0 %v4463_v19  ;;  %v693_v19 = vld [vmem:[#allocation5 + $0xaa0] sm:$0xff]  ;;  %v4745_v34 = vpack.c.bf16 %v726_v27, %v716_v26  ;;  %v734_v36 = vld [vmem:[#allocation5 + $0xbe8] sm:$0xff]  ;;  %v736_v38 = vld [vmem:[#allocation5 + $0xbf8] sm:$0xff] }
  0xe9   : > { %4720 = vmatpush1.bf16.msra.mxu1 %v4719_v20  ;;  %4466 = vmatprep.subr.bf16.mxu0 %v4465_v21  ;;  %v703_v20 = vld [vmem:[#allocation5 + $0xaf0] sm:$0xff]  ;;  %v725_v35 = vld [vmem:[#allocation5 + $0xba0] sm:$0xff]  ;;  %v746_v39 = vld [vmem:[#allocation5 + $0xc48] sm:$0xff] }
  0xea   : > { %4722 = vmatprep.subr.bf16.mxu1 %v4721_v25  ;;  %v695_v21 = vld [vmem:[#allocation5 + $0xab0] sm:$0xff]  ;;  %v724_v25 = vld [vmem:[#allocation5 + $0xb98] sm:$0xff]  ;;  %v4487_v28 = vpack.c.bf16 %v703_v20, %v693_v19  ;;  %v4749_v46 = vpack.c.bf16 %v746_v39, %v736_v38  ;;  %v745_v47 = vld [vmem:[#allocation5 + $0xc40] sm:$0xff] }
  0xeb   : > { %v4743_v29 = vpack.c.bf16 %v705_v23, %v695_v21  ;;  %v4489_v30 = vpack.c.bf16 %v724_v25, %v714_v24  ;;  %v754_v48 = vld [vmem:[#allocation5 + $0xc88] sm:$0xff]  ;;  %v756_v50 = vld [vmem:[#allocation5 + $0xc98] sm:$0xff]  ;;  %v765_v59 = vld [vmem:[#allocation5 + $0xce0] sm:$0xff] }
  0xec   : > { %4468 = vmatpush1.bf16.msra.mxu0 %v4467_v31  ;;  %v713_v31 = vld [vmem:[#allocation5 + $0xb40] sm:$0xff]  ;;  %v766_v51 = vld [vmem:[#allocation5 + $0xce8] sm:$0xff]  ;;  %v776_v62 = vld [vmem:[#allocation5 + $0xd38] sm:$0xff] }
  0xed   : > { %4724 = vmatpush1.bf16.msra.mxu1 %v4723_v32  ;;  %4470 = vmatprep.subr.bf16.mxu0 %v4469_v33  ;;  %v723_v32 = vld [vmem:[#allocation5 + $0xb90] sm:$0xff]  ;;  %v4753_v58 = vpack.c.bf16 %v766_v51, %v756_v50  ;;  %v774_v60 = vld [vmem:[#allocation5 + $0xd28] sm:$0xff]  ;;  %v785_v7 = vld [vmem:[#allocation5 + $0xd80] sm:$0xff] }
  0xee   : > { %4726 = vmatprep.subr.bf16.mxu1 %v4725_v37  ;;  %v715_v33 = vld [vmem:[#allocation5 + $0xb50] sm:$0xff]  ;;  %v744_v37 = vld [vmem:[#allocation5 + $0xc38] sm:$0xff]  ;;  %v4491_v40 = vpack.c.bf16 %v723_v32, %v713_v31  ;;  %v786_v63 = vld [vmem:[#allocation5 + $0xd88] sm:$0xff] }
  0xef   : > { %v4747_v41 = vpack.c.bf16 %v725_v35, %v715_v33  ;;  %v4493_v42 = vpack.c.bf16 %v744_v37, %v734_v36  ;;  %v4757_v6 = vpack.c.bf16 %v786_v63, %v776_v62  ;;  %v794_v8 = vld [vmem:[#allocation5 + $0xdc8] sm:$0xff]  ;;  %v796_v10 = vld [vmem:[#allocation5 + $0xdd8] sm:$0xff]  ;;  %v793_v14 = vld [vmem:[#allocation5 + $0xdc0] sm:$0xff] }
  0xf0   : > { %4472 = vmatpush1.bf16.msra.mxu0 %v4471_v43  ;;  %v733_v43 = vld [vmem:[#allocation5 + $0xbe0] sm:$0xff]  ;;  %v806_v11 = vld [vmem:[#allocation5 + $0xe28] sm:$0xff]  ;;  %v824_v23 = vld [vmem:[#allocation5 + $0xeb8] sm:$0xff] }
  0xf1   : > { %4728 = vmatpush1.bf16.msra.mxu1 %v4727_v44  ;;  %4474 = vmatprep.subr.bf16.mxu0 %v4473_v45  ;;  %v743_v44 = vld [vmem:[#allocation5 + $0xc30] sm:$0xff]  ;;  %v346_v12 = vld [vmem:[%s6713_s26 + $0x48] sm:$0xff]  ;;  %v805_v19 = vld [vmem:[#allocation5 + $0xe20] sm:$0xff]  ;;  %v4761_v21 = vpack.c.bf16 %v806_v11, %v796_v10 }
  0xf2   : > { %4730 = vmatprep.subr.bf16.mxu1 %v4729_v49  ;;  %v735_v45 = vld [vmem:[#allocation5 + $0xbf0] sm:$0xff]  ;;  %v764_v49 = vld [vmem:[#allocation5 + $0xcd8] sm:$0xff]  ;;  %v4495_v52 = vpack.c.bf16 %v743_v44, %v733_v43  ;;  %v345_v20 = vld [vmem:[%s6713_s26 + $0x40] sm:$0xff] }
  0xf3   : > { %v4751_v53 = vpack.c.bf16 %v745_v47, %v735_v45  ;;  %v4497_v54 = vpack.c.bf16 %v764_v49, %v754_v48  ;;  %v340_v24 = vld [vmem:[%s6713_s26 + $0x18] sm:$0xff]  ;;  %v826_v26 = vld [vmem:[#allocation5 + $0xec8] sm:$0xff]  ;;  %v823_v31 = vld [vmem:[#allocation5 + $0xeb0] sm:$0xff] }
  0xf4   : > { %4476 = vmatpush1.bf16.msra.mxu0 %v4475_v55  ;;  %v753_v55 = vld [vmem:[#allocation5 + $0xc80] sm:$0xff]  ;;  %v816_v25 = vld [vmem:[#allocation5 + $0xe78] sm:$0xff]  ;;  %v815_v32 = vld [vmem:[#allocation5 + $0xe70] sm:$0xff] }
  0xf5   : > { %4732 = vmatpush1.bf16.msra.mxu1 %v4731_v56  ;;  %4478 = vmatprep.subr.bf16.mxu0 %v4477_v57  ;;  %v763_v56 = vld [vmem:[#allocation5 + $0xcd0] sm:$0xff]  ;;  %v4765_v33 = vpack.c.bf16 %v826_v26, %v816_v25  ;;  %v834_v35 = vld [vmem:[#allocation5 + $0xf08] sm:$0xff]  ;;  %v844_v36 = vld [vmem:[#allocation5 + $0xf58] sm:$0xff] }
  0xf6   : > { %4734 = vmatprep.subr.bf16.mxu1 %v4733_v61  ;;  %v755_v57 = vld [vmem:[#allocation5 + $0xc90] sm:$0xff]  ;;  %v784_v61 = vld [vmem:[#allocation5 + $0xd78] sm:$0xff]  ;;  %v4499_v0 = vpack.c.bf16 %v763_v56, %v753_v55  ;;  %v846_v38 = vld [vmem:[#allocation5 + $0xf68] sm:$0xff] }
  0xf7   : > { %v4755_v1 = vpack.c.bf16 %v765_v59, %v755_v57  ;;  %v4501_v2 = vpack.c.bf16 %v784_v61, %v774_v60  ;;  %v836_v37 = vld [vmem:[#allocation5 + $0xf18] sm:$0xff]  ;;  %v843_v43 = vld [vmem:[#allocation5 + $0xf50] sm:$0xff]  ;;  %v854_v47 = vld [vmem:[#allocation5 + $0xfa8] sm:$0xff] }
  0xf8   : > { %4480 = vmatpush1.bf16.msra.mxu0 %v4479_v3  ;;  %v773_v3 = vld [vmem:[#allocation5 + $0xd20] sm:$0xff]  ;;  %v835_v44 = vld [vmem:[#allocation5 + $0xf10] sm:$0xff]  ;;  %v4769_v45 = vpack.c.bf16 %v846_v38, %v836_v37  ;;  %v864_v48 = vld [vmem:[#allocation5 + $0xff8] sm:$0xff] }
  0xf9   : > { %4736 = vmatpush1.bf16.msra.mxu1 %v4735_v4  ;;  %4482 = vmatprep.subr.bf16.mxu0 %v4481_v5  ;;  %v783_v4 = vld [vmem:[#allocation5 + $0xd70] sm:$0xff]  ;;  %v856_v49 = vld [vmem:[#allocation5 + $0xfb8] sm:$0xff]  ;;  %v866_v50 = vld [vmem:[#allocation5 + $0x1008] sm:$0xff] }
  0xfa   : > { %4738 = vmatprep.subr.bf16.mxu1 %v4737_v9  ;;  %v775_v5 = vld [vmem:[#allocation5 + $0xd30] sm:$0xff]  ;;  %v804_v9 = vld [vmem:[#allocation5 + $0xe18] sm:$0xff]  ;;  %v4503_v13 = vpack.c.bf16 %v783_v4, %v773_v3  ;;  %v4773_v57 = vpack.c.bf16 %v866_v50, %v856_v49  ;;  %v874_v59 = vld [vmem:[#allocation5 + $0x1048] sm:$0xff] }
  0xfb   : > { %1698 = vmatmul.mubr.f32.vlgmr.msra.gmra.mrb[0].mxu0 %v337_v15  ;;  %v863_v55 = vld [vmem:[#allocation5 + $0xff0] sm:$0xff]  ;;  %v884_v60 = vld [vmem:[#allocation5 + $0x1098] sm:$0xff]  ;;  %v886_v62 = vld [vmem:[#allocation5 + $0x10a8] sm:$0xff] }
  0xfc   : > { %4484 = vmatpush1.bf16.msra.mxu0 %v4483_v16  ;;  %2006 = vmatmul.mubr.f32.vlgmr.msra.gmra.mrb[0].mxu1 %v337_v15  ;;  %v803_v15 = vld [vmem:[#allocation5 + $0xe10] sm:$0xff]  ;;  %v4759_v16 = vpack.c.bf16 %v785_v7, %v775_v5  ;;  %v876_v61 = vld [vmem:[#allocation5 + $0x1058] sm:$0xff]  ;;  %v894_v7 = vld [vmem:[#allocation5 + $0x10e8] sm:$0xff] }
  0xfd   : > { %4740 = vmatpush1.bf16.msra.mxu1 %v4739_v17  ;;  %4486 = vmatprep.subr.bf16.mxu0 %v4485_v18  ;;  %v4505_v17 = vpack.c.bf16 %v804_v9, %v794_v8  ;;  %v795_v18 = vld [vmem:[#allocation5 + $0xdd0] sm:$0xff]  ;;  %v4507_v27 = vpack.c.bf16 %v803_v15, %v793_v14  ;;  %v4777_v5 = vpack.c.bf16 %v886_v62, %v876_v61  ;;  %v904_v8 = vld [vmem:[#allocation5 + $0x1138] sm:$0xff]  ;;  %v906_v10 = vld [vmem:[#allocation5 + $0x1148] sm:$0xff] }
  0xfe   : > { %4742 = vmatprep.subr.bf16.mxu1 %v4741_v22  ;;  %1703 = vmatprep.mubr.f32.mxu0 %v346_v12  ;;  %v814_v22 = vld [vmem:[#allocation5 + $0xe68] sm:$0xff]  ;;  %v855_v56 = vld [vmem:[#allocation5 + $0xfb0] sm:$0xff]  ;;  %v896_v9 = vld [vmem:[#allocation5 + $0x10f8] sm:$0xff] }
  0xff   : > { %2011 = vmatprep.mubr.f32.mxu1 %v346_v12  ;;  %1704 = vmatmul.mubr.f32.gmra.mrb[2].mxu0 %v345_v20  ;;  %v883_v3 = vld [vmem:[#allocation5 + $0x1090] sm:$0xff]  ;;  %v893_v14 = vld [vmem:[#allocation5 + $0x10e0] sm:$0xff] }
 0x100   : > { %4488 = vmatpush1.bf16.msra.mxu0 %v4487_v28  ;;  %2012 = vmatmul.mubr.f32.gmra.mrb[2].mxu1 %v345_v20  ;;  %v4763_v28 = vpack.c.bf16 %v805_v19, %v795_v18  ;;  %v875_v4 = vld [vmem:[#allocation5 + $0x1050] sm:$0xff]  ;;  %v905_v18 = vld [vmem:[#allocation5 + $0x1140] sm:$0xff]  ;;  %v914_v19 = vld [vmem:[#allocation5 + $0x1188] sm:$0xff] }
 0x101   : > { %4744 = vmatpush1.bf16.msra.mxu1 %v4743_v29  ;;  %4490 = vmatprep.subr.bf16.mxu0 %v4489_v30  ;;  %v4509_v29 = vpack.c.bf16 %v824_v23, %v814_v22  ;;  %v813_v30 = vld [vmem:[#allocation5 + $0xe60] sm:$0xff]  ;;  %v903_v15 = vld [vmem:[#allocation5 + $0x1130] sm:$0xff]  ;;  %v924_v20 = vld [vmem:[#allocation5 + $0x11d8] sm:$0xff] }
 0x102   : > { %4746 = vmatprep.subr.bf16.mxu1 %v4745_v34  ;;  %1774 = vmatprep.mubr.f32.mxu0 %v340_v24  ;;  %v825_v34 = vld [vmem:[#allocation5 + $0xec0] sm:$0xff]  ;;  %v4511_v39 = vpack.c.bf16 %v823_v31, %v813_v30  ;;  %v926_v22 = vld [vmem:[#allocation5 + $0x11e8] sm:$0xff]  ;;  %v4527_v23 = vpack.c.bf16 %v903_v15, %v893_v14  ;;  %v4529_v25 = vpack.c.bf16 %v924_v20, %v914_v19  ;;  %v339_v19 = vld [vmem:[%s6713_s26 + $0x10] sm:$0xff] }
 0x103   : > { %2082 = vmatprep.mubr.f32.mxu1 %v340_v24  ;;  %v913_v26 = vld [vmem:[#allocation5 + $0x1180] sm:$0xff]  ;;  %v934_v31 = vld [vmem:[#allocation5 + $0x1228] sm:$0xff] }
 0x104   : > { %4492 = vmatpush1.bf16.msra.mxu0 %v4491_v40  ;;  %v4767_v40 = vpack.c.bf16 %v825_v34, %v815_v32  ;;  %v925_v30 = vld [vmem:[#allocation5 + $0x11e0] sm:$0xff]  ;;  %v944_v32 = vld [vmem:[#allocation5 + $0x1278] sm:$0xff]  ;;  %v946_v34 = vld [vmem:[#allocation5 + $0x1288] sm:$0xff] }
 0x105   : > { %4748 = vmatpush1.bf16.msra.mxu1 %v4747_v41  ;;  %4494 = vmatprep.subr.bf16.mxu0 %v4493_v42  ;;  %v4513_v41 = vpack.c.bf16 %v844_v36, %v834_v35  ;;  %v833_v42 = vld [vmem:[#allocation5 + $0xf00] sm:$0xff]  ;;  %v4533_v37 = vpack.c.bf16 %v944_v32, %v934_v31  ;;  %v1014_v15 = vld [vmem:[#allocation5 + $0x14a8] sm:$0xff]  ;;  %v348_v32 = vld [vmem:[%s6713_s26 + $0x58] sm:$0xff] }
 0x106   : > { %4750 = vmatprep.subr.bf16.mxu1 %v4749_v46  ;;  %v845_v46 = vld [vmem:[#allocation5 + $0xf60] sm:$0xff]  ;;  %v4515_v51 = vpack.c.bf16 %v843_v43, %v833_v42  ;;  %v954_v43 = vld [vmem:[#allocation5 + $0x12c8] sm:$0xff] }
 0x107   : > { %v933_v38 = vld [vmem:[#allocation5 + $0x1220] sm:$0xff]  ;;  %v1046_v31 = vld [vmem:[#allocation5 + $0x15a8] sm:$0xff] }
 0x108   : > { %4496 = vmatpush1.bf16.msra.mxu0 %v4495_v52  ;;  %v4771_v52 = vpack.c.bf16 %v845_v46, %v835_v44  ;;  %v945_v42 = vld [vmem:[#allocation5 + $0x1280] sm:$0xff]  ;;  %v964_v44 = vld [vmem:[#allocation5 + $0x1318] sm:$0xff]  ;;  %v966_v46 = vld [vmem:[#allocation5 + $0x1328] sm:$0xff] }
 0x109   : > { %4752 = vmatpush1.bf16.msra.mxu1 %v4751_v53  ;;  %4498 = vmatprep.subr.bf16.mxu0 %v4497_v54  ;;  %v4517_v53 = vpack.c.bf16 %v864_v48, %v854_v47  ;;  %v853_v54 = vld [vmem:[#allocation5 + $0xfa0] sm:$0xff]  ;;  %v4537_v49 = vpack.c.bf16 %v964_v44, %v954_v43  ;;  %v1064_v43 = vld [vmem:[#allocation5 + $0x1638] sm:$0xff] }
 0x10a   : > { %4754 = vmatprep.subr.bf16.mxu1 %v4753_v58  ;;  %v865_v58 = vld [vmem:[#allocation5 + $0x1000] sm:$0xff]  ;;  %v4519_v63 = vpack.c.bf16 %v863_v55, %v853_v54  ;;  %v974_v55 = vld [vmem:[#allocation5 + $0x1368] sm:$0xff]  ;;  %v1056_v44 = vld [vmem:[#allocation5 + $0x15f8] sm:$0xff] }
 0x10b   : > { %v953_v50 = vld [vmem:[#allocation5 + $0x12c0] sm:$0xff] }
 0x10c   : > { %4500 = vmatpush1.bf16.msra.mxu0 %v4499_v0  ;;  %v4775_v0 = vpack.c.bf16 %v865_v58, %v855_v56  ;;  %v965_v54 = vld [vmem:[#allocation5 + $0x1320] sm:$0xff]  ;;  %v984_v56 = vld [vmem:[#allocation5 + $0x13b8] sm:$0xff]  ;;  %v986_v58 = vld [vmem:[#allocation5 + $0x13c8] sm:$0xff] }
 0x10d   : > { %4756 = vmatpush1.bf16.msra.mxu1 %v4755_v1  ;;  %4502 = vmatprep.subr.bf16.mxu0 %v4501_v2  ;;  %v4521_v1 = vpack.c.bf16 %v884_v60, %v874_v59  ;;  %v873_v2 = vld [vmem:[#allocation5 + $0x1040] sm:$0xff]  ;;  %v4541_v61 = vpack.c.bf16 %v984_v56, %v974_v55  ;;  %v1074_v55 = vld [vmem:[#allocation5 + $0x1688] sm:$0xff]  ;;  %v1084_v56 = vld [vmem:[#allocation5 + $0x16d8] sm:$0xff] }
 0x10e   : > { %4758 = vmatprep.subr.bf16.mxu1 %v4757_v6  ;;  %v885_v6 = vld [vmem:[#allocation5 + $0x10a0] sm:$0xff]  ;;  %v4523_v11 = vpack.c.bf16 %v883_v3, %v873_v2  ;;  %v994_v3 = vld [vmem:[#allocation5 + $0x1408] sm:$0xff] }
 0x10f   : > { %v4779_v12 = vpack.c.bf16 %v885_v6, %v875_v4  ;;  %v973_v62 = vld [vmem:[#allocation5 + $0x1360] sm:$0xff]  ;;  %v1004_v4 = vld [vmem:[#allocation5 + $0x1458] sm:$0xff]  ;;  %v1006_v6 = vld [vmem:[#allocation5 + $0x1468] sm:$0xff] }
 0x110   : > { %4504 = vmatpush1.bf16.msra.mxu0 %v4503_v13  ;;  %v4525_v13 = vpack.c.bf16 %v904_v8, %v894_v7  ;;  %v985_v2 = vld [vmem:[#allocation5 + $0x13c0] sm:$0xff] }
 0x111   : > { %4760 = vmatpush1.bf16.msra.mxu1 %v4759_v16  ;;  %4506 = vmatprep.subr.bf16.mxu0 %v4505_v17  ;;  %v895_v16 = vld [vmem:[#allocation5 + $0x10f0] sm:$0xff]  ;;  %v4781_v17 = vpack.c.bf16 %v906_v10, %v896_v9  ;;  %v4545_v9 = vpack.c.bf16 %v1004_v4, %v994_v3  ;;  %v993_v10 = vld [vmem:[#allocation5 + $0x1400] sm:$0xff]  ;;  %v1094_v3 = vld [vmem:[#allocation5 + $0x1728] sm:$0xff] }
 0x112   : > { %4762 = vmatprep.subr.bf16.mxu1 %v4761_v21  ;;  %v916_v21 = vld [vmem:[#allocation5 + $0x1198] sm:$0xff]  ;;  %v4783_v24 = vpack.c.bf16 %v905_v18, %v895_v16  ;;  %v1005_v14 = vld [vmem:[#allocation5 + $0x1460] sm:$0xff]  ;;  %v1026_v18 = vld [vmem:[#allocation5 + $0x1508] sm:$0xff] }
 0x113   : > { %v1024_v16 = vld [vmem:[#allocation5 + $0x14f8] sm:$0xff] }
 0x114   : > { %4508 = vmatpush1.bf16.msra.mxu0 %v4507_v27  ;;  %v923_v27 = vld [vmem:[#allocation5 + $0x11d0] sm:$0xff]  ;;  %v1104_v4 = vld [vmem:[#allocation5 + $0x1778] sm:$0xff] }
 0x115   : > { %4764 = vmatpush1.bf16.msra.mxu1 %v4763_v28  ;;  %4510 = vmatprep.subr.bf16.mxu0 %v4509_v29  ;;  %v915_v28 = vld [vmem:[#allocation5 + $0x1190] sm:$0xff]  ;;  %v4785_v29 = vpack.c.bf16 %v926_v22, %v916_v21  ;;  %v4531_v35 = vpack.c.bf16 %v923_v27, %v913_v26  ;;  %v4549_v22 = vpack.c.bf16 %v1024_v16, %v1014_v15  ;;  %v1025_v27 = vld [vmem:[#allocation5 + $0x1500] sm:$0xff]  ;;  %v1114_v15 = vld [vmem:[#allocation5 + $0x17c8] sm:$0xff] }
 0x116   : > { %4766 = vmatprep.subr.bf16.mxu1 %v4765_v33  ;;  %v936_v33 = vld [vmem:[#allocation5 + $0x1238] sm:$0xff]  ;;  %v4787_v36 = vpack.c.bf16 %v925_v30, %v915_v28  ;;  %v1034_v28 = vld [vmem:[#allocation5 + $0x1548] sm:$0xff] }
 0x117   : > { %v1036_v30 = vld [vmem:[#allocation5 + $0x1558] sm:$0xff] }
 0x118   : > { %4512 = vmatpush1.bf16.msra.mxu0 %v4511_v39  ;;  %v943_v39 = vld [vmem:[#allocation5 + $0x1270] sm:$0xff]  ;;  %v1124_v16 = vld [vmem:[#allocation5 + $0x1818] sm:$0xff] }
 0x119   : > { %4768 = vmatpush1.bf16.msra.mxu1 %v4767_v40  ;;  %4514 = vmatprep.subr.bf16.mxu0 %v4513_v41  ;;  %v935_v40 = vld [vmem:[#allocation5 + $0x1230] sm:$0xff]  ;;  %v4789_v41 = vpack.c.bf16 %v946_v34, %v936_v33  ;;  %v4535_v47 = vpack.c.bf16 %v943_v39, %v933_v38 }
 0x11a   : > { %4770 = vmatprep.subr.bf16.mxu1 %v4769_v45  ;;  %v956_v45 = vld [vmem:[#allocation5 + $0x12d8] sm:$0xff]  ;;  %v4791_v48 = vpack.c.bf16 %v945_v42, %v935_v40  ;;  %v347_v34 = vld [vmem:[%s6713_s26 + $0x50] sm:$0xff]  ;;  %v4809_v40 = vpack.c.bf16 %v1046_v31, %v1036_v30  ;;  %v1054_v42 = vld [vmem:[#allocation5 + $0x15e8] sm:$0xff] }
 0x11b   : > { %v1043_v38 = vld [vmem:[#allocation5 + $0x1590] sm:$0xff]  ;;  %v1146_v30 = vld [vmem:[#allocation5 + $0x18c8] sm:$0xff] }
 0x11c   : > { %4516 = vmatpush1.bf16.msra.mxu0 %v4515_v51  ;;  %v963_v51 = vld [vmem:[#allocation5 + $0x1310] sm:$0xff] }
 0x11d   : > { %4772 = vmatpush1.bf16.msra.mxu1 %v4771_v52  ;;  %4518 = vmatprep.subr.bf16.mxu0 %v4517_v53  ;;  %v955_v52 = vld [vmem:[#allocation5 + $0x12d0] sm:$0xff]  ;;  %v4793_v53 = vpack.c.bf16 %v966_v46, %v956_v45  ;;  %v4539_v59 = vpack.c.bf16 %v963_v51, %v953_v50  ;;  %v1066_v45 = vld [vmem:[#allocation5 + $0x1648] sm:$0xff]  ;;  %v1053_v50 = vld [vmem:[#allocation5 + $0x15e0] sm:$0xff] }
 0x11e   : > { %4774 = vmatprep.subr.bf16.mxu1 %v4773_v57  ;;  %v976_v57 = vld [vmem:[#allocation5 + $0x1378] sm:$0xff]  ;;  %v4795_v60 = vpack.c.bf16 %v965_v54, %v955_v52  ;;  %v1035_v39 = vld [vmem:[#allocation5 + $0x1550] sm:$0xff]  ;;  %v342_v46 = vld [vmem:[%s6713_s26 + $0x28] sm:$0xff] }
 0x11f   : > { %v1063_v51 = vld [vmem:[#allocation5 + $0x1630] sm:$0xff]  ;;  %v1065_v54 = vld [vmem:[#allocation5 + $0x1640] sm:$0xff] }
 0x120   : > { %4520 = vmatpush1.bf16.msra.mxu0 %v4519_v63  ;;  %v983_v63 = vld [vmem:[#allocation5 + $0x13b0] sm:$0xff] }
 0x121   : > { %4776 = vmatpush1.bf16.msra.mxu1 %v4775_v0  ;;  %4522 = vmatprep.subr.bf16.mxu0 %v4521_v1  ;;  %v975_v0 = vld [vmem:[#allocation5 + $0x1370] sm:$0xff]  ;;  %v4797_v1 = vpack.c.bf16 %v986_v58, %v976_v57  ;;  %v4543_v7 = vpack.c.bf16 %v983_v63, %v973_v62  ;;  %v1076_v57 = vld [vmem:[#allocation5 + $0x1698] sm:$0xff]  ;;  %v1086_v58 = vld [vmem:[#allocation5 + $0x16e8] sm:$0xff] }
 0x122   : > { %4778 = vmatprep.subr.bf16.mxu1 %v4777_v5  ;;  %v996_v5 = vld [vmem:[#allocation5 + $0x1418] sm:$0xff]  ;;  %v4799_v8 = vpack.c.bf16 %v985_v2, %v975_v0  ;;  %v1055_v52 = vld [vmem:[#allocation5 + $0x15f0] sm:$0xff]  ;;  %v1073_v62 = vld [vmem:[#allocation5 + $0x1680] sm:$0xff] }
 0x123   : > { %v1083_v63 = vld [vmem:[#allocation5 + $0x16d0] sm:$0xff]  ;;  %v1085_v2 = vld [vmem:[#allocation5 + $0x16e0] sm:$0xff] }
 0x124   : > { %4524 = vmatpush1.bf16.msra.mxu0 %v4523_v11  ;;  %v1003_v11 = vld [vmem:[#allocation5 + $0x1450] sm:$0xff] }
 0x125   : > { %4780 = vmatpush1.bf16.msra.mxu1 %v4779_v12  ;;  %4526 = vmatprep.subr.bf16.mxu0 %v4525_v13  ;;  %v995_v12 = vld [vmem:[#allocation5 + $0x1410] sm:$0xff]  ;;  %v4801_v13 = vpack.c.bf16 %v1006_v6, %v996_v5  ;;  %v4547_v20 = vpack.c.bf16 %v1003_v11, %v993_v10  ;;  %v1096_v5 = vld [vmem:[#allocation5 + $0x1738] sm:$0xff]  ;;  %v1106_v6 = vld [vmem:[#allocation5 + $0x1788] sm:$0xff] }
 0x126   : > { %4782 = vmatprep.subr.bf16.mxu1 %v4781_v17  ;;  %v1016_v17 = vld [vmem:[#allocation5 + $0x14b8] sm:$0xff]  ;;  %v4803_v21 = vpack.c.bf16 %v1005_v14, %v995_v12  ;;  %v1075_v0 = vld [vmem:[#allocation5 + $0x1690] sm:$0xff]  ;;  %v1093_v10 = vld [vmem:[#allocation5 + $0x1720] sm:$0xff] }
 0x127   : > { %v4805_v26 = vpack.c.bf16 %v1026_v18, %v1016_v17  ;;  %v1103_v11 = vld [vmem:[#allocation5 + $0x1770] sm:$0xff]  ;;  %v1105_v14 = vld [vmem:[#allocation5 + $0x1780] sm:$0xff]  ;;  %v1116_v17 = vld [vmem:[#allocation5 + $0x17d8] sm:$0xff] }
 0x128   : > { %4528 = vmatpush1.bf16.msra.mxu0 %v4527_v23  ;;  %v1013_v23 = vld [vmem:[#allocation5 + $0x14a0] sm:$0xff]  ;;  %v1095_v12 = vld [vmem:[#allocation5 + $0x1730] sm:$0xff]  ;;  %v1126_v18 = vld [vmem:[#allocation5 + $0x1828] sm:$0xff] }
 0x129   : > { %4784 = vmatpush1.bf16.msra.mxu1 %v4783_v24  ;;  %4530 = vmatprep.subr.bf16.mxu0 %v4529_v25  ;;  %v1023_v24 = vld [vmem:[#allocation5 + $0x14f0] sm:$0xff] }
 0x12a   : > { %4786 = vmatprep.subr.bf16.mxu1 %v4785_v29  ;;  %v1015_v25 = vld [vmem:[#allocation5 + $0x14b0] sm:$0xff]  ;;  %v1044_v29 = vld [vmem:[#allocation5 + $0x1598] sm:$0xff]  ;;  %v4551_v33 = vpack.c.bf16 %v1023_v24, %v1013_v23 }
 0x12b   : > { %v1123_v23 = vld [vmem:[#allocation5 + $0x1810] sm:$0xff] }
 0x12c   : > { %4532 = vmatpush1.bf16.msra.mxu0 %v4531_v35  ;;  %v4807_v35 = vpack.c.bf16 %v1025_v27, %v1015_v25  ;;  %v1115_v24 = vld [vmem:[#allocation5 + $0x17d0] sm:$0xff]  ;;  %v4825_v25 = vpack.c.bf16 %v1126_v18, %v1116_v17  ;;  %v1134_v27 = vld [vmem:[#allocation5 + $0x1868] sm:$0xff]  ;;  %v1213_v18 = vld [vmem:[#allocation5 + $0x1ae0] sm:$0xff] }
 0x12d   : > { %4788 = vmatpush1.bf16.msra.mxu1 %v4787_v36  ;;  %4534 = vmatprep.subr.bf16.mxu0 %v4533_v37  ;;  %v4553_v36 = vpack.c.bf16 %v1044_v29, %v1034_v28  ;;  %v1033_v37 = vld [vmem:[#allocation5 + $0x1540] sm:$0xff]  ;;  %v1144_v28 = vld [vmem:[#allocation5 + $0x18b8] sm:$0xff] }
 0x12e   : > { %4790 = vmatprep.subr.bf16.mxu1 %v4789_v41  ;;  %v1045_v41 = vld [vmem:[#allocation5 + $0x15a0] sm:$0xff]  ;;  %v1136_v29 = vld [vmem:[#allocation5 + $0x1878] sm:$0xff] }
 0x130   : > { %4536 = vmatpush1.bf16.msra.mxu0 %v4535_v47  ;;  %v4555_v47 = vpack.c.bf16 %v1043_v38, %v1033_v37  ;;  %v4829_v37 = vpack.c.bf16 %v1146_v30, %v1136_v29  ;;  %v1145_v38 = vld [vmem:[#allocation5 + $0x18c0] sm:$0xff] }
 0x131   : > { %4792 = vmatpush1.bf16.msra.mxu1 %v4791_v48  ;;  %4538 = vmatprep.subr.bf16.mxu0 %v4537_v49  ;;  %v4811_v48 = vpack.c.bf16 %v1045_v41, %v1035_v39  ;;  %v4557_v49 = vpack.c.bf16 %v1064_v43, %v1054_v42  ;;  %v1154_v39 = vld [vmem:[#allocation5 + $0x1908] sm:$0xff]  ;;  %v1156_v41 = vld [vmem:[#allocation5 + $0x1918] sm:$0xff]  ;;  %v1233_v30 = vld [vmem:[#allocation5 + $0x1b80] sm:$0xff] }
 0x132   : > { %4794 = vmatprep.subr.bf16.mxu1 %v4793_v53  ;;  %v4813_v53 = vpack.c.bf16 %v1066_v45, %v1056_v44  ;;  %v1166_v42 = vld [vmem:[#allocation5 + $0x1968] sm:$0xff] }
 0x134   : > { %4540 = vmatpush1.bf16.msra.mxu0 %v4539_v59  ;;  %v4559_v59 = vpack.c.bf16 %v1063_v51, %v1053_v50  ;;  %v1165_v50 = vld [vmem:[#allocation5 + $0x1960] sm:$0xff]  ;;  %v1174_v51 = vld [vmem:[#allocation5 + $0x19a8] sm:$0xff] }
 0x135   : > { %4796 = vmatpush1.bf16.msra.mxu1 %v4795_v60  ;;  %4542 = vmatprep.subr.bf16.mxu0 %v4541_v61  ;;  %v4815_v60 = vpack.c.bf16 %v1065_v54, %v1055_v52  ;;  %v4561_v61 = vpack.c.bf16 %v1084_v56, %v1074_v55  ;;  %v1184_v52 = vld [vmem:[#allocation5 + $0x19f8] sm:$0xff]  ;;  %v1186_v54 = vld [vmem:[#allocation5 + $0x1a08] sm:$0xff] }
 0x136   : > { %4798 = vmatprep.subr.bf16.mxu1 %v4797_v1  ;;  %v4817_v1 = vpack.c.bf16 %v1086_v58, %v1076_v57  ;;  %v4581_v57 = vpack.c.bf16 %v1184_v52, %v1174_v51  ;;  %v1173_v58 = vld [vmem:[#allocation5 + $0x19a0] sm:$0xff] }
 0x138   : > { %4544 = vmatpush1.bf16.msra.mxu0 %v4543_v7  ;;  %v4563_v7 = vpack.c.bf16 %v1083_v63, %v1073_v62  ;;  %v1185_v62 = vld [vmem:[#allocation5 + $0x1a00] sm:$0xff]  ;;  %v1194_v63 = vld [vmem:[#allocation5 + $0x1a48] sm:$0xff] }
 0x139   : > { %4800 = vmatpush1.bf16.msra.mxu1 %v4799_v8  ;;  %4546 = vmatprep.subr.bf16.mxu0 %v4545_v9  ;;  %v4819_v8 = vpack.c.bf16 %v1085_v2, %v1075_v0  ;;  %v4565_v9 = vpack.c.bf16 %v1104_v4, %v1094_v3  ;;  %v1204_v0 = vld [vmem:[#allocation5 + $0x1a98] sm:$0xff]  ;;  %v1206_v2 = vld [vmem:[#allocation5 + $0x1aa8] sm:$0xff] }
 0x13a   : > { %4802 = vmatprep.subr.bf16.mxu1 %v4801_v13  ;;  %v4821_v13 = vpack.c.bf16 %v1106_v6, %v1096_v5  ;;  %v4585_v5 = vpack.c.bf16 %v1204_v0, %v1194_v63  ;;  %v1193_v6 = vld [vmem:[#allocation5 + $0x1a40] sm:$0xff] }
 0x13b   : > { %1775 = vmatmul.mubr.f32.vlgmr.msra.gmra.mrb[0].mxu0 %v339_v19 }
 0x13c   : > { %4548 = vmatpush1.bf16.msra.mxu0 %v4547_v20  ;;  %2083 = vmatmul.mubr.f32.vlgmr.msra.gmra.mrb[0].mxu1 %v339_v19  ;;  %v4567_v19 = vpack.c.bf16 %v1103_v11, %v1093_v10  ;;  %v4823_v20 = vpack.c.bf16 %v1105_v14, %v1095_v12  ;;  %v1205_v10 = vld [vmem:[#allocation5 + $0x1aa0] sm:$0xff]  ;;  %v1214_v11 = vld [vmem:[#allocation5 + $0x1ae8] sm:$0xff]  ;;  %v1224_v12 = vld [vmem:[#allocation5 + $0x1b38] sm:$0xff] }
 0x13d   : > { %4804 = vmatpush1.bf16.msra.mxu1 %v4803_v21  ;;  %4550 = vmatprep.subr.bf16.mxu0 %v4549_v22  ;;  %v4569_v21 = vpack.c.bf16 %v1124_v16, %v1114_v15  ;;  %v1113_v22 = vld [vmem:[#allocation5 + $0x17c0] sm:$0xff]  ;;  %v1226_v14 = vld [vmem:[#allocation5 + $0x1b48] sm:$0xff]  ;;  %v4589_v17 = vpack.c.bf16 %v1224_v12, %v1214_v11 }
 0x13e   : > { %4806 = vmatprep.subr.bf16.mxu1 %v4805_v26  ;;  %1780 = vmatprep.mubr.f32.mxu0 %v348_v32  ;;  %v1125_v26 = vld [vmem:[#allocation5 + $0x1820] sm:$0xff]  ;;  %v4571_v31 = vpack.c.bf16 %v1123_v23, %v1113_v22  ;;  %v1234_v23 = vld [vmem:[#allocation5 + $0x1b88] sm:$0xff] }
 0x13f   : > { %2088 = vmatprep.mubr.f32.mxu1 %v348_v32  ;;  %1781 = vmatmul.mubr.f32.gmra.mrb[2].mxu0 %v347_v34  ;;  %v4827_v32 = vpack.c.bf16 %v1125_v26, %v1115_v24  ;;  %v1225_v22 = vld [vmem:[#allocation5 + $0x1b40] sm:$0xff]  ;;  %v1244_v24 = vld [vmem:[#allocation5 + $0x1bd8] sm:$0xff]  ;;  %v1246_v26 = vld [vmem:[#allocation5 + $0x1be8] sm:$0xff] }
 0x140   : > { %4552 = vmatpush1.bf16.msra.mxu0 %v4551_v33  ;;  %2089 = vmatmul.mubr.f32.gmra.mrb[2].mxu1 %v347_v34  ;;  %v4573_v33 = vpack.c.bf16 %v1144_v28, %v1134_v27  ;;  %v1133_v34 = vld [vmem:[#allocation5 + $0x1860] sm:$0xff]  ;;  %v4593_v29 = vpack.c.bf16 %v1244_v24, %v1234_v23 }
 0x141   : > { %4808 = vmatpush1.bf16.msra.mxu1 %v4807_v35  ;;  %4554 = vmatprep.subr.bf16.mxu0 %v4553_v36  ;;  %v1143_v35 = vld [vmem:[#allocation5 + $0x18b0] sm:$0xff]  ;;  %v341_v23 = vld [vmem:[%s6713_s26 + $0x20] sm:$0xff] }
 0x142   : > { %4810 = vmatprep.subr.bf16.mxu1 %v4809_v40  ;;  %1851 = vmatprep.mubr.f32.mxu0 %v342_v46  ;;  %v1135_v36 = vld [vmem:[#allocation5 + $0x1870] sm:$0xff]  ;;  %v1164_v40 = vld [vmem:[#allocation5 + $0x1958] sm:$0xff]  ;;  %v4575_v43 = vpack.c.bf16 %v1143_v35, %v1133_v34  ;;  %v1245_v34 = vld [vmem:[#allocation5 + $0x1be0] sm:$0xff] }
 0x143   : > { %2159 = vmatprep.mubr.f32.mxu1 %v342_v46  ;;  %v4831_v44 = vpack.c.bf16 %v1145_v38, %v1135_v36  ;;  %v4577_v45 = vpack.c.bf16 %v1164_v40, %v1154_v39  ;;  %v1153_v46 = vld [vmem:[#allocation5 + $0x1900] sm:$0xff]  ;;  %v1254_v35 = vld [vmem:[#allocation5 + $0x1c28] sm:$0xff]  ;;  %v1264_v36 = vld [vmem:[#allocation5 + $0x1c78] sm:$0xff] }
 0x144   : > { %4556 = vmatpush1.bf16.msra.mxu0 %v4555_v47  ;;  %v1163_v47 = vld [vmem:[#allocation5 + $0x1950] sm:$0xff]  ;;  %v1266_v38 = vld [vmem:[#allocation5 + $0x1c88] sm:$0xff] }
 0x145   : > { %4812 = vmatpush1.bf16.msra.mxu1 %v4811_v48  ;;  %4558 = vmatprep.subr.bf16.mxu0 %v4557_v49  ;;  %v1155_v48 = vld [vmem:[#allocation5 + $0x1910] sm:$0xff]  ;;  %v4833_v49 = vpack.c.bf16 %v1166_v42, %v1156_v41  ;;  %v4579_v55 = vpack.c.bf16 %v1163_v47, %v1153_v46  ;;  %v4597_v41 = vpack.c.bf16 %v1264_v36, %v1254_v35  ;;  %v1253_v42 = vld [vmem:[#allocation5 + $0x1c20] sm:$0xff]  ;;  %v1274_v47 = vld [vmem:[#allocation5 + $0x1cc8] sm:$0xff] }
 0x146   : > { %4814 = vmatprep.subr.bf16.mxu1 %v4813_v53  ;;  %v1176_v53 = vld [vmem:[#allocation5 + $0x19b8] sm:$0xff]  ;;  %v4835_v56 = vpack.c.bf16 %v1165_v50, %v1155_v48  ;;  %v1265_v46 = vld [vmem:[#allocation5 + $0x1c80] sm:$0xff]  ;;  %v1286_v50 = vld [vmem:[#allocation5 + $0x1d28] sm:$0xff] }
 0x147   : > { %v1284_v48 = vld [vmem:[#allocation5 + $0x1d18] sm:$0xff]  ;;  %v1366_v35 = vld [vmem:[#allocation5 + $0x1fa8] sm:$0xff] }
 0x148   : > { %4560 = vmatpush1.bf16.msra.mxu0 %v4559_v59  ;;  %v1183_v59 = vld [vmem:[#allocation5 + $0x19f0] sm:$0xff]  ;;  %v350_v36 = vld [vmem:[%s6713_s26 + $0x68] sm:$0xff] }
 0x149   : > { %4816 = vmatpush1.bf16.msra.mxu1 %v4815_v60  ;;  %4562 = vmatprep.subr.bf16.mxu0 %v4561_v61  ;;  %v1175_v60 = vld [vmem:[#allocation5 + $0x19b0] sm:$0xff]  ;;  %v4837_v61 = vpack.c.bf16 %v1186_v54, %v1176_v53  ;;  %v4583_v3 = vpack.c.bf16 %v1183_v59, %v1173_v58  ;;  %v4601_v53 = vpack.c.bf16 %v1284_v48, %v1274_v47  ;;  %v1273_v54 = vld [vmem:[#allocation5 + $0x1cc0] sm:$0xff]  ;;  %v1294_v59 = vld [vmem:[#allocation5 + $0x1d68] sm:$0xff] }
 0x14a   : > { %4818 = vmatprep.subr.bf16.mxu1 %v4817_v1  ;;  %v1196_v1 = vld [vmem:[#allocation5 + $0x1a58] sm:$0xff]  ;;  %v4839_v4 = vpack.c.bf16 %v1185_v62, %v1175_v60  ;;  %v1285_v58 = vld [vmem:[#allocation5 + $0x1d20] sm:$0xff]  ;;  %v1306_v62 = vld [vmem:[#allocation5 + $0x1dc8] sm:$0xff] }
 0x14b   : > { %v1304_v60 = vld [vmem:[#allocation5 + $0x1db8] sm:$0xff] }
 0x14c   : > { %4564 = vmatpush1.bf16.msra.mxu0 %v4563_v7  ;;  %v1203_v7 = vld [vmem:[#allocation5 + $0x1a90] sm:$0xff]  ;;  %v1384_v47 = vld [vmem:[#allocation5 + $0x2038] sm:$0xff] }
 0x14d   : > { %4820 = vmatpush1.bf16.msra.mxu1 %v4819_v8  ;;  %4566 = vmatprep.subr.bf16.mxu0 %v4565_v9  ;;  %v1195_v8 = vld [vmem:[#allocation5 + $0x1a50] sm:$0xff]  ;;  %v4841_v9 = vpack.c.bf16 %v1206_v2, %v1196_v1  ;;  %v4587_v15 = vpack.c.bf16 %v1203_v7, %v1193_v6  ;;  %v4605_v1 = vpack.c.bf16 %v1304_v60, %v1294_v59  ;;  %v1293_v2 = vld [vmem:[#allocation5 + $0x1d60] sm:$0xff]  ;;  %v1314_v7 = vld [vmem:[#allocation5 + $0x1e08] sm:$0xff] }
 0x14e   : > { %4822 = vmatprep.subr.bf16.mxu1 %v4821_v13  ;;  %v1216_v13 = vld [vmem:[#allocation5 + $0x1af8] sm:$0xff]  ;;  %v4843_v16 = vpack.c.bf16 %v1205_v10, %v1195_v8  ;;  %v1305_v6 = vld [vmem:[#allocation5 + $0x1dc0] sm:$0xff]  ;;  %v1326_v10 = vld [vmem:[#allocation5 + $0x1e68] sm:$0xff] }
 0x14f   : > { %v1324_v8 = vld [vmem:[#allocation5 + $0x1e58] sm:$0xff]  ;;  %v1394_v59 = vld [vmem:[#allocation5 + $0x2088] sm:$0xff] }
 0x150   : > { %4568 = vmatpush1.bf16.msra.mxu0 %v4567_v19  ;;  %v1223_v19 = vld [vmem:[#allocation5 + $0x1b30] sm:$0xff]  ;;  %v1376_v48 = vld [vmem:[#allocation5 + $0x1ff8] sm:$0xff] }
 0x151   : > { %4824 = vmatpush1.bf16.msra.mxu1 %v4823_v20  ;;  %4570 = vmatprep.subr.bf16.mxu0 %v4569_v21  ;;  %v1215_v20 = vld [vmem:[#allocation5 + $0x1af0] sm:$0xff]  ;;  %v4845_v21 = vpack.c.bf16 %v1226_v14, %v1216_v13  ;;  %v4591_v27 = vpack.c.bf16 %v1223_v19, %v1213_v18  ;;  %v4609_v13 = vpack.c.bf16 %v1324_v8, %v1314_v7  ;;  %v1313_v14 = vld [vmem:[#allocation5 + $0x1e00] sm:$0xff]  ;;  %v1334_v19 = vld [vmem:[#allocation5 + $0x1ea8] sm:$0xff] }
 0x152   : > { %4826 = vmatprep.subr.bf16.mxu1 %v4825_v25  ;;  %v1236_v25 = vld [vmem:[#allocation5 + $0x1b98] sm:$0xff]  ;;  %v4847_v28 = vpack.c.bf16 %v1225_v22, %v1215_v20  ;;  %v1325_v18 = vld [vmem:[#allocation5 + $0x1e60] sm:$0xff]  ;;  %v1346_v22 = vld [vmem:[#allocation5 + $0x1f08] sm:$0xff] }
 0x153   : > { %v1344_v20 = vld [vmem:[#allocation5 + $0x1ef8] sm:$0xff]  ;;  %v1414_v7 = vld [vmem:[#allocation5 + $0x2128] sm:$0xff] }
 0x154   : > { %4572 = vmatpush1.bf16.msra.mxu0 %v4571_v31  ;;  %v1243_v31 = vld [vmem:[#allocation5 + $0x1bd0] sm:$0xff]  ;;  %v1404_v60 = vld [vmem:[#allocation5 + $0x20d8] sm:$0xff] }
 0x155   : > { %4828 = vmatpush1.bf16.msra.mxu1 %v4827_v32  ;;  %4574 = vmatprep.subr.bf16.mxu0 %v4573_v33  ;;  %v1235_v32 = vld [vmem:[#allocation5 + $0x1b90] sm:$0xff]  ;;  %v4849_v33 = vpack.c.bf16 %v1246_v26, %v1236_v25  ;;  %v4595_v39 = vpack.c.bf16 %v1243_v31, %v1233_v30  ;;  %v4613_v26 = vpack.c.bf16 %v1344_v20, %v1334_v19  ;;  %v1345_v31 = vld [vmem:[#allocation5 + $0x1f00] sm:$0xff]  ;;  %v1424_v8 = vld [vmem:[#allocation5 + $0x2178] sm:$0xff] }
 0x156   : > { %4830 = vmatprep.subr.bf16.mxu1 %v4829_v37  ;;  %v1256_v37 = vld [vmem:[#allocation5 + $0x1c38] sm:$0xff]  ;;  %v4851_v40 = vpack.c.bf16 %v1245_v34, %v1235_v32  ;;  %v1354_v32 = vld [vmem:[#allocation5 + $0x1f48] sm:$0xff] }
 0x157   : > { %v1356_v34 = vld [vmem:[#allocation5 + $0x1f58] sm:$0xff]  ;;  %v1434_v19 = vld [vmem:[#allocation5 + $0x21c8] sm:$0xff] }
 0x158   : > { %4576 = vmatpush1.bf16.msra.mxu0 %v4575_v43  ;;  %v1263_v43 = vld [vmem:[#allocation5 + $0x1c70] sm:$0xff]  ;;  %v1444_v20 = vld [vmem:[#allocation5 + $0x2218] sm:$0xff] }
 0x159   : > { %4832 = vmatpush1.bf16.msra.mxu1 %v4831_v44  ;;  %4578 = vmatprep.subr.bf16.mxu0 %v4577_v45  ;;  %v1255_v44 = vld [vmem:[#allocation5 + $0x1c30] sm:$0xff]  ;;  %v4853_v45 = vpack.c.bf16 %v1266_v38, %v1256_v37  ;;  %v4599_v51 = vpack.c.bf16 %v1263_v43, %v1253_v42  ;;  %v349_v38 = vld [vmem:[%s6713_s26 + $0x60] sm:$0xff] }
 0x15a   : > { %4834 = vmatprep.subr.bf16.mxu1 %v4833_v49  ;;  %v1276_v49 = vld [vmem:[#allocation5 + $0x1cd8] sm:$0xff]  ;;  %v4855_v52 = vpack.c.bf16 %v1265_v46, %v1255_v44  ;;  %v1363_v42 = vld [vmem:[#allocation5 + $0x1f90] sm:$0xff]  ;;  %v4873_v44 = vpack.c.bf16 %v1366_v35, %v1356_v34  ;;  %v1374_v46 = vld [vmem:[#allocation5 + $0x1fe8] sm:$0xff] }
 0x15b   : > { %v1355_v43 = vld [vmem:[#allocation5 + $0x1f50] sm:$0xff]  ;;  %v1466_v34 = vld [vmem:[#allocation5 + $0x22c8] sm:$0xff] }
 0x15c   : > { %4580 = vmatpush1.bf16.msra.mxu0 %v4579_v55  ;;  %v1283_v55 = vld [vmem:[#allocation5 + $0x1d10] sm:$0xff] }
 0x15d   : > { %4836 = vmatpush1.bf16.msra.mxu1 %v4835_v56  ;;  %4582 = vmatprep.subr.bf16.mxu0 %v4581_v57  ;;  %v1275_v56 = vld [vmem:[#allocation5 + $0x1cd0] sm:$0xff]  ;;  %v4857_v57 = vpack.c.bf16 %v1286_v50, %v1276_v49  ;;  %v4603_v63 = vpack.c.bf16 %v1283_v55, %v1273_v54  ;;  %v1386_v49 = vld [vmem:[#allocation5 + $0x2048] sm:$0xff]  ;;  %v344_v50 = vld [vmem:[%s6713_s26 + $0x38] sm:$0xff] }
 0x15e   : > { %4838 = vmatprep.subr.bf16.mxu1 %v4837_v61  ;;  %v1296_v61 = vld [vmem:[#allocation5 + $0x1d78] sm:$0xff]  ;;  %v4859_v0 = vpack.c.bf16 %v1285_v58, %v1275_v56  ;;  %v1373_v54 = vld [vmem:[#allocation5 + $0x1fe0] sm:$0xff]  ;;  %v1383_v55 = vld [vmem:[#allocation5 + $0x2030] sm:$0xff] }
 0x15f   : > { %v1375_v56 = vld [vmem:[#allocation5 + $0x1ff0] sm:$0xff]  ;;  %v1385_v58 = vld [vmem:[#allocation5 + $0x2040] sm:$0xff] }
 0x160   : > { %4584 = vmatpush1.bf16.msra.mxu0 %v4583_v3  ;;  %v1303_v3 = vld [vmem:[#allocation5 + $0x1db0] sm:$0xff] }
 0x161   : > { %4840 = vmatpush1.bf16.msra.mxu1 %v4839_v4  ;;  %4586 = vmatprep.subr.bf16.mxu0 %v4585_v5  ;;  %v1295_v4 = vld [vmem:[#allocation5 + $0x1d70] sm:$0xff]  ;;  %v4861_v5 = vpack.c.bf16 %v1306_v62, %v1296_v61  ;;  %v4607_v11 = vpack.c.bf16 %v1303_v3, %v1293_v2  ;;  %v1396_v61 = vld [vmem:[#allocation5 + $0x2098] sm:$0xff]  ;;  %v1406_v62 = vld [vmem:[#allocation5 + $0x20e8] sm:$0xff] }
 0x162   : > { %4842 = vmatprep.subr.bf16.mxu1 %v4841_v9  ;;  %v1316_v9 = vld [vmem:[#allocation5 + $0x1e18] sm:$0xff]  ;;  %v4863_v12 = vpack.c.bf16 %v1305_v6, %v1295_v4  ;;  %v1393_v2 = vld [vmem:[#allocation5 + $0x2080] sm:$0xff]  ;;  %v1403_v3 = vld [vmem:[#allocation5 + $0x20d0] sm:$0xff] }
 0x163   : > { %v1395_v4 = vld [vmem:[#allocation5 + $0x2090] sm:$0xff]  ;;  %v1405_v6 = vld [vmem:[#allocation5 + $0x20e0] sm:$0xff] }
 0x164   : > { %4588 = vmatpush1.bf16.msra.mxu0 %v4587_v15  ;;  %v1323_v15 = vld [vmem:[#allocation5 + $0x1e50] sm:$0xff] }
 0x165   : > { %4844 = vmatpush1.bf16.msra.mxu1 %v4843_v16  ;;  %4590 = vmatprep.subr.bf16.mxu0 %v4589_v17  ;;  %v1315_v16 = vld [vmem:[#allocation5 + $0x1e10] sm:$0xff]  ;;  %v4865_v17 = vpack.c.bf16 %v1326_v10, %v1316_v9  ;;  %v4611_v24 = vpack.c.bf16 %v1323_v15, %v1313_v14  ;;  %v1416_v9 = vld [vmem:[#allocation5 + $0x2138] sm:$0xff]  ;;  %v1426_v10 = vld [vmem:[#allocation5 + $0x2188] sm:$0xff] }
 0x166   : > { %4846 = vmatprep.subr.bf16.mxu1 %v4845_v21  ;;  %v1336_v21 = vld [vmem:[#allocation5 + $0x1eb8] sm:$0xff]  ;;  %v4867_v25 = vpack.c.bf16 %v1325_v18, %v1315_v16  ;;  %v1413_v14 = vld [vmem:[#allocation5 + $0x2120] sm:$0xff]  ;;  %v1423_v15 = vld [vmem:[#allocation5 + $0x2170] sm:$0xff] }
 0x167   : > { %v4869_v30 = vpack.c.bf16 %v1346_v22, %v1336_v21  ;;  %v1415_v16 = vld [vmem:[#allocation5 + $0x2130] sm:$0xff]  ;;  %v1425_v18 = vld [vmem:[#allocation5 + $0x2180] sm:$0xff]  ;;  %v1436_v21 = vld [vmem:[#allocation5 + $0x21d8] sm:$0xff] }
 0x168   : > { %4592 = vmatpush1.bf16.msra.mxu0 %v4591_v27  ;;  %v1333_v27 = vld [vmem:[#allocation5 + $0x1ea0] sm:$0xff]  ;;  %v1446_v22 = vld [vmem:[#allocation5 + $0x2228] sm:$0xff] }
 0x169   : > { %4848 = vmatpush1.bf16.msra.mxu1 %v4847_v28  ;;  %4594 = vmatprep.subr.bf16.mxu0 %v4593_v29  ;;  %v1343_v28 = vld [vmem:[#allocation5 + $0x1ef0] sm:$0xff] }
 0x16a   : > { %4850 = vmatprep.subr.bf16.mxu1 %v4849_v33  ;;  %v1335_v29 = vld [vmem:[#allocation5 + $0x1eb0] sm:$0xff]  ;;  %v1364_v33 = vld [vmem:[#allocation5 + $0x1f98] sm:$0xff]  ;;  %v4615_v37 = vpack.c.bf16 %v1343_v28, %v1333_v27 }
 0x16b   : > { %v1443_v27 = vld [vmem:[#allocation5 + $0x2210] sm:$0xff] }
 0x16c   : > { %4596 = vmatpush1.bf16.msra.mxu0 %v4595_v39  ;;  %v4871_v39 = vpack.c.bf16 %v1345_v31, %v1335_v29  ;;  %v1435_v28 = vld [vmem:[#allocation5 + $0x21d0] sm:$0xff]  ;;  %v4889_v29 = vpack.c.bf16 %v1446_v22, %v1436_v21  ;;  %v1454_v31 = vld [vmem:[#allocation5 + $0x2268] sm:$0xff]  ;;  %v1533_v22 = vld [vmem:[#allocation5 + $0x24e0] sm:$0xff] }
 0x16d   : > { %4852 = vmatpush1.bf16.msra.mxu1 %v4851_v40  ;;  %4598 = vmatprep.subr.bf16.mxu0 %v4597_v41  ;;  %v4617_v40 = vpack.c.bf16 %v1364_v33, %v1354_v32  ;;  %v1353_v41 = vld [vmem:[#allocation5 + $0x1f40] sm:$0xff]  ;;  %v1464_v32 = vld [vmem:[#allocation5 + $0x22b8] sm:$0xff] }
 0x16e   : > { %4854 = vmatprep.subr.bf16.mxu1 %v4853_v45  ;;  %v1365_v45 = vld [vmem:[#allocation5 + $0x1fa0] sm:$0xff]  ;;  %v1456_v33 = vld [vmem:[#allocation5 + $0x2278] sm:$0xff] }
 0x170   : > { %4600 = vmatpush1.bf16.msra.mxu0 %v4599_v51  ;;  %v4619_v51 = vpack.c.bf16 %v1363_v42, %v1353_v41  ;;  %v4893_v41 = vpack.c.bf16 %v1466_v34, %v1456_v33  ;;  %v1465_v42 = vld [vmem:[#allocation5 + $0x22c0] sm:$0xff] }
 0x171   : > { %4856 = vmatpush1.bf16.msra.mxu1 %v4855_v52  ;;  %4602 = vmatprep.subr.bf16.mxu0 %v4601_v53  ;;  %v4875_v52 = vpack.c.bf16 %v1365_v45, %v1355_v43  ;;  %v4621_v53 = vpack.c.bf16 %v1384_v47, %v1374_v46  ;;  %v1474_v43 = vld [vmem:[#allocation5 + $0x2308] sm:$0xff]  ;;  %v1476_v45 = vld [vmem:[#allocation5 + $0x2318] sm:$0xff]  ;;  %v1553_v34 = vld [vmem:[#allocation5 + $0x2580] sm:$0xff] }
 0x172   : > { %4858 = vmatprep.subr.bf16.mxu1 %v4857_v57  ;;  %v4877_v57 = vpack.c.bf16 %v1386_v49, %v1376_v48  ;;  %v1486_v46 = vld [vmem:[#allocation5 + $0x2368] sm:$0xff] }
 0x174   : > { %4604 = vmatpush1.bf16.msra.mxu0 %v4603_v63  ;;  %v4623_v63 = vpack.c.bf16 %v1383_v55, %v1373_v54  ;;  %v1485_v54 = vld [vmem:[#allocation5 + $0x2360] sm:$0xff]  ;;  %v1494_v55 = vld [vmem:[#allocation5 + $0x23a8] sm:$0xff] }
 0x175   : > { %4860 = vmatpush1.bf16.msra.mxu1 %v4859_v0  ;;  %4606 = vmatprep.subr.bf16.mxu0 %v4605_v1  ;;  %v4879_v0 = vpack.c.bf16 %v1385_v58, %v1375_v56  ;;  %v4625_v1 = vpack.c.bf16 %v1404_v60, %v1394_v59  ;;  %v1504_v56 = vld [vmem:[#allocation5 + $0x23f8] sm:$0xff]  ;;  %v1506_v58 = vld [vmem:[#allocation5 + $0x2408] sm:$0xff] }
 0x176   : > { %4862 = vmatprep.subr.bf16.mxu1 %v4861_v5  ;;  %v4881_v5 = vpack.c.bf16 %v1406_v62, %v1396_v61  ;;  %v4645_v61 = vpack.c.bf16 %v1504_v56, %v1494_v55  ;;  %v1493_v62 = vld [vmem:[#allocation5 + $0x23a0] sm:$0xff] }
 0x178   : > { %4608 = vmatpush1.bf16.msra.mxu0 %v4607_v11  ;;  %v4627_v11 = vpack.c.bf16 %v1403_v3, %v1393_v2  ;;  %v1505_v2 = vld [vmem:[#allocation5 + $0x2400] sm:$0xff]  ;;  %v1514_v3 = vld [vmem:[#allocation5 + $0x2448] sm:$0xff] }
 0x179   : > { %4864 = vmatpush1.bf16.msra.mxu1 %v4863_v12  ;;  %4610 = vmatprep.subr.bf16.mxu0 %v4609_v13  ;;  %v4883_v12 = vpack.c.bf16 %v1405_v6, %v1395_v4  ;;  %v4629_v13 = vpack.c.bf16 %v1424_v8, %v1414_v7  ;;  %v1524_v4 = vld [vmem:[#allocation5 + $0x2498] sm:$0xff]  ;;  %v1526_v6 = vld [vmem:[#allocation5 + $0x24a8] sm:$0xff] }
 0x17a   : > { %4866 = vmatprep.subr.bf16.mxu1 %v4865_v17  ;;  %v4885_v17 = vpack.c.bf16 %v1426_v10, %v1416_v9  ;;  %v4649_v9 = vpack.c.bf16 %v1524_v4, %v1514_v3  ;;  %v1513_v10 = vld [vmem:[#allocation5 + $0x2440] sm:$0xff] }
 0x17b   : > { %1852 = vmatmul.mubr.f32.vlgmr.msra.gmra.mrb[0].mxu0 %v341_v23 }
 0x17c   : > { %4612 = vmatpush1.bf16.msra.mxu0 %v4611_v24  ;;  %2160 = vmatmul.mubr.f32.vlgmr.msra.gmra.mrb[0].mxu1 %v341_v23  ;;  %v4631_v23 = vpack.c.bf16 %v1423_v15, %v1413_v14  ;;  %v4887_v24 = vpack.c.bf16 %v1425_v18, %v1415_v16  ;;  %v1525_v14 = vld [vmem:[#allocation5 + $0x24a0] sm:$0xff]  ;;  %v1534_v15 = vld [vmem:[#allocation5 + $0x24e8] sm:$0xff]  ;;  %v1544_v16 = vld [vmem:[#allocation5 + $0x2538] sm:$0xff] }
 0x17d   : > { %4868 = vmatpush1.bf16.msra.mxu1 %v4867_v25  ;;  %4614 = vmatprep.subr.bf16.mxu0 %v4613_v26  ;;  %v4633_v25 = vpack.c.bf16 %v1444_v20, %v1434_v19  ;;  %v1433_v26 = vld [vmem:[#allocation5 + $0x21c0] sm:$0xff]  ;;  %v1546_v18 = vld [vmem:[#allocation5 + $0x2548] sm:$0xff]  ;;  %v4653_v21 = vpack.c.bf16 %v1544_v16, %v1534_v15 }
 0x17e   : > { %4870 = vmatprep.subr.bf16.mxu1 %v4869_v30  ;;  %1857 = vmatprep.mubr.f32.mxu0 %v350_v36  ;;  %v1445_v30 = vld [vmem:[#allocation5 + $0x2220] sm:$0xff]  ;;  %v4635_v35 = vpack.c.bf16 %v1443_v27, %v1433_v26  ;;  %v1554_v27 = vld [vmem:[#allocation5 + $0x2588] sm:$0xff] }
 0x17f   : > { %2165 = vmatprep.mubr.f32.mxu1 %v350_v36  ;;  %1858 = vmatmul.mubr.f32.gmra.mrb[2].mxu0 %v349_v38  ;;  %v4891_v36 = vpack.c.bf16 %v1445_v30, %v1435_v28  ;;  %v1545_v26 = vld [vmem:[#allocation5 + $0x2540] sm:$0xff]  ;;  %v1564_v28 = vld [vmem:[#allocation5 + $0x25d8] sm:$0xff]  ;;  %v1566_v30 = vld [vmem:[#allocation5 + $0x25e8] sm:$0xff] }
 0x180   : > { %4616 = vmatpush1.bf16.msra.mxu0 %v4615_v37  ;;  %2166 = vmatmul.mubr.f32.gmra.mrb[2].mxu1 %v349_v38  ;;  %v4637_v37 = vpack.c.bf16 %v1464_v32, %v1454_v31  ;;  %v1453_v38 = vld [vmem:[#allocation5 + $0x2260] sm:$0xff]  ;;  %v4657_v33 = vpack.c.bf16 %v1564_v28, %v1554_v27  ;;  %v343_v27 = vld [vmem:[%s6713_s26 + $0x30] sm:$0xff] }
 0x181   : > { %4872 = vmatpush1.bf16.msra.mxu1 %v4871_v39  ;;  %4618 = vmatprep.subr.bf16.mxu0 %v4617_v40  ;;  %v1463_v39 = vld [vmem:[#allocation5 + $0x22b0] sm:$0xff] }
 0x182   : > { %4874 = vmatprep.subr.bf16.mxu1 %v4873_v44  ;;  %1928 = vmatprep.mubr.f32.mxu0 %v344_v50  ;;  %v1455_v40 = vld [vmem:[#allocation5 + $0x2270] sm:$0xff]  ;;  %v1484_v44 = vld [vmem:[#allocation5 + $0x2358] sm:$0xff]  ;;  %v4639_v47 = vpack.c.bf16 %v1463_v39, %v1453_v38  ;;  %v1565_v38 = vld [vmem:[#allocation5 + $0x25e0] sm:$0xff] }
 0x183   : > { %2236 = vmatprep.mubr.f32.mxu1 %v344_v50  ;;  %v4895_v48 = vpack.c.bf16 %v1465_v42, %v1455_v40  ;;  %v4641_v49 = vpack.c.bf16 %v1484_v44, %v1474_v43  ;;  %v1473_v50 = vld [vmem:[#allocation5 + $0x2300] sm:$0xff]  ;;  %v1574_v39 = vld [vmem:[#allocation5 + $0x2628] sm:$0xff]  ;;  %v1584_v40 = vld [vmem:[#allocation5 + $0x2678] sm:$0xff] }
 0x184   : > { %4620 = vmatpush1.bf16.msra.mxu0 %v4619_v51  ;;  %v1483_v51 = vld [vmem:[#allocation5 + $0x2350] sm:$0xff]  ;;  %v1586_v42 = vld [vmem:[#allocation5 + $0x2688] sm:$0xff] }
 0x185   : > { %4876 = vmatpush1.bf16.msra.mxu1 %v4875_v52  ;;  %4622 = vmatprep.subr.bf16.mxu0 %v4621_v53  ;;  %v1475_v52 = vld [vmem:[#allocation5 + $0x2310] sm:$0xff]  ;;  %v4897_v53 = vpack.c.bf16 %v1486_v46, %v1476_v45  ;;  %v4643_v59 = vpack.c.bf16 %v1483_v51, %v1473_v50  ;;  %v4661_v45 = vpack.c.bf16 %v1584_v40, %v1574_v39  ;;  %v1573_v46 = vld [vmem:[#allocation5 + $0x2620] sm:$0xff]  ;;  %v1594_v51 = vld [vmem:[#allocation5 + $0x26c8] sm:$0xff] }
 0x186   : > { %4878 = vmatprep.subr.bf16.mxu1 %v4877_v57  ;;  %v1496_v57 = vld [vmem:[#allocation5 + $0x23b8] sm:$0xff]  ;;  %v4899_v60 = vpack.c.bf16 %v1485_v54, %v1475_v52  ;;  %v1585_v50 = vld [vmem:[#allocation5 + $0x2680] sm:$0xff]  ;;  %v1606_v54 = vld [vmem:[#allocation5 + $0x2728] sm:$0xff] }
 0x187   : > { %v1604_v52 = vld [vmem:[#allocation5 + $0x2718] sm:$0xff]  ;;  %v410_v40 = vld [vmem:[#allocation5 + $0x1c8] sm:$0xff] }
 0x188   : > { %4624 = vmatpush1.bf16.msra.mxu0 %v4623_v63  ;;  %v1503_v63 = vld [vmem:[#allocation5 + $0x23f0] sm:$0xff]  ;;  %v400_v39 = vld [vmem:[#allocation5 + $0x178] sm:$0xff] }
 0x189   : > { %4880 = vmatpush1.bf16.msra.mxu1 %v4879_v0  ;;  %4626 = vmatprep.subr.bf16.mxu0 %v4625_v1  ;;  %v1495_v0 = vld [vmem:[#allocation5 + $0x23b0] sm:$0xff]  ;;  %v4901_v1 = vpack.c.bf16 %v1506_v58, %v1496_v57  ;;  %v4647_v7 = vpack.c.bf16 %v1503_v63, %v1493_v62  ;;  %v4665_v57 = vpack.c.bf16 %v1604_v52, %v1594_v51  ;;  %v1593_v58 = vld [vmem:[#allocation5 + $0x26c0] sm:$0xff]  ;;  %v1614_v63 = vld [vmem:[#allocation5 + $0x2768] sm:$0xff] }
 0x18a   : > { %4882 = vmatprep.subr.bf16.mxu1 %v4881_v5  ;;  %v1516_v5 = vld [vmem:[#allocation5 + $0x2458] sm:$0xff]  ;;  %v4903_v8 = vpack.c.bf16 %v1505_v2, %v1495_v0  ;;  %v1605_v62 = vld [vmem:[#allocation5 + $0x2720] sm:$0xff]  ;;  %v1626_v2 = vld [vmem:[#allocation5 + $0x27c8] sm:$0xff] }
 0x18b   : > { %v1624_v0 = vld [vmem:[#allocation5 + $0x27b8] sm:$0xff] }
 0x18c   : > { %4628 = vmatpush1.bf16.msra.mxu0 %v4627_v11  ;;  %v1523_v11 = vld [vmem:[#allocation5 + $0x2490] sm:$0xff]  ;;  %v428_v51 = vld [vmem:[#allocation5 + $0x258] sm:$0xff] }
 0x18d   : > { %4884 = vmatpush1.bf16.msra.mxu1 %v4883_v12  ;;  %4630 = vmatprep.subr.bf16.mxu0 %v4629_v13  ;;  %v1515_v12 = vld [vmem:[#allocation5 + $0x2450] sm:$0xff]  ;;  %v4905_v13 = vpack.c.bf16 %v1526_v6, %v1516_v5  ;;  %v4651_v19 = vpack.c.bf16 %v1523_v11, %v1513_v10  ;;  %v4669_v5 = vpack.c.bf16 %v1624_v0, %v1614_v63  ;;  %v1613_v6 = vld [vmem:[#allocation5 + $0x2760] sm:$0xff]  ;;  %v358_v11 = vld [vmem:[#allocation5 + $0x28] sm:$0xff] }
 0x18e   : > { %4886 = vmatprep.subr.bf16.mxu1 %v4885_v17  ;;  %v1536_v17 = vld [vmem:[#allocation5 + $0x24f8] sm:$0xff]  ;;  %v4907_v20 = vpack.c.bf16 %v1525_v14, %v1515_v12  ;;  %v1625_v10 = vld [vmem:[#allocation5 + $0x27c0] sm:$0xff]  ;;  %v370_v14 = vld [vmem:[#allocation5 + $0x88] sm:$0xff] }
 0x18f   : > { %v368_v12 = vld [vmem:[#allocation5 + $0x78] sm:$0xff]  ;;  %v6143_v0 = vld [vmem:[%s6713_s26 + $0x8] sm:$0xff] }
 0x190   : > { %4632 = vmatpush1.bf16.msra.mxu0 %v4631_v23  ;;  %v1543_v23 = vld [vmem:[#allocation5 + $0x2530] sm:$0xff]  ;;  %v420_v52 = vld [vmem:[#allocation5 + $0x218] sm:$0xff] }
 0x191   : > { %4888 = vmatpush1.bf16.msra.mxu1 %v4887_v24  ;;  %4634 = vmatprep.subr.bf16.mxu0 %v4633_v25  ;;  %v1535_v24 = vld [vmem:[#allocation5 + $0x24f0] sm:$0xff]  ;;  %v4909_v25 = vpack.c.bf16 %v1546_v18, %v1536_v17  ;;  %v4655_v31 = vpack.c.bf16 %v1543_v23, %v1533_v22  ;;  %v4929_v17 = vpack.c.bf16 %v368_v12, %v358_v11  ;;  %v357_v18 = vld [vmem:[#allocation5 + $0x20] sm:$0xff]  ;;  %v378_v23 = vld [vmem:[#allocation5 + $0xc8] sm:$0xff] }
 0x192   : > { %4890 = vmatprep.subr.bf16.mxu1 %v4889_v29  ;;  %v1556_v29 = vld [vmem:[#allocation5 + $0x2598] sm:$0xff]  ;;  %v4911_v32 = vpack.c.bf16 %v1545_v26, %v1535_v24  ;;  %v369_v22 = vld [vmem:[#allocation5 + $0x80] sm:$0xff]  ;;  %v390_v26 = vld [vmem:[#allocation5 + $0x128] sm:$0xff] }
 0x193   : > { %v388_v24 = vld [vmem:[#allocation5 + $0x118] sm:$0xff]  ;;  %v458_v11 = vld [vmem:[#allocation5 + $0x348] sm:$0xff] }
 0x194   : > { %4636 = vmatpush1.bf16.msra.mxu0 %v4635_v35  ;;  %v1563_v35 = vld [vmem:[#allocation5 + $0x25d0] sm:$0xff]  ;;  %v448_v63 = vld [vmem:[#allocation5 + $0x2f8] sm:$0xff] }
 0x195   : > { %4892 = vmatpush1.bf16.msra.mxu1 %v4891_v36  ;;  %4638 = vmatprep.subr.bf16.mxu0 %v4637_v37  ;;  %v1555_v36 = vld [vmem:[#allocation5 + $0x2590] sm:$0xff]  ;;  %v4913_v37 = vpack.c.bf16 %v1566_v30, %v1556_v29  ;;  %v4659_v43 = vpack.c.bf16 %v1563_v35, %v1553_v34  ;;  %v352_v29 = vld [vmem:[%s6713_s26 + $0x78] sm:$0xff]  ;;  %v4933_v34 = vpack.c.bf16 %v388_v24, %v378_v23  ;;  %v478_v23 = vld [vmem:[#allocation5 + $0x3e8] sm:$0xff] }
 0x196   : > { %4894 = vmatprep.subr.bf16.mxu1 %v4893_v41  ;;  %v1576_v41 = vld [vmem:[#allocation5 + $0x2638] sm:$0xff]  ;;  %v4915_v44 = vpack.c.bf16 %v1565_v38, %v1555_v36  ;;  %v389_v36 = vld [vmem:[#allocation5 + $0x120] sm:$0xff] }
 0x197   : > { %v408_v38 = vld [vmem:[#allocation5 + $0x1b8] sm:$0xff] }
 0x198   : > { %4640 = vmatpush1.bf16.msra.mxu0 %v4639_v47  ;;  %v1583_v47 = vld [vmem:[#allocation5 + $0x2670] sm:$0xff]  ;;  %v468_v12 = vld [vmem:[#allocation5 + $0x398] sm:$0xff] }
 0x199   : > { %4896 = vmatpush1.bf16.msra.mxu1 %v4895_v48  ;;  %4642 = vmatprep.subr.bf16.mxu0 %v4641_v49  ;;  %v1575_v48 = vld [vmem:[#allocation5 + $0x2630] sm:$0xff]  ;;  %v4917_v49 = vpack.c.bf16 %v1586_v42, %v1576_v41  ;;  %v4663_v55 = vpack.c.bf16 %v1583_v47, %v1573_v46  ;;  %v488_v24 = vld [vmem:[#allocation5 + $0x438] sm:$0xff] }
 0x19a   : > { %4898 = vmatprep.subr.bf16.mxu1 %v4897_v53  ;;  %v1596_v53 = vld [vmem:[#allocation5 + $0x26d8] sm:$0xff]  ;;  %v4919_v56 = vpack.c.bf16 %v1585_v50, %v1575_v48  ;;  %v351_v41 = vld [vmem:[%s6713_s26 + $0x70] sm:$0xff]  ;;  %v5193_v48 = vpack.c.bf16 %v410_v40, %v400_v39  ;;  %v418_v50 = vld [vmem:[#allocation5 + $0x208] sm:$0xff] }
 0x19b   : > { %v407_v46 = vld [vmem:[#allocation5 + $0x1b0] sm:$0xff] }
 0x19c   : > { %4644 = vmatpush1.bf16.msra.mxu0 %v4643_v59  ;;  %v1603_v59 = vld [vmem:[#allocation5 + $0x2710] sm:$0xff] }
 0x19d   : > { %4900 = vmatpush1.bf16.msra.mxu1 %v4899_v60  ;;  %4646 = vmatprep.subr.bf16.mxu0 %v4645_v61  ;;  %v1595_v60 = vld [vmem:[#allocation5 + $0x26d0] sm:$0xff]  ;;  %v4921_v61 = vpack.c.bf16 %v1606_v54, %v1596_v53  ;;  %v4667_v3 = vpack.c.bf16 %v1603_v59, %v1593_v58  ;;  %v430_v53 = vld [vmem:[#allocation5 + $0x268] sm:$0xff] }
 0x19e   : > { %4902 = vmatprep.subr.bf16.mxu1 %v4901_v1  ;;  %v1616_v1 = vld [vmem:[#allocation5 + $0x2778] sm:$0xff]  ;;  %v4923_v4 = vpack.c.bf16 %v1605_v62, %v1595_v60  ;;  %v399_v47 = vld [vmem:[#allocation5 + $0x170] sm:$0xff]  ;;  %v5197_v60 = vpack.c.bf16 %v430_v53, %v420_v52  ;;  %v438_v62 = vld [vmem:[#allocation5 + $0x2a8] sm:$0xff] }
 0x19f   : > { %v427_v58 = vld [vmem:[#allocation5 + $0x250] sm:$0xff] }
 0x1a0   : > { %4648 = vmatpush1.bf16.msra.mxu0 %v4647_v7  ;;  %v1623_v7 = vld [vmem:[#allocation5 + $0x27b0] sm:$0xff] }
 0x1a1   : > { %4904 = vmatpush1.bf16.msra.mxu1 %v4903_v8  ;;  %4650 = vmatprep.subr.bf16.mxu0 %v4649_v9  ;;  %v1615_v8 = vld [vmem:[#allocation5 + $0x2770] sm:$0xff]  ;;  %v4925_v9 = vpack.c.bf16 %v1626_v2, %v1616_v1  ;;  %v4671_v15 = vpack.c.bf16 %v1623_v7, %v1613_v6  ;;  %v440_v1 = vld [vmem:[#allocation5 + $0x2b8] sm:$0xff]  ;;  %v450_v2 = vld [vmem:[#allocation5 + $0x308] sm:$0xff] }
 0x1a2   : > { %4906 = vmatprep.subr.bf16.mxu1 %v4905_v13  ;;  %v360_v13 = vld [vmem:[#allocation5 + $0x38] sm:$0xff]  ;;  %v4927_v16 = vpack.c.bf16 %v1625_v10, %v1615_v8  ;;  %v419_v59 = vld [vmem:[#allocation5 + $0x210] sm:$0xff]  ;;  %v437_v6 = vld [vmem:[#allocation5 + $0x2a0] sm:$0xff] }
 0x1a3   : > { %v447_v7 = vld [vmem:[#allocation5 + $0x2f0] sm:$0xff]  ;;  %v449_v10 = vld [vmem:[#allocation5 + $0x300] sm:$0xff] }
 0x1a4   : > { %4652 = vmatpush1.bf16.msra.mxu0 %v4651_v19  ;;  %v367_v19 = vld [vmem:[#allocation5 + $0x70] sm:$0xff] }
 0x1a5   : > { %4908 = vmatpush1.bf16.msra.mxu1 %v4907_v20  ;;  %4654 = vmatprep.subr.bf16.mxu0 %v4653_v21  ;;  %v5185_v20 = vpack.c.bf16 %v370_v14, %v360_v13  ;;  %v359_v21 = vld [vmem:[#allocation5 + $0x30] sm:$0xff]  ;;  %v4931_v28 = vpack.c.bf16 %v367_v19, %v357_v18  ;;  %v460_v13 = vld [vmem:[#allocation5 + $0x358] sm:$0xff]  ;;  %v470_v14 = vld [vmem:[#allocation5 + $0x3a8] sm:$0xff] }
 0x1a6   : > { %4910 = vmatprep.subr.bf16.mxu1 %v4909_v25  ;;  %v380_v25 = vld [vmem:[#allocation5 + $0xd8] sm:$0xff]  ;;  %v5187_v30 = vpack.c.bf16 %v369_v22, %v359_v21  ;;  %v439_v8 = vld [vmem:[#allocation5 + $0x2b0] sm:$0xff]  ;;  %v457_v18 = vld [vmem:[#allocation5 + $0x340] sm:$0xff]  ;;  %v5205_v21 = vpack.c.bf16 %v470_v14, %v460_v13 }
 0x1a7   : > { %v5189_v35 = vpack.c.bf16 %v390_v26, %v380_v25  ;;  %v467_v19 = vld [vmem:[#allocation5 + $0x390] sm:$0xff]  ;;  %v469_v22 = vld [vmem:[#allocation5 + $0x3a0] sm:$0xff]  ;;  %v480_v25 = vld [vmem:[#allocation5 + $0x3f8] sm:$0xff] }
 0x1a8   : > { %4656 = vmatpush1.bf16.msra.mxu0 %v4655_v31  ;;  %v377_v31 = vld [vmem:[#allocation5 + $0xc0] sm:$0xff]  ;;  %v490_v26 = vld [vmem:[#allocation5 + $0x448] sm:$0xff] }
 0x1a9   : > { %4912 = vmatpush1.bf16.msra.mxu1 %v4911_v32  ;;  %4658 = vmatprep.subr.bf16.mxu0 %v4657_v33  ;;  %v387_v32 = vld [vmem:[#allocation5 + $0x110] sm:$0xff]  ;;  %v557_v14 = vld [vmem:[#allocation5 + $0x660] sm:$0xff] }
 0x1aa   : > { %4914 = vmatprep.subr.bf16.mxu1 %v4913_v37  ;;  %v379_v33 = vld [vmem:[#allocation5 + $0xd0] sm:$0xff]  ;;  %v398_v37 = vld [vmem:[#allocation5 + $0x168] sm:$0xff]  ;;  %v4935_v42 = vpack.c.bf16 %v387_v32, %v377_v31 }
 0x1ab   : > { %v487_v31 = vld [vmem:[#allocation5 + $0x430] sm:$0xff] }
 0x1ac   : > { %4660 = vmatpush1.bf16.msra.mxu0 %v4659_v43  ;;  %v5191_v43 = vpack.c.bf16 %v389_v36, %v379_v33  ;;  %v479_v32 = vld [vmem:[#allocation5 + $0x3f0] sm:$0xff]  ;;  %v5209_v33 = vpack.c.bf16 %v490_v26, %v480_v25  ;;  %v508_v36 = vld [vmem:[#allocation5 + $0x4d8] sm:$0xff]  ;;  %v577_v26 = vld [vmem:[#allocation5 + $0x700] sm:$0xff] }
 0x1ad   : > { %4916 = vmatpush1.bf16.msra.mxu1 %v4915_v44  ;;  %4662 = vmatprep.subr.bf16.mxu0 %v4661_v45  ;;  %v4937_v44 = vpack.c.bf16 %v408_v38, %v398_v37  ;;  %v397_v45 = vld [vmem:[#allocation5 + $0x160] sm:$0xff]  ;;  %v500_v37 = vld [vmem:[#allocation5 + $0x498] sm:$0xff]  ;;  %v510_v38 = vld [vmem:[#allocation5 + $0x4e8] sm:$0xff] }
 0x1ae   : > { %4918 = vmatprep.subr.bf16.mxu1 %v4917_v49  ;;  %v409_v49 = vld [vmem:[#allocation5 + $0x1c0] sm:$0xff]  ;;  %v4939_v54 = vpack.c.bf16 %v407_v46, %v397_v45  ;;  %v5213_v45 = vpack.c.bf16 %v510_v38, %v500_v37 }
 0x1af   : > { %v509_v46 = vld [vmem:[#allocation5 + $0x4e0] sm:$0xff] }
 0x1b0   : > { %4664 = vmatpush1.bf16.msra.mxu0 %v4663_v55  ;;  %v5195_v55 = vpack.c.bf16 %v409_v49, %v399_v47  ;;  %v518_v47 = vld [vmem:[#allocation5 + $0x528] sm:$0xff]  ;;  %v520_v49 = vld [vmem:[#allocation5 + $0x538] sm:$0xff]  ;;  %v597_v38 = vld [vmem:[#allocation5 + $0x7a0] sm:$0xff] }
 0x1b1   : > { %4920 = vmatpush1.bf16.msra.mxu1 %v4919_v56  ;;  %4666 = vmatprep.subr.bf16.mxu0 %v4665_v57  ;;  %v4941_v56 = vpack.c.bf16 %v428_v51, %v418_v50  ;;  %v417_v57 = vld [vmem:[#allocation5 + $0x200] sm:$0xff]  ;;  %v530_v50 = vld [vmem:[#allocation5 + $0x588] sm:$0xff] }
 0x1b2   : > { %4922 = vmatprep.subr.bf16.mxu1 %v4921_v61  ;;  %v429_v61 = vld [vmem:[#allocation5 + $0x260] sm:$0xff] }
 0x1b4   : > { %4668 = vmatpush1.bf16.msra.mxu0 %v4667_v3  ;;  %v4943_v3 = vpack.c.bf16 %v427_v58, %v417_v57  ;;  %v5217_v57 = vpack.c.bf16 %v530_v50, %v520_v49  ;;  %v529_v58 = vld [vmem:[#allocation5 + $0x580] sm:$0xff] }
 0x1b5   : > { %4924 = vmatpush1.bf16.msra.mxu1 %v4923_v4  ;;  %4670 = vmatprep.subr.bf16.mxu0 %v4669_v5  ;;  %v5199_v4 = vpack.c.bf16 %v429_v61, %v419_v59  ;;  %v4945_v5 = vpack.c.bf16 %v448_v63, %v438_v62  ;;  %v538_v59 = vld [vmem:[#allocation5 + $0x5c8] sm:$0xff]  ;;  %v540_v61 = vld [vmem:[#allocation5 + $0x5d8] sm:$0xff]  ;;  %v617_v50 = vld [vmem:[#allocation5 + $0x840] sm:$0xff] }
 0x1b6   : > { %4926 = vmatprep.subr.bf16.mxu1 %v4925_v9  ;;  %v5201_v9 = vpack.c.bf16 %v450_v2, %v440_v1  ;;  %v550_v62 = vld [vmem:[#allocation5 + $0x628] sm:$0xff]  ;;  %v537_v2 = vld [vmem:[#allocation5 + $0x5c0] sm:$0xff] }
 0x1b8   : > { %4672 = vmatpush1.bf16.msra.mxu0 %v4671_v15  ;;  %v4947_v15 = vpack.c.bf16 %v447_v7, %v437_v6  ;;  %v549_v6 = vld [vmem:[#allocation5 + $0x620] sm:$0xff]  ;;  %v558_v7 = vld [vmem:[#allocation5 + $0x668] sm:$0xff] }
 0x1b9   : > { %4928 = vmatpush1.bf16.msra.mxu1 %v4927_v16  ;;  %4930 = vmatprep.subr.bf16.mxu0 %v4929_v17  ;;  %v5203_v16 = vpack.c.bf16 %v449_v10, %v439_v8  ;;  %v4949_v17 = vpack.c.bf16 %v468_v12, %v458_v11  ;;  %v568_v8 = vld [vmem:[#allocation5 + $0x6b8] sm:$0xff]  ;;  %v570_v10 = vld [vmem:[#allocation5 + $0x6c8] sm:$0xff] }
 0x1ba   : > { %5186 = vmatprep.subr.bf16.mxu1 %v5185_v20  ;;  %v459_v20 = vld [vmem:[#allocation5 + $0x350] sm:$0xff]  ;;  %v4969_v13 = vpack.c.bf16 %v568_v8, %v558_v7 }
 0x1bb   : > { %1929 = vmatmul.mubr.f32.vlgmr.msra.gmra.mrb[0].mxu0 %v343_v27 }
 0x1bc   : > { %2237 = vmatmul.mubr.f32.vlgmr.msra.gmra.mrb[0].mxu1 %v343_v27  ;;  %4932 = vmatpush1.bf16.msra.mxu0 %v4931_v28  ;;  %v4951_v27 = vpack.c.bf16 %v467_v19, %v457_v18  ;;  %v5207_v28 = vpack.c.bf16 %v469_v22, %v459_v20  ;;  %v569_v18 = vld [vmem:[#allocation5 + $0x6c0] sm:$0xff]  ;;  %v578_v19 = vld [vmem:[#allocation5 + $0x708] sm:$0xff]  ;;  %v588_v20 = vld [vmem:[#allocation5 + $0x758] sm:$0xff] }
 0x1bd   : > { %5188 = vmatpush1.bf16.msra.mxu1 %v5187_v30  ;;  %1934 = vmatprep.mubr.f32.mxu0 %v352_v29  ;;  %v477_v30 = vld [vmem:[#allocation5 + $0x3e0] sm:$0xff]  ;;  %v590_v22 = vld [vmem:[#allocation5 + $0x768] sm:$0xff]  ;;  %v4973_v25 = vpack.c.bf16 %v588_v20, %v578_v19 }
 0x1be   : > { %4934 = vmatprep.subr.bf16.mxu0 %v4933_v34  ;;  %5190 = vmatprep.subr.bf16.mxu1 %v5189_v35  ;;  %v489_v34 = vld [vmem:[#allocation5 + $0x440] sm:$0xff]  ;;  %v498_v35 = vld [vmem:[#allocation5 + $0x488] sm:$0xff]  ;;  %v4955_v39 = vpack.c.bf16 %v487_v31, %v477_v30 }
 0x1bf   : > { %1935 = vmatmul.mubr.f32.gmra.mrb[2].mxu0 %v351_v41  ;;  %2242 = vmatprep.mubr.f32.mxu1 %v352_v29  ;;  %v4953_v29 = vpack.c.bf16 %v488_v24, %v478_v23  ;;  %v5211_v40 = vpack.c.bf16 %v489_v34, %v479_v32  ;;  %v589_v30 = vld [vmem:[#allocation5 + $0x760] sm:$0xff]  ;;  %v598_v31 = vld [vmem:[#allocation5 + $0x7a8] sm:$0xff]  ;;  %v608_v32 = vld [vmem:[#allocation5 + $0x7f8] sm:$0xff] }
 0x1c0   : > { %4936 = vmatpush1.bf16.msra.mxu0 %v4935_v42  ;;  %2243 = vmatmul.mubr.f32.gmra.mrb[2].mxu1 %v351_v41  ;;  %v4957_v41 = vpack.c.bf16 %v508_v36, %v498_v35  ;;  %v497_v42 = vld [vmem:[#allocation5 + $0x480] sm:$0xff]  ;;  %v610_v34 = vld [vmem:[#allocation5 + $0x808] sm:$0xff]  ;;  %v4977_v37 = vpack.c.bf16 %v608_v32, %v598_v31 }
 0x1c1   : > { %5192 = vmatpush1.bf16.msra.mxu1 %v5191_v43  ;;  %4938 = vmatprep.subr.bf16.mxu0 %v4937_v44  ;;  %v507_v43 = vld [vmem:[#allocation5 + $0x4d0] sm:$0xff] }
 0x1c2   : > { %5194 = vmatprep.subr.bf16.mxu1 %v5193_v48  ;;  %2313 = vmatprep.mubr.f32.mxu0 %v6143_v0  ;;  %v499_v44 = vld [vmem:[#allocation5 + $0x490] sm:$0xff]  ;;  %v528_v48 = vld [vmem:[#allocation5 + $0x578] sm:$0xff]  ;;  %v4959_v51 = vpack.c.bf16 %v507_v43, %v497_v42  ;;  %v609_v42 = vld [vmem:[#allocation5 + $0x800] sm:$0xff] }
 0x1c3   : > { %2621 = vmatprep.mubr.f32.mxu1 %v6143_v0  ;;  %v5215_v52 = vpack.c.bf16 %v509_v46, %v499_v44  ;;  %v4961_v53 = vpack.c.bf16 %v528_v48, %v518_v47  ;;  %v618_v43 = vld [vmem:[#allocation5 + $0x848] sm:$0xff]  ;;  %v628_v44 = vld [vmem:[#allocation5 + $0x898] sm:$0xff] }
 0x1c4   : > { %4940 = vmatpush1.bf16.msra.mxu0 %v4939_v54  ;;  %v517_v54 = vld [vmem:[#allocation5 + $0x520] sm:$0xff]  ;;  %v630_v46 = vld [vmem:[#allocation5 + $0x8a8] sm:$0xff]  ;;  %v4981_v49 = vpack.c.bf16 %v628_v44, %v618_v43 }
 0x1c5   : > { %5196 = vmatpush1.bf16.msra.mxu1 %v5195_v55  ;;  %4942 = vmatprep.subr.bf16.mxu0 %v4941_v56  ;;  %v527_v55 = vld [vmem:[#allocation5 + $0x570] sm:$0xff]  ;;  %v730_v43 = vld [vmem:[#allocation5 + $0xbc8] sm:$0xff] }
 0x1c6   : > { %5198 = vmatprep.subr.bf16.mxu1 %v5197_v60  ;;  %v519_v56 = vld [vmem:[#allocation5 + $0x530] sm:$0xff]  ;;  %v548_v60 = vld [vmem:[#allocation5 + $0x618] sm:$0xff]  ;;  %v4963_v63 = vpack.c.bf16 %v527_v55, %v517_v54  ;;  %v629_v54 = vld [vmem:[#allocation5 + $0x8a0] sm:$0xff] }
 0x1c7   : > { %v5219_v0 = vpack.c.bf16 %v529_v58, %v519_v56  ;;  %v4965_v1 = vpack.c.bf16 %v548_v60, %v538_v59  ;;  %v638_v55 = vld [vmem:[#allocation5 + $0x8e8] sm:$0xff]  ;;  %v648_v56 = vld [vmem:[#allocation5 + $0x938] sm:$0xff] }
 0x1c8   : > { %4944 = vmatpush1.bf16.msra.mxu0 %v4943_v3  ;;  %v547_v3 = vld [vmem:[#allocation5 + $0x610] sm:$0xff]  ;;  %v650_v58 = vld [vmem:[#allocation5 + $0x948] sm:$0xff] }
 0x1c9   : > { %5200 = vmatpush1.bf16.msra.mxu1 %v5199_v4  ;;  %4946 = vmatprep.subr.bf16.mxu0 %v4945_v5  ;;  %v539_v4 = vld [vmem:[#allocation5 + $0x5d0] sm:$0xff]  ;;  %v5221_v5 = vpack.c.bf16 %v550_v62, %v540_v61  ;;  %v4967_v11 = vpack.c.bf16 %v547_v3, %v537_v2  ;;  %v4985_v61 = vpack.c.bf16 %v648_v56, %v638_v55  ;;  %v637_v62 = vld [vmem:[#allocation5 + $0x8e0] sm:$0xff]  ;;  %v658_v3 = vld [vmem:[#allocation5 + $0x988] sm:$0xff] }
 0x1ca   : > { %5202 = vmatprep.subr.bf16.mxu1 %v5201_v9  ;;  %v560_v9 = vld [vmem:[#allocation5 + $0x678] sm:$0xff]  ;;  %v5223_v12 = vpack.c.bf16 %v549_v6, %v539_v4  ;;  %v649_v2 = vld [vmem:[#allocation5 + $0x940] sm:$0xff]  ;;  %v670_v6 = vld [vmem:[#allocation5 + $0x9e8] sm:$0xff] }
 0x1cb   : > { %v668_v4 = vld [vmem:[#allocation5 + $0x9d8] sm:$0xff]  ;;  %v750_v56 = vld [vmem:[#allocation5 + $0xc68] sm:$0xff] }
 0x1cc   : > { %4948 = vmatpush1.bf16.msra.mxu0 %v4947_v15  ;;  %v567_v15 = vld [vmem:[#allocation5 + $0x6b0] sm:$0xff]  ;;  %v740_v55 = vld [vmem:[#allocation5 + $0xc18] sm:$0xff] }
 0x1cd   : > { %5204 = vmatpush1.bf16.msra.mxu1 %v5203_v16  ;;  %4950 = vmatprep.subr.bf16.mxu0 %v4949_v17  ;;  %v559_v16 = vld [vmem:[#allocation5 + $0x670] sm:$0xff]  ;;  %v5225_v17 = vpack.c.bf16 %v570_v10, %v560_v9  ;;  %v4971_v23 = vpack.c.bf16 %v567_v15, %v557_v14  ;;  %v4989_v9 = vpack.c.bf16 %v668_v4, %v658_v3  ;;  %v657_v10 = vld [vmem:[#allocation5 + $0x980] sm:$0xff]  ;;  %v678_v15 = vld [vmem:[#allocation5 + $0xa28] sm:$0xff] }
 0x1ce   : > { %5206 = vmatprep.subr.bf16.mxu1 %v5205_v21  ;;  %v580_v21 = vld [vmem:[#allocation5 + $0x718] sm:$0xff]  ;;  %v5227_v24 = vpack.c.bf16 %v569_v18, %v559_v16  ;;  %v669_v14 = vld [vmem:[#allocation5 + $0x9e0] sm:$0xff]  ;;  %v690_v18 = vld [vmem:[#allocation5 + $0xa88] sm:$0xff] }
 0x1cf   : > { %v688_v16 = vld [vmem:[#allocation5 + $0xa78] sm:$0xff] }
 0x1d0   : > { %4952 = vmatpush1.bf16.msra.mxu0 %v4951_v27  ;;  %v587_v27 = vld [vmem:[#allocation5 + $0x750] sm:$0xff]  ;;  %v768_v3 = vld [vmem:[#allocation5 + $0xcf8] sm:$0xff] }
 0x1d1   : > { %5208 = vmatpush1.bf16.msra.mxu1 %v5207_v28  ;;  %4954 = vmatprep.subr.bf16.mxu0 %v4953_v29  ;;  %v579_v28 = vld [vmem:[#allocation5 + $0x710] sm:$0xff]  ;;  %v5229_v29 = vpack.c.bf16 %v590_v22, %v580_v21  ;;  %v4975_v35 = vpack.c.bf16 %v587_v27, %v577_v26  ;;  %v4993_v21 = vpack.c.bf16 %v688_v16, %v678_v15  ;;  %v677_v22 = vld [vmem:[#allocation5 + $0xa20] sm:$0xff]  ;;  %v698_v27 = vld [vmem:[#allocation5 + $0xac8] sm:$0xff] }
 0x1d2   : > { %5210 = vmatprep.subr.bf16.mxu1 %v5209_v33  ;;  %v600_v33 = vld [vmem:[#allocation5 + $0x7b8] sm:$0xff]  ;;  %v5231_v36 = vpack.c.bf16 %v589_v30, %v579_v28  ;;  %v689_v26 = vld [vmem:[#allocation5 + $0xa80] sm:$0xff]  ;;  %v710_v30 = vld [vmem:[#allocation5 + $0xb28] sm:$0xff] }
 0x1d3   : > { %v708_v28 = vld [vmem:[#allocation5 + $0xb18] sm:$0xff]  ;;  %v778_v15 = vld [vmem:[#allocation5 + $0xd48] sm:$0xff] }
 0x1d4   : > { %4956 = vmatpush1.bf16.msra.mxu0 %v4955_v39  ;;  %v607_v39 = vld [vmem:[#allocation5 + $0x7f0] sm:$0xff]  ;;  %v6147_v4 = vld [vmem:[%s6713_s26 + $0x18] sm:$0xff] }
 0x1d5   : > { %5212 = vmatpush1.bf16.msra.mxu1 %v5211_v40  ;;  %4958 = vmatprep.subr.bf16.mxu0 %v4957_v41  ;;  %v599_v40 = vld [vmem:[#allocation5 + $0x7b0] sm:$0xff]  ;;  %v5233_v41 = vpack.c.bf16 %v610_v34, %v600_v33  ;;  %v4979_v47 = vpack.c.bf16 %v607_v39, %v597_v38  ;;  %v4997_v33 = vpack.c.bf16 %v708_v28, %v698_v27  ;;  %v697_v34 = vld [vmem:[#allocation5 + $0xac0] sm:$0xff]  ;;  %v718_v39 = vld [vmem:[#allocation5 + $0xb68] sm:$0xff] }
 0x1d6   : > { %5214 = vmatprep.subr.bf16.mxu1 %v5213_v45  ;;  %v620_v45 = vld [vmem:[#allocation5 + $0x858] sm:$0xff]  ;;  %v5235_v48 = vpack.c.bf16 %v609_v42, %v599_v40  ;;  %v709_v38 = vld [vmem:[#allocation5 + $0xb20] sm:$0xff]  ;;  %v798_v27 = vld [vmem:[#allocation5 + $0xde8] sm:$0xff] }
 0x1d7   : > { %v728_v40 = vld [vmem:[#allocation5 + $0xbb8] sm:$0xff] }
 0x1d8   : > { %4960 = vmatpush1.bf16.msra.mxu0 %v4959_v51  ;;  %v627_v51 = vld [vmem:[#allocation5 + $0x890] sm:$0xff]  ;;  %v720_v42 = vld [vmem:[#allocation5 + $0xb78] sm:$0xff] }
 0x1d9   : > { %5216 = vmatpush1.bf16.msra.mxu1 %v5215_v52  ;;  %4962 = vmatprep.subr.bf16.mxu0 %v4961_v53  ;;  %v619_v52 = vld [vmem:[#allocation5 + $0x850] sm:$0xff]  ;;  %v5237_v53 = vpack.c.bf16 %v630_v46, %v620_v45  ;;  %v4983_v59 = vpack.c.bf16 %v627_v51, %v617_v50  ;;  %v5001_v46 = vpack.c.bf16 %v728_v40, %v718_v39  ;;  %v729_v51 = vld [vmem:[#allocation5 + $0xbc0] sm:$0xff]  ;;  %v788_v16 = vld [vmem:[#allocation5 + $0xd98] sm:$0xff] }
 0x1da   : > { %5218 = vmatprep.subr.bf16.mxu1 %v5217_v57  ;;  %v640_v57 = vld [vmem:[#allocation5 + $0x8f8] sm:$0xff]  ;;  %v5239_v60 = vpack.c.bf16 %v629_v54, %v619_v52  ;;  %v5257_v50 = vpack.c.bf16 %v730_v43, %v720_v42  ;;  %v738_v52 = vld [vmem:[#allocation5 + $0xc08] sm:$0xff] }
 0x1db   : > { %v6145_v54 = vld [vmem:[%s6713_s26 + $0x48] sm:$0xff]  ;;  %v808_v28 = vld [vmem:[#allocation5 + $0xe38] sm:$0xff] }
 0x1dc   : > { %4964 = vmatpush1.bf16.msra.mxu0 %v4963_v63  ;;  %v647_v63 = vld [vmem:[#allocation5 + $0x930] sm:$0xff]  ;;  %v818_v39 = vld [vmem:[#allocation5 + $0xe88] sm:$0xff]  ;;  %v828_v40 = vld [vmem:[#allocation5 + $0xed8] sm:$0xff] }
 0x1dd   : > { %5220 = vmatpush1.bf16.msra.mxu1 %v5219_v0  ;;  %4966 = vmatprep.subr.bf16.mxu0 %v4965_v1  ;;  %v639_v0 = vld [vmem:[#allocation5 + $0x8f0] sm:$0xff]  ;;  %v5241_v1 = vpack.c.bf16 %v650_v58, %v640_v57  ;;  %v4987_v7 = vpack.c.bf16 %v647_v63, %v637_v62  ;;  %v6146_v57 = vld [vmem:[%s6713_s26 + $0x40] sm:$0xff]  ;;  %v830_v42 = vld [vmem:[#allocation5 + $0xee8] sm:$0xff] }
 0x1de   : > { %5222 = vmatprep.subr.bf16.mxu1 %v5221_v5  ;;  %v660_v5 = vld [vmem:[#allocation5 + $0x998] sm:$0xff]  ;;  %v5243_v8 = vpack.c.bf16 %v649_v2, %v639_v0  ;;  %v747_v62 = vld [vmem:[#allocation5 + $0xc50] sm:$0xff]  ;;  %v5261_v0 = vpack.c.bf16 %v750_v56, %v740_v55  ;;  %v758_v2 = vld [vmem:[#allocation5 + $0xca8] sm:$0xff] }
 0x1df   : > { %v739_v63 = vld [vmem:[#allocation5 + $0xc10] sm:$0xff] }
 0x1e0   : > { %4968 = vmatpush1.bf16.msra.mxu0 %v4967_v11  ;;  %v667_v11 = vld [vmem:[#allocation5 + $0x9d0] sm:$0xff] }
 0x1e1   : > { %5224 = vmatpush1.bf16.msra.mxu1 %v5223_v12  ;;  %4970 = vmatprep.subr.bf16.mxu0 %v4969_v13  ;;  %v659_v12 = vld [vmem:[#allocation5 + $0x990] sm:$0xff]  ;;  %v5245_v13 = vpack.c.bf16 %v670_v6, %v660_v5  ;;  %v4991_v19 = vpack.c.bf16 %v667_v11, %v657_v10  ;;  %v760_v5 = vld [vmem:[#allocation5 + $0xcb8] sm:$0xff]  ;;  %v770_v6 = vld [vmem:[#allocation5 + $0xd08] sm:$0xff] }
 0x1e2   : > { %5226 = vmatprep.subr.bf16.mxu1 %v5225_v17  ;;  %v680_v17 = vld [vmem:[#allocation5 + $0xa38] sm:$0xff]  ;;  %v5247_v20 = vpack.c.bf16 %v669_v14, %v659_v12  ;;  %v757_v10 = vld [vmem:[#allocation5 + $0xca0] sm:$0xff]  ;;  %v767_v11 = vld [vmem:[#allocation5 + $0xcf0] sm:$0xff] }
 0x1e3   : > { %v759_v12 = vld [vmem:[#allocation5 + $0xcb0] sm:$0xff]  ;;  %v769_v14 = vld [vmem:[#allocation5 + $0xd00] sm:$0xff] }
 0x1e4   : > { %4972 = vmatpush1.bf16.msra.mxu0 %v4971_v23  ;;  %v687_v23 = vld [vmem:[#allocation5 + $0xa70] sm:$0xff] }
 0x1e5   : > { %5228 = vmatpush1.bf16.msra.mxu1 %v5227_v24  ;;  %4974 = vmatprep.subr.bf16.mxu0 %v4973_v25  ;;  %v679_v24 = vld [vmem:[#allocation5 + $0xa30] sm:$0xff]  ;;  %v5249_v25 = vpack.c.bf16 %v690_v18, %v680_v17  ;;  %v4995_v31 = vpack.c.bf16 %v687_v23, %v677_v22  ;;  %v780_v17 = vld [vmem:[#allocation5 + $0xd58] sm:$0xff]  ;;  %v790_v18 = vld [vmem:[#allocation5 + $0xda8] sm:$0xff] }
 0x1e6   : > { %5230 = vmatprep.subr.bf16.mxu1 %v5229_v29  ;;  %v700_v29 = vld [vmem:[#allocation5 + $0xad8] sm:$0xff]  ;;  %v5251_v32 = vpack.c.bf16 %v689_v26, %v679_v24  ;;  %v777_v22 = vld [vmem:[#allocation5 + $0xd40] sm:$0xff]  ;;  %v787_v23 = vld [vmem:[#allocation5 + $0xd90] sm:$0xff] }
 0x1e7   : > { %v779_v24 = vld [vmem:[#allocation5 + $0xd50] sm:$0xff]  ;;  %v789_v26 = vld [vmem:[#allocation5 + $0xda0] sm:$0xff] }
 0x1e8   : > { %4976 = vmatpush1.bf16.msra.mxu0 %v4975_v35  ;;  %v707_v35 = vld [vmem:[#allocation5 + $0xb10] sm:$0xff] }
 0x1e9   : > { %5232 = vmatpush1.bf16.msra.mxu1 %v5231_v36  ;;  %4978 = vmatprep.subr.bf16.mxu0 %v4977_v37  ;;  %v699_v36 = vld [vmem:[#allocation5 + $0xad0] sm:$0xff]  ;;  %v5253_v37 = vpack.c.bf16 %v710_v30, %v700_v29  ;;  %v4999_v44 = vpack.c.bf16 %v707_v35, %v697_v34  ;;  %v800_v29 = vld [vmem:[#allocation5 + $0xdf8] sm:$0xff]  ;;  %v810_v30 = vld [vmem:[#allocation5 + $0xe48] sm:$0xff] }
 0x1ea   : > { %5234 = vmatprep.subr.bf16.mxu1 %v5233_v41  ;;  %v6144_v41 = vld [vmem:[%s6713_s26] sm:$0xff]  ;;  %v5255_v45 = vpack.c.bf16 %v709_v38, %v699_v36  ;;  %v807_v35 = vld [vmem:[#allocation5 + $0xe30] sm:$0xff] }
 0x1eb   : > { %v797_v34 = vld [vmem:[#allocation5 + $0xde0] sm:$0xff]  ;;  %v799_v36 = vld [vmem:[#allocation5 + $0xdf0] sm:$0xff] }
 0x1ec   : > { %4980 = vmatpush1.bf16.msra.mxu0 %v4979_v47  ;;  %v717_v47 = vld [vmem:[#allocation5 + $0xb60] sm:$0xff]  ;;  %v5019_v43 = vpack.c.bf16 %v807_v35, %v797_v34  ;;  %v918_v35 = vld [vmem:[#allocation5 + $0x11a8] sm:$0xff] }
 0x1ed   : > { %5236 = vmatpush1.bf16.msra.mxu1 %v5235_v48  ;;  %4982 = vmatprep.subr.bf16.mxu0 %v4981_v49  ;;  %v727_v48 = vld [vmem:[#allocation5 + $0xbb0] sm:$0xff]  ;;  %v809_v38 = vld [vmem:[#allocation5 + $0xe40] sm:$0xff] }
 0x1ee   : > { %5238 = vmatprep.subr.bf16.mxu1 %v5237_v53  ;;  %v719_v49 = vld [vmem:[#allocation5 + $0xb70] sm:$0xff]  ;;  %v748_v53 = vld [vmem:[#allocation5 + $0xc58] sm:$0xff]  ;;  %v5003_v58 = vpack.c.bf16 %v727_v48, %v717_v47  ;;  %v909_v34 = vld [vmem:[#allocation5 + $0x1160] sm:$0xff] }
 0x1ef   : > { %v827_v47 = vld [vmem:[#allocation5 + $0xed0] sm:$0xff] }
 0x1f0   : > { %4984 = vmatpush1.bf16.msra.mxu0 %v4983_v59  ;;  %v5259_v59 = vpack.c.bf16 %v729_v51, %v719_v49  ;;  %v819_v48 = vld [vmem:[#allocation5 + $0xe90] sm:$0xff]  ;;  %v838_v51 = vld [vmem:[#allocation5 + $0xf28] sm:$0xff] }
 0x1f1   : > { %5240 = vmatpush1.bf16.msra.mxu1 %v5239_v60  ;;  %4986 = vmatprep.subr.bf16.mxu0 %v4985_v61  ;;  %v5005_v60 = vpack.c.bf16 %v748_v53, %v738_v52  ;;  %v737_v61 = vld [vmem:[#allocation5 + $0xc00] sm:$0xff]  ;;  %v848_v52 = vld [vmem:[#allocation5 + $0xf78] sm:$0xff] }
 0x1f2   : > { %5242 = vmatprep.subr.bf16.mxu1 %v5241_v1  ;;  %v749_v1 = vld [vmem:[#allocation5 + $0xc60] sm:$0xff]  ;;  %v840_v53 = vld [vmem:[#allocation5 + $0xf38] sm:$0xff] }
 0x1f4   : > { %4988 = vmatpush1.bf16.msra.mxu0 %v4987_v7  ;;  %v5007_v7 = vpack.c.bf16 %v747_v62, %v737_v61  ;;  %v849_v62 = vld [vmem:[#allocation5 + $0xf80] sm:$0xff] }
 0x1f5   : > { %5244 = vmatpush1.bf16.msra.mxu1 %v5243_v8  ;;  %4990 = vmatprep.subr.bf16.mxu0 %v4989_v9  ;;  %v5263_v8 = vpack.c.bf16 %v749_v1, %v739_v63  ;;  %v5009_v9 = vpack.c.bf16 %v768_v3, %v758_v2  ;;  %v858_v63 = vld [vmem:[#allocation5 + $0xfc8] sm:$0xff]  ;;  %v860_v1 = vld [vmem:[#allocation5 + $0xfd8] sm:$0xff] }
 0x1f6   : > { %5246 = vmatprep.subr.bf16.mxu1 %v5245_v13  ;;  %v5265_v13 = vpack.c.bf16 %v770_v6, %v760_v5  ;;  %v870_v2 = vld [vmem:[#allocation5 + $0x1028] sm:$0xff]  ;;  %v857_v6 = vld [vmem:[#allocation5 + $0xfc0] sm:$0xff] }
 0x1f8   : > { %4992 = vmatpush1.bf16.msra.mxu0 %v4991_v19  ;;  %v5011_v19 = vpack.c.bf16 %v767_v11, %v757_v10  ;;  %v869_v10 = vld [vmem:[#allocation5 + $0x1020] sm:$0xff]  ;;  %v878_v11 = vld [vmem:[#allocation5 + $0x1068] sm:$0xff] }
 0x1f9   : > { %5248 = vmatpush1.bf16.msra.mxu1 %v5247_v20  ;;  %4994 = vmatprep.subr.bf16.mxu0 %v4993_v21  ;;  %v5267_v20 = vpack.c.bf16 %v769_v14, %v759_v12  ;;  %v5013_v21 = vpack.c.bf16 %v788_v16, %v778_v15  ;;  %v888_v12 = vld [vmem:[#allocation5 + $0x10b8] sm:$0xff]  ;;  %v890_v14 = vld [vmem:[#allocation5 + $0x10c8] sm:$0xff] }
 0x1fa   : > { %5250 = vmatprep.subr.bf16.mxu1 %v5249_v25  ;;  %v5269_v25 = vpack.c.bf16 %v790_v18, %v780_v17  ;;  %v5033_v17 = vpack.c.bf16 %v888_v12, %v878_v11  ;;  %v877_v18 = vld [vmem:[#allocation5 + $0x1060] sm:$0xff] }
 0x1fb   : > { %2314 = vmatmul.mubr.f32.vlgmr.msra.gmra.mrb[4].mxu0 %v6144_v41 }
 0x1fc   : > { %4996 = vmatpush1.bf16.msra.mxu0 %v4995_v31  ;;  %2622 = vmatmul.mubr.f32.vlgmr.msra.gmra.mrb[4].mxu1 %v6144_v41  ;;  %v5015_v31 = vpack.c.bf16 %v787_v23, %v777_v22  ;;  %v820_v41 = vld [vmem:[#allocation5 + $0xe98] sm:$0xff]  ;;  %v889_v22 = vld [vmem:[#allocation5 + $0x10c0] sm:$0xff]  ;;  %v898_v23 = vld [vmem:[#allocation5 + $0x1108] sm:$0xff] }
 0x1fd   : > { %5252 = vmatpush1.bf16.msra.mxu1 %v5251_v32  ;;  %4998 = vmatprep.subr.bf16.mxu0 %v4997_v33  ;;  %v5271_v32 = vpack.c.bf16 %v789_v26, %v779_v24  ;;  %v5017_v33 = vpack.c.bf16 %v808_v28, %v798_v27  ;;  %v5277_v49 = vpack.c.bf16 %v830_v42, %v820_v41  ;;  %v908_v24 = vld [vmem:[#allocation5 + $0x1158] sm:$0xff]  ;;  %v910_v26 = vld [vmem:[#allocation5 + $0x1168] sm:$0xff]  ;;  %v917_v42 = vld [vmem:[#allocation5 + $0x11a0] sm:$0xff] }
 0x1fe   : > { %5254 = vmatprep.subr.bf16.mxu1 %v5253_v37  ;;  %2319 = vmatprep.mubr.f32.mxu0 %v6145_v54  ;;  %v5273_v37 = vpack.c.bf16 %v810_v30, %v800_v29  ;;  %v5037_v29 = vpack.c.bf16 %v908_v24, %v898_v23  ;;  %v897_v30 = vld [vmem:[#allocation5 + $0x1100] sm:$0xff] }
 0x1ff   : > { %2627 = vmatprep.mubr.f32.mxu1 %v6145_v54  ;;  %2320 = vmatmul.mubr.f32.gmra.mrb[6].mxu0 %v6146_v57  ;;  %v850_v54 = vld [vmem:[#allocation5 + $0xf88] sm:$0xff] }
 0x200   : > { %5000 = vmatpush1.bf16.msra.mxu0 %v4999_v44  ;;  %2628 = vmatmul.mubr.f32.gmra.mrb[6].mxu1 %v6146_v57  ;;  %v5275_v44 = vpack.c.bf16 %v809_v38, %v799_v36  ;;  %v5025_v57 = vpack.c.bf16 %v848_v52, %v838_v51  ;;  %v5281_v61 = vpack.c.bf16 %v850_v54, %v840_v53  ;;  %v928_v36 = vld [vmem:[#allocation5 + $0x11f8] sm:$0xff]  ;;  %v930_v38 = vld [vmem:[#allocation5 + $0x1208] sm:$0xff]  ;;  %v937_v54 = vld [vmem:[#allocation5 + $0x1240] sm:$0xff] }
 0x201   : > { %5256 = vmatpush1.bf16.msra.mxu1 %v5255_v45  ;;  %5002 = vmatprep.subr.bf16.mxu0 %v5001_v46  ;;  %v5021_v45 = vpack.c.bf16 %v828_v40, %v818_v39  ;;  %v817_v46 = vld [vmem:[#allocation5 + $0xe80] sm:$0xff]  ;;  %v5041_v41 = vpack.c.bf16 %v928_v36, %v918_v35 }
 0x202   : > { %5258 = vmatprep.subr.bf16.mxu1 %v5257_v50  ;;  %2390 = vmatprep.mubr.f32.mxu0 %v6147_v4  ;;  %v829_v50 = vld [vmem:[#allocation5 + $0xee0] sm:$0xff]  ;;  %v5023_v55 = vpack.c.bf16 %v827_v47, %v817_v46  ;;  %v938_v47 = vld [vmem:[#allocation5 + $0x1248] sm:$0xff] }
 0x203   : > { %2698 = vmatprep.mubr.f32.mxu1 %v6147_v4  ;;  %v5279_v56 = vpack.c.bf16 %v829_v50, %v819_v48  ;;  %v929_v46 = vld [vmem:[#allocation5 + $0x1200] sm:$0xff]  ;;  %v948_v48 = vld [vmem:[#allocation5 + $0x1298] sm:$0xff]  ;;  %v950_v50 = vld [vmem:[#allocation5 + $0x12a8] sm:$0xff] }
 0x204   : > { %5004 = vmatpush1.bf16.msra.mxu0 %v5003_v58  ;;  %v837_v58 = vld [vmem:[#allocation5 + $0xf20] sm:$0xff]  ;;  %v5045_v53 = vpack.c.bf16 %v948_v48, %v938_v47  ;;  %v1050_v47 = vld [vmem:[#allocation5 + $0x15c8] sm:$0xff] }
 0x205   : > { %5260 = vmatpush1.bf16.msra.mxu1 %v5259_v59  ;;  %5006 = vmatprep.subr.bf16.mxu0 %v5005_v60  ;;  %v847_v59 = vld [vmem:[#allocation5 + $0xf70] sm:$0xff] }
 0x206   : > { %5262 = vmatprep.subr.bf16.mxu1 %v5261_v0  ;;  %v839_v60 = vld [vmem:[#allocation5 + $0xf30] sm:$0xff]  ;;  %v868_v0 = vld [vmem:[#allocation5 + $0x1018] sm:$0xff]  ;;  %v5027_v3 = vpack.c.bf16 %v847_v59, %v837_v58  ;;  %v949_v58 = vld [vmem:[#allocation5 + $0x12a0] sm:$0xff] }
 0x207   : > { %v5283_v4 = vpack.c.bf16 %v849_v62, %v839_v60  ;;  %v5029_v5 = vpack.c.bf16 %v868_v0, %v858_v63  ;;  %v958_v59 = vld [vmem:[#allocation5 + $0x12e8] sm:$0xff]  ;;  %v968_v60 = vld [vmem:[#allocation5 + $0x1338] sm:$0xff] }
 0x208   : > { %5008 = vmatpush1.bf16.msra.mxu0 %v5007_v7  ;;  %v867_v7 = vld [vmem:[#allocation5 + $0x1010] sm:$0xff]  ;;  %v970_v62 = vld [vmem:[#allocation5 + $0x1348] sm:$0xff] }
 0x209   : > { %5264 = vmatpush1.bf16.msra.mxu1 %v5263_v8  ;;  %5010 = vmatprep.subr.bf16.mxu0 %v5009_v9  ;;  %v859_v8 = vld [vmem:[#allocation5 + $0xfd0] sm:$0xff]  ;;  %v5285_v9 = vpack.c.bf16 %v870_v2, %v860_v1  ;;  %v5031_v15 = vpack.c.bf16 %v867_v7, %v857_v6  ;;  %v5049_v1 = vpack.c.bf16 %v968_v60, %v958_v59  ;;  %v957_v2 = vld [vmem:[#allocation5 + $0x12e0] sm:$0xff]  ;;  %v978_v7 = vld [vmem:[#allocation5 + $0x1388] sm:$0xff] }
 0x20a   : > { %5266 = vmatprep.subr.bf16.mxu1 %v5265_v13  ;;  %v880_v13 = vld [vmem:[#allocation5 + $0x1078] sm:$0xff]  ;;  %v5287_v16 = vpack.c.bf16 %v869_v10, %v859_v8  ;;  %v969_v6 = vld [vmem:[#allocation5 + $0x1340] sm:$0xff]  ;;  %v990_v10 = vld [vmem:[#allocation5 + $0x13e8] sm:$0xff] }
 0x20b   : > { %v988_v8 = vld [vmem:[#allocation5 + $0x13d8] sm:$0xff]  ;;  %v1070_v60 = vld [vmem:[#allocation5 + $0x1668] sm:$0xff] }
 0x20c   : > { %5012 = vmatpush1.bf16.msra.mxu0 %v5011_v19  ;;  %v887_v19 = vld [vmem:[#allocation5 + $0x10b0] sm:$0xff]  ;;  %v1060_v59 = vld [vmem:[#allocation5 + $0x1618] sm:$0xff] }
 0x20d   : > { %5268 = vmatpush1.bf16.msra.mxu1 %v5267_v20  ;;  %5014 = vmatprep.subr.bf16.mxu0 %v5013_v21  ;;  %v879_v20 = vld [vmem:[#allocation5 + $0x1070] sm:$0xff]  ;;  %v5289_v21 = vpack.c.bf16 %v890_v14, %v880_v13  ;;  %v5035_v27 = vpack.c.bf16 %v887_v19, %v877_v18  ;;  %v5053_v13 = vpack.c.bf16 %v988_v8, %v978_v7  ;;  %v977_v14 = vld [vmem:[#allocation5 + $0x1380] sm:$0xff]  ;;  %v998_v19 = vld [vmem:[#allocation5 + $0x1428] sm:$0xff] }
 0x20e   : > { %5270 = vmatprep.subr.bf16.mxu1 %v5269_v25  ;;  %v900_v25 = vld [vmem:[#allocation5 + $0x1118] sm:$0xff]  ;;  %v5291_v28 = vpack.c.bf16 %v889_v22, %v879_v20  ;;  %v989_v18 = vld [vmem:[#allocation5 + $0x13e0] sm:$0xff]  ;;  %v1010_v22 = vld [vmem:[#allocation5 + $0x1488] sm:$0xff] }
 0x20f   : > { %v1008_v20 = vld [vmem:[#allocation5 + $0x1478] sm:$0xff]  ;;  %v6151_v8 = vld [vmem:[%s6713_s26 + $0x28] sm:$0xff] }
 0x210   : > { %5016 = vmatpush1.bf16.msra.mxu0 %v5015_v31  ;;  %v907_v31 = vld [vmem:[#allocation5 + $0x1150] sm:$0xff]  ;;  %v1088_v7 = vld [vmem:[#allocation5 + $0x16f8] sm:$0xff] }
 0x211   : > { %5272 = vmatpush1.bf16.msra.mxu1 %v5271_v32  ;;  %5018 = vmatprep.subr.bf16.mxu0 %v5017_v33  ;;  %v899_v32 = vld [vmem:[#allocation5 + $0x1110] sm:$0xff]  ;;  %v5293_v33 = vpack.c.bf16 %v910_v26, %v900_v25  ;;  %v5039_v39 = vpack.c.bf16 %v907_v31, %v897_v30  ;;  %v5057_v25 = vpack.c.bf16 %v1008_v20, %v998_v19  ;;  %v997_v26 = vld [vmem:[#allocation5 + $0x1420] sm:$0xff]  ;;  %v1018_v31 = vld [vmem:[#allocation5 + $0x14c8] sm:$0xff] }
 0x212   : > { %5274 = vmatprep.subr.bf16.mxu1 %v5273_v37  ;;  %v920_v37 = vld [vmem:[#allocation5 + $0x11b8] sm:$0xff]  ;;  %v5295_v40 = vpack.c.bf16 %v909_v34, %v899_v32  ;;  %v1009_v30 = vld [vmem:[#allocation5 + $0x1480] sm:$0xff]  ;;  %v1030_v34 = vld [vmem:[#allocation5 + $0x1528] sm:$0xff] }
 0x213   : > { %v1028_v32 = vld [vmem:[#allocation5 + $0x1518] sm:$0xff]  ;;  %v1098_v19 = vld [vmem:[#allocation5 + $0x1748] sm:$0xff] }
 0x214   : > { %5020 = vmatpush1.bf16.msra.mxu0 %v5019_v43  ;;  %v927_v43 = vld [vmem:[#allocation5 + $0x11f0] sm:$0xff]  ;;  %v1108_v20 = vld [vmem:[#allocation5 + $0x1798] sm:$0xff] }
 0x215   : > { %5276 = vmatpush1.bf16.msra.mxu1 %v5275_v44  ;;  %5022 = vmatprep.subr.bf16.mxu0 %v5021_v45  ;;  %v919_v44 = vld [vmem:[#allocation5 + $0x11b0] sm:$0xff]  ;;  %v5297_v45 = vpack.c.bf16 %v930_v38, %v920_v37  ;;  %v5043_v51 = vpack.c.bf16 %v927_v43, %v917_v42  ;;  %v5061_v37 = vpack.c.bf16 %v1028_v32, %v1018_v31  ;;  %v1017_v38 = vld [vmem:[#allocation5 + $0x14c0] sm:$0xff]  ;;  %v1038_v43 = vld [vmem:[#allocation5 + $0x1568] sm:$0xff] }
 0x216   : > { %5278 = vmatprep.subr.bf16.mxu1 %v5277_v49  ;;  %v940_v49 = vld [vmem:[#allocation5 + $0x1258] sm:$0xff]  ;;  %v5299_v52 = vpack.c.bf16 %v929_v46, %v919_v44  ;;  %v1029_v42 = vld [vmem:[#allocation5 + $0x1520] sm:$0xff]  ;;  %v1118_v31 = vld [vmem:[#allocation5 + $0x17e8] sm:$0xff] }
 0x217   : > { %v1048_v44 = vld [vmem:[#allocation5 + $0x15b8] sm:$0xff] }
 0x218   : > { %5024 = vmatpush1.bf16.msra.mxu0 %v5023_v55  ;;  %v947_v55 = vld [vmem:[#allocation5 + $0x1290] sm:$0xff]  ;;  %v1040_v46 = vld [vmem:[#allocation5 + $0x1578] sm:$0xff] }
 0x219   : > { %5280 = vmatpush1.bf16.msra.mxu1 %v5279_v56  ;;  %5026 = vmatprep.subr.bf16.mxu0 %v5025_v57  ;;  %v939_v56 = vld [vmem:[#allocation5 + $0x1250] sm:$0xff]  ;;  %v5301_v57 = vpack.c.bf16 %v950_v50, %v940_v49  ;;  %v5047_v63 = vpack.c.bf16 %v947_v55, %v937_v54  ;;  %v5065_v50 = vpack.c.bf16 %v1048_v44, %v1038_v43  ;;  %v1049_v55 = vld [vmem:[#allocation5 + $0x15c0] sm:$0xff]  ;;  %v1128_v32 = vld [vmem:[#allocation5 + $0x1838] sm:$0xff] }
 0x21a   : > { %5282 = vmatprep.subr.bf16.mxu1 %v5281_v61  ;;  %v960_v61 = vld [vmem:[#allocation5 + $0x12f8] sm:$0xff]  ;;  %v5303_v0 = vpack.c.bf16 %v949_v58, %v939_v56  ;;  %v5321_v54 = vpack.c.bf16 %v1050_v47, %v1040_v46  ;;  %v1058_v56 = vld [vmem:[#allocation5 + $0x1608] sm:$0xff] }
 0x21b   : > { %v6149_v58 = vld [vmem:[%s6713_s26 + $0x58] sm:$0xff]  ;;  %v1138_v43 = vld [vmem:[#allocation5 + $0x1888] sm:$0xff] }
 0x21c   : > { %5028 = vmatpush1.bf16.msra.mxu0 %v5027_v3  ;;  %v967_v3 = vld [vmem:[#allocation5 + $0x1330] sm:$0xff]  ;;  %v1148_v44 = vld [vmem:[#allocation5 + $0x18d8] sm:$0xff]  ;;  %v1150_v46 = vld [vmem:[#allocation5 + $0x18e8] sm:$0xff] }
 0x21d   : > { %5284 = vmatpush1.bf16.msra.mxu1 %v5283_v4  ;;  %5030 = vmatprep.subr.bf16.mxu0 %v5029_v5  ;;  %v959_v4 = vld [vmem:[#allocation5 + $0x12f0] sm:$0xff]  ;;  %v5305_v5 = vpack.c.bf16 %v970_v62, %v960_v61  ;;  %v5051_v11 = vpack.c.bf16 %v967_v3, %v957_v2 }
 0x21e   : > { %5286 = vmatprep.subr.bf16.mxu1 %v5285_v9  ;;  %v980_v9 = vld [vmem:[#allocation5 + $0x1398] sm:$0xff]  ;;  %v5307_v12 = vpack.c.bf16 %v969_v6, %v959_v4  ;;  %v6150_v61 = vld [vmem:[%s6713_s26 + $0x50] sm:$0xff]  ;;  %v5325_v4 = vpack.c.bf16 %v1070_v60, %v1060_v59  ;;  %v1078_v6 = vld [vmem:[#allocation5 + $0x16a8] sm:$0xff] }
 0x21f   : > { %v1067_v2 = vld [vmem:[#allocation5 + $0x1650] sm:$0xff] }
 0x220   : > { %5032 = vmatpush1.bf16.msra.mxu0 %v5031_v15  ;;  %v987_v15 = vld [vmem:[#allocation5 + $0x13d0] sm:$0xff] }
 0x221   : > { %5288 = vmatpush1.bf16.msra.mxu1 %v5287_v16  ;;  %5034 = vmatprep.subr.bf16.mxu0 %v5033_v17  ;;  %v979_v16 = vld [vmem:[#allocation5 + $0x1390] sm:$0xff]  ;;  %v5309_v17 = vpack.c.bf16 %v990_v10, %v980_v9  ;;  %v5055_v23 = vpack.c.bf16 %v987_v15, %v977_v14  ;;  %v1080_v9 = vld [vmem:[#allocation5 + $0x16b8] sm:$0xff]  ;;  %v1090_v10 = vld [vmem:[#allocation5 + $0x1708] sm:$0xff] }
 0x222   : > { %5290 = vmatprep.subr.bf16.mxu1 %v5289_v21  ;;  %v1000_v21 = vld [vmem:[#allocation5 + $0x1438] sm:$0xff]  ;;  %v5311_v24 = vpack.c.bf16 %v989_v18, %v979_v16  ;;  %v1059_v3 = vld [vmem:[#allocation5 + $0x1610] sm:$0xff]  ;;  %v1077_v14 = vld [vmem:[#allocation5 + $0x16a0] sm:$0xff] }
 0x223   : > { %v1087_v15 = vld [vmem:[#allocation5 + $0x16f0] sm:$0xff]  ;;  %v1089_v18 = vld [vmem:[#allocation5 + $0x1700] sm:$0xff] }
 0x224   : > { %5036 = vmatpush1.bf16.msra.mxu0 %v5035_v27  ;;  %v1007_v27 = vld [vmem:[#allocation5 + $0x1470] sm:$0xff] }
 0x225   : > { %5292 = vmatpush1.bf16.msra.mxu1 %v5291_v28  ;;  %5038 = vmatprep.subr.bf16.mxu0 %v5037_v29  ;;  %v999_v28 = vld [vmem:[#allocation5 + $0x1430] sm:$0xff]  ;;  %v5313_v29 = vpack.c.bf16 %v1010_v22, %v1000_v21  ;;  %v5059_v35 = vpack.c.bf16 %v1007_v27, %v997_v26  ;;  %v1100_v21 = vld [vmem:[#allocation5 + $0x1758] sm:$0xff]  ;;  %v1110_v22 = vld [vmem:[#allocation5 + $0x17a8] sm:$0xff] }
 0x226   : > { %5294 = vmatprep.subr.bf16.mxu1 %v5293_v33  ;;  %v1020_v33 = vld [vmem:[#allocation5 + $0x14d8] sm:$0xff]  ;;  %v5315_v36 = vpack.c.bf16 %v1009_v30, %v999_v28  ;;  %v1079_v16 = vld [vmem:[#allocation5 + $0x16b0] sm:$0xff]  ;;  %v1097_v26 = vld [vmem:[#allocation5 + $0x1740] sm:$0xff] }
 0x227   : > { %v1107_v27 = vld [vmem:[#allocation5 + $0x1790] sm:$0xff]  ;;  %v1109_v30 = vld [vmem:[#allocation5 + $0x17a0] sm:$0xff] }
 0x228   : > { %5040 = vmatpush1.bf16.msra.mxu0 %v5039_v39  ;;  %v1027_v39 = vld [vmem:[#allocation5 + $0x1510] sm:$0xff] }
 0x229   : > { %5296 = vmatpush1.bf16.msra.mxu1 %v5295_v40  ;;  %5042 = vmatprep.subr.bf16.mxu0 %v5041_v41  ;;  %v1019_v40 = vld [vmem:[#allocation5 + $0x14d0] sm:$0xff]  ;;  %v5317_v41 = vpack.c.bf16 %v1030_v34, %v1020_v33  ;;  %v5063_v48 = vpack.c.bf16 %v1027_v39, %v1017_v38  ;;  %v1120_v33 = vld [vmem:[#allocation5 + $0x17f8] sm:$0xff]  ;;  %v1130_v34 = vld [vmem:[#allocation5 + $0x1848] sm:$0xff] }
 0x22a   : > { %5298 = vmatprep.subr.bf16.mxu1 %v5297_v45  ;;  %v6148_v45 = vld [vmem:[%s6713_s26 + $0x10] sm:$0xff]  ;;  %v5319_v49 = vpack.c.bf16 %v1029_v42, %v1019_v40  ;;  %v1117_v38 = vld [vmem:[#allocation5 + $0x17e0] sm:$0xff] }
 0x22b   : > { %v1099_v28 = vld [vmem:[#allocation5 + $0x1750] sm:$0xff]  ;;  %v1129_v42 = vld [vmem:[#allocation5 + $0x1840] sm:$0xff] }
 0x22c   : > { %5044 = vmatpush1.bf16.msra.mxu0 %v5043_v51  ;;  %v1037_v51 = vld [vmem:[#allocation5 + $0x1560] sm:$0xff]  ;;  %v1127_v39 = vld [vmem:[#allocation5 + $0x1830] sm:$0xff] }
 0x22d   : > { %5300 = vmatpush1.bf16.msra.mxu1 %v5299_v52  ;;  %5046 = vmatprep.subr.bf16.mxu0 %v5045_v53  ;;  %v1047_v52 = vld [vmem:[#allocation5 + $0x15b0] sm:$0xff]  ;;  %v5083_v47 = vpack.c.bf16 %v1127_v39, %v1117_v38  ;;  %v1229_v38 = vld [vmem:[#allocation5 + $0x1b60] sm:$0xff]  ;;  %v1238_v39 = vld [vmem:[#allocation5 + $0x1ba8] sm:$0xff] }
 0x22e   : > { %5302 = vmatprep.subr.bf16.mxu1 %v5301_v57  ;;  %v1039_v53 = vld [vmem:[#allocation5 + $0x1570] sm:$0xff]  ;;  %v1068_v57 = vld [vmem:[#allocation5 + $0x1658] sm:$0xff]  ;;  %v5067_v62 = vpack.c.bf16 %v1047_v52, %v1037_v51 }
 0x22f   : > { %v1119_v40 = vld [vmem:[#allocation5 + $0x17f0] sm:$0xff] }
 0x230   : > { %5048 = vmatpush1.bf16.msra.mxu0 %v5047_v63  ;;  %v5323_v63 = vpack.c.bf16 %v1049_v55, %v1039_v53  ;;  %v1147_v51 = vld [vmem:[#allocation5 + $0x18d0] sm:$0xff]  ;;  %v1158_v55 = vld [vmem:[#allocation5 + $0x1928] sm:$0xff] }
 0x231   : > { %5304 = vmatpush1.bf16.msra.mxu1 %v5303_v0  ;;  %5050 = vmatprep.subr.bf16.mxu0 %v5049_v1  ;;  %v5069_v0 = vpack.c.bf16 %v1068_v57, %v1058_v56  ;;  %v1057_v1 = vld [vmem:[#allocation5 + $0x1600] sm:$0xff]  ;;  %v1139_v52 = vld [vmem:[#allocation5 + $0x1890] sm:$0xff]  ;;  %v1168_v56 = vld [vmem:[#allocation5 + $0x1978] sm:$0xff] }
 0x232   : > { %5306 = vmatprep.subr.bf16.mxu1 %v5305_v5  ;;  %v1069_v5 = vld [vmem:[#allocation5 + $0x1660] sm:$0xff]  ;;  %v1160_v57 = vld [vmem:[#allocation5 + $0x1938] sm:$0xff] }
 0x234   : > { %5052 = vmatpush1.bf16.msra.mxu0 %v5051_v11  ;;  %v5071_v11 = vpack.c.bf16 %v1067_v2, %v1057_v1  ;;  %v1169_v2 = vld [vmem:[#allocation5 + $0x1980] sm:$0xff] }
 0x235   : > { %5308 = vmatpush1.bf16.msra.mxu1 %v5307_v12  ;;  %5054 = vmatprep.subr.bf16.mxu0 %v5053_v13  ;;  %v5327_v12 = vpack.c.bf16 %v1069_v5, %v1059_v3  ;;  %v5073_v13 = vpack.c.bf16 %v1088_v7, %v1078_v6  ;;  %v1178_v3 = vld [vmem:[#allocation5 + $0x19c8] sm:$0xff]  ;;  %v1180_v5 = vld [vmem:[#allocation5 + $0x19d8] sm:$0xff] }
 0x236   : > { %5310 = vmatprep.subr.bf16.mxu1 %v5309_v17  ;;  %v5329_v17 = vpack.c.bf16 %v1090_v10, %v1080_v9  ;;  %v1190_v6 = vld [vmem:[#allocation5 + $0x1a28] sm:$0xff]  ;;  %v1177_v10 = vld [vmem:[#allocation5 + $0x19c0] sm:$0xff] }
 0x238   : > { %5056 = vmatpush1.bf16.msra.mxu0 %v5055_v23  ;;  %v5075_v23 = vpack.c.bf16 %v1087_v15, %v1077_v14  ;;  %v1189_v14 = vld [vmem:[#allocation5 + $0x1a20] sm:$0xff]  ;;  %v1198_v15 = vld [vmem:[#allocation5 + $0x1a68] sm:$0xff] }
 0x239   : > { %5312 = vmatpush1.bf16.msra.mxu1 %v5311_v24  ;;  %5058 = vmatprep.subr.bf16.mxu0 %v5057_v25  ;;  %v5331_v24 = vpack.c.bf16 %v1089_v18, %v1079_v16  ;;  %v5077_v25 = vpack.c.bf16 %v1108_v20, %v1098_v19  ;;  %v1208_v16 = vld [vmem:[#allocation5 + $0x1ab8] sm:$0xff]  ;;  %v1210_v18 = vld [vmem:[#allocation5 + $0x1ac8] sm:$0xff] }
 0x23a   : > { %5314 = vmatprep.subr.bf16.mxu1 %v5313_v29  ;;  %v5333_v29 = vpack.c.bf16 %v1110_v22, %v1100_v21  ;;  %v5097_v21 = vpack.c.bf16 %v1208_v16, %v1198_v15  ;;  %v1197_v22 = vld [vmem:[#allocation5 + $0x1a60] sm:$0xff] }
 0x23b   : > { %2391 = vmatmul.mubr.f32.vlgmr.msra.gmra.mrb[4].mxu0 %v6148_v45 }
 0x23c   : > { %5060 = vmatpush1.bf16.msra.mxu0 %v5059_v35  ;;  %2699 = vmatmul.mubr.f32.vlgmr.msra.gmra.mrb[4].mxu1 %v6148_v45  ;;  %v5079_v35 = vpack.c.bf16 %v1107_v27, %v1097_v26  ;;  %v1140_v45 = vld [vmem:[#allocation5 + $0x1898] sm:$0xff]  ;;  %v1209_v26 = vld [vmem:[#allocation5 + $0x1ac0] sm:$0xff]  ;;  %v1218_v27 = vld [vmem:[#allocation5 + $0x1b08] sm:$0xff] }
 0x23d   : > { %5316 = vmatpush1.bf16.msra.mxu1 %v5315_v36  ;;  %5062 = vmatprep.subr.bf16.mxu0 %v5061_v37  ;;  %v5335_v36 = vpack.c.bf16 %v1109_v30, %v1099_v28  ;;  %v5081_v37 = vpack.c.bf16 %v1128_v32, %v1118_v31  ;;  %v5341_v53 = vpack.c.bf16 %v1150_v46, %v1140_v45  ;;  %v1228_v28 = vld [vmem:[#allocation5 + $0x1b58] sm:$0xff]  ;;  %v1230_v30 = vld [vmem:[#allocation5 + $0x1b68] sm:$0xff]  ;;  %v1237_v46 = vld [vmem:[#allocation5 + $0x1ba0] sm:$0xff] }
 0x23e   : > { %5318 = vmatprep.subr.bf16.mxu1 %v5317_v41  ;;  %2396 = vmatprep.mubr.f32.mxu0 %v6149_v58  ;;  %v5337_v41 = vpack.c.bf16 %v1130_v34, %v1120_v33  ;;  %v5101_v33 = vpack.c.bf16 %v1228_v28, %v1218_v27  ;;  %v1217_v34 = vld [vmem:[#allocation5 + $0x1b00] sm:$0xff] }
 0x23f   : > { %2704 = vmatprep.mubr.f32.mxu1 %v6149_v58  ;;  %2397 = vmatmul.mubr.f32.gmra.mrb[6].mxu0 %v6150_v61  ;;  %v1170_v58 = vld [vmem:[#allocation5 + $0x1988] sm:$0xff] }
 0x240   : > { %5064 = vmatpush1.bf16.msra.mxu0 %v5063_v48  ;;  %2705 = vmatmul.mubr.f32.gmra.mrb[6].mxu1 %v6150_v61  ;;  %v5339_v48 = vpack.c.bf16 %v1129_v42, %v1119_v40  ;;  %v5089_v61 = vpack.c.bf16 %v1168_v56, %v1158_v55  ;;  %v5345_v1 = vpack.c.bf16 %v1170_v58, %v1160_v57  ;;  %v1248_v40 = vld [vmem:[#allocation5 + $0x1bf8] sm:$0xff]  ;;  %v1250_v42 = vld [vmem:[#allocation5 + $0x1c08] sm:$0xff]  ;;  %v1257_v58 = vld [vmem:[#allocation5 + $0x1c40] sm:$0xff] }
 0x241   : > { %5320 = vmatpush1.bf16.msra.mxu1 %v5319_v49  ;;  %5066 = vmatprep.subr.bf16.mxu0 %v5065_v50  ;;  %v5085_v49 = vpack.c.bf16 %v1148_v44, %v1138_v43  ;;  %v1137_v50 = vld [vmem:[#allocation5 + $0x1880] sm:$0xff]  ;;  %v5105_v45 = vpack.c.bf16 %v1248_v40, %v1238_v39 }
 0x242   : > { %5322 = vmatprep.subr.bf16.mxu1 %v5321_v54  ;;  %2467 = vmatprep.mubr.f32.mxu0 %v6151_v8  ;;  %v1149_v54 = vld [vmem:[#allocation5 + $0x18e0] sm:$0xff]  ;;  %v5087_v59 = vpack.c.bf16 %v1147_v51, %v1137_v50  ;;  %v1258_v51 = vld [vmem:[#allocation5 + $0x1c48] sm:$0xff] }
 0x243   : > { %2775 = vmatprep.mubr.f32.mxu1 %v6151_v8  ;;  %v5343_v60 = vpack.c.bf16 %v1149_v54, %v1139_v52  ;;  %v1249_v50 = vld [vmem:[#allocation5 + $0x1c00] sm:$0xff]  ;;  %v1268_v52 = vld [vmem:[#allocation5 + $0x1c98] sm:$0xff]  ;;  %v1270_v54 = vld [vmem:[#allocation5 + $0x1ca8] sm:$0xff] }
 0x244   : > { %5068 = vmatpush1.bf16.msra.mxu0 %v5067_v62  ;;  %v1157_v62 = vld [vmem:[#allocation5 + $0x1920] sm:$0xff]  ;;  %v5109_v57 = vpack.c.bf16 %v1268_v52, %v1258_v51  ;;  %v1370_v51 = vld [vmem:[#allocation5 + $0x1fc8] sm:$0xff] }
 0x245   : > { %5324 = vmatpush1.bf16.msra.mxu1 %v5323_v63  ;;  %5070 = vmatprep.subr.bf16.mxu0 %v5069_v0  ;;  %v1167_v63 = vld [vmem:[#allocation5 + $0x1970] sm:$0xff] }
 0x246   : > { %5326 = vmatprep.subr.bf16.mxu1 %v5325_v4  ;;  %v1159_v0 = vld [vmem:[#allocation5 + $0x1930] sm:$0xff]  ;;  %v1188_v4 = vld [vmem:[#allocation5 + $0x1a18] sm:$0xff]  ;;  %v5091_v7 = vpack.c.bf16 %v1167_v63, %v1157_v62  ;;  %v1269_v62 = vld [vmem:[#allocation5 + $0x1ca0] sm:$0xff] }
 0x247   : > { %v5347_v8 = vpack.c.bf16 %v1169_v2, %v1159_v0  ;;  %v5093_v9 = vpack.c.bf16 %v1188_v4, %v1178_v3  ;;  %v1278_v63 = vld [vmem:[#allocation5 + $0x1ce8] sm:$0xff]  ;;  %v1288_v0 = vld [vmem:[#allocation5 + $0x1d38] sm:$0xff] }
 0x248   : > { %5072 = vmatpush1.bf16.msra.mxu0 %v5071_v11  ;;  %v1187_v11 = vld [vmem:[#allocation5 + $0x1a10] sm:$0xff]  ;;  %v1290_v2 = vld [vmem:[#allocation5 + $0x1d48] sm:$0xff] }
 0x249   : > { %5328 = vmatpush1.bf16.msra.mxu1 %v5327_v12  ;;  %5074 = vmatprep.subr.bf16.mxu0 %v5073_v13  ;;  %v1179_v12 = vld [vmem:[#allocation5 + $0x19d0] sm:$0xff]  ;;  %v5349_v13 = vpack.c.bf16 %v1190_v6, %v1180_v5  ;;  %v5095_v19 = vpack.c.bf16 %v1187_v11, %v1177_v10  ;;  %v5113_v5 = vpack.c.bf16 %v1288_v0, %v1278_v63  ;;  %v1277_v6 = vld [vmem:[#allocation5 + $0x1ce0] sm:$0xff]  ;;  %v1298_v11 = vld [vmem:[#allocation5 + $0x1d88] sm:$0xff] }
 0x24a   : > { %5330 = vmatprep.subr.bf16.mxu1 %v5329_v17  ;;  %v1200_v17 = vld [vmem:[#allocation5 + $0x1a78] sm:$0xff]  ;;  %v5351_v20 = vpack.c.bf16 %v1189_v14, %v1179_v12  ;;  %v1289_v10 = vld [vmem:[#allocation5 + $0x1d40] sm:$0xff]  ;;  %v1310_v14 = vld [vmem:[#allocation5 + $0x1de8] sm:$0xff] }
 0x24b   : > { %v1308_v12 = vld [vmem:[#allocation5 + $0x1dd8] sm:$0xff]  ;;  %v1390_v0 = vld [vmem:[#allocation5 + $0x2068] sm:$0xff] }
 0x24c   : > { %5076 = vmatpush1.bf16.msra.mxu0 %v5075_v23  ;;  %v1207_v23 = vld [vmem:[#allocation5 + $0x1ab0] sm:$0xff]  ;;  %v1380_v63 = vld [vmem:[#allocation5 + $0x2018] sm:$0xff] }
 0x24d   : > { %5332 = vmatpush1.bf16.msra.mxu1 %v5331_v24  ;;  %5078 = vmatprep.subr.bf16.mxu0 %v5077_v25  ;;  %v1199_v24 = vld [vmem:[#allocation5 + $0x1a70] sm:$0xff]  ;;  %v5353_v25 = vpack.c.bf16 %v1210_v18, %v1200_v17  ;;  %v5099_v31 = vpack.c.bf16 %v1207_v23, %v1197_v22  ;;  %v5117_v17 = vpack.c.bf16 %v1308_v12, %v1298_v11  ;;  %v1297_v18 = vld [vmem:[#allocation5 + $0x1d80] sm:$0xff]  ;;  %v1318_v23 = vld [vmem:[#allocation5 + $0x1e28] sm:$0xff] }
 0x24e   : > { %5334 = vmatprep.subr.bf16.mxu1 %v5333_v29  ;;  %v1220_v29 = vld [vmem:[#allocation5 + $0x1b18] sm:$0xff]  ;;  %v5355_v32 = vpack.c.bf16 %v1209_v26, %v1199_v24  ;;  %v1309_v22 = vld [vmem:[#allocation5 + $0x1de0] sm:$0xff]  ;;  %v1330_v26 = vld [vmem:[#allocation5 + $0x1e88] sm:$0xff] }
 0x24f   : > { %v1328_v24 = vld [vmem:[#allocation5 + $0x1e78] sm:$0xff] }
 0x250   : > { %5080 = vmatpush1.bf16.msra.mxu0 %v5079_v35  ;;  %v1227_v35 = vld [vmem:[#allocation5 + $0x1b50] sm:$0xff]  ;;  %v1408_v11 = vld [vmem:[#allocation5 + $0x20f8] sm:$0xff] }
 0x251   : > { %5336 = vmatpush1.bf16.msra.mxu1 %v5335_v36  ;;  %5082 = vmatprep.subr.bf16.mxu0 %v5081_v37  ;;  %v1219_v36 = vld [vmem:[#allocation5 + $0x1b10] sm:$0xff]  ;;  %v5357_v37 = vpack.c.bf16 %v1230_v30, %v1220_v29  ;;  %v5103_v43 = vpack.c.bf16 %v1227_v35, %v1217_v34  ;;  %v5121_v29 = vpack.c.bf16 %v1328_v24, %v1318_v23  ;;  %v1317_v30 = vld [vmem:[#allocation5 + $0x1e20] sm:$0xff]  ;;  %v1338_v35 = vld [vmem:[#allocation5 + $0x1ec8] sm:$0xff] }
 0x252   : > { %5338 = vmatprep.subr.bf16.mxu1 %v5337_v41  ;;  %v1240_v41 = vld [vmem:[#allocation5 + $0x1bb8] sm:$0xff]  ;;  %v5359_v44 = vpack.c.bf16 %v1229_v38, %v1219_v36  ;;  %v1329_v34 = vld [vmem:[#allocation5 + $0x1e80] sm:$0xff]  ;;  %v1350_v38 = vld [vmem:[#allocation5 + $0x1f28] sm:$0xff] }
 0x253   : > { %v1348_v36 = vld [vmem:[#allocation5 + $0x1f18] sm:$0xff]  ;;  %v1418_v23 = vld [vmem:[#allocation5 + $0x2148] sm:$0xff] }
 0x254   : > { %5084 = vmatpush1.bf16.msra.mxu0 %v5083_v47  ;;  %v1247_v47 = vld [vmem:[#allocation5 + $0x1bf0] sm:$0xff]  ;;  %v6155_v12 = vld [vmem:[%s6713_s26 + $0x38] sm:$0xff] }
 0x255   : > { %5340 = vmatpush1.bf16.msra.mxu1 %v5339_v48  ;;  %5086 = vmatprep.subr.bf16.mxu0 %v5085_v49  ;;  %v1239_v48 = vld [vmem:[#allocation5 + $0x1bb0] sm:$0xff]  ;;  %v5361_v49 = vpack.c.bf16 %v1250_v42, %v1240_v41  ;;  %v5107_v55 = vpack.c.bf16 %v1247_v47, %v1237_v46  ;;  %v5125_v41 = vpack.c.bf16 %v1348_v36, %v1338_v35  ;;  %v1337_v42 = vld [vmem:[#allocation5 + $0x1ec0] sm:$0xff]  ;;  %v1358_v47 = vld [vmem:[#allocation5 + $0x1f68] sm:$0xff] }
 0x256   : > { %5342 = vmatprep.subr.bf16.mxu1 %v5341_v53  ;;  %v1260_v53 = vld [vmem:[#allocation5 + $0x1c58] sm:$0xff]  ;;  %v5363_v56 = vpack.c.bf16 %v1249_v50, %v1239_v48  ;;  %v1349_v46 = vld [vmem:[#allocation5 + $0x1f20] sm:$0xff]  ;;  %v1438_v35 = vld [vmem:[#allocation5 + $0x21e8] sm:$0xff] }
 0x257   : > { %v1368_v48 = vld [vmem:[#allocation5 + $0x1fb8] sm:$0xff] }
 0x258   : > { %5088 = vmatpush1.bf16.msra.mxu0 %v5087_v59  ;;  %v1267_v59 = vld [vmem:[#allocation5 + $0x1c90] sm:$0xff]  ;;  %v1360_v50 = vld [vmem:[#allocation5 + $0x1f78] sm:$0xff] }
 0x259   : > { %5344 = vmatpush1.bf16.msra.mxu1 %v5343_v60  ;;  %5090 = vmatprep.subr.bf16.mxu0 %v5089_v61  ;;  %v1259_v60 = vld [vmem:[#allocation5 + $0x1c50] sm:$0xff]  ;;  %v5365_v61 = vpack.c.bf16 %v1270_v54, %v1260_v53  ;;  %v5111_v3 = vpack.c.bf16 %v1267_v59, %v1257_v58  ;;  %v5129_v54 = vpack.c.bf16 %v1368_v48, %v1358_v47  ;;  %v1369_v59 = vld [vmem:[#allocation5 + $0x1fc0] sm:$0xff]  ;;  %v1428_v24 = vld [vmem:[#allocation5 + $0x2198] sm:$0xff] }
 0x25a   : > { %5346 = vmatprep.subr.bf16.mxu1 %v5345_v1  ;;  %v1280_v1 = vld [vmem:[#allocation5 + $0x1cf8] sm:$0xff]  ;;  %v5367_v4 = vpack.c.bf16 %v1269_v62, %v1259_v60  ;;  %v5385_v58 = vpack.c.bf16 %v1370_v51, %v1360_v50  ;;  %v1378_v60 = vld [vmem:[#allocation5 + $0x2008] sm:$0xff]  ;;  %v1449_v47 = vld [vmem:[#allocation5 + $0x2240] sm:$0xff] }
 0x25b   : > { %v6153_v62 = vld [vmem:[%s6713_s26 + $0x68] sm:$0xff]  ;;  %v1448_v36 = vld [vmem:[#allocation5 + $0x2238] sm:$0xff] }
 0x25c   : > { %5092 = vmatpush1.bf16.msra.mxu0 %v5091_v7  ;;  %v1287_v7 = vld [vmem:[#allocation5 + $0x1d30] sm:$0xff]  ;;  %v1458_v48 = vld [vmem:[#allocation5 + $0x2288] sm:$0xff] }
 0x25d   : > { %5348 = vmatpush1.bf16.msra.mxu1 %v5347_v8  ;;  %5094 = vmatprep.subr.bf16.mxu0 %v5093_v9  ;;  %v1279_v8 = vld [vmem:[#allocation5 + $0x1cf0] sm:$0xff]  ;;  %v5369_v9 = vpack.c.bf16 %v1290_v2, %v1280_v1  ;;  %v5115_v15 = vpack.c.bf16 %v1287_v7, %v1277_v6  ;;  %v6154_v1 = vld [vmem:[%s6713_s26 + $0x60] sm:$0xff] }
 0x25e   : > { %5350 = vmatprep.subr.bf16.mxu1 %v5349_v13  ;;  %v1300_v13 = vld [vmem:[#allocation5 + $0x1d98] sm:$0xff]  ;;  %v5371_v16 = vpack.c.bf16 %v1289_v10, %v1279_v8  ;;  %v1387_v6 = vld [vmem:[#allocation5 + $0x2050] sm:$0xff]  ;;  %v5389_v8 = vpack.c.bf16 %v1390_v0, %v1380_v63  ;;  %v1398_v10 = vld [vmem:[#allocation5 + $0x20a8] sm:$0xff] }
 0x25f   : > { %v1379_v7 = vld [vmem:[#allocation5 + $0x2010] sm:$0xff]  ;;  %v1469_v63 = vld [vmem:[#allocation5 + $0x22e0] sm:$0xff]  ;;  %v1478_v0 = vld [vmem:[#allocation5 + $0x2328] sm:$0xff] }
 0x260   : > { %5096 = vmatpush1.bf16.msra.mxu0 %v5095_v19  ;;  %v1307_v19 = vld [vmem:[#allocation5 + $0x1dd0] sm:$0xff] }
 0x261   : > { %5352 = vmatpush1.bf16.msra.mxu1 %v5351_v20  ;;  %5098 = vmatprep.subr.bf16.mxu0 %v5097_v21  ;;  %v1299_v20 = vld [vmem:[#allocation5 + $0x1d90] sm:$0xff]  ;;  %v5373_v21 = vpack.c.bf16 %v1310_v14, %v1300_v13  ;;  %v5119_v27 = vpack.c.bf16 %v1307_v19, %v1297_v18  ;;  %v1400_v13 = vld [vmem:[#allocation5 + $0x20b8] sm:$0xff]  ;;  %v1410_v14 = vld [vmem:[#allocation5 + $0x2108] sm:$0xff] }
 0x262   : > { %5354 = vmatprep.subr.bf16.mxu1 %v5353_v25  ;;  %v1320_v25 = vld [vmem:[#allocation5 + $0x1e38] sm:$0xff]  ;;  %v5375_v28 = vpack.c.bf16 %v1309_v22, %v1299_v20  ;;  %v1397_v18 = vld [vmem:[#allocation5 + $0x20a0] sm:$0xff]  ;;  %v1407_v19 = vld [vmem:[#allocation5 + $0x20f0] sm:$0xff] }
 0x263   : > { %v1399_v20 = vld [vmem:[#allocation5 + $0x20b0] sm:$0xff]  ;;  %v1409_v22 = vld [vmem:[#allocation5 + $0x2100] sm:$0xff] }
 0x264   : > { %5100 = vmatpush1.bf16.msra.mxu0 %v5099_v31  ;;  %v1327_v31 = vld [vmem:[#allocation5 + $0x1e70] sm:$0xff] }
 0x265   : > { %5356 = vmatpush1.bf16.msra.mxu1 %v5355_v32  ;;  %5102 = vmatprep.subr.bf16.mxu0 %v5101_v33  ;;  %v1319_v32 = vld [vmem:[#allocation5 + $0x1e30] sm:$0xff]  ;;  %v5377_v33 = vpack.c.bf16 %v1330_v26, %v1320_v25  ;;  %v5123_v39 = vpack.c.bf16 %v1327_v31, %v1317_v30  ;;  %v1420_v25 = vld [vmem:[#allocation5 + $0x2158] sm:$0xff]  ;;  %v1430_v26 = vld [vmem:[#allocation5 + $0x21a8] sm:$0xff] }
 0x266   : > { %5358 = vmatprep.subr.bf16.mxu1 %v5357_v37  ;;  %v1340_v37 = vld [vmem:[#allocation5 + $0x1ed8] sm:$0xff]  ;;  %v5379_v40 = vpack.c.bf16 %v1329_v34, %v1319_v32  ;;  %v1417_v30 = vld [vmem:[#allocation5 + $0x2140] sm:$0xff]  ;;  %v1427_v31 = vld [vmem:[#allocation5 + $0x2190] sm:$0xff] }
 0x267   : > { %v1419_v32 = vld [vmem:[#allocation5 + $0x2150] sm:$0xff]  ;;  %v1429_v34 = vld [vmem:[#allocation5 + $0x21a0] sm:$0xff] }
 0x268   : > { %5104 = vmatpush1.bf16.msra.mxu0 %v5103_v43  ;;  %v1347_v43 = vld [vmem:[#allocation5 + $0x1f10] sm:$0xff] }
 0x269   : > { %5360 = vmatpush1.bf16.msra.mxu1 %v5359_v44  ;;  %5106 = vmatprep.subr.bf16.mxu0 %v5105_v45  ;;  %v1339_v44 = vld [vmem:[#allocation5 + $0x1ed0] sm:$0xff]  ;;  %v5381_v45 = vpack.c.bf16 %v1350_v38, %v1340_v37  ;;  %v5127_v52 = vpack.c.bf16 %v1347_v43, %v1337_v42  ;;  %v1440_v37 = vld [vmem:[#allocation5 + $0x21f8] sm:$0xff]  ;;  %v1450_v38 = vld [vmem:[#allocation5 + $0x2248] sm:$0xff] }
 0x26a   : > { %5362 = vmatprep.subr.bf16.mxu1 %v5361_v49  ;;  %v6152_v49 = vld [vmem:[%s6713_s26 + $0x20] sm:$0xff]  ;;  %v5383_v53 = vpack.c.bf16 %v1349_v46, %v1339_v44  ;;  %v1447_v43 = vld [vmem:[#allocation5 + $0x2230] sm:$0xff]  ;;  %v5401_v46 = vpack.c.bf16 %v1450_v38, %v1440_v37 }
 0x26b   : > { %v1437_v42 = vld [vmem:[#allocation5 + $0x21e0] sm:$0xff]  ;;  %v1439_v44 = vld [vmem:[#allocation5 + $0x21f0] sm:$0xff] }
 0x26c   : > { %5108 = vmatpush1.bf16.msra.mxu0 %v5107_v55  ;;  %v1357_v55 = vld [vmem:[#allocation5 + $0x1f60] sm:$0xff] }
 0x26d   : > { %5364 = vmatpush1.bf16.msra.mxu1 %v5363_v56  ;;  %5110 = vmatprep.subr.bf16.mxu0 %v5109_v57  ;;  %v1367_v56 = vld [vmem:[#allocation5 + $0x1fb0] sm:$0xff]  ;;  %v1529_v38 = vld [vmem:[#allocation5 + $0x24c0] sm:$0xff] }
 0x26e   : > { %5366 = vmatprep.subr.bf16.mxu1 %v5365_v61  ;;  %v1359_v57 = vld [vmem:[#allocation5 + $0x1f70] sm:$0xff]  ;;  %v1388_v61 = vld [vmem:[#allocation5 + $0x2058] sm:$0xff]  ;;  %v5131_v2 = vpack.c.bf16 %v1367_v56, %v1357_v55  ;;  %v5147_v55 = vpack.c.bf16 %v1447_v43, %v1437_v42  ;;  %v5403_v56 = vpack.c.bf16 %v1449_v47, %v1439_v44  ;;  %v1550_v42 = vld [vmem:[#allocation5 + $0x2568] sm:$0xff] }
 0x26f   : > { %v1537_v47 = vld [vmem:[#allocation5 + $0x2500] sm:$0xff] }
 0x270   : > { %5112 = vmatpush1.bf16.msra.mxu0 %v5111_v3  ;;  %v5387_v3 = vpack.c.bf16 %v1369_v59, %v1359_v57  ;;  %v1467_v59 = vld [vmem:[#allocation5 + $0x22d0] sm:$0xff] }
 0x271   : > { %5368 = vmatpush1.bf16.msra.mxu1 %v5367_v4  ;;  %5114 = vmatprep.subr.bf16.mxu0 %v5113_v5  ;;  %v5133_v4 = vpack.c.bf16 %v1388_v61, %v1378_v60  ;;  %v1377_v5 = vld [vmem:[#allocation5 + $0x2000] sm:$0xff]  ;;  %v1459_v60 = vld [vmem:[#allocation5 + $0x2290] sm:$0xff] }
 0x272   : > { %5370 = vmatprep.subr.bf16.mxu1 %v5369_v9  ;;  %v1389_v9 = vld [vmem:[#allocation5 + $0x2060] sm:$0xff] }
 0x274   : > { %5116 = vmatpush1.bf16.msra.mxu0 %v5115_v15  ;;  %v5135_v15 = vpack.c.bf16 %v1387_v6, %v1377_v5 }
 0x275   : > { %5372 = vmatpush1.bf16.msra.mxu1 %v5371_v16  ;;  %5118 = vmatprep.subr.bf16.mxu0 %v5117_v17  ;;  %v5391_v16 = vpack.c.bf16 %v1389_v9, %v1379_v7  ;;  %v5137_v17 = vpack.c.bf16 %v1408_v11, %v1398_v10  ;;  %v1477_v10 = vld [vmem:[#allocation5 + $0x2320] sm:$0xff]  ;;  %v1487_v11 = vld [vmem:[#allocation5 + $0x2370] sm:$0xff] }
 0x276   : > { %5374 = vmatprep.subr.bf16.mxu1 %v5373_v21  ;;  %v5393_v21 = vpack.c.bf16 %v1410_v14, %v1400_v13  ;;  %v1489_v14 = vld [vmem:[#allocation5 + $0x2380] sm:$0xff] }
 0x278   : > { %5120 = vmatpush1.bf16.msra.mxu0 %v5119_v27  ;;  %v5139_v27 = vpack.c.bf16 %v1407_v19, %v1397_v18  ;;  %v1510_v18 = vld [vmem:[#allocation5 + $0x2428] sm:$0xff]  ;;  %v5155_v19 = vpack.c.bf16 %v1487_v11, %v1477_v10 }
 0x279   : > { %5376 = vmatpush1.bf16.msra.mxu1 %v5375_v28  ;;  %5122 = vmatprep.subr.bf16.mxu0 %v5121_v29  ;;  %v5395_v28 = vpack.c.bf16 %v1409_v22, %v1399_v20  ;;  %v5141_v29 = vpack.c.bf16 %v1428_v24, %v1418_v23  ;;  %v1497_v22 = vld [vmem:[#allocation5 + $0x23c0] sm:$0xff]  ;;  %v1507_v23 = vld [vmem:[#allocation5 + $0x2410] sm:$0xff]  ;;  %v1590_v10 = vld [vmem:[#allocation5 + $0x26a8] sm:$0xff] }
 0x27a   : > { %5378 = vmatprep.subr.bf16.mxu1 %v5377_v33  ;;  %v5397_v33 = vpack.c.bf16 %v1430_v26, %v1420_v25  ;;  %v1499_v24 = vld [vmem:[#allocation5 + $0x23d0] sm:$0xff]  ;;  %v1509_v26 = vld [vmem:[#allocation5 + $0x2420] sm:$0xff] }
 0x27b   : > { %2468 = vmatmul.mubr.f32.vlgmr.msra.gmra.mrb[4].mxu0 %v6152_v49 }
 0x27c   : > { %5124 = vmatpush1.bf16.msra.mxu0 %v5123_v39  ;;  %2776 = vmatmul.mubr.f32.vlgmr.msra.gmra.mrb[4].mxu1 %v6152_v49  ;;  %v5143_v39 = vpack.c.bf16 %v1427_v31, %v1417_v30  ;;  %v1468_v49 = vld [vmem:[#allocation5 + $0x22d8] sm:$0xff]  ;;  %v1530_v30 = vld [vmem:[#allocation5 + $0x24c8] sm:$0xff]  ;;  %v5159_v31 = vpack.c.bf16 %v1507_v23, %v1497_v22 }
 0x27d   : > { %5380 = vmatpush1.bf16.msra.mxu1 %v5379_v40  ;;  %5126 = vmatprep.subr.bf16.mxu0 %v5125_v41  ;;  %v5399_v40 = vpack.c.bf16 %v1429_v34, %v1419_v32  ;;  %v5145_v41 = vpack.c.bf16 %v1448_v36, %v1438_v35  ;;  %v5149_v57 = vpack.c.bf16 %v1468_v49, %v1458_v48  ;;  %v1517_v34 = vld [vmem:[#allocation5 + $0x2460] sm:$0xff]  ;;  %v1527_v35 = vld [vmem:[#allocation5 + $0x24b0] sm:$0xff]  ;;  %v1610_v22 = vld [vmem:[#allocation5 + $0x2748] sm:$0xff] }
 0x27e   : > { %5382 = vmatprep.subr.bf16.mxu1 %v5381_v45  ;;  %2473 = vmatprep.mubr.f32.mxu0 %v6153_v62  ;;  %v5415_v32 = vpack.c.bf16 %v1509_v26, %v1499_v24  ;;  %v1519_v36 = vld [vmem:[#allocation5 + $0x2470] sm:$0xff]  ;;  %v5163_v43 = vpack.c.bf16 %v1527_v35, %v1517_v34  ;;  %v1597_v26 = vld [vmem:[#allocation5 + $0x26e0] sm:$0xff]  ;;  %v1630_v34 = vld [vmem:[#allocation5 + $0x27e8] sm:$0xff] }
 0x27f   : > { %2781 = vmatprep.mubr.f32.mxu1 %v6153_v62  ;;  %2474 = vmatmul.mubr.f32.gmra.mrb[6].mxu0 %v6154_v1  ;;  %v5419_v44 = vpack.c.bf16 %v1529_v38, %v1519_v36  ;;  %v1547_v48 = vld [vmem:[#allocation5 + $0x2550] sm:$0xff]  ;;  %v1617_v38 = vld [vmem:[#allocation5 + $0x2780] sm:$0xff] }
 0x280   : > { %5128 = vmatpush1.bf16.msra.mxu0 %v5127_v52  ;;  %2782 = vmatmul.mubr.f32.gmra.mrb[6].mxu1 %v6154_v1  ;;  %v1460_v52 = vld [vmem:[#allocation5 + $0x2298] sm:$0xff]  ;;  %v1539_v49 = vld [vmem:[#allocation5 + $0x2510] sm:$0xff] }
 0x281   : > { %5384 = vmatpush1.bf16.msra.mxu1 %v5383_v53  ;;  %5130 = vmatprep.subr.bf16.mxu0 %v5129_v54  ;;  %v1470_v53 = vld [vmem:[#allocation5 + $0x22e8] sm:$0xff]  ;;  %v1488_v1 = vld [vmem:[#allocation5 + $0x2378] sm:$0xff] }
 0x282   : > { %5386 = vmatprep.subr.bf16.mxu1 %v5385_v58  ;;  %2544 = vmatprep.mubr.f32.mxu0 %v6155_v12  ;;  %v1457_v58 = vld [vmem:[#allocation5 + $0x2280] sm:$0xff]  ;;  %v5405_v62 = vpack.c.bf16 %v1470_v53, %v1460_v52  ;;  %v5153_v9 = vpack.c.bf16 %v1488_v1, %v1478_v0  ;;  %v1567_v0 = vld [vmem:[#allocation5 + $0x25f0] sm:$0xff] }
 0x283   : > { %2852 = vmatprep.mubr.f32.mxu1 %v6155_v12  ;;  %v5151_v6 = vpack.c.bf16 %v1467_v59, %v1457_v58  ;;  %v1479_v12 = vld [vmem:[#allocation5 + $0x2330] sm:$0xff]  ;;  %v1549_v53 = vld [vmem:[#allocation5 + $0x2560] sm:$0xff]  ;;  %v1570_v58 = vld [vmem:[#allocation5 + $0x2608] sm:$0xff]  ;;  %v5167_v59 = vpack.c.bf16 %v1547_v48, %v1537_v47 }
 0x284   : > { %5132 = vmatpush1.bf16.msra.mxu0 %v5131_v2  ;;  %v5411_v20 = vpack.c.bf16 %v1489_v14, %v1479_v12  ;;  %v1559_v1 = vld [vmem:[#allocation5 + $0x25b0] sm:$0xff]  ;;  %v1577_v14 = vld [vmem:[#allocation5 + $0x2640] sm:$0xff] }
 0x285   : > { %5388 = vmatpush1.bf16.msra.mxu1 %v5387_v3  ;;  %5134 = vmatprep.subr.bf16.mxu0 %v5133_v4  ;;  %v1480_v3 = vld [vmem:[#allocation5 + $0x2338] sm:$0xff]  ;;  %v1490_v4 = vld [vmem:[#allocation5 + $0x2388] sm:$0xff] }
 0x286   : > { %5390 = vmatprep.subr.bf16.mxu1 %v5389_v8  ;;  %v5407_v8 = vpack.c.bf16 %v1469_v63, %v1459_v60  ;;  %v5409_v13 = vpack.c.bf16 %v1490_v4, %v1480_v3  ;;  %v5423_v60 = vpack.c.bf16 %v1549_v53, %v1539_v49  ;;  %v1557_v63 = vld [vmem:[#allocation5 + $0x25a0] sm:$0xff]  ;;  %v382_v53 = vld [vmem:[#allocation5 + $0xe8] sm:$0xff] }
 0x287   : > { %v1569_v4 = vld [vmem:[#allocation5 + $0x2600] sm:$0xff]  ;;  %v5171_v11 = vpack.c.bf16 %v1567_v0, %v1557_v63  ;;  %v6156_v63 = vld [vmem:[%s6713_s26 + $0x30] sm:$0xff] }
 0x288   : > { %5136 = vmatpush1.bf16.msra.mxu0 %v5135_v15  ;;  %v1498_v15 = vld [vmem:[#allocation5 + $0x23c8] sm:$0xff]  ;;  %v5427_v12 = vpack.c.bf16 %v1569_v4, %v1559_v1  ;;  %v361_v49 = vld [vmem:[#allocation5 + $0x40] sm:$0xff]  ;;  %v6157_v1 = vld [vmem:[%s6713_s26 + $0x78] sm:$0xff] }
 0x289   : > { %5392 = vmatpush1.bf16.msra.mxu1 %v5391_v16  ;;  %5138 = vmatprep.subr.bf16.mxu0 %v5137_v17  ;;  %v1508_v16 = vld [vmem:[#allocation5 + $0x2418] sm:$0xff]  ;;  %v401_v4 = vld [vmem:[#allocation5 + $0x180] sm:$0xff] }
 0x28a   : > { %5394 = vmatprep.subr.bf16.mxu1 %v5393_v21  ;;  %v1500_v17 = vld [vmem:[#allocation5 + $0x23d8] sm:$0xff]  ;;  %v5157_v21 = vpack.c.bf16 %v1508_v16, %v1498_v15  ;;  %v1587_v15 = vld [vmem:[#allocation5 + $0x2690] sm:$0xff] }
 0x28b   : > { %v5413_v25 = vpack.c.bf16 %v1510_v18, %v1500_v17  ;;  %v1579_v16 = vld [vmem:[#allocation5 + $0x2650] sm:$0xff]  ;;  %v1589_v18 = vld [vmem:[#allocation5 + $0x26a0] sm:$0xff]  ;;  %v5175_v23 = vpack.c.bf16 %v1587_v15, %v1577_v14  ;;  %v6159_v15 = vld [vmem:[%s6713_s26 + $0x8] sm:$0xff] }
 0x28c   : > { %5140 = vmatpush1.bf16.msra.mxu0 %v5139_v27  ;;  %v1518_v27 = vld [vmem:[#allocation5 + $0x2468] sm:$0xff]  ;;  %v5431_v24 = vpack.c.bf16 %v1589_v18, %v1579_v16  ;;  %v431_v14 = vld [vmem:[#allocation5 + $0x270] sm:$0xff] }
 0x28d   : > { %5396 = vmatpush1.bf16.msra.mxu1 %v5395_v28  ;;  %5142 = vmatprep.subr.bf16.mxu0 %v5141_v29  ;;  %v1528_v28 = vld [vmem:[#allocation5 + $0x24b8] sm:$0xff]  ;;  %v442_v16 = vld [vmem:[#allocation5 + $0x2c8] sm:$0xff] }
 0x28e   : > { %v6760_v45 = vpop.f32.mrb[0].mxu0  ;;  %5398 = vmatprep.subr.bf16.mxu1 %v5397_v33  ;;  %v1520_v29 = vld [vmem:[#allocation5 + $0x2478] sm:$0xff]  ;;  %v5161_v33 = vpack.c.bf16 %v1528_v28, %v1518_v27  ;;  %v1607_v27 = vld [vmem:[#allocation5 + $0x2730] sm:$0xff] }
 0x28f   : > { %v6762_v50 = vpop.f32.mrb[0].mxu1  ;;  %v6764_v51 = vpop.f32.mrb[1].mxu0  ;;  %v5417_v37 = vpack.c.bf16 %v1530_v30, %v1520_v29  ;;  %v1599_v28 = vld [vmem:[#allocation5 + $0x26f0] sm:$0xff]  ;;  %v1609_v30 = vld [vmem:[#allocation5 + $0x2740] sm:$0xff]  ;;  %v5179_v35 = vpack.c.bf16 %v1607_v27, %v1597_v26 }
 0x290   : > { %v6766_v54 = vpop.f32.mrb[1].mxu1  ;;  %5144 = vmatpush1.bf16.msra.mxu0 %v5143_v39  ;;  %v1538_v39 = vld [vmem:[#allocation5 + $0x2508] sm:$0xff]  ;;  %v5435_v36 = vpack.c.bf16 %v1609_v30, %v1599_v28  ;;  %v461_v26 = vld [vmem:[#allocation5 + $0x360] sm:$0xff]  ;;  %v471_v27 = vld [vmem:[#allocation5 + $0x3b0] sm:$0xff] }
 0x291   : > { %5400 = vmatpush1.bf16.msra.mxu1 %v5399_v40  ;;  %5146 = vmatprep.subr.bf16.mxu0 %v5145_v41  ;;  %v1548_v40 = vld [vmem:[#allocation5 + $0x2558] sm:$0xff]  ;;  %v482_v28 = vld [vmem:[#allocation5 + $0x408] sm:$0xff]  ;;  %v5463_v30 = vpack.c.bf16 %v471_v27, %v461_v26 }
 0x292   : > { %v6768_v61 = vpop.f32.mrb[2].mxu0  ;;  %5402 = vmatprep.subr.bf16.mxu1 %v5401_v46  ;;  %v1540_v41 = vld [vmem:[#allocation5 + $0x2518] sm:$0xff]  ;;  %v5165_v46 = vpack.c.bf16 %v1548_v40, %v1538_v39  ;;  %v1627_v39 = vld [vmem:[#allocation5 + $0x27d0] sm:$0xff]  ;;  %v662_v26 = vld [vmem:[#allocation5 + $0x9a8] sm:$0xff] }
 0x293   : > { %v6770_v2 = vpop.f32.mrb[3].mxu0  ;;  %v6772_v5 = vpop.f32.mrb[2].mxu1  ;;  %v5421_v52 = vpack.c.bf16 %v1550_v42, %v1540_v41  ;;  %v1619_v40 = vld [vmem:[#allocation5 + $0x2790] sm:$0xff]  ;;  %v1629_v42 = vld [vmem:[#allocation5 + $0x27e0] sm:$0xff]  ;;  %v672_v27 = vld [vmem:[#allocation5 + $0x9f8] sm:$0xff] }
 0x294   : > { %5148 = vmatpush1.bf16.msra.mxu0 %v5147_v55  ;;  %v6774_v7 = vpop.f32.mrb[3].mxu1  ;;  %v1558_v55 = vld [vmem:[#allocation5 + $0x25a8] sm:$0xff]  ;;  %v5439_v47 = vpack.c.bf16 %v1629_v42, %v1619_v40 }
 0x295   : > { %5404 = vmatpush1.bf16.msra.mxu1 %v5403_v56  ;;  %5150 = vmatprep.subr.bf16.mxu0 %v5149_v57  ;;  %v1568_v56 = vld [vmem:[#allocation5 + $0x25f8] sm:$0xff]  ;;  %v522_v40 = vld [vmem:[#allocation5 + $0x548] sm:$0xff] }
 0x296   : > { %5406 = vmatprep.subr.bf16.mxu1 %v5405_v62  ;;  %v1560_v57 = vld [vmem:[#allocation5 + $0x25b8] sm:$0xff]  ;;  %v5169_v62 = vpack.c.bf16 %v1568_v56, %v1558_v55 }
 0x297   : > { %v5425_v3 = vpack.c.bf16 %v1570_v58, %v1560_v57  ;;  %v392_v55 = vld [vmem:[#allocation5 + $0x138] sm:$0xff]  ;;  %v381_v57 = vld [vmem:[#allocation5 + $0xe0] sm:$0xff]  ;;  %v391_v58 = vld [vmem:[#allocation5 + $0x130] sm:$0xff] }
 0x298   : > { %5152 = vmatpush1.bf16.msra.mxu0 %v5151_v6  ;;  %v1578_v6 = vld [vmem:[#allocation5 + $0x2648] sm:$0xff]  ;;  %v5447_v0 = vpack.c.bf16 %v391_v58, %v381_v57  ;;  %v572_v57 = vld [vmem:[#allocation5 + $0x6d8] sm:$0xff] }
 0x299   : > { %5408 = vmatpush1.bf16.msra.mxu1 %v5407_v8  ;;  %5154 = vmatprep.subr.bf16.mxu0 %v5153_v9  ;;  %v1588_v8 = vld [vmem:[#allocation5 + $0x2698] sm:$0xff] }
 0x29a   : > { %5410 = vmatprep.subr.bf16.mxu1 %v5409_v13  ;;  %v1580_v9 = vld [vmem:[#allocation5 + $0x2658] sm:$0xff]  ;;  %v5173_v13 = vpack.c.bf16 %v1588_v8, %v1578_v6  ;;  %v411_v6 = vld [vmem:[#allocation5 + $0x1d0] sm:$0xff]  ;;  %v422_v8 = vld [vmem:[#allocation5 + $0x228] sm:$0xff] }
 0x29b   : > { %v5429_v17 = vpack.c.bf16 %v1590_v10, %v1580_v9  ;;  %v432_v9 = vld [vmem:[#allocation5 + $0x278] sm:$0xff]  ;;  %v6158_v10 = vld [vmem:[%s6713_s26 + $0x70] sm:$0xff] }
 0x29c   : > { %5156 = vmatpush1.bf16.msra.mxu0 %v5155_v19  ;;  %v1598_v19 = vld [vmem:[#allocation5 + $0x26e8] sm:$0xff] }
 0x29d   : > { %5412 = vmatpush1.bf16.msra.mxu1 %v5411_v20  ;;  %5158 = vmatprep.subr.bf16.mxu0 %v5157_v21  ;;  %v1608_v20 = vld [vmem:[#allocation5 + $0x2738] sm:$0xff] }
 0x29e   : > { %5414 = vmatprep.subr.bf16.mxu1 %v5413_v25  ;;  %v1600_v21 = vld [vmem:[#allocation5 + $0x26f8] sm:$0xff]  ;;  %v5177_v25 = vpack.c.bf16 %v1608_v20, %v1598_v19  ;;  %v441_v20 = vld [vmem:[#allocation5 + $0x2c0] sm:$0xff] }
 0x29f   : > { %v5433_v29 = vpack.c.bf16 %v1610_v22, %v1600_v21  ;;  %v451_v21 = vld [vmem:[#allocation5 + $0x310] sm:$0xff]  ;;  %v462_v22 = vld [vmem:[#allocation5 + $0x368] sm:$0xff] }
 0x2a0   : > { %5160 = vmatpush1.bf16.msra.mxu0 %v5159_v31  ;;  %v1618_v31 = vld [vmem:[#allocation5 + $0x2788] sm:$0xff] }
 0x2a1   : > { %5416 = vmatpush1.bf16.msra.mxu1 %v5415_v32  ;;  %5162 = vmatprep.subr.bf16.mxu0 %v5161_v33  ;;  %v1628_v32 = vld [vmem:[#allocation5 + $0x27d8] sm:$0xff] }
 0x2a2   : > { %5418 = vmatprep.subr.bf16.mxu1 %v5417_v37  ;;  %v1620_v33 = vld [vmem:[#allocation5 + $0x2798] sm:$0xff]  ;;  %v5181_v37 = vpack.c.bf16 %v1628_v32, %v1618_v31  ;;  %v481_v32 = vld [vmem:[#allocation5 + $0x400] sm:$0xff] }
 0x2a3   : > { %v5437_v41 = vpack.c.bf16 %v1630_v34, %v1620_v33  ;;  %v491_v33 = vld [vmem:[#allocation5 + $0x450] sm:$0xff]  ;;  %v502_v34 = vld [vmem:[#allocation5 + $0x4a8] sm:$0xff] }
 0x2a4   : > { %5164 = vmatpush1.bf16.msra.mxu0 %v5163_v43  ;;  %v362_v43 = vld [vmem:[#allocation5 + $0x48] sm:$0xff] }
 0x2a5   : > { %5420 = vmatpush1.bf16.msra.mxu1 %v5419_v44  ;;  %5166 = vmatprep.subr.bf16.mxu0 %v5165_v46  ;;  %v372_v44 = vld [vmem:[#allocation5 + $0x98] sm:$0xff]  ;;  %v5183_v46 = vpack.c.bf16 %v1627_v39, %v1617_v38  ;;  %v501_v38 = vld [vmem:[#allocation5 + $0x4a0] sm:$0xff]  ;;  %v511_v39 = vld [vmem:[#allocation5 + $0x4f0] sm:$0xff] }
 0x2a6   : > { %5422 = vmatprep.subr.bf16.mxu1 %v5421_v52  ;;  %v5441_v48 = vpack.c.bf16 %v372_v44, %v362_v43  ;;  %v371_v52 = vld [vmem:[#allocation5 + $0x90] sm:$0xff]  ;;  %v5471_v42 = vpack.c.bf16 %v511_v39, %v501_v38  ;;  %v521_v44 = vld [vmem:[#allocation5 + $0x540] sm:$0xff]  ;;  %v702_v38 = vld [vmem:[#allocation5 + $0xae8] sm:$0xff] }
 0x2a7   : > { %v5443_v56 = vpack.c.bf16 %v371_v52, %v361_v49  ;;  %v712_v39 = vld [vmem:[#allocation5 + $0xb38] sm:$0xff] }
 0x2a8   : > { %5168 = vmatpush1.bf16.msra.mxu0 %v5167_v59  ;;  %v5445_v59 = vpack.c.bf16 %v392_v55, %v382_v53  ;;  %v541_v53 = vld [vmem:[#allocation5 + $0x5e0] sm:$0xff]  ;;  %v551_v55 = vld [vmem:[#allocation5 + $0x630] sm:$0xff] }
 0x2a9   : > { %5424 = vmatpush1.bf16.msra.mxu1 %v5423_v60  ;;  %5170 = vmatprep.subr.bf16.mxu0 %v5169_v62  ;;  %v402_v60 = vld [vmem:[#allocation5 + $0x188] sm:$0xff]  ;;  %v412_v62 = vld [vmem:[#allocation5 + $0x1d8] sm:$0xff]  ;;  %v5479_v58 = vpack.c.bf16 %v551_v55, %v541_v53  ;;  %v721_v53 = vld [vmem:[#allocation5 + $0xb80] sm:$0xff] }
 0x2aa   : > { %5426 = vmatprep.subr.bf16.mxu1 %v5425_v3  ;;  %v5449_v3 = vpack.c.bf16 %v412_v62, %v402_v60  ;;  %v561_v60 = vld [vmem:[#allocation5 + $0x680] sm:$0xff]  ;;  %v571_v62 = vld [vmem:[#allocation5 + $0x6d0] sm:$0xff] }
 0x2ab   : > { %v731_v55 = vld [vmem:[#allocation5 + $0xbd0] sm:$0xff] }
 0x2ac   : > { %5172 = vmatpush1.bf16.msra.mxu0 %v5171_v11  ;;  %v5451_v11 = vpack.c.bf16 %v411_v6, %v401_v4  ;;  %v581_v4 = vld [vmem:[#allocation5 + $0x720] sm:$0xff]  ;;  %v591_v6 = vld [vmem:[#allocation5 + $0x770] sm:$0xff] }
 0x2ad   : > { %5428 = vmatpush1.bf16.msra.mxu1 %v5427_v12  ;;  %5174 = vmatprep.subr.bf16.mxu0 %v5173_v13  ;;  %v5453_v12 = vpack.c.bf16 %v432_v9, %v422_v8  ;;  %v421_v13 = vld [vmem:[#allocation5 + $0x220] sm:$0xff]  ;;  %v602_v8 = vld [vmem:[#allocation5 + $0x7c8] sm:$0xff]  ;;  %v612_v9 = vld [vmem:[#allocation5 + $0x818] sm:$0xff] }
 0x2ae   : > { %5430 = vmatprep.subr.bf16.mxu1 %v5429_v17  ;;  %v452_v17 = vld [vmem:[#allocation5 + $0x318] sm:$0xff]  ;;  %v5455_v18 = vpack.c.bf16 %v431_v14, %v421_v13  ;;  %v611_v13 = vld [vmem:[#allocation5 + $0x810] sm:$0xff]  ;;  %v622_v14 = vld [vmem:[#allocation5 + $0x868] sm:$0xff] }
 0x2af   : > { %v5457_v19 = vpack.c.bf16 %v452_v17, %v442_v16 }
 0x2b0   : > { %5176 = vmatpush1.bf16.msra.mxu0 %v5175_v23  ;;  %v472_v23 = vld [vmem:[#allocation5 + $0x3b8] sm:$0xff] }
 0x2b1   : > { %5432 = vmatpush1.bf16.msra.mxu1 %v5431_v24  ;;  %5178 = vmatprep.subr.bf16.mxu0 %v5177_v25  ;;  %v5459_v24 = vpack.c.bf16 %v451_v21, %v441_v20  ;;  %v5461_v25 = vpack.c.bf16 %v472_v23, %v462_v22  ;;  %v642_v20 = vld [vmem:[#allocation5 + $0x908] sm:$0xff]  ;;  %v652_v21 = vld [vmem:[#allocation5 + $0x958] sm:$0xff] }
 0x2b2   : > { %5434 = vmatprep.subr.bf16.mxu1 %v5433_v29  ;;  %v492_v29 = vld [vmem:[#allocation5 + $0x458] sm:$0xff]  ;;  %v5497_v23 = vpack.c.bf16 %v652_v21, %v642_v20  ;;  %v771_v20 = vld [vmem:[#allocation5 + $0xd10] sm:$0xff] }
 0x2b3   : > { %v5465_v31 = vpack.c.bf16 %v492_v29, %v482_v28  ;;  %v5501_v29 = vpack.c.bf16 %v672_v27, %v662_v26 }
 0x2b4   : > { %5180 = vmatpush1.bf16.msra.mxu0 %v5179_v35  ;;  %v512_v35 = vld [vmem:[#allocation5 + $0x4f8] sm:$0xff] }
 0x2b5   : > { %5436 = vmatpush1.bf16.msra.mxu1 %v5435_v36  ;;  %5182 = vmatprep.subr.bf16.mxu0 %v5181_v37  ;;  %v5467_v36 = vpack.c.bf16 %v491_v33, %v481_v32  ;;  %v5469_v37 = vpack.c.bf16 %v512_v35, %v502_v34  ;;  %v682_v32 = vld [vmem:[#allocation5 + $0xa48] sm:$0xff]  ;;  %v692_v33 = vld [vmem:[#allocation5 + $0xa98] sm:$0xff] }
 0x2b6   : > { %5438 = vmatprep.subr.bf16.mxu1 %v5437_v41  ;;  %v532_v41 = vld [vmem:[#allocation5 + $0x598] sm:$0xff]  ;;  %v5505_v35 = vpack.c.bf16 %v692_v33, %v682_v32  ;;  %v791_v32 = vld [vmem:[#allocation5 + $0xdb0] sm:$0xff] }
 0x2b7   : > { %v5473_v43 = vpack.c.bf16 %v532_v41, %v522_v40  ;;  %v5509_v41 = vpack.c.bf16 %v712_v39, %v702_v38 }
 0x2b8   : > { %5184 = vmatpush1.bf16.msra.mxu0 %v5183_v46  ;;  %v531_v46 = vld [vmem:[#allocation5 + $0x590] sm:$0xff] }
 0x2b9   : > { %5440 = vmatpush1.bf16.msra.mxu1 %v5439_v47  ;;  %5442 = vmatprep.subr.bf16.mxu0 %v5441_v48  ;;  %v542_v47 = vld [vmem:[#allocation5 + $0x5e8] sm:$0xff]  ;;  %v552_v48 = vld [vmem:[#allocation5 + $0x638] sm:$0xff]  ;;  %v5475_v49 = vpack.c.bf16 %v531_v46, %v521_v44 }
 0x2ba   : > { %v5477_v52 = vpack.c.bf16 %v552_v48, %v542_v47  ;;  %v722_v44 = vld [vmem:[#allocation5 + $0xb88] sm:$0xff]  ;;  %v732_v46 = vld [vmem:[#allocation5 + $0xbd8] sm:$0xff]  ;;  %v6160_v47 = vld [vmem:[%s6713_s26] sm:$0xff] }
 0x2bb   : > { %2545 = vmatmul.mubr.f32.vlgmr.msra.gmra.mrb[4].mxu0 %v6156_v63 }
 0x2bc   : > { %2853 = vmatmul.mubr.f32.vlgmr.msra.gmra.mrb[4].mxu1 %v6156_v63  ;;  %5444 = vmatpush1.bf16.msra.mxu0 %v5443_v56  ;;  %v562_v56 = vld [vmem:[#allocation5 + $0x688] sm:$0xff] }
 0x2bd   : > { %2550 = vmatprep.mubr.f32.mxu0 %v6157_v1  ;;  %2858 = vmatprep.mubr.f32.mxu1 %v6157_v1  ;;  %v582_v63 = vld [vmem:[#allocation5 + $0x728] sm:$0xff]  ;;  %v5483_v1 = vpack.c.bf16 %v571_v62, %v561_v60  ;;  %v5515_v62 = vpack.c.bf16 %v731_v55, %v721_v53 }
 0x2be   : > { %5446 = vmatprep.subr.bf16.mxu0 %v5445_v59  ;;  %v5481_v59 = vpack.c.bf16 %v572_v57, %v562_v56  ;;  %v742_v56 = vld [vmem:[#allocation5 + $0xc28] sm:$0xff]  ;;  %v752_v57 = vld [vmem:[#allocation5 + $0xc78] sm:$0xff] }
 0x2bf   : > { %2551 = vmatmul.mubr.f32.gmra.mrb[6].mxu0 %v6158_v10  ;;  %v3416_v60 = vld [vmem:[#allocation10 + $0x20] sm:$0xff] }
 0x2c0   : > { %2859 = vmatmul.mubr.f32.gmra.mrb[6].mxu1 %v6158_v10  ;;  %5448 = vmatpush1.bf16.msra.mxu0 %v5447_v0  ;;  %v592_v0 = vld [vmem:[#allocation5 + $0x778] sm:$0xff]  ;;  %v5487_v10 = vpack.c.bf16 %v591_v6, %v581_v4  ;;  %v5517_v4 = vpack.c.bf16 %v752_v57, %v742_v56  ;;  %v741_v6 = vld [vmem:[#allocation5 + $0xc20] sm:$0xff]  ;;  %v3436_v56 = vld [vmem:[#allocation10 + $0xc0] sm:$0xff] }
 0x2c1   : > { %5450 = vmatprep.subr.bf16.mxu0 %v5449_v3  ;;  %2929 = vmatprep.mubr.f32.mxu0 %v6159_v15  ;;  %v5485_v3 = vpack.c.bf16 %v592_v0, %v582_v63  ;;  %v632_v15 = vld [vmem:[#allocation5 + $0x8b8] sm:$0xff]  ;;  %v3439_v57 = vld [vmem:[#allocation10 + $0xd8] sm:$0xff] }
 0x2c2   : > { %v5493_v17 = vpack.c.bf16 %v632_v15, %v622_v14  ;;  %v6163_v63 = vld [vmem:[%s6713_s26 + $0x18] sm:$0xff] }
 0x2c4   : > { %5452 = vmatpush1.bf16.msra.mxu0 %v5451_v11  ;;  %v5489_v11 = vpack.c.bf16 %v612_v9, %v602_v8  ;;  %v751_v8 = vld [vmem:[#allocation5 + $0xc70] sm:$0xff] }
 0x2c5   : > { %5454 = vmatprep.subr.bf16.mxu0 %v5453_v12  ;;  %v601_v12 = vld [vmem:[#allocation5 + $0x7c0] sm:$0xff]  ;;  %v5519_v14 = vpack.c.bf16 %v751_v8, %v741_v6 }
 0x2c6   : > { %v5491_v16 = vpack.c.bf16 %v611_v13, %v601_v12  ;;  %v3419_v12 = vld [vmem:[#allocation10 + $0x38] sm:$0xff]  ;;  %v3422_v13 = vld [vmem:[#allocation10 + $0x50] sm:$0xff] }
 0x2c7   : > { %v5701_v15 = vpack.c.bf16 %v3422_v13, %v3419_v12  ;;  %v3446_v6 = vld [vmem:[#allocation10 + $0x110] sm:$0xff]  ;;  %v3445_v12 = vld [vmem:[#allocation10 + $0x108] sm:$0xff]  ;;  %v862_v13 = vld [vmem:[#allocation5 + $0xfe8] sm:$0xff] }
 0x2c8   : > { %5456 = vmatpush1.bf16.msra.mxu0 %v5455_v18  ;;  %v621_v18 = vld [vmem:[#allocation5 + $0x860] sm:$0xff] }
 0x2c9   : > { %5458 = vmatprep.subr.bf16.mxu0 %v5457_v19  ;;  %v631_v19 = vld [vmem:[#allocation5 + $0x8b0] sm:$0xff] }
 0x2ca   : > { %v5495_v22 = vpack.c.bf16 %v631_v19, %v621_v18  ;;  %v761_v19 = vld [vmem:[#allocation5 + $0xcc0] sm:$0xff] }
 0x2cb   : > { %v5523_v26 = vpack.c.bf16 %v771_v20, %v761_v19  ;;  %v3452_v19 = vld [vmem:[#allocation10 + $0x140] sm:$0xff] }
 0x2cc   : > { %5460 = vmatpush1.bf16.msra.mxu0 %v5459_v24  ;;  %v641_v24 = vld [vmem:[#allocation5 + $0x900] sm:$0xff] }
 0x2cd   : > { %5462 = vmatprep.subr.bf16.mxu0 %v5461_v25  ;;  %v651_v25 = vld [vmem:[#allocation5 + $0x950] sm:$0xff] }
 0x2ce   : > { %v5499_v28 = vpack.c.bf16 %v651_v25, %v641_v24  ;;  %v3425_v24 = vld [vmem:[#allocation10 + $0x68] sm:$0xff]  ;;  %v3428_v25 = vld [vmem:[#allocation10 + $0x80] sm:$0xff] }
 0x2cf   : > { %v5705_v27 = vpack.c.bf16 %v3428_v25, %v3425_v24  ;;  %v3451_v24 = vld [vmem:[#allocation10 + $0x138] sm:$0xff] }
 0x2d0   : > { %5464 = vmatpush1.bf16.msra.mxu0 %v5463_v30  ;;  %v661_v30 = vld [vmem:[#allocation5 + $0x9a0] sm:$0xff]  ;;  %v882_v25 = vld [vmem:[#allocation5 + $0x1088] sm:$0xff] }
 0x2d1   : > { %5466 = vmatprep.subr.bf16.mxu0 %v5465_v31  ;;  %v671_v31 = vld [vmem:[#allocation5 + $0x9f0] sm:$0xff] }
 0x2d2   : > { %v5503_v34 = vpack.c.bf16 %v671_v31, %v661_v30  ;;  %v781_v31 = vld [vmem:[#allocation5 + $0xd60] sm:$0xff] }
 0x2d3   : > { %v5527_v38 = vpack.c.bf16 %v791_v32, %v781_v31  ;;  %v3458_v31 = vld [vmem:[#allocation10 + $0x170] sm:$0xff] }
 0x2d4   : > { %5468 = vmatpush1.bf16.msra.mxu0 %v5467_v36  ;;  %v681_v36 = vld [vmem:[#allocation5 + $0xa40] sm:$0xff] }
 0x2d5   : > { %5470 = vmatprep.subr.bf16.mxu0 %v5469_v37  ;;  %v691_v37 = vld [vmem:[#allocation5 + $0xa90] sm:$0xff] }
 0x2d6   : > { %v5507_v40 = vpack.c.bf16 %v691_v37, %v681_v36  ;;  %v3431_v36 = vld [vmem:[#allocation10 + $0x98] sm:$0xff]  ;;  %v3434_v37 = vld [vmem:[#allocation10 + $0xb0] sm:$0xff] }
 0x2d7   : > { %v5709_v39 = vpack.c.bf16 %v3434_v37, %v3431_v36  ;;  %v3457_v36 = vld [vmem:[#allocation10 + $0x168] sm:$0xff]  ;;  %v902_v37 = vld [vmem:[#allocation5 + $0x1128] sm:$0xff] }
 0x2d8   : > { %5472 = vmatpush1.bf16.msra.mxu0 %v5471_v42  ;;  %v701_v42 = vld [vmem:[#allocation5 + $0xae0] sm:$0xff] }
 0x2d9   : > { %5474 = vmatprep.subr.bf16.mxu0 %v5473_v43  ;;  %v711_v43 = vld [vmem:[#allocation5 + $0xb30] sm:$0xff] }
 0x2da   : > { %v5511_v48 = vpack.c.bf16 %v711_v43, %v701_v42  ;;  %v801_v43 = vld [vmem:[#allocation5 + $0xe00] sm:$0xff] }
 0x2dc   : > { %5476 = vmatpush1.bf16.msra.mxu0 %v5475_v49  ;;  %v6161_v49 = vld [vmem:[%s6713_s26 + $0x48] sm:$0xff] }
 0x2dd   : > { %5478 = vmatprep.subr.bf16.mxu0 %v5477_v52  ;;  %v5513_v52 = vpack.c.bf16 %v732_v46, %v722_v44  ;;  %v811_v44 = vld [vmem:[#allocation5 + $0xe50] sm:$0xff] }
 0x2de   : > { %v5531_v53 = vpack.c.bf16 %v811_v44, %v801_v43  ;;  %v3464_v43 = vld [vmem:[#allocation10 + $0x1a0] sm:$0xff] }
 0x2e0   : > { %5480 = vmatpush1.bf16.msra.mxu0 %v5479_v58  ;;  %v6162_v58 = vld [vmem:[%s6713_s26 + $0x40] sm:$0xff] }
 0x2e1   : > { %5482 = vmatprep.subr.bf16.mxu0 %v5481_v59  ;;  %v3413_v59 = vld [vmem:[#allocation10 + $0x8] sm:$0xff] }
 0x2e2   : > { %v5697_v0 = vpack.c.bf16 %v3416_v60, %v3413_v59  ;;  %v821_v59 = vld [vmem:[#allocation5 + $0xea0] sm:$0xff]  ;;  %v831_v60 = vld [vmem:[#allocation5 + $0xef0] sm:$0xff] }
 0x2e4   : > { %5484 = vmatpush1.bf16.msra.mxu0 %v5483_v1  ;;  %v3412_v1 = vld [vmem:[#allocation10] sm:$0xff]  ;;  %5698 = vmatprep.subr.bf16.mxu1 %v5697_v0  ;;  %v852_v0 = vld [vmem:[#allocation5 + $0xf98] sm:$0xff] }
 0x2e5   : > { %5486 = vmatprep.subr.bf16.mxu0 %v5485_v3  ;;  %v3415_v3 = vld [vmem:[#allocation10 + $0x18] sm:$0xff] }
 0x2e6   : > { %v5699_v9 = vpack.c.bf16 %v3415_v3, %v3412_v1  ;;  %v5535_v1 = vpack.c.bf16 %v831_v60, %v821_v59  ;;  %v841_v3 = vld [vmem:[#allocation5 + $0xf40] sm:$0xff] }
 0x2e7   : > { %v3470_v59 = vld [vmem:[#allocation10 + $0x1d0] sm:$0xff] }
 0x2e8   : > { %5488 = vmatpush1.bf16.msra.mxu0 %v5487_v10  ;;  %v762_v10 = vld [vmem:[#allocation5 + $0xcc8] sm:$0xff]  ;;  %5700 = vmatpush1.bf16.msra.mxu1 %v5699_v9  ;;  %v851_v9 = vld [vmem:[#allocation5 + $0xf90] sm:$0xff] }
 0x2e9   : > { %5490 = vmatprep.subr.bf16.mxu0 %v5489_v11  ;;  %v772_v11 = vld [vmem:[#allocation5 + $0xd18] sm:$0xff]  ;;  %5702 = vmatprep.subr.bf16.mxu1 %v5701_v15 }
 0x2ea   : > { %v5521_v18 = vpack.c.bf16 %v772_v11, %v762_v10  ;;  %v3442_v11 = vld [vmem:[#allocation10 + $0xf0] sm:$0xff] }
 0x2eb   : > { %v5719_v15 = vpack.c.bf16 %v3445_v12, %v3442_v11  ;;  %v3476_v11 = vld [vmem:[#allocation10 + $0x200] sm:$0xff] }
 0x2ec   : > { %5492 = vmatpush1.bf16.msra.mxu0 %v5491_v16  ;;  %v3418_v16 = vld [vmem:[#allocation10 + $0x30] sm:$0xff] }
 0x2ed   : > { %5494 = vmatprep.subr.bf16.mxu0 %v5493_v17  ;;  %v3421_v17 = vld [vmem:[#allocation10 + $0x48] sm:$0xff] }
 0x2ee   : > { %v5703_v21 = vpack.c.bf16 %v3421_v17, %v3418_v16  ;;  %v5539_v16 = vpack.c.bf16 %v851_v9, %v841_v3  ;;  %v861_v17 = vld [vmem:[#allocation5 + $0xfe0] sm:$0xff]  ;;  %v942_v3 = vld [vmem:[#allocation5 + $0x1268] sm:$0xff] }
 0x2ef   : > { %v941_v9 = vld [vmem:[#allocation5 + $0x1260] sm:$0xff] }
 0x2f0   : > { %5496 = vmatpush1.bf16.msra.mxu0 %v5495_v22  ;;  %v782_v22 = vld [vmem:[#allocation5 + $0xd68] sm:$0xff]  ;;  %5704 = vmatpush1.bf16.msra.mxu1 %v5703_v21  ;;  %v871_v21 = vld [vmem:[#allocation5 + $0x1030] sm:$0xff] }
 0x2f1   : > { %5498 = vmatprep.subr.bf16.mxu0 %v5497_v23  ;;  %v792_v23 = vld [vmem:[#allocation5 + $0xdb8] sm:$0xff]  ;;  %5706 = vmatprep.subr.bf16.mxu1 %v5705_v27 }
 0x2f2   : > { %v5525_v30 = vpack.c.bf16 %v792_v23, %v782_v22  ;;  %v3448_v23 = vld [vmem:[#allocation10 + $0x120] sm:$0xff] }
 0x2f3   : > { %v5723_v27 = vpack.c.bf16 %v3451_v24, %v3448_v23  ;;  %v3482_v23 = vld [vmem:[#allocation10 + $0x230] sm:$0xff] }
 0x2f4   : > { %5500 = vmatpush1.bf16.msra.mxu0 %v5499_v28  ;;  %v3424_v28 = vld [vmem:[#allocation10 + $0x60] sm:$0xff] }
 0x2f5   : > { %5502 = vmatprep.subr.bf16.mxu0 %v5501_v29  ;;  %v3427_v29 = vld [vmem:[#allocation10 + $0x78] sm:$0xff] }
 0x2f6   : > { %v5707_v33 = vpack.c.bf16 %v3427_v29, %v3424_v28  ;;  %v5543_v28 = vpack.c.bf16 %v871_v21, %v861_v17  ;;  %v881_v29 = vld [vmem:[#allocation5 + $0x1080] sm:$0xff]  ;;  %v962_v17 = vld [vmem:[#allocation5 + $0x1308] sm:$0xff] }
 0x2f7   : > { %v961_v21 = vld [vmem:[#allocation5 + $0x1300] sm:$0xff] }
 0x2f8   : > { %5504 = vmatpush1.bf16.msra.mxu0 %v5503_v34  ;;  %v802_v34 = vld [vmem:[#allocation5 + $0xe08] sm:$0xff]  ;;  %5708 = vmatpush1.bf16.msra.mxu1 %v5707_v33  ;;  %v891_v33 = vld [vmem:[#allocation5 + $0x10d0] sm:$0xff] }
 0x2f9   : > { %5506 = vmatprep.subr.bf16.mxu0 %v5505_v35  ;;  %v812_v35 = vld [vmem:[#allocation5 + $0xe58] sm:$0xff]  ;;  %5710 = vmatprep.subr.bf16.mxu1 %v5709_v39 }
 0x2fa   : > { %v5529_v42 = vpack.c.bf16 %v812_v35, %v802_v34  ;;  %v3454_v35 = vld [vmem:[#allocation10 + $0x150] sm:$0xff] }
 0x2fb   : > { %2930 = vmatmul.mubr.f32.vlgmr.msra.gmra.mrb[8].mxu0 %v6160_v47  ;;  %v822_v47 = vld [vmem:[#allocation5 + $0xea8] sm:$0xff]  ;;  %v5727_v39 = vpack.c.bf16 %v3457_v36, %v3454_v35 }
 0x2fc   : > { %5508 = vmatpush1.bf16.msra.mxu0 %v5507_v40  ;;  %2935 = vmatprep.mubr.f32.mxu0 %v6161_v49  ;;  %v3430_v40 = vld [vmem:[#allocation10 + $0x90] sm:$0xff]  ;;  %v3437_v49 = vld [vmem:[#allocation10 + $0xc8] sm:$0xff]  ;;  %v3488_v35 = vld [vmem:[#allocation10 + $0x260] sm:$0xff] }
 0x2fd   : > { %5510 = vmatprep.subr.bf16.mxu0 %v5509_v41  ;;  %v3433_v41 = vld [vmem:[#allocation10 + $0xa8] sm:$0xff] }
 0x2fe   : > { %v5711_v46 = vpack.c.bf16 %v3433_v41, %v3430_v40  ;;  %v5547_v40 = vpack.c.bf16 %v891_v33, %v881_v29  ;;  %v901_v41 = vld [vmem:[#allocation5 + $0x1120] sm:$0xff]  ;;  %v982_v29 = vld [vmem:[#allocation5 + $0x13a8] sm:$0xff] }
 0x2ff   : > { %2936 = vmatmul.mubr.f32.gmra.mrb[10].mxu0 %v6162_v58  ;;  %v981_v33 = vld [vmem:[#allocation5 + $0x13a0] sm:$0xff] }
 0x300   : > { %5512 = vmatpush1.bf16.msra.mxu0 %v5511_v48  ;;  %3006 = vmatprep.mubr.f32.mxu0 %v6163_v63  ;;  %v832_v48 = vld [vmem:[#allocation5 + $0xef8] sm:$0xff]  ;;  %v842_v63 = vld [vmem:[#allocation5 + $0xf48] sm:$0xff] }
 0x301   : > { %5514 = vmatprep.subr.bf16.mxu0 %v5513_v52  ;;  %5712 = vmatpush1.bf16.msra.mxu1 %v5711_v46  ;;  %v3440_v52 = vld [vmem:[#allocation10 + $0xe0] sm:$0xff]  ;;  %v5533_v58 = vpack.c.bf16 %v832_v48, %v822_v47  ;;  %v5537_v8 = vpack.c.bf16 %v852_v0, %v842_v63  ;;  %v3466_v0 = vld [vmem:[#allocation10 + $0x1b0] sm:$0xff] }
 0x302   : > { %v5713_v55 = vpack.c.bf16 %v3440_v52, %v3437_v49  ;;  %v911_v46 = vld [vmem:[#allocation5 + $0x1170] sm:$0xff]  ;;  %v3463_v49 = vld [vmem:[#allocation10 + $0x198] sm:$0xff] }
 0x303   : > { %v3460_v48 = vld [vmem:[#allocation10 + $0x180] sm:$0xff] }
 0x304   : > { %5516 = vmatpush1.bf16.msra.mxu0 %v5515_v62  ;;  %v5715_v62 = vpack.c.bf16 %v3439_v57, %v3436_v56  ;;  %5714 = vmatprep.subr.bf16.mxu1 %v5713_v55  ;;  %v922_v52 = vld [vmem:[#allocation5 + $0x11c8] sm:$0xff]  ;;  %v5731_v55 = vpack.c.bf16 %v3463_v49, %v3460_v48  ;;  %v5551_v56 = vpack.c.bf16 %v911_v46, %v901_v41  ;;  %v921_v57 = vld [vmem:[#allocation5 + $0x11c0] sm:$0xff] }
 0x305   : > { %5518 = vmatprep.subr.bf16.mxu0 %v5517_v4  ;;  %v3443_v4 = vld [vmem:[#allocation10 + $0xf8] sm:$0xff]  ;;  %v3490_v48 = vld [vmem:[#allocation10 + $0x270] sm:$0xff] }
 0x306   : > { %5716 = vmatpush1.bf16.msra.mxu1 %v5715_v62  ;;  %v5717_v10 = vpack.c.bf16 %v3446_v6, %v3443_v4  ;;  %v931_v62 = vld [vmem:[#allocation5 + $0x1210] sm:$0xff]  ;;  %v952_v4 = vld [vmem:[#allocation5 + $0x12b8] sm:$0xff]  ;;  %v1002_v41 = vld [vmem:[#allocation5 + $0x1448] sm:$0xff] }
 0x307   : > { %v5557_v12 = vpack.c.bf16 %v952_v4, %v942_v3  ;;  %v3491_v46 = vld [vmem:[#allocation10 + $0x278] sm:$0xff]  ;;  %v1031_v4 = vld [vmem:[#allocation5 + $0x1530] sm:$0xff] }
 0x308   : > { %5520 = vmatpush1.bf16.msra.mxu0 %v5519_v14  ;;  %v872_v14 = vld [vmem:[#allocation5 + $0x1038] sm:$0xff]  ;;  %5718 = vmatprep.subr.bf16.mxu1 %v5717_v10  ;;  %v1021_v3 = vld [vmem:[#allocation5 + $0x14e0] sm:$0xff] }
 0x309   : > { %5522 = vmatprep.subr.bf16.mxu0 %v5521_v18  ;;  %v3449_v18 = vld [vmem:[#allocation10 + $0x128] sm:$0xff]  ;;  %v5541_v20 = vpack.c.bf16 %v872_v14, %v862_v13 }
 0x30a   : > { %5720 = vmatpush1.bf16.msra.mxu1 %v5719_v15  ;;  %v5721_v22 = vpack.c.bf16 %v3452_v19, %v3449_v18  ;;  %v3473_v10 = vld [vmem:[#allocation10 + $0x1e8] sm:$0xff]  ;;  %v3472_v15 = vld [vmem:[#allocation10 + $0x1e0] sm:$0xff] }
 0x30b   : > { %v951_v13 = vld [vmem:[#allocation5 + $0x12b0] sm:$0xff]  ;;  %v5737_v14 = vpack.c.bf16 %v3476_v11, %v3473_v10  ;;  %v972_v18 = vld [vmem:[#allocation5 + $0x1358] sm:$0xff] }
 0x30c   : > { %5524 = vmatpush1.bf16.msra.mxu0 %v5523_v26  ;;  %v892_v26 = vld [vmem:[#allocation5 + $0x10d8] sm:$0xff]  ;;  %5722 = vmatprep.subr.bf16.mxu1 %v5721_v22  ;;  %v3479_v22 = vld [vmem:[#allocation10 + $0x218] sm:$0xff]  ;;  %v5561_v24 = vpack.c.bf16 %v972_v18, %v962_v17 }
 0x30d   : > { %5526 = vmatprep.subr.bf16.mxu0 %v5525_v30  ;;  %v3455_v30 = vld [vmem:[#allocation10 + $0x158] sm:$0xff]  ;;  %v5545_v32 = vpack.c.bf16 %v892_v26, %v882_v25  ;;  %v971_v25 = vld [vmem:[#allocation5 + $0x1350] sm:$0xff]  ;;  %v5741_v26 = vpack.c.bf16 %v3482_v23, %v3479_v22  ;;  %v1052_v10 = vld [vmem:[#allocation5 + $0x15d8] sm:$0xff] }
 0x30e   : > { %5724 = vmatpush1.bf16.msra.mxu1 %v5723_v27  ;;  %v5725_v34 = vpack.c.bf16 %v3458_v31, %v3455_v30  ;;  %v3478_v27 = vld [vmem:[#allocation10 + $0x210] sm:$0xff]  ;;  %v1051_v22 = vld [vmem:[#allocation5 + $0x15d0] sm:$0xff] }
 0x30f   : > { %v992_v30 = vld [vmem:[#allocation5 + $0x13f8] sm:$0xff] }
 0x310   : > { %5528 = vmatpush1.bf16.msra.mxu0 %v5527_v38  ;;  %v912_v38 = vld [vmem:[#allocation5 + $0x1178] sm:$0xff]  ;;  %5726 = vmatprep.subr.bf16.mxu1 %v5725_v34  ;;  %v5565_v36 = vpack.c.bf16 %v992_v30, %v982_v29  ;;  %v1061_v30 = vld [vmem:[#allocation5 + $0x1620] sm:$0xff] }
 0x311   : > { %5530 = vmatprep.subr.bf16.mxu0 %v5529_v42  ;;  %v3461_v42 = vld [vmem:[#allocation10 + $0x188] sm:$0xff]  ;;  %v5549_v44 = vpack.c.bf16 %v912_v38, %v902_v37  ;;  %v3502_v18 = vld [vmem:[#allocation10 + $0x2d0] sm:$0xff] }
 0x312   : > { %5728 = vmatpush1.bf16.msra.mxu1 %v5727_v39  ;;  %v5729_v47 = vpack.c.bf16 %v3464_v43, %v3461_v42  ;;  %v3485_v34 = vld [vmem:[#allocation10 + $0x248] sm:$0xff]  ;;  %v3484_v39 = vld [vmem:[#allocation10 + $0x240] sm:$0xff] }
 0x313   : > { %v991_v37 = vld [vmem:[#allocation5 + $0x13f0] sm:$0xff]  ;;  %v5745_v38 = vpack.c.bf16 %v3488_v35, %v3485_v34  ;;  %v1012_v42 = vld [vmem:[#allocation5 + $0x1498] sm:$0xff] }
 0x314   : > { %5532 = vmatpush1.bf16.msra.mxu0 %v5531_v53  ;;  %v932_v53 = vld [vmem:[#allocation5 + $0x1218] sm:$0xff]  ;;  %5730 = vmatprep.subr.bf16.mxu1 %v5729_v47  ;;  %v5569_v49 = vpack.c.bf16 %v1012_v42, %v1002_v41  ;;  %v3512_v41 = vld [vmem:[#allocation10 + $0x320] sm:$0xff] }
 0x315   : > { %5534 = vmatprep.subr.bf16.mxu0 %v5533_v58  ;;  %v3467_v58 = vld [vmem:[#allocation10 + $0x1b8] sm:$0xff]  ;;  %v5553_v60 = vpack.c.bf16 %v932_v53, %v922_v52  ;;  %v3494_v47 = vld [vmem:[#allocation10 + $0x290] sm:$0xff]  ;;  %v1011_v53 = vld [vmem:[#allocation5 + $0x1490] sm:$0xff] }
 0x316   : > { %5732 = vmatpush1.bf16.msra.mxu1 %v5731_v55  ;;  %v5733_v63 = vpack.c.bf16 %v3470_v59, %v3467_v58  ;;  %v1001_v52 = vld [vmem:[#allocation5 + $0x1440] sm:$0xff]  ;;  %v5749_v55 = vpack.c.bf16 %v3494_v47, %v3491_v46  ;;  %v1032_v58 = vld [vmem:[#allocation5 + $0x1538] sm:$0xff]  ;;  %v1111_v47 = vld [vmem:[#allocation5 + $0x17b0] sm:$0xff] }
 0x317   : > { %v1101_v46 = vld [vmem:[#allocation5 + $0x1760] sm:$0xff] }
 0x318   : > { %5536 = vmatpush1.bf16.msra.mxu0 %v5535_v1  ;;  %v3469_v1 = vld [vmem:[#allocation10 + $0x1c8] sm:$0xff]  ;;  %5734 = vmatprep.subr.bf16.mxu1 %v5733_v63  ;;  %v3500_v63 = vld [vmem:[#allocation10 + $0x2c0] sm:$0xff] }
 0x319   : > { %5538 = vmatprep.subr.bf16.mxu0 %v5537_v8  ;;  %v5735_v6 = vpack.c.bf16 %v3469_v1, %v3466_v0  ;;  %v5555_v8 = vpack.c.bf16 %v931_v62, %v921_v57  ;;  %v1022_v57 = vld [vmem:[#allocation5 + $0x14e8] sm:$0xff]  ;;  %v3497_v62 = vld [vmem:[#allocation10 + $0x2a8] sm:$0xff] }
 0x31a   : > { %v3496_v0 = vld [vmem:[#allocation10 + $0x2a0] sm:$0xff]  ;;  %v5573_v1 = vpack.c.bf16 %v1032_v58, %v1022_v57  ;;  %v1152_v58 = vld [vmem:[#allocation5 + $0x18f8] sm:$0xff] }
 0x31b   : > { %5736 = vmatpush1.bf16.msra.mxu1 %v5735_v6  ;;  %v5753_v6 = vpack.c.bf16 %v3500_v63, %v3497_v62  ;;  %v1142_v57 = vld [vmem:[#allocation5 + $0x18a8] sm:$0xff]  ;;  %v1141_v62 = vld [vmem:[#allocation5 + $0x18a0] sm:$0xff]  ;;  %v1151_v63 = vld [vmem:[#allocation5 + $0x18f0] sm:$0xff] }
 0x31c   : > { %5540 = vmatpush1.bf16.msra.mxu0 %v5539_v16  ;;  %v3475_v16 = vld [vmem:[#allocation10 + $0x1f8] sm:$0xff]  ;;  %5738 = vmatprep.subr.bf16.mxu1 %v5737_v14  ;;  %v3506_v14 = vld [vmem:[#allocation10 + $0x2f0] sm:$0xff] }
 0x31d   : > { %5542 = vmatprep.subr.bf16.mxu0 %v5541_v20  ;;  %v5739_v19 = vpack.c.bf16 %v3475_v16, %v3472_v15  ;;  %v5559_v20 = vpack.c.bf16 %v951_v13, %v941_v9  ;;  %v1042_v9 = vld [vmem:[#allocation5 + $0x1588] sm:$0xff]  ;;  %v5575_v15 = vpack.c.bf16 %v1031_v4, %v1021_v3  ;;  %v6165_v16 = vld [vmem:[%s6713_s26 + $0x58] sm:$0xff]  ;;  %v5599_v3 = vpack.c.bf16 %v1151_v63, %v1141_v62 }
 0x31e   : > { %v3503_v13 = vld [vmem:[#allocation10 + $0x2d8] sm:$0xff]  ;;  %v1352_v63 = vld [vmem:[#allocation5 + $0x1f38] sm:$0xff] }
 0x31f   : > { %5740 = vmatpush1.bf16.msra.mxu1 %v5739_v19  ;;  %v5757_v17 = vpack.c.bf16 %v3506_v14, %v3503_v13  ;;  %v3505_v19 = vld [vmem:[#allocation10 + $0x2e8] sm:$0xff]  ;;  %v1181_v13 = vld [vmem:[#allocation5 + $0x19e0] sm:$0xff]  ;;  %v1342_v62 = vld [vmem:[#allocation5 + $0x1ee8] sm:$0xff] }
 0x320   : > { %5544 = vmatpush1.bf16.msra.mxu0 %v5543_v28  ;;  %v3481_v28 = vld [vmem:[#allocation10 + $0x228] sm:$0xff]  ;;  %5742 = vmatprep.subr.bf16.mxu1 %v5741_v26  ;;  %v5759_v23 = vpack.c.bf16 %v3505_v19, %v3502_v18  ;;  %v1201_v19 = vld [vmem:[#allocation5 + $0x1a80] sm:$0xff] }
 0x321   : > { %5546 = vmatprep.subr.bf16.mxu0 %v5545_v32  ;;  %v5743_v31 = vpack.c.bf16 %v3481_v28, %v3478_v27  ;;  %v5563_v32 = vpack.c.bf16 %v971_v25, %v961_v21  ;;  %v1041_v21 = vld [vmem:[#allocation5 + $0x1580] sm:$0xff]  ;;  %v1072_v25 = vld [vmem:[#allocation5 + $0x1678] sm:$0xff]  ;;  %v6166_v26 = vld [vmem:[%s6713_s26 + $0x50] sm:$0xff] }
 0x322   : > { %v5579_v27 = vpack.c.bf16 %v1051_v22, %v1041_v21  ;;  %v6167_v28 = vld [vmem:[%s6713_s26 + $0x28] sm:$0xff]  ;;  %v1191_v14 = vld [vmem:[#allocation5 + $0x1a30] sm:$0xff]  ;;  %v1232_v22 = vld [vmem:[#allocation5 + $0x1b78] sm:$0xff] }
 0x323   : > { %5744 = vmatpush1.bf16.msra.mxu1 %v5743_v31  ;;  %v1071_v31 = vld [vmem:[#allocation5 + $0x1670] sm:$0xff]  ;;  %v1222_v21 = vld [vmem:[#allocation5 + $0x1b28] sm:$0xff] }
 0x324   : > { %5548 = vmatpush1.bf16.msra.mxu0 %v5547_v40  ;;  %v3487_v40 = vld [vmem:[#allocation10 + $0x258] sm:$0xff]  ;;  %5746 = vmatprep.subr.bf16.mxu1 %v5745_v38  ;;  %v5583_v34 = vpack.c.bf16 %v1071_v31, %v1061_v30 }
 0x325   : > { %5550 = vmatprep.subr.bf16.mxu0 %v5549_v44  ;;  %v5747_v43 = vpack.c.bf16 %v3487_v40, %v3484_v39  ;;  %v5567_v44 = vpack.c.bf16 %v991_v37, %v981_v33  ;;  %v1092_v33 = vld [vmem:[#allocation5 + $0x1718] sm:$0xff]  ;;  %v1091_v37 = vld [vmem:[#allocation5 + $0x1710] sm:$0xff]  ;;  %v1102_v38 = vld [vmem:[#allocation5 + $0x1768] sm:$0xff] }
 0x326   : > { %v1112_v39 = vld [vmem:[#allocation5 + $0x17b8] sm:$0xff]  ;;  %v1241_v31 = vld [vmem:[#allocation5 + $0x1bc0] sm:$0xff] }
 0x327   : > { %5748 = vmatpush1.bf16.msra.mxu1 %v5747_v43  ;;  %v3509_v40 = vld [vmem:[#allocation10 + $0x308] sm:$0xff] }
 0x328   : > { %5552 = vmatpush1.bf16.msra.mxu0 %v5551_v56  ;;  %v3493_v56 = vld [vmem:[#allocation10 + $0x288] sm:$0xff]  ;;  %5750 = vmatprep.subr.bf16.mxu1 %v5749_v55  ;;  %v5761_v42 = vpack.c.bf16 %v3512_v41, %v3509_v40  ;;  %v1121_v55 = vld [vmem:[#allocation5 + $0x1800] sm:$0xff] }
 0x329   : > { %5554 = vmatprep.subr.bf16.mxu0 %v5553_v60  ;;  %v5751_v59 = vpack.c.bf16 %v3493_v56, %v3490_v48  ;;  %v5571_v60 = vpack.c.bf16 %v1011_v53, %v1001_v52  ;;  %v1122_v48 = vld [vmem:[#allocation5 + $0x1808] sm:$0xff]  ;;  %v5591_v52 = vpack.c.bf16 %v1111_v47, %v1101_v46  ;;  %v1131_v56 = vld [vmem:[#allocation5 + $0x1850] sm:$0xff]  ;;  %v1292_v40 = vld [vmem:[#allocation5 + $0x1d58] sm:$0xff] }
 0x32a   : > { %v1302_v46 = vld [vmem:[#allocation5 + $0x1da8] sm:$0xff]  ;;  %v1312_v47 = vld [vmem:[#allocation5 + $0x1df8] sm:$0xff] }
 0x32b   : > { %5752 = vmatpush1.bf16.msra.mxu1 %v5751_v59  ;;  %v5595_v59 = vpack.c.bf16 %v1131_v56, %v1121_v55  ;;  %v1322_v55 = vld [vmem:[#allocation5 + $0x1e48] sm:$0xff]  ;;  %v1332_v56 = vld [vmem:[#allocation5 + $0x1e98] sm:$0xff] }
 0x32c   : > { %5556 = vmatpush1.bf16.msra.mxu0 %v5555_v8  ;;  %v3499_v8 = vld [vmem:[#allocation10 + $0x2b8] sm:$0xff]  ;;  %5754 = vmatprep.subr.bf16.mxu1 %v5753_v6 }
 0x32d   : > { %5558 = vmatprep.subr.bf16.mxu0 %v5557_v12  ;;  %v5755_v11 = vpack.c.bf16 %v3499_v8, %v3496_v0  ;;  %v6164_v12 = vld [vmem:[%s6713_s26 + $0x10] sm:$0xff]  ;;  %v1162_v0 = vld [vmem:[#allocation5 + $0x1948] sm:$0xff]  ;;  %v1161_v6 = vld [vmem:[#allocation5 + $0x1940] sm:$0xff] }
 0x32e   : > { %v1171_v8 = vld [vmem:[#allocation5 + $0x1990] sm:$0xff] }
 0x32f   : > { %5756 = vmatpush1.bf16.msra.mxu1 %v5755_v11  ;;  %v5603_v11 = vpack.c.bf16 %v1171_v8, %v1161_v6  ;;  %v1362_v6 = vld [vmem:[#allocation5 + $0x1f88] sm:$0xff]  ;;  %v1372_v8 = vld [vmem:[#allocation5 + $0x1fd8] sm:$0xff] }
 0x330   : > { %5560 = vmatpush1.bf16.msra.mxu0 %v5559_v20  ;;  %v5577_v20 = vpack.c.bf16 %v1052_v10, %v1042_v9  ;;  %5758 = vmatprep.subr.bf16.mxu1 %v5757_v17  ;;  %v1182_v9 = vld [vmem:[#allocation5 + $0x19e8] sm:$0xff]  ;;  %v1192_v10 = vld [vmem:[#allocation5 + $0x1a38] sm:$0xff]  ;;  %v5607_v17 = vpack.c.bf16 %v1191_v14, %v1181_v13  ;;  %v1361_v13 = vld [vmem:[#allocation5 + $0x1f80] sm:$0xff] }
 0x331   : > { %5562 = vmatprep.subr.bf16.mxu0 %v5561_v24  ;;  %v1062_v24 = vld [vmem:[#allocation5 + $0x1628] sm:$0xff]  ;;  %v1371_v14 = vld [vmem:[#allocation5 + $0x1fd0] sm:$0xff] }
 0x332   : > { %v5581_v29 = vpack.c.bf16 %v1072_v25, %v1062_v24  ;;  %v5613_v24 = vpack.c.bf16 %v1232_v22, %v1222_v21  ;;  %v1221_v25 = vld [vmem:[#allocation5 + $0x1b20] sm:$0xff]  ;;  %v1391_v22 = vld [vmem:[#allocation5 + $0x2070] sm:$0xff] }
 0x333   : > { %5760 = vmatpush1.bf16.msra.mxu1 %v5759_v23  ;;  %v1381_v21 = vld [vmem:[#allocation5 + $0x2020] sm:$0xff] }
 0x334   : > { %5564 = vmatpush1.bf16.msra.mxu0 %v5563_v32  ;;  %v1082_v32 = vld [vmem:[#allocation5 + $0x16c8] sm:$0xff]  ;;  %5762 = vmatprep.subr.bf16.mxu1 %v5761_v42 }
 0x335   : > { %5566 = vmatprep.subr.bf16.mxu0 %v5565_v36  ;;  %v5585_v35 = vpack.c.bf16 %v1092_v33, %v1082_v32  ;;  %v1081_v36 = vld [vmem:[#allocation5 + $0x16c0] sm:$0xff]  ;;  %v1251_v32 = vld [vmem:[#allocation5 + $0x1c10] sm:$0xff]  ;;  %v1262_v33 = vld [vmem:[#allocation5 + $0x1c68] sm:$0xff] }
 0x336   : > { %v5587_v43 = vpack.c.bf16 %v1091_v37, %v1081_v36  ;;  %v1261_v37 = vld [vmem:[#allocation5 + $0x1c60] sm:$0xff] }
 0x338   : > { %5568 = vmatpush1.bf16.msra.mxu0 %v5567_v44  ;;  %v5589_v44 = vpack.c.bf16 %v1112_v39, %v1102_v38  ;;  %v1271_v38 = vld [vmem:[#allocation5 + $0x1cb0] sm:$0xff]  ;;  %v1282_v39 = vld [vmem:[#allocation5 + $0x1d08] sm:$0xff] }
 0x339   : > { %5570 = vmatprep.subr.bf16.mxu0 %v5569_v49  ;;  %v1132_v49 = vld [vmem:[#allocation5 + $0x1858] sm:$0xff]  ;;  %v5623_v41 = vpack.c.bf16 %v1271_v38, %v1261_v37  ;;  %v5625_v42 = vpack.c.bf16 %v1292_v40, %v1282_v39  ;;  %v1441_v39 = vld [vmem:[#allocation5 + $0x2200] sm:$0xff]  ;;  %v1451_v40 = vld [vmem:[#allocation5 + $0x2250] sm:$0xff] }
 0x33a   : > { %v5593_v53 = vpack.c.bf16 %v1132_v49, %v1122_v48  ;;  %v5629_v49 = vpack.c.bf16 %v1312_v47, %v1302_v46 }
 0x33b   : > { %3007 = vmatmul.mubr.f32.vlgmr.msra.gmra.mrb[8].mxu0 %v6164_v12  ;;  %v5605_v12 = vpack.c.bf16 %v1192_v10, %v1182_v9  ;;  %v6168_v9 = vld [vmem:[%s6713_s26 + $0x20] sm:$0xff] }
 0x33c   : > { %5572 = vmatpush1.bf16.msra.mxu0 %v5571_v60  ;;  %3012 = vmatprep.mubr.f32.mxu0 %v6165_v16  ;;  %v5597_v60 = vpack.c.bf16 %v1152_v58, %v1142_v57  ;;  %v1212_v16 = vld [vmem:[#allocation5 + $0x1ad8] sm:$0xff]  ;;  %v5633_v58 = vpack.c.bf16 %v1332_v56, %v1322_v55  ;;  %v5659_v55 = vpack.c.bf16 %v1451_v40, %v1441_v39 }
 0x33d   : > { %5574 = vmatprep.subr.bf16.mxu0 %v5573_v1  ;;  %v1172_v1 = vld [vmem:[#allocation5 + $0x1998] sm:$0xff]  ;;  %v3175_v56 = vmul.f32 %v6762_v50, %v6762_v50 }
 0x33e   : > { %v5601_v4 = vpack.c.bf16 %v1172_v1, %v1162_v0  ;;  %v5637_v1 = vpack.c.bf16 %v1352_v63, %v1342_v62 }
 0x33f   : > { %3013 = vmatmul.mubr.f32.gmra.mrb[10].mxu0 %v6166_v26  ;;  %v1231_v26 = vld [vmem:[#allocation5 + $0x1b70] sm:$0xff] }
 0x340   : > { %5576 = vmatpush1.bf16.msra.mxu0 %v5575_v15  ;;  %3083 = vmatprep.mubr.f32.mxu0 %v6167_v28  ;;  %v1202_v15 = vld [vmem:[#allocation5 + $0x1a88] sm:$0xff]  ;;  %v1252_v28 = vld [vmem:[#allocation5 + $0x1c18] sm:$0xff] }
 0x341   : > { %5578 = vmatprep.subr.bf16.mxu0 %v5577_v20  ;;  %v5609_v18 = vpack.c.bf16 %v1212_v16, %v1202_v15  ;;  %v1211_v20 = vld [vmem:[#allocation5 + $0x1ad0] sm:$0xff]  ;;  %v1382_v15 = vld [vmem:[#allocation5 + $0x2028] sm:$0xff]  ;;  %v1392_v16 = vld [vmem:[#allocation5 + $0x2078] sm:$0xff] }
 0x342   : > { %v5611_v23 = vpack.c.bf16 %v1211_v20, %v1201_v19  ;;  %v6171_v19 = vld [vmem:[%s6713_s26 + $0x38] sm:$0xff]  ;;  %v5645_v20 = vpack.c.bf16 %v1392_v16, %v1382_v15 }
 0x344   : > { %5580 = vmatpush1.bf16.msra.mxu0 %v5579_v27  ;;  %v1242_v27 = vld [vmem:[#allocation5 + $0x1bc8] sm:$0xff] }
 0x345   : > { %5582 = vmatprep.subr.bf16.mxu0 %v5581_v29  ;;  %v5615_v29 = vpack.c.bf16 %v1231_v26, %v1221_v25  ;;  %v5617_v30 = vpack.c.bf16 %v1252_v28, %v1242_v27  ;;  %v5647_v25 = vpack.c.bf16 %v1391_v22, %v1381_v21  ;;  %v1401_v27 = vld [vmem:[#allocation5 + $0x20c0] sm:$0xff]  ;;  %v1411_v28 = vld [vmem:[#allocation5 + $0x2110] sm:$0xff] }
 0x348   : > { %5584 = vmatpush1.bf16.msra.mxu0 %v5583_v34  ;;  %v1272_v34 = vld [vmem:[#allocation5 + $0x1cb8] sm:$0xff] }
 0x349   : > { %5586 = vmatprep.subr.bf16.mxu0 %v5585_v35  ;;  %v5619_v35 = vpack.c.bf16 %v1251_v32, %v1241_v31  ;;  %v5621_v36 = vpack.c.bf16 %v1272_v34, %v1262_v33  ;;  %v5651_v31 = vpack.c.bf16 %v1411_v28, %v1401_v27  ;;  %v1421_v33 = vld [vmem:[#allocation5 + $0x2160] sm:$0xff]  ;;  %v1431_v34 = vld [vmem:[#allocation5 + $0x21b0] sm:$0xff] }
 0x34a   : > { %v5655_v37 = vpack.c.bf16 %v1431_v34, %v1421_v33  ;;  %v1511_v27 = vld [vmem:[#allocation5 + $0x2430] sm:$0xff] }
 0x34c   : > { %5588 = vmatpush1.bf16.msra.mxu0 %v5587_v43  ;;  %v1281_v43 = vld [vmem:[#allocation5 + $0x1d00] sm:$0xff] }
 0x34d   : > { %5590 = vmatprep.subr.bf16.mxu0 %v5589_v44  ;;  %v1291_v44 = vld [vmem:[#allocation5 + $0x1d50] sm:$0xff] }
 0x34e   : > { %v5627_v48 = vpack.c.bf16 %v1291_v44, %v1281_v43  ;;  %v1472_v43 = vld [vmem:[#allocation5 + $0x22f8] sm:$0xff]  ;;  %v3173_v44 = vmul.f32 %v6760_v45, %v6760_v45 }
 0x350   : > { %5592 = vmatpush1.bf16.msra.mxu0 %v5591_v52  ;;  %v1301_v52 = vld [vmem:[#allocation5 + $0x1da0] sm:$0xff] }
 0x351   : > { %5594 = vmatprep.subr.bf16.mxu0 %v5593_v53  ;;  %v1311_v53 = vld [vmem:[#allocation5 + $0x1df0] sm:$0xff] }
 0x352   : > { %v5631_v57 = vpack.c.bf16 %v1311_v53, %v1301_v52 }
 0x354   : > { %5596 = vmatpush1.bf16.msra.mxu0 %v5595_v59  ;;  %v1321_v59 = vld [vmem:[#allocation5 + $0x1e40] sm:$0xff] }
 0x355   : > { %5598 = vmatprep.subr.bf16.mxu0 %v5597_v60  ;;  %v1331_v60 = vld [vmem:[#allocation5 + $0x1e90] sm:$0xff] }
 0x356   : > { %v5635_v0 = vpack.c.bf16 %v1331_v60, %v1321_v59  ;;  %v1461_v59 = vld [vmem:[#allocation5 + $0x22a0] sm:$0xff]  ;;  %v1471_v60 = vld [vmem:[#allocation5 + $0x22f0] sm:$0xff] }
 0x358   : > { %5600 = vmatpush1.bf16.msra.mxu0 %v5599_v3  ;;  %v1341_v3 = vld [vmem:[#allocation5 + $0x1ee0] sm:$0xff] }
 0x359   : > { %5602 = vmatprep.subr.bf16.mxu0 %v5601_v4  ;;  %v1351_v4 = vld [vmem:[#allocation5 + $0x1f30] sm:$0xff] }
 0x35a   : > { %v5639_v10 = vpack.c.bf16 %v1351_v4, %v1341_v3 }
 0x35c   : > { %5604 = vmatpush1.bf16.msra.mxu0 %v5603_v11  ;;  %v6169_v11 = vld [vmem:[%s6713_s26 + $0x68] sm:$0xff] }
 0x35d   : > { %5606 = vmatprep.subr.bf16.mxu0 %v5605_v12  ;;  %v5641_v12 = vpack.c.bf16 %v1372_v8, %v1362_v6  ;;  %v3179_v6 = vmul.f32 %v6770_v2, %v6770_v2 }
 0x360   : > { %5608 = vmatpush1.bf16.msra.mxu0 %v5607_v17  ;;  %v6170_v17 = vld [vmem:[%s6713_s26 + $0x60] sm:$0xff] }
 0x361   : > { %5610 = vmatprep.subr.bf16.mxu0 %v5609_v18  ;;  %v5643_v18 = vpack.c.bf16 %v1371_v14, %v1361_v13  ;;  %v1491_v13 = vld [vmem:[#allocation5 + $0x2390] sm:$0xff]  ;;  %v3180_v14 = vmul.f32 %v6772_v5, %v6772_v5 }
 0x364   : > { %5612 = vmatpush1.bf16.msra.mxu0 %v5611_v23  ;;  %v1402_v23 = vld [vmem:[#allocation5 + $0x20c8] sm:$0xff] }
 0x365   : > { %5614 = vmatprep.subr.bf16.mxu0 %v5613_v24  ;;  %v1412_v24 = vld [vmem:[#allocation5 + $0x2118] sm:$0xff] }
 0x366   : > { %v5649_v26 = vpack.c.bf16 %v1412_v24, %v1402_v23 }
 0x368   : > { %5616 = vmatpush1.bf16.msra.mxu0 %v5615_v29  ;;  %v1422_v29 = vld [vmem:[#allocation5 + $0x2168] sm:$0xff] }
 0x369   : > { %5618 = vmatprep.subr.bf16.mxu0 %v5617_v30  ;;  %v1432_v30 = vld [vmem:[#allocation5 + $0x21b8] sm:$0xff] }
 0x36a   : > { %v5653_v32 = vpack.c.bf16 %v1432_v30, %v1422_v29 }
 0x36c   : > { %5620 = vmatpush1.bf16.msra.mxu0 %v5619_v35  ;;  %v1442_v35 = vld [vmem:[#allocation5 + $0x2208] sm:$0xff] }
 0x36d   : > { %5622 = vmatprep.subr.bf16.mxu0 %v5621_v36  ;;  %v1452_v36 = vld [vmem:[#allocation5 + $0x2258] sm:$0xff] }
 0x36e   : > { %v5657_v38 = vpack.c.bf16 %v1452_v36, %v1442_v35  ;;  %v1522_v36 = vld [vmem:[#allocation5 + $0x2488] sm:$0xff] }
 0x370   : > { %5624 = vmatpush1.bf16.msra.mxu0 %v5623_v41 }
 0x371   : > { %5626 = vmatprep.subr.bf16.mxu0 %v5625_v42  ;;  %v1462_v42 = vld [vmem:[#allocation5 + $0x22a8] sm:$0xff] }
 0x374   : > { %5628 = vmatpush1.bf16.msra.mxu0 %v5627_v48  ;;  %v3174_v48 = vmul.f32 %v6764_v51, %v6764_v51  ;;  %v1482_v51 = vld [vmem:[#allocation5 + $0x2348] sm:$0xff] }
 0x375   : > { %5630 = vmatprep.subr.bf16.mxu0 %v5629_v49 }
 0x378   : > { %5632 = vmatpush1.bf16.msra.mxu0 %v5631_v57 }
 0x379   : > { %5634 = vmatprep.subr.bf16.mxu0 %v5633_v58  ;;  %v5661_v58 = vpack.c.bf16 %v1472_v43, %v1462_v42 }
 0x37b   : > { %3084 = vmatmul.mubr.f32.vlgmr.msra.gmra.mrb[8].mxu0 %v6168_v9 }
 0x37c   : > { %5636 = vmatpush1.bf16.msra.mxu0 %v5635_v0  ;;  %3089 = vmatprep.mubr.f32.mxu0 %v6169_v11  ;;  %v1492_v0 = vld [vmem:[#allocation5 + $0x2398] sm:$0xff]  ;;  %v5663_v11 = vpack.c.bf16 %v1471_v60, %v1461_v59  ;;  %v1542_v59 = vld [vmem:[#allocation5 + $0x2528] sm:$0xff] }
 0x37d   : > { %5638 = vmatprep.subr.bf16.mxu0 %v5637_v1  ;;  %v3178_v1 = vmul.f32 %v6768_v61, %v6768_v61  ;;  %v5665_v61 = vpack.c.bf16 %v1492_v0, %v1482_v51  ;;  %v1552_v60 = vld [vmem:[#allocation5 + $0x2578] sm:$0xff] }
 0x37f   : > { %3090 = vmatmul.mubr.f32.gmra.mrb[10].mxu0 %v6170_v17 }
 0x380   : > { %5640 = vmatpush1.bf16.msra.mxu0 %v5639_v10  ;;  %3160 = vmatprep.mubr.f32.mxu0 %v6171_v19  ;;  %v1512_v19 = vld [vmem:[#allocation5 + $0x2438] sm:$0xff] }
 0x381   : > { %5642 = vmatprep.subr.bf16.mxu0 %v5641_v12  ;;  %v1481_v12 = vld [vmem:[#allocation5 + $0x2340] sm:$0xff] }
 0x382   : > { %v5667_v22 = vpack.c.bf16 %v1491_v13, %v1481_v12  ;;  %v5677_v13 = vpack.c.bf16 %v1552_v60, %v1542_v59  ;;  %v1602_v60 = vld [vmem:[#allocation5 + $0x2708] sm:$0xff] }
 0x384   : > { %5644 = vmatpush1.bf16.msra.mxu0 %v5643_v18  ;;  %v1502_v18 = vld [vmem:[#allocation5 + $0x23e8] sm:$0xff] }
 0x385   : > { %5646 = vmatprep.subr.bf16.mxu0 %v5645_v20 }
 0x388   : > { %5648 = vmatpush1.bf16.msra.mxu0 %v5647_v25 }
 0x389   : > { %5650 = vmatprep.subr.bf16.mxu0 %v5649_v26  ;;  %v1501_v26 = vld [vmem:[#allocation5 + $0x23e0] sm:$0xff] }
 0x38a   : > { %v5671_v40 = vpack.c.bf16 %v1511_v27, %v1501_v26 }
 0x38c   : > { %5652 = vmatpush1.bf16.msra.mxu0 %v5651_v31  ;;  %v5669_v31 = vpack.c.bf16 %v1512_v19, %v1502_v18  ;;  %v1562_v19 = vld [vmem:[#allocation5 + $0x25c8] sm:$0xff] }
 0x38d   : > { %5654 = vmatprep.subr.bf16.mxu0 %v5653_v32 }
 0x38e   : > { %v6792_v41 = vpop.f32.mrb[4].mxu0 }
 0x38f   : > { %v2854_v46 = vpop.f32.mrb[4].mxu1  ;;  %v2548_v47 = vpop.f32.mrb[5].mxu0 }
 0x390   : > { %v3184_v49 = vmul.f32 %v2854_v46, %v2854_v46  ;;  %v3183_v52 = vmul.f32 %v2548_v47, %v2548_v47  ;;  %v2856_v53 = vpop.f32.mrb[5].mxu1  ;;  %5656 = vmatpush1.bf16.msra.mxu0 %v5655_v37  ;;  %v1532_v37 = vld [vmem:[#allocation5 + $0x24d8] sm:$0xff]  ;;  %v1521_v47 = vld [vmem:[#allocation5 + $0x2480] sm:$0xff] }
 0x391   : > { %v3185_v57 = vmul.f32 %v2856_v53, %v2856_v53  ;;  %5658 = vmatprep.subr.bf16.mxu0 %v5657_v38  ;;  %v5673_v53 = vpack.c.bf16 %v1532_v37, %v1522_v36 }
 0x392   : > { %v6800_v62 = vadd.f32 %v3184_v49, %v3174_v48  ;;  %v6802_v45 = vadd.f32 %v3183_v52, %v3173_v44  ;;  %v6804_v63 = vpop.f32.mrb[6].mxu0  ;;  %v1531_v48 = vld [vmem:[#allocation5 + $0x24d0] sm:$0xff] }
 0x393   : > { %v6808_v3 = vadd.f32 %v3185_v57, %v3175_v56  ;;  %v2860_v4 = vpop.f32.mrb[6].mxu1  ;;  %v2554_v50 = vpop.f32.mrb[7].mxu0 }
 0x394   : > { %v3189_v8 = vmul.f32 %v2860_v4, %v2860_v4  ;;  %v3188_v9 = vmul.f32 %v2554_v50, %v2554_v50  ;;  %v2862_v10 = vpop.f32.mrb[7].mxu1  ;;  %5660 = vmatpush1.bf16.msra.mxu0 %v5659_v55  ;;  %v3244_v2 = vmul.f32 %v6800_v62, %v6800_v62  ;;  %v3243_v20 = vmul.f32 %v6802_v45, %v6802_v45 }
 0x395   : > { %v3190_v15 = vmul.f32 %v2862_v10, %v2862_v10  ;;  %5662 = vmatprep.subr.bf16.mxu0 %v5661_v58  ;;  %v3245_v28 = vmul.f32 %v6808_v3, %v6808_v3  ;;  %v1551_v10 = vld [vmem:[#allocation5 + $0x2570] sm:$0xff] }
 0x396   : > { %v6814_v16 = vadd.f32 %v3189_v8, %v3179_v6  ;;  %v6816_v17 = vadd.f32 %v3188_v9, %v3178_v1  ;;  %v5675_v1 = vpack.c.bf16 %v1531_v48, %v1521_v47  ;;  %v1541_v9 = vld [vmem:[#allocation5 + $0x2520] sm:$0xff] }
 0x397   : > { %v6822_v21 = vadd.f32 %v3190_v15, %v3180_v14 }
 0x398   : > { %v3210_v5 = vadd.f32 %v6814_v16, %v6800_v62  ;;  %v3249_v23 = vmul.f32 %v6814_v16, %v6814_v16  ;;  %v3203_v24 = vadd.f32 %v6816_v17, %v6802_v45  ;;  %v3248_v25 = vmul.f32 %v6816_v17, %v6816_v17  ;;  %5664 = vmatpush1.bf16.msra.mxu0 %v5663_v11 }
 0x399   : > { %v3217_v29 = vadd.f32 %v6822_v21, %v6808_v3  ;;  %v3250_v30 = vmul.f32 %v6822_v21, %v6822_v21  ;;  %5666 = vmatprep.subr.bf16.mxu0 %v5665_v61 }
 0x39a   : > { %v3211_v32 = vrot.slane %v3210_v5, 4  ;;  %v3260_v33 = vadd.f32 %v3249_v23, %v3244_v2  ;;  %v3204_v34 = vrot.slane %v3203_v24, 4  ;;  %v3253_v35 = vadd.f32 %v3248_v25, %v3243_v20  ;;  %v1572_v2 = vld [vmem:[#allocation5 + $0x2618] sm:$0xff]  ;;  %v1561_v23 = vld [vmem:[#allocation5 + $0x25c0] sm:$0xff] }
 0x39b   : > { %v3218_v38 = vrot.slane %v3217_v29, 4  ;;  %v3267_v39 = vadd.f32 %v3250_v30, %v3245_v28  ;;  %v1571_v28 = vld [vmem:[#allocation5 + $0x2610] sm:$0xff]  ;;  %v1592_v30 = vld [vmem:[#allocation5 + $0x26b8] sm:$0xff] }
 0x39c   : > { %v3212_v42 = vadd.f32 %v3211_v32, %v3210_v5  ;;  %v3261_v43 = vrot.slane %v3260_v33, 4  ;;  %v3205_v44 = vadd.f32 %v3204_v34, %v3203_v24  ;;  %v3254_v46 = vrot.slane %v3253_v35, 4  ;;  %5668 = vmatpush1.bf16.msra.mxu0 %v5667_v22 }
 0x39d   : > { %v3219_v49 = vadd.f32 %v3218_v38, %v3217_v29  ;;  %v3268_v52 = vrot.slane %v3267_v39, 4  ;;  %5670 = vmatprep.subr.bf16.mxu0 %v5669_v31  ;;  %v5679_v5 = vpack.c.bf16 %v1551_v10, %v1541_v9  ;;  %v1582_v29 = vld [vmem:[#allocation5 + $0x2668] sm:$0xff]  ;;  %v1611_v9 = vld [vmem:[#allocation5 + $0x2750] sm:$0xff]  ;;  %v3340_v10 = vlaneseq }
 0x39e   : > { %v3213_v55 = vrot.slane %v3212_v42, 2  ;;  %v3262_v56 = vadd.f32 %v3261_v43, %v3260_v33  ;;  %v3206_v57 = vrot.slane %v3205_v44, 2  ;;  %v3255_v58 = vadd.f32 %v3254_v46, %v3253_v35 }
 0x39f   : > { %v3220_v51 = vrot.slane %v3219_v49, 2  ;;  %v3269_v0 = vadd.f32 %v3268_v52, %v3267_v39  ;;  %v5681_v33 = vpack.c.bf16 %v1572_v2, %v1562_v19  ;;  %v6862_v19 = vshrl.u32 %v3340_v10, 7  ;;  %v3529_v10 = vld [vmem:[#allocation10 + $0x3a8] sm:$0xff] }
 0x3a0   : > { %v3214_v4 = vadd.f32 %v3213_v55, %v3212_v42  ;;  %v3263_v50 = vrot.slane %v3262_v56, 2  ;;  %v3207_v6 = vadd.f32 %v3206_v57, %v3205_v44  ;;  %v3256_v8 = vrot.slane %v3255_v58, 2  ;;  %5672 = vmatpush1.bf16.msra.mxu0 %v5671_v40  ;;  %v1581_v55 = vld [vmem:[#allocation5 + $0x2660] sm:$0xff] }
 0x3a1   : > { %v3221_v11 = vadd.f32 %v3220_v51, %v3219_v49  ;;  %v3270_v12 = vrot.slane %v3269_v0, 2  ;;  %5674 = vmatprep.subr.bf16.mxu0 %v5673_v53  ;;  %v5683_v40 = vpack.c.bf16 %v1571_v28, %v1561_v23  ;;  %v5685_v42 = vpack.c.bf16 %v1592_v30, %v1582_v29  ;;  %v1612_v51 = vld [vmem:[#allocation5 + $0x2758] sm:$0xff]  ;;  %v6872_v23 = vld [vmem:[#allocation8] sm:$0x1f]  ;;  %v6172_v28 = vld [vmem:[%s6713_s26 + $0x30] sm:$0xff] }
 0x3a2   : > { %v3215_v14 = vrot.slane %v3214_v4, 1  ;;  %v3264_v15 = vadd.f32 %v3263_v50, %v3262_v56  ;;  %v3208_v61 = vrot.slane %v3207_v6, 1  ;;  %v3257_v18 = vadd.f32 %v3256_v8, %v3255_v58  ;;  %v1591_v56 = vld [vmem:[#allocation5 + $0x26b0] sm:$0xff]  ;;  %v1601_v8 = vld [vmem:[#allocation5 + $0x2700] sm:$0xff] }
 0x3a3   : > { %v3222_v20 = vrot.slane %v3221_v11, 1  ;;  %v3271_v22 = vadd.f32 %v3270_v12, %v3269_v0  ;;  %v1622_v12 = vld [vmem:[#allocation5 + $0x27a8] sm:$0xff] }
 0x3a4   : > { %v3216_v24 = vadd.f32 %v3215_v14, %v3214_v4  ;;  %v3265_v25 = vrot.slane %v3264_v15, 1  ;;  %v3209_v26 = vadd.f32 %v3208_v61, %v3207_v6  ;;  %v3258_v27 = vrot.slane %v3257_v18, 1  ;;  %5676 = vmatpush1.bf16.msra.mxu0 %v5675_v1  ;;  %v1621_v61 = vld [vmem:[#allocation5 + $0x27a0] sm:$0xff] }
 0x3a5   : > { %v3223_v31 = vadd.f32 %v3222_v20, %v3221_v11  ;;  %v3272_v32 = vrot.slane %v3271_v22, 1  ;;  %5678 = vmatprep.subr.bf16.mxu0 %v5677_v13  ;;  %v5687_v4 = vpack.c.bf16 %v1591_v56, %v1581_v55  ;;  %v5689_v6 = vpack.c.bf16 %v1612_v51, %v1602_v60  ;;  %v3524_v51 = vld [vmem:[#allocation10 + $0x380] sm:$0xff] }
 0x3a6   : > { %v6838_v34 = vmul.f32 0.11111111, %v3216_v24  ;;  %v3266_v35 = vadd.f32 %v3265_v25, %v3264_v15  ;;  %v6840_v36 = vmul.f32 0.11111111, %v3209_v26  ;;  %v3259_v37 = vadd.f32 %v3258_v27, %v3257_v18  ;;  %v1631_v18 = vld [vmem:[#allocation5 + $0x27f0] sm:$0xff] }
 0x3a7   : > { %v6842_v38 = vmul.f32 0.11111111, %v3223_v31  ;;  %v3273_v39 = vadd.f32 %v3272_v32, %v3271_v22  ;;  %v5691_v15 = vpack.c.bf16 %v1611_v9, %v1601_v8  ;;  %v5695_v2 = vpack.c.bf16 %v1631_v18, %v1621_v61  ;;  %v6867_v22 = vld [vmem:[#allocation7] sm:$0x1f] }
 0x3a8   : > { %v3289_v43 = vmul.f32 0.11111111, %v3266_v35  ;;  %v3294_v44 = vmul.f32 %v6838_v34, %v6838_v34  ;;  %v3314_v46 = vsub.f32 %v6814_v16, %v6838_v34  ;;  %v3288_v47 = vmul.f32 0.11111111, %v3259_v37  ;;  %5680 = vmatpush1.bf16.msra.mxu0 %v5679_v5  ;;  %v3508_v37 = vld [vmem:[#allocation10 + $0x300] sm:$0xff]  ;;  %v3526_v9 = vld [vmem:[#allocation10 + $0x390] sm:$0xff] }
 0x3a9   : > { %v3293_v48 = vmul.f32 %v6840_v36, %v6840_v36  ;;  %v3308_v49 = vsub.f32 %v6802_v45, %v6840_v36  ;;  %v3313_v52 = vsub.f32 %v6816_v17, %v6840_v36  ;;  %v3290_v53 = vmul.f32 0.11111111, %v3273_v39  ;;  %5682 = vmatprep.subr.bf16.mxu0 %v5681_v33  ;;  %v6173_v33 = vld [vmem:[%s6713_s26 + $0x78] sm:$0xff] }
 0x3aa   : > { %v3299_v57 = vsub.f32 %v3289_v43, %v3294_v44  ;;  %v3295_v58 = vmul.f32 %v6842_v38, %v6842_v38  ;;  %v3310_v16 = vsub.f32 %v6808_v3, %v6842_v38  ;;  %v3315_v59 = vsub.f32 %v6822_v21, %v6842_v38  ;;  %v1632_v21 = vld [vmem:[#allocation5 + $0x27f8] sm:$0xff]  ;;  %v3511_v38 = vld [vmem:[#allocation10 + $0x318] sm:$0xff] }
 0x3ab   : > { %v3298_v45 = vsub.f32 %v3288_v47, %v3293_v48  ;;  %v3309_v17 = vsub.f32 %v6800_v62, %v6838_v34  ;;  %v5693_v62 = vpack.c.bf16 %v1632_v21, %v1622_v12  ;;  %v6865_v20 = vsub.s32 1, %v6862_v19  ;;  %v3518_v43 = vld [vmem:[#allocation10 + $0x350] sm:$0xff]  ;;  %v6174_v48 = vld [vmem:[%s6713_s26 + $0x70] sm:$0xff] }
 0x3ac   : > { %v3304_v0 = vmax.f32 %v3299_v57, 0.0  ;;  %v3300_v1 = vsub.f32 %v3290_v53, %v3295_v58  ;;  %5684 = vmatpush1.bf16.msra.mxu0 %v5683_v40  ;;  %v6870_v5 = vsub.s32 0, %v6862_v19  ;;  %v3514_v57 = vld [vmem:[#allocation10 + $0x330] sm:$0xff]  ;;  %v3517_v58 = vld [vmem:[#allocation10 + $0x348] sm:$0xff]  ;;  %v3536_v12 = vld [vmem:[#allocation10 + $0x3e0] sm:$0xff] }
 0x3ad   : > { %v3303_v50 = vmax.f32 %v3298_v45, 0.0  ;;  %5686 = vmatprep.subr.bf16.mxu0 %v5685_v42  ;;  %v3347_v24 = vrot.slane %v6867_v22, %v6865_v20  ;;  %v3384_v30 = vrot.slane %v6872_v23, %v6865_v20  ;;  %v3515_v42 = vld [vmem:[#allocation10 + $0x338] sm:$0xff]  ;;  %v3542_v61 = vld [vmem:[#allocation10 + $0x410] sm:$0xff] }
 0x3ae   : > { %v3319_v3 = vadd.f32 1e-05, %v3304_v0  ;;  %v3305_v11 = vmax.f32 %v3300_v1, 0.0  ;;  %v3343_v26 = vrot.slane %v6867_v22, %v6870_v5  ;;  %v3380_v35 = vrot.slane %v6872_v23, %v6870_v5  ;;  %v3520_v0 = vld [vmem:[#allocation10 + $0x360] sm:$0xff]  ;;  %v3523_v1 = vld [vmem:[#allocation10 + $0x378] sm:$0xff] }
 0x3af   : > { %v3318_v13 = vadd.f32 1e-05, %v3303_v50  ;;  %v3530_v50 = vld [vmem:[#allocation10 + $0x3b0] sm:$0xff] }
 0x3b0   : > { %v3320_v14 = vadd.f32 1e-05, %v3305_v11  ;;  %5688 = vmatpush1.bf16.msra.mxu0 %v5687_v4  ;;  %6133 = vrsqrt.f32 %v3319_v3  ;;  %v3527_v4 = vld [vmem:[#allocation10 + $0x398] sm:$0xff]  ;;  %v5775_v3 = vpack.c.bf16 %v3529_v10, %v3526_v9  ;;  %v3533_v11 = vld [vmem:[#allocation10 + $0x3c8] sm:$0xff] }
 0x3b1   : > { %6135 = vrsqrt.f32 %v3318_v13  ;;  %5690 = vmatprep.subr.bf16.mxu0 %v5689_v6  ;;  %v5771_v6 = vpack.c.bf16 %v3523_v1, %v3520_v0  ;;  %v5773_v8 = vpack.c.bf16 %v3530_v50, %v3527_v4  ;;  %v5777_v21 = vpack.c.bf16 %v3536_v12, %v3533_v11  ;;  %v3532_v13 = vld [vmem:[#allocation10 + $0x3c0] sm:$0xff]  ;;  %v3571_v0 = vld [vmem:[#allocation10 + $0x4f8] sm:$0xff]  ;;  %v3578_v50 = vld [vmem:[#allocation10 + $0x530] sm:$0xff] }
 0x3b2   : > { %6137 = vrsqrt.f32 %v3320_v14  ;;  %v3535_v14 = vld [vmem:[#allocation10 + $0x3d8] sm:$0xff]  ;;  %v3577_v9 = vld [vmem:[#allocation10 + $0x528] sm:$0xff]  ;;  %v3584_v11 = vld [vmem:[#allocation10 + $0x560] sm:$0xff] }
 0x3b3   : > { %v3575_v4 = vld [vmem:[#allocation10 + $0x518] sm:$0xff]  ;;  %v3580_v12 = vld [vmem:[#allocation10 + $0x540] sm:$0xff] }
 0x3b4   : > { %5692 = vmatpush1.bf16.msra.mxu0 %v5691_v15  ;;  %v5779_v15 = vpack.c.bf16 %v3535_v14, %v3532_v13  ;;  %v3583_v13 = vld [vmem:[#allocation10 + $0x558] sm:$0xff] }
 0x3b5   : > { %5694 = vmatprep.subr.bf16.mxu0 %v5693_v62  ;;  %v3539_v62 = vld [vmem:[#allocation10 + $0x3f8] sm:$0xff] }
 0x3b6   : > { %v5781_v18 = vpack.c.bf16 %v3542_v61, %v3539_v62  ;;  %v3587_v14 = vld [vmem:[#allocation10 + $0x578] sm:$0xff]  ;;  %v5811_v62 = vpack.c.bf16 %v3583_v13, %v3580_v12 }
 0x3b8   : > { %5696 = vmatpush1.bf16.msra.mxu0 %v5695_v2  ;;  %v3538_v2 = vld [vmem:[#allocation10 + $0x3f0] sm:$0xff] }
 0x3ba   : > { %v6134_v25 = vpop.eup %6133 }
 0x3bb   : > { %v6136_v27 = vpop.eup %6135  ;;  %3161 = vmatmul.mubr.f32.vlgmr.msra.gmra.mrb[8].mxu0 %v6172_v28  ;;  %v3329_v29 = vmul.f32 %v6134_v25, %v3309_v17  ;;  %v3334_v31 = vmul.f32 %v6134_v25, %v3314_v46 }
 0x3bc   : > { %v6138_v32 = vpop.eup %6137  ;;  %3166 = vmatprep.mubr.f32.mxu0 %v6173_v33  ;;  %v3328_v34 = vmul.f32 %v6136_v27, %v3308_v49  ;;  %v3333_v36 = vmul.f32 %v6136_v27, %v3313_v52  ;;  %v5763_v49 = vpack.c.bf16 %v3511_v38, %v3508_v37  ;;  %v5765_v52 = vpack.c.bf16 %v3518_v43, %v3515_v42  ;;  %v3548_v27 = vld [vmem:[#allocation10 + $0x440] sm:$0xff]  ;;  %v3554_v33 = vld [vmem:[#allocation10 + $0x470] sm:$0xff]  ;;  %v3557_v38 = vld [vmem:[#allocation10 + $0x488] sm:$0xff] }
 0x3bd   : > { %v3366_v39 = vmul.f32 %v3347_v24, %v3329_v29  ;;  %v3371_v40 = vmul.f32 %v3347_v24, %v3334_v31  ;;  %v6884_v44 = vmul.f32 %v6138_v32, %v3310_v16  ;;  %v6886_v47 = vmul.f32 %v6138_v32, %v3315_v59  ;;  %v3521_v16 = vld [vmem:[#allocation10 + $0x368] sm:$0xff]  ;;  %v3544_v29 = vld [vmem:[#allocation10 + $0x420] sm:$0xff]  ;;  %v3551_v32 = vld [vmem:[#allocation10 + $0x458] sm:$0xff] }
 0x3be   : > { %v3365_v46 = vmul.f32 %v3343_v26, %v3328_v34  ;;  %v3370_v56 = vmul.f32 %v3343_v26, %v3333_v36  ;;  %v5767_v59 = vpack.c.bf16 %v3517_v58, %v3514_v57  ;;  %v5769_v17 = vpack.c.bf16 %v3524_v51, %v3521_v16  ;;  %v3541_v24 = vld [vmem:[#allocation10 + $0x408] sm:$0xff]  ;;  %v3556_v42 = vld [vmem:[#allocation10 + $0x480] sm:$0xff]  ;;  %v3559_v43 = vld [vmem:[#allocation10 + $0x498] sm:$0xff] }
 0x3bf   : > { %3167 = vmatmul.mubr.f32.gmra.mrb[10].mxu0 %v6174_v48  ;;  %v6889_v53 = vadd.f32 %v3384_v30, %v3366_v39  ;;  %v6894_v60 = vadd.f32 %v3384_v30, %v3371_v40  ;;  %v5783_v25 = vpack.c.bf16 %v3541_v24, %v3538_v2  ;;  %v3545_v26 = vld [vmem:[#allocation10 + $0x428] sm:$0xff]  ;;  %v3547_v30 = vld [vmem:[#allocation10 + $0x438] sm:$0xff]  ;;  %v5789_v34 = vpack.c.bf16 %v3554_v33, %v3551_v32  ;;  %v3560_v39 = vld [vmem:[#allocation10 + $0x4a0] sm:$0xff] }
 0x3c0   : > { %v6891_v55 = vadd.f32 %v3380_v35, %v3365_v46  ;;  %v6898_v45 = vadd.f32 %v3380_v35, %v3370_v56  ;;  %v5785_v28 = vpack.c.bf16 %v3548_v27, %v3545_v26  ;;  %v5787_v31 = vpack.c.bf16 %v3547_v30, %v3544_v29  ;;  %v3550_v35 = vld [vmem:[#allocation10 + $0x450] sm:$0xff]  ;;  %v3553_v36 = vld [vmem:[#allocation10 + $0x468] sm:$0xff]  ;;  %v3563_v48 = vld [vmem:[#allocation10 + $0x4b8] sm:$0xff] }
 0x3c1   : > { %3733 = vmatprep.mubr.f32.mxu1 %v6889_v53  ;;  %v5791_v37 = vpack.c.bf16 %v3553_v36, %v3550_v35  ;;  %v5793_v40 = vpack.c.bf16 %v3560_v39, %v3557_v38  ;;  %v5795_v46 = vpack.c.bf16 %v3559_v43, %v3556_v42  ;;  %v3565_v57 = vld [vmem:[#allocation10 + $0x4c8] sm:$0xff]  ;;  %v3572_v51 = vld [vmem:[#allocation10 + $0x500] sm:$0xff]  ;;  %v3595_v29 = vld [vmem:[#allocation10 + $0x5b8] sm:$0xff]  ;;  %v3176_v42 = vmul.f32 %v6766_v54, %v6766_v54 }
 0x3c2   : > { %3734 = vmatmul.mubr.f32.vlgmr.msra.gmra.mrb[8].mxu1 %v6891_v55  ;;  %v3569_v16 = vld [vmem:[#allocation10 + $0x4e8] sm:$0xff]  ;;  %v3599_v30 = vld [vmem:[#allocation10 + $0x5d8] sm:$0xff]  ;;  %v3608_v38 = vld [vmem:[#allocation10 + $0x620] sm:$0xff] }
 0x3c3   : > { %3739 = vmatprep.mubr.f32.mxu1 %v6894_v60  ;;  %5764 = vmatpush1.bf16.msra.mxu1 %v5763_v49  ;;  %v3566_v49 = vld [vmem:[#allocation10 + $0x4d0] sm:$0xff]  ;;  %v3589_v2 = vld [vmem:[#allocation10 + $0x588] sm:$0xff] }
 0x3c4   : > { %5766 = vmatprep.subr.bf16.mxu1 %v5765_v52  ;;  %v5797_v56 = vpack.c.bf16 %v3566_v49, %v3563_v48  ;;  %v3562_v52 = vld [vmem:[#allocation10 + $0x4b0] sm:$0xff]  ;;  %v3593_v24 = vld [vmem:[#allocation10 + $0x5a8] sm:$0xff]  ;;  %v3177_v48 = vmul.f32 %v6792_v41, %v6792_v41 }
 0x3c5   : > { %v5799_v58 = vpack.c.bf16 %v3565_v57, %v3562_v52  ;;  %v3601_v35 = vld [vmem:[#allocation10 + $0x5e8] sm:$0xff] }
 0x3c6   : > { %3740 = vmatmul.mubr.f32.gmra.mrb[10].mxu1 %v6898_v45 }
 0x3c7   : > { %5768 = vmatpush1.bf16.msra.mxu1 %v5767_v59  ;;  %v5801_v59 = vpack.c.bf16 %v3572_v51, %v3569_v16 }
 0x3c8   : > { %5770 = vmatprep.subr.bf16.mxu1 %v5769_v17  ;;  %v3568_v17 = vld [vmem:[#allocation10 + $0x4e0] sm:$0xff] }
 0x3c9   : > { %v5803_v1 = vpack.c.bf16 %v3571_v0, %v3568_v17 }
 0x3cb   : > { %5772 = vmatpush1.bf16.msra.mxu1 %v5771_v6  ;;  %v5805_v6 = vpack.c.bf16 %v3578_v50, %v3575_v4 }
 0x3cc   : > { %5774 = vmatprep.subr.bf16.mxu1 %v5773_v8  ;;  %v3574_v8 = vld [vmem:[#allocation10 + $0x510] sm:$0xff] }
 0x3cd   : > { %v5807_v10 = vpack.c.bf16 %v3577_v9, %v3574_v8 }
 0x3cf   : > { %5776 = vmatpush1.bf16.msra.mxu1 %v5775_v3  ;;  %v3581_v3 = vld [vmem:[#allocation10 + $0x548] sm:$0xff] }
 0x3d0   : > { %5778 = vmatprep.subr.bf16.mxu1 %v5777_v21  ;;  %v5809_v21 = vpack.c.bf16 %v3584_v11, %v3581_v3 }
 0x3d3   : > { %5780 = vmatpush1.bf16.msra.mxu1 %v5779_v15  ;;  %v3590_v15 = vld [vmem:[#allocation10 + $0x590] sm:$0xff] }
 0x3d4   : > { %5782 = vmatprep.subr.bf16.mxu1 %v5781_v18  ;;  %v5813_v61 = vpack.c.bf16 %v3590_v15, %v3587_v14  ;;  %v3586_v18 = vld [vmem:[#allocation10 + $0x570] sm:$0xff] }
 0x3d5   : > { %v5815_v26 = vpack.c.bf16 %v3589_v2, %v3586_v18 }
 0x3d7   : > { %5784 = vmatpush1.bf16.msra.mxu1 %v5783_v25  ;;  %v3596_v25 = vld [vmem:[#allocation10 + $0x5c0] sm:$0xff] }
 0x3d8   : > { %5786 = vmatprep.subr.bf16.mxu1 %v5785_v28  ;;  %v5817_v27 = vpack.c.bf16 %v3596_v25, %v3593_v24  ;;  %v3592_v28 = vld [vmem:[#allocation10 + $0x5a0] sm:$0xff] }
 0x3d9   : > { %v5819_v32 = vpack.c.bf16 %v3595_v29, %v3592_v28 }
 0x3db   : > { %5788 = vmatpush1.bf16.msra.mxu1 %v5787_v31  ;;  %v3602_v31 = vld [vmem:[#allocation10 + $0x5f0] sm:$0xff] }
 0x3dc   : > { %5790 = vmatprep.subr.bf16.mxu1 %v5789_v34  ;;  %v5821_v33 = vpack.c.bf16 %v3602_v31, %v3599_v30  ;;  %v3598_v34 = vld [vmem:[#allocation10 + $0x5d0] sm:$0xff] }
 0x3dd   : > { %v5823_v36 = vpack.c.bf16 %v3601_v35, %v3598_v34 }
 0x3df   : > { %5792 = vmatpush1.bf16.msra.mxu1 %v5791_v37  ;;  %v3605_v37 = vld [vmem:[#allocation10 + $0x608] sm:$0xff] }
 0x3e0   : > { %5794 = vmatprep.subr.bf16.mxu1 %v5793_v40  ;;  %v5825_v39 = vpack.c.bf16 %v3608_v38, %v3605_v37 }
 0x3e3   : > { %5796 = vmatpush1.bf16.msra.mxu1 %v5795_v46 }
 0x3e4   : > { %5798 = vmatprep.subr.bf16.mxu1 %v5797_v56 }
 0x3e7   : > { %5800 = vmatpush1.bf16.msra.mxu1 %v5799_v58  ;;  %v3181_v58 = vmul.f32 %v6774_v7, %v6774_v7 }
 0x3e8   : > { %5802 = vmatprep.subr.bf16.mxu1 %v5801_v59  ;;  %v3182_v59 = vmul.f32 %v6804_v63, %v6804_v63 }
 0x3eb   : > { %5804 = vmatpush1.bf16.msra.mxu1 %v5803_v1 }
 0x3ec   : > { %5806 = vmatprep.subr.bf16.mxu1 %v5805_v6 }
 0x3ef   : > { %5808 = vmatpush1.bf16.msra.mxu1 %v5807_v10 }
 0x3f0   : > { %5810 = vmatprep.subr.bf16.mxu1 %v5809_v21 }
 0x3f3   : > { %5812 = vmatpush1.bf16.msra.mxu1 %v5811_v62 }
 0x3f4   : > { %5814 = vmatprep.subr.bf16.mxu1 %v5813_v61 }
 0x3f7   : > { %5816 = vmatpush1.bf16.msra.mxu1 %v5815_v26 }
 0x3f8   : > { %5818 = vmatprep.subr.bf16.mxu1 %v5817_v27 }
 0x3fb   : > { %5820 = vmatpush1.bf16.msra.mxu1 %v5819_v32 }
 0x3fc   : > { %5822 = vmatprep.subr.bf16.mxu1 %v5821_v33 }
 0x3ff   : > { %5824 = vmatpush1.bf16.msra.mxu1 %v5823_v36 }
 0x400   : > { %5826 = vmatprep.subr.bf16.mxu1 %v5825_v39 }
 0x48e   : > { %v3162_v40 = vpop.f32.mrb[8].mxu0 }
 0x48f   : > { %v3186_v43 = vmul.f32 %v3162_v40, %v3162_v40  ;;  %v3164_v46 = vpop.f32.mrb[9].mxu0 }
 0x490   : > { %v3187_v49 = vmul.f32 %v3164_v46, %v3164_v46 }
 0x491   : > { %v6905_v56 = vadd.f32 %v3186_v43, %v3176_v42 }
 0x492   : > { %v6907_v52 = vadd.f32 %v3187_v49, %v3177_v48  ;;  %v3168_v57 = vpop.f32.mrb[10].mxu0 }
 0x493   : > { %v3191_v16 = vmul.f32 %v3168_v57, %v3168_v57  ;;  %v3170_v51 = vpop.f32.mrb[11].mxu0  ;;  %v3246_v41 = vmul.f32 %v6905_v56, %v6905_v56 }
 0x494   : > { %v3192_v54 = vmul.f32 %v3170_v51, %v3170_v51  ;;  %v3247_v50 = vmul.f32 %v6907_v52, %v6907_v52 }
 0x495   : > { %v3201_v17 = vadd.f32 %v3191_v16, %v3181_v58 }
 0x496   : > { %v6913_v0 = vadd.f32 %v3192_v54, %v3182_v59  ;;  %v6928_v54 = vsub.s32 2, %v6862_v19 }
 0x497   : > { %v3224_v1 = vadd.f32 %v3201_v17, %v6905_v56  ;;  %v3251_v4 = vmul.f32 %v3201_v17, %v3201_v17 }
 0x498   : > { %v3231_v7 = vadd.f32 %v6913_v0, %v6907_v52  ;;  %v3252_v6 = vmul.f32 %v6913_v0, %v6913_v0 }
 0x499   : > { %v3225_v63 = vrot.slane %v3224_v1, 4  ;;  %v3274_v8 = vadd.f32 %v3251_v4, %v3246_v41 }
 0x49a   : > { %v3232_v9 = vrot.slane %v3231_v7, 4  ;;  %v3281_v10 = vadd.f32 %v3252_v6, %v3247_v50  ;;  %v3388_v6 = vrot.slane %v6872_v23, %v6928_v54 }
 0x49b   : > { %v3226_v3 = vadd.f32 %v3225_v63, %v3224_v1  ;;  %v3275_v11 = vrot.slane %v3274_v8, 4  ;;  %v3604_v63 = vld [vmem:[#allocation10 + $0x600] sm:$0xff] }
 0x49c   : > { %v3233_v12 = vadd.f32 %v3232_v9, %v3231_v7  ;;  %v3282_v21 = vrot.slane %v3281_v10, 4 }
 0x49d   : > { %v3227_v13 = vrot.slane %v3226_v3, 2  ;;  %v3276_v14 = vadd.f32 %v3275_v11, %v3274_v8  ;;  %v3607_v8 = vld [vmem:[#allocation10 + $0x618] sm:$0xff] }
 0x49e   : > { %v3234_v15 = vrot.slane %v3233_v12, 2  ;;  %v3283_v62 = vadd.f32 %v3282_v21, %v3281_v10  ;;  %v3614_v21 = vld [vmem:[#allocation10 + $0x650] sm:$0xff] }
 0x49f   : > { %v3228_v61 = vadd.f32 %v3227_v13, %v3226_v3  ;;  %v3277_v18 = vrot.slane %v3276_v14, 2 }
 0x4a0   : > { %v3235_v2 = vadd.f32 %v3234_v15, %v3233_v12  ;;  %v3284_v24 = vrot.slane %v3283_v62, 2  ;;  %v3611_v12 = vld [vmem:[#allocation10 + $0x638] sm:$0xff] }
 0x4a1   : > { %v3229_v25 = vrot.slane %v3228_v61, 1  ;;  %v3278_v26 = vadd.f32 %v3277_v18, %v3276_v14  ;;  %v5827_v14 = vpack.c.bf16 %v3607_v8, %v3604_v63  ;;  %v3613_v18 = vld [vmem:[#allocation10 + $0x648] sm:$0xff] }
 0x4a2   : > { %v3236_v27 = vrot.slane %v3235_v2, 1  ;;  %v3285_v28 = vadd.f32 %v3284_v24, %v3283_v62  ;;  %v5829_v62 = vpack.c.bf16 %v3614_v21, %v3611_v12  ;;  %v3617_v24 = vld [vmem:[#allocation10 + $0x668] sm:$0xff] }
 0x4a3   : > { %v3230_v29 = vadd.f32 %v3229_v25, %v3228_v61  ;;  %v3279_v30 = vrot.slane %v3278_v26, 1  ;;  %v3610_v61 = vld [vmem:[#allocation10 + $0x630] sm:$0xff]  ;;  %v3620_v25 = vld [vmem:[#allocation10 + $0x680] sm:$0xff]  ;;  %v3649_v63 = vld [vmem:[#allocation10 + $0x768] sm:$0xff] }
 0x4a4   : > { %v3237_v31 = vadd.f32 %v3236_v27, %v3235_v2  ;;  %v3286_v32 = vrot.slane %v3285_v28, 1 }
 0x4a5   : > { %v3241_v33 = vmul.f32 0.11111111, %v3230_v29  ;;  %v3280_v34 = vadd.f32 %v3279_v30, %v3278_v26  ;;  %v5831_v26 = vpack.c.bf16 %v3613_v18, %v3610_v61  ;;  %v3616_v29 = vld [vmem:[#allocation10 + $0x660] sm:$0xff]  ;;  %v3623_v30 = vld [vmem:[#allocation10 + $0x698] sm:$0xff] }
 0x4a6   : > { %v3242_v35 = vmul.f32 0.11111111, %v3237_v31  ;;  %v3287_v36 = vadd.f32 %v3286_v32, %v3285_v28  ;;  %v5833_v28 = vpack.c.bf16 %v3620_v25, %v3617_v24  ;;  %v3626_v31 = vld [vmem:[#allocation10 + $0x6b0] sm:$0xff]  ;;  %v3468_v61 = vld [vmem:[#allocation10 + $0x1c0] sm:$0xff]  ;;  %v3471_v18 = vld [vmem:[#allocation10 + $0x1d8] sm:$0xff] }
 0x4a7   : > { %v3291_v37 = vmul.f32 0.11111111, %v3280_v34  ;;  %v3296_v38 = vmul.f32 %v3241_v33, %v3241_v33  ;;  %v3316_v39 = vsub.f32 %v3201_v17, %v3241_v33  ;;  %v3311_v40 = vsub.f32 %v6905_v56, %v3241_v33 }
 0x4a8   : > { %v3292_v42 = vmul.f32 0.11111111, %v3287_v36  ;;  %v3297_v43 = vmul.f32 %v3242_v35, %v3242_v35  ;;  %v3312_v46 = vsub.f32 %v6907_v52, %v3242_v35  ;;  %v3317_v48 = vsub.f32 %v6913_v0, %v3242_v35  ;;  %v3622_v35 = vld [vmem:[#allocation10 + $0x690] sm:$0xff]  ;;  %v3625_v36 = vld [vmem:[#allocation10 + $0x6a8] sm:$0xff] }
 0x4a9   : > { %v3301_v49 = vsub.f32 %v3291_v37, %v3296_v38  ;;  %v3354_v17 = vsub.s32 3, %v6862_v19  ;;  %v3351_v56 = vrot.slane %v6867_v22, %v6928_v54  ;;  %v6437_v33 = vmov 0.0   ;;  %v3629_v37 = vld [vmem:[#allocation10 + $0x6c8] sm:$0xff]  ;;  %v3632_v38 = vld [vmem:[#allocation10 + $0x6e0] sm:$0xff] }
 0x4aa   : > { %v3302_v57 = vsub.f32 %v3292_v42, %v3297_v43  ;;  %v5837_v34 = vpack.c.bf16 %v3626_v31, %v3623_v30  ;;  %v3628_v42 = vld [vmem:[#allocation10 + $0x6c0] sm:$0xff]  ;;  %v3631_v43 = vld [vmem:[#allocation10 + $0x6d8] sm:$0xff]  ;;  %v3477_v30 = vld [vmem:[#allocation10 + $0x208] sm:$0xff] }
 0x4ab   : > { %v3306_v58 = vmax.f32 %v3301_v49, 0.0  ;;  %v3355_v52 = vrot.slane %v6867_v22, %v3354_v17  ;;  %v3392_v4 = vrot.slane %v6872_v23, %v3354_v17  ;;  %v3367_v7 = vmul.f32 %v3351_v56, %v6884_v44 }
 0x4ac   : > { %v3307_v16 = vmax.f32 %v3302_v57, 0.0  ;;  %v3372_v44 = vmul.f32 %v3351_v56, %v6886_v47  ;;  %v3619_v47 = vld [vmem:[#allocation10 + $0x678] sm:$0xff]  ;;  %v5843_v49 = vpack.c.bf16 %v3631_v43, %v3628_v42 }
 0x4ad   : > { %v3321_v51 = vadd.f32 1e-05, %v3306_v58  ;;  %v6944_v15 = vadd.f32 %v3388_v6, %v3367_v7  ;;  %v5835_v32 = vpack.c.bf16 %v3619_v47, %v3616_v29  ;;  %v3634_v58 = vld [vmem:[#allocation10 + $0x6f0] sm:$0xff]  ;;  %v3423_v29 = vld [vmem:[#allocation10 + $0x58] sm:$0xff] }
 0x4ae   : > { %v3322_v59 = vadd.f32 1e-05, %v3307_v16  ;;  %v6952_v27 = vadd.f32 %v3388_v6, %v3372_v44  ;;  %v3637_v16 = vld [vmem:[#allocation10 + $0x708] sm:$0xff]  ;;  %v3646_v6 = vld [vmem:[#allocation10 + $0x750] sm:$0xff] }
 0x4af   : > { %6139 = vrsqrt.f32 %v3321_v51  ;;  %v3641_v51 = vld [vmem:[#allocation10 + $0x728] sm:$0xff]  ;;  %v5847_v17 = vpack.c.bf16 %v3637_v16, %v3634_v58  ;;  %v5855_v12 = vpack.c.bf16 %v3649_v63, %v3646_v6  ;;  %v3474_v47 = vld [vmem:[#allocation10 + $0x1f0] sm:$0xff]  ;;  %v3456_v6 = vld [vmem:[#allocation10 + $0x160] sm:$0xff] }
 0x4b0   : > { %6141 = vrsqrt.f32 %v3322_v59  ;;  %v3644_v59 = vld [vmem:[#allocation10 + $0x740] sm:$0xff]  ;;  %v3417_v44 = vld [vmem:[#allocation10 + $0x28] sm:$0xff]  ;;  %v5865_v31 = vpack.c.bf16 %v3477_v30, %v3474_v47  ;;  %v3459_v63 = vld [vmem:[#allocation10 + $0x178] sm:$0xff] }
 0x4b1   : > { %v5849_v56 = vpack.c.bf16 %v3644_v59, %v3641_v51  ;;  %v3447_v51 = vld [vmem:[#allocation10 + $0x118] sm:$0xff]  ;;  %v3498_v59 = vld [vmem:[#allocation10 + $0x2b0] sm:$0xff]  ;;  %v3525_v30 = vld [vmem:[#allocation10 + $0x388] sm:$0xff] }
 0x4b2   : > { %v3522_v47 = vld [vmem:[#allocation10 + $0x370] sm:$0xff] }
 0x4b9   : > { %v6140_v41 = vpop.eup %6139 }
 0x4ba   : > { %v6142_v0 = vpop.eup %6141  ;;  %v3331_v1 = vmul.f32 %v6140_v41, %v3311_v40  ;;  %v3336_v50 = vmul.f32 %v6140_v41, %v3316_v39  ;;  %v5839_v39 = vpack.c.bf16 %v3625_v36, %v3622_v35  ;;  %v5841_v40 = vpack.c.bf16 %v3632_v38, %v3629_v37  ;;  %v3643_v41 = vld [vmem:[#allocation10 + $0x738] sm:$0xff]  ;;  %v3480_v35 = vld [vmem:[#allocation10 + $0x220] sm:$0xff] }
 0x4bb   : > { %v6938_v9 = vmul.f32 %v6142_v0, %v3312_v46  ;;  %v6940_v10 = vmul.f32 %v6142_v0, %v3317_v48  ;;  %v3635_v46 = vld [vmem:[#allocation10 + $0x6f8] sm:$0xff]  ;;  %v3638_v48 = vld [vmem:[#allocation10 + $0x710] sm:$0xff]  ;;  %v3358_v0 = vsub.s32 4, %v6862_v19  ;;  %v3432_v38 = vld [vmem:[#allocation10 + $0xa0] sm:$0xff] }
 0x4bc   : > { %v3368_v3 = vmul.f32 %v3355_v52, %v3331_v1  ;;  %v3373_v11 = vmul.f32 %v3355_v52, %v3336_v50  ;;  %v5845_v57 = vpack.c.bf16 %v3638_v48, %v3635_v46  ;;  %v3640_v52 = vld [vmem:[#allocation10 + $0x720] sm:$0xff]  ;;  %v3647_v1 = vld [vmem:[#allocation10 + $0x758] sm:$0xff]  ;;  %v3438_v46 = vld [vmem:[#allocation10 + $0xd0] sm:$0xff] }
 0x4bd   : > { %v5851_v50 = vpack.c.bf16 %v3643_v41, %v3640_v52  ;;  %v3359_v8 = vrot.slane %v6867_v22, %v3358_v0  ;;  %v3483_v36 = vld [vmem:[#allocation10 + $0x238] sm:$0xff]  ;;  %v3441_v48 = vld [vmem:[#allocation10 + $0xe8] sm:$0xff]  ;;  %v3450_v41 = vld [vmem:[#allocation10 + $0x130] sm:$0xff] }
 0x4be   : > { %v6942_v13 = vadd.f32 %v3392_v4, %v3368_v3  ;;  %v6948_v2 = vadd.f32 %v3392_v4, %v3373_v11  ;;  %v3650_v4 = vld [vmem:[#allocation10 + $0x770] sm:$0xff]  ;;  %v3465_v11 = vld [vmem:[#allocation10 + $0x1a8] sm:$0xff]  ;;  %v5869_v37 = vpack.c.bf16 %v3483_v36, %v3480_v35  ;;  %v5875_v58 = vpack.c.bf16 %v3441_v48, %v3438_v46  ;;  %v3528_v35 = vld [vmem:[#allocation10 + $0x3a0] sm:$0xff] }
 0x4bf   : > { %v5853_v7 = vpack.c.bf16 %v3650_v4, %v3647_v1  ;;  %v3462_v3 = vld [vmem:[#allocation10 + $0x190] sm:$0xff]  ;;  %v3369_v21 = vmul.f32 %v3359_v8, %v6938_v9  ;;  %v3374_v22 = vmul.f32 %v3359_v8, %v6940_v10  ;;  %v3504_v1 = vld [vmem:[#allocation10 + $0x2e0] sm:$0xff]  ;;  %v3507_v4 = vld [vmem:[#allocation10 + $0x2f8] sm:$0xff] }
 0x4c0   : > { %3810 = vmatprep.mubr.f32.mxu1 %v6942_v13  ;;  %v5857_v19 = vpack.c.bf16 %v3465_v11, %v3462_v3  ;;  %v3558_v8 = vld [vmem:[#allocation10 + $0x490] sm:$0xff]  ;;  %v3561_v3 = vld [vmem:[#allocation10 + $0x4a8] sm:$0xff]  ;;  %v5887_v11 = vpack.c.bf16 %v3459_v63, %v3456_v6 }
 0x4c1   : > { %3811 = vmatmul.mubr.f32.vlgmr.msra.gmra.mrb[8].mxu1 %v6944_v15  ;;  %v3582_v36 = vld [vmem:[#allocation10 + $0x550] sm:$0xff]  ;;  %v3597_v48 = vld [vmem:[#allocation10 + $0x5c8] sm:$0xff] }
 0x4c2   : > { %5828 = vmatpush1.bf16.msra.mxu1 %v5827_v14  ;;  %3816 = vmatprep.mubr.f32.mxu1 %v6948_v2  ;;  %v3396_v14 = vrot.slane %v6872_v23, %v3358_v0  ;;  %v3453_v0 = vld [vmem:[#allocation10 + $0x148] sm:$0xff]  ;;  %v3594_v46 = vld [vmem:[#allocation10 + $0x5b0] sm:$0xff] }
 0x4c3   : > { %5830 = vmatprep.subr.bf16.mxu1 %v5829_v62  ;;  %v3414_v62 = vld [vmem:[#allocation10 + $0x10] sm:$0xff] }
 0x4c4   : > { %v5859_v24 = vpack.c.bf16 %v3417_v44, %v3414_v62  ;;  %v6960_v25 = vadd.f32 %v3396_v14, %v3369_v21  ;;  %v6965_v9 = vadd.f32 %v3396_v14, %v3374_v22  ;;  %v3510_v21 = vld [vmem:[#allocation10 + $0x310] sm:$0xff]  ;;  %v3513_v14 = vld [vmem:[#allocation10 + $0x328] sm:$0xff]  ;;  %v3567_v62 = vld [vmem:[#allocation10 + $0x4d8] sm:$0xff] }
 0x4c5   : > { %3817 = vmatmul.mubr.f32.gmra.mrb[10].mxu1 %v6952_v27  ;;  %v5891_v44 = vpack.c.bf16 %v3513_v14, %v3510_v21  ;;  %v3570_v22 = vld [vmem:[#allocation10 + $0x4f0] sm:$0xff] }
 0x4c6   : > { %5832 = vmatpush1.bf16.msra.mxu1 %v5831_v26  ;;  %3887 = vmatprep.mubr.f32.mxu1 %v6437_v33  ;;  %v5861_v26 = vpack.c.bf16 %v3471_v18, %v3468_v61  ;;  %v3516_v18 = vld [vmem:[#allocation10 + $0x340] sm:$0xff]  ;;  %v3618_v63 = vld [vmem:[#allocation10 + $0x670] sm:$0xff] }
 0x4c7   : > { %5834 = vmatprep.subr.bf16.mxu1 %v5833_v28  ;;  %v3420_v28 = vld [vmem:[#allocation10 + $0x40] sm:$0xff]  ;;  %v3630_v14 = vld [vmem:[#allocation10 + $0x6d0] sm:$0xff] }
 0x4c8   : > { %v5863_v23 = vpack.c.bf16 %v3423_v29, %v3420_v28 }
 0x4ca   : > { %5836 = vmatpush1.bf16.msra.mxu1 %v5835_v32  ;;  %v3426_v32 = vld [vmem:[#allocation10 + $0x70] sm:$0xff] }
 0x4cb   : > { %5838 = vmatprep.subr.bf16.mxu1 %v5837_v34  ;;  %v3429_v34 = vld [vmem:[#allocation10 + $0x88] sm:$0xff] }
 0x4cc   : > { %v5867_v10 = vpack.c.bf16 %v3429_v34, %v3426_v32  ;;  %v5899_v32 = vpack.c.bf16 %v3525_v30, %v3522_v47 }
 0x4ce   : > { %5840 = vmatpush1.bf16.msra.mxu1 %v5839_v39  ;;  %v3435_v39 = vld [vmem:[#allocation10 + $0xb8] sm:$0xff] }
 0x4cf   : > { %5842 = vmatprep.subr.bf16.mxu1 %v5841_v40  ;;  %v3489_v40 = vld [vmem:[#allocation10 + $0x268] sm:$0xff]  ;;  %v5871_v42 = vpack.c.bf16 %v3435_v39, %v3432_v38  ;;  %v3534_v38 = vld [vmem:[#allocation10 + $0x3d0] sm:$0xff] }
 0x4d0   : > { %v3537_v39 = vld [vmem:[#allocation10 + $0x3e8] sm:$0xff] }
 0x4d2   : > { %5844 = vmatpush1.bf16.msra.mxu1 %v5843_v49  ;;  %v3492_v49 = vld [vmem:[#allocation10 + $0x280] sm:$0xff] }
 0x4d3   : > { %5846 = vmatprep.subr.bf16.mxu1 %v5845_v57  ;;  %v3495_v57 = vld [vmem:[#allocation10 + $0x298] sm:$0xff] }
 0x4d4   : > { %v5877_v16 = vpack.c.bf16 %v3495_v57, %v3492_v49  ;;  %v5913_v57 = vpack.c.bf16 %v3597_v48, %v3594_v46 }
 0x4d6   : > { %5848 = vmatpush1.bf16.msra.mxu1 %v5847_v17  ;;  %v3501_v17 = vld [vmem:[#allocation10 + $0x2c8] sm:$0xff] }
 0x4d7   : > { %5850 = vmatprep.subr.bf16.mxu1 %v5849_v56  ;;  %v5881_v52 = vpack.c.bf16 %v3501_v17, %v3498_v59 }
 0x4da   : > { %5852 = vmatpush1.bf16.msra.mxu1 %v5851_v50  ;;  %v5883_v50 = vpack.c.bf16 %v3453_v0, %v3450_v41  ;;  %v3606_v41 = vld [vmem:[#allocation10 + $0x610] sm:$0xff]  ;;  %v3609_v0 = vld [vmem:[#allocation10 + $0x628] sm:$0xff] }
 0x4db   : > { %5854 = vmatprep.subr.bf16.mxu1 %v5853_v7  ;;  %v5885_v7 = vpack.c.bf16 %v3507_v4, %v3504_v1  ;;  %v5921_v4 = vpack.c.bf16 %v3609_v0, %v3606_v41 }
 0x4de   : > { %5856 = vmatpush1.bf16.msra.mxu1 %v5855_v12  ;;  %v5889_v12 = vpack.c.bf16 %v3561_v3, %v3558_v8  ;;  %v3621_v8 = vld [vmem:[#allocation10 + $0x688] sm:$0xff] }
 0x4df   : > { %5858 = vmatprep.subr.bf16.mxu1 %v5857_v19  ;;  %v3564_v19 = vld [vmem:[#allocation10 + $0x4c0] sm:$0xff]  ;;  %v5929_v3 = vpack.c.bf16 %v3621_v8, %v3618_v63 }
 0x4e0   : > { %v5893_v61 = vpack.c.bf16 %v3567_v62, %v3564_v19  ;;  %v3633_v19 = vld [vmem:[#allocation10 + $0x6e8] sm:$0xff] }
 0x4e1   : > { %3888 = vmatmul.mubr.f32.vlgmr.msra.gmra.mrb[8].mxu1 %v6960_v25  ;;  %v5937_v62 = vpack.c.bf16 %v3633_v19, %v3630_v14 }
 0x4e2   : > { %5860 = vmatpush3.bf16.msra.mxu1 %v5859_v24  ;;  %3893 = vmatprep.mubr.f32.mxu1 %v6437_v33  ;;  %v3486_v33 = vld [vmem:[#allocation10 + $0x250] sm:$0xff]  ;;  %v3519_v24 = vld [vmem:[#allocation10 + $0x358] sm:$0xff] }
 0x4e3   : > { %5862 = vmatprep.subr.bf16.mxu1 %v5861_v26  ;;  %v5873_v43 = vpack.c.bf16 %v3489_v40, %v3486_v33  ;;  %v3573_v26 = vld [vmem:[#allocation10 + $0x508] sm:$0xff]  ;;  %v5895_v28 = vpack.c.bf16 %v3519_v24, %v3516_v18  ;;  %v3588_v33 = vld [vmem:[#allocation10 + $0x580] sm:$0xff]  ;;  %v3591_v40 = vld [vmem:[#allocation10 + $0x598] sm:$0xff] }
 0x4e4   : > { %v5897_v29 = vpack.c.bf16 %v3573_v26, %v3570_v22  ;;  %v3645_v18 = vld [vmem:[#allocation10 + $0x748] sm:$0xff]  ;;  %v3648_v24 = vld [vmem:[#allocation10 + $0x760] sm:$0xff] }
 0x4e5   : > { %3894 = vmatmul.mubr.f32.gmra.mrb[10].mxu1 %v6965_v9  ;;  %v3652_v26 = vld [vmem:[#allocation11] sm:$0x7] }
 0x4e6   : > { %5864 = vmatpush3.bf16.msra.mxu1 %v5863_v23  ;;  %3964 = vmatprep.mubr.f32.mxu1 %v6889_v53  ;;  %v3444_v53 = vld [vmem:[#allocation10 + $0x100] sm:$0xff] }
 0x4e7   : > { %5866 = vmatprep.subr.bf16.mxu1 %v5865_v31  ;;  %v5879_v56 = vpack.c.bf16 %v3447_v51, %v3444_v53  ;;  %v3576_v23 = vld [vmem:[#allocation10 + $0x520] sm:$0xff]  ;;  %v3579_v31 = vld [vmem:[#allocation10 + $0x538] sm:$0xff] }
 0x4e8   : > { %v5901_v34 = vpack.c.bf16 %v3579_v31, %v3576_v23  ;;  %v3600_v53 = vld [vmem:[#allocation10 + $0x5e0] sm:$0xff]  ;;  %v3603_v51 = vld [vmem:[#allocation10 + $0x5f8] sm:$0xff] }
 0x4e9   : > { %v5917_v17 = vpack.c.bf16 %v3603_v51, %v3600_v53 }
 0x4ea   : > { %5868 = vmatpush3.bf16.msra.mxu1 %v5867_v10 }
 0x4eb   : > { %5870 = vmatprep.subr.bf16.mxu1 %v5869_v37 }
 0x4ee   : > { %5872 = vmatpush3.bf16.msra.mxu1 %v5871_v42  ;;  %v5909_v42 = vpack.c.bf16 %v3591_v40, %v3588_v33 }
 0x4ef   : > { %5874 = vmatprep.subr.bf16.mxu1 %v5873_v43  ;;  %v3543_v43 = vld [vmem:[#allocation10 + $0x418] sm:$0xff] }
 0x4f2   : > { %5876 = vmatpush3.bf16.msra.mxu1 %v5875_v58  ;;  %v3546_v58 = vld [vmem:[#allocation10 + $0x430] sm:$0xff] }
 0x4f3   : > { %5878 = vmatprep.subr.bf16.mxu1 %v5877_v16  ;;  %v3549_v16 = vld [vmem:[#allocation10 + $0x448] sm:$0xff] }
 0x4f4   : > { %v5915_v59 = vpack.c.bf16 %v3549_v16, %v3546_v58 }
 0x4f6   : > { %5880 = vmatpush3.bf16.msra.mxu1 %v5879_v56  ;;  %v3552_v56 = vld [vmem:[#allocation10 + $0x460] sm:$0xff] }
 0x4f7   : > { %5882 = vmatprep.subr.bf16.mxu1 %v5881_v52  ;;  %v3555_v52 = vld [vmem:[#allocation10 + $0x478] sm:$0xff] }
 0x4f8   : > { %v5919_v1 = vpack.c.bf16 %v3555_v52, %v3552_v56 }
 0x4fa   : > { %5884 = vmatpush3.bf16.msra.mxu1 %v5883_v50  ;;  %v3612_v50 = vld [vmem:[#allocation10 + $0x640] sm:$0xff] }
 0x4fb   : > { %5886 = vmatprep.subr.bf16.mxu1 %v5885_v7  ;;  %v3615_v7 = vld [vmem:[#allocation10 + $0x658] sm:$0xff] }
 0x4fc   : > { %v5925_v6 = vpack.c.bf16 %v3615_v7, %v3612_v50 }
 0x4fe   : > { %5888 = vmatpush3.bf16.msra.mxu1 %v5887_v11  ;;  %v3624_v11 = vld [vmem:[#allocation10 + $0x6a0] sm:$0xff] }
 0x4ff   : > { %5890 = vmatprep.subr.bf16.mxu1 %v5889_v12  ;;  %v3627_v12 = vld [vmem:[#allocation10 + $0x6b8] sm:$0xff] }
 0x500   : > { %v5933_v21 = vpack.c.bf16 %v3627_v12, %v3624_v11 }
 0x501   : > { %3965 = vmatmul.mubr.f32.vlgmr.msra.gmra.mrb[12].mxu1 %v6891_v55  ;;  %v3531_v55 = vld [vmem:[#allocation10 + $0x3b8] sm:$0xff] }
 0x502   : > { %3969 = vmatprep.mubr.f32.mxu1 %v6894_v60  ;;  %5892 = vmatpush3.bf16.msra.mxu1 %v5891_v44  ;;  %v3585_v60 = vld [vmem:[#allocation10 + $0x568] sm:$0xff]  ;;  %v5903_v10 = vpack.c.bf16 %v3531_v55, %v3528_v35  ;;  %v3639_v44 = vld [vmem:[#allocation10 + $0x718] sm:$0xff] }
 0x503   : > { %5894 = vmatprep.subr.bf16.mxu1 %v5893_v61  ;;  %v5905_v37 = vpack.c.bf16 %v3585_v60, %v3582_v36  ;;  %v3642_v61 = vld [vmem:[#allocation10 + $0x730] sm:$0xff] }
 0x505   : > { %3970 = vmatmul.mubr.f32.gmra.mrb[14].mxu1 %v6898_v45  ;;  %v5907_v45 = vpack.c.bf16 %v3537_v39, %v3534_v38 }
 0x506   : > { %5896 = vmatpush3.bf16.msra.mxu1 %v5895_v28  ;;  %4039 = vmatprep.mubr.f32.mxu1 %v6942_v13  ;;  %v3540_v13 = vld [vmem:[#allocation10 + $0x400] sm:$0xff]  ;;  %v3657_v28 = vrot.slane %v3652_v26, %v6870_v5 }
 0x507   : > { %5898 = vmatprep.subr.bf16.mxu1 %v5897_v29  ;;  %v5911_v49 = vpack.c.bf16 %v3543_v43, %v3540_v13  ;;  %v3661_v29 = vrot.slane %v3652_v26, %v6865_v20 }
 0x50a   : > { %5900 = vmatpush3.bf16.msra.mxu1 %v5899_v32 }
 0x50b   : > { %5902 = vmatprep.subr.bf16.mxu1 %v5901_v34 }
 0x50e   : > { %5904 = vmatpush3.bf16.msra.mxu1 %v5903_v10 }
 0x50f   : > { %5906 = vmatprep.subr.bf16.mxu1 %v5905_v37  ;;  %v3665_v37 = vrot.slane %v3652_v26, %v6928_v54 }
 0x512   : > { %5908 = vmatpush3.bf16.msra.mxu1 %v5907_v45 }
 0x513   : > { %5910 = vmatprep.subr.bf16.mxu1 %v5909_v42 }
 0x516   : > { %5912 = vmatpush3.bf16.msra.mxu1 %v5911_v49 }
 0x517   : > { %5914 = vmatprep.subr.bf16.mxu1 %v5913_v57 }
 0x51a   : > { %5916 = vmatpush3.bf16.msra.mxu1 %v5915_v59 }
 0x51b   : > { %5918 = vmatprep.subr.bf16.mxu1 %v5917_v17 }
 0x51e   : > { %5920 = vmatpush3.bf16.msra.mxu1 %v5919_v1 }
 0x51f   : > { %5922 = vmatprep.subr.bf16.mxu1 %v5921_v4 }
 0x521   : > { %4040 = vmatmul.mubr.f32.vlgmr.msra.gmra.mrb[16].mxu1 %v6944_v15  ;;  %v3636_v15 = vld [vmem:[#allocation10 + $0x700] sm:$0xff] }
 0x522   : > { %4044 = vmatprep.mubr.f32.mxu1 %v6948_v2  ;;  %5924 = vmatpush3.bf16.msra.mxu1 %v5921_v4  ;;  %v5941_v2 = vpack.c.bf16 %v3639_v44, %v3636_v15 }
 0x523   : > { %5926 = vmatprep.subr.bf16.mxu1 %v5925_v6 }
 0x525   : > { %4045 = vmatmul.mubr.f32.gmra.mrb[18].mxu1 %v6952_v27  ;;  %v5945_v27 = vpack.c.bf16 %v3645_v18, %v3642_v61 }
 0x526   : > { %5928 = vmatpush3.bf16.msra.mxu1 %v5925_v6  ;;  %4414 = vmatprep.mubr.f32.mxu1 %v6960_v25  ;;  %v3651_v25 = vld [vmem:[#allocation10 + $0x778] sm:$0xff] }
 0x527   : > { %5930 = vmatprep.subr.bf16.mxu1 %v5929_v3  ;;  %v5949_v22 = vpack.c.bf16 %v3651_v25, %v3648_v24 }
 0x52a   : > { %5932 = vmatpush3.bf16.msra.mxu1 %v5929_v3 }
 0x52b   : > { %5934 = vmatprep.subr.bf16.mxu1 %v5933_v21 }
 0x52e   : > { %5936 = vmatpush3.bf16.msra.mxu1 %v5933_v21 }
 0x52f   : > { %5938 = vmatprep.subr.bf16.mxu1 %v5937_v62 }
 0x532   : > { %5940 = vmatpush3.bf16.msra.mxu1 %v5937_v62 }
 0x533   : > { %5942 = vmatprep.subr.bf16.mxu1 %v5941_v2 }
 0x536   : > { %5944 = vmatpush3.bf16.msra.mxu1 %v5941_v2 }
 0x537   : > { %5946 = vmatprep.subr.bf16.mxu1 %v5945_v27 }
 0x53a   : > { %5948 = vmatpush3.bf16.msra.mxu1 %v5945_v27 }
 0x53b   : > { %5950 = vmatprep.subr.bf16.mxu1 %v5949_v22 }
 0x53e   : > { %5952 = vmatpush3.bf16.msra.mxu1 %v5949_v22 }
 0x541   : > { %4415 = vmatmul.mubr.f32.vlgmr.msra.gmra.mrb[20].mxu1 %v6965_v9 }
 0x5b4   : > { %v3889_v47 = vpop.f32.mrb[8].mxu1 }
 0x5b5   : > { %v5953_v30 = vadd.f32 %v3889_v47, %v3657_v28  ;;  %v3891_v23 = vpop.f32.mrb[9].mxu1 }
 0x5b6   : > { %v5954_v31 = vadd.f32 %v3891_v23, %v3661_v29 }
 0x5b7   : > { %4125 = vst [vmem:[%s6981_s14] sm:$0xff] %v5953_v30 }
 0x5b8   : > { %4126 = vst [vmem:[%s6981_s14 + $0x8] sm:$0xff] %v5954_v31  ;;  %v3895_v32 = vpop.f32.mrb[10].mxu1 }
 0x5b9   : > { %v5955_v9 = vadd.f32 %v3895_v32, %v3657_v28  ;;  %v3897_v34 = vpop.f32.mrb[11].mxu1 }
 0x5ba   : > { %v5956_v35 = vadd.f32 %v3897_v34, %v3661_v29 }
 0x5bb   : > { %4128 = vst [vmem:[%s6981_s14 + $0x18] sm:$0xff] %v5955_v9 }
 0x5bc   : > { %4129 = vst [vmem:[%s6981_s14 + $0x20] sm:$0xff] %v5956_v35 }
 0x5d4   : > { %v4320_v5 = vpop.f32.mrb[12].mxu1 }
 0x5d5   : > { %v4321_v20 = vpop.f32.mrb[13].mxu1 }
 0x5d6   : > { %v4322_v55 = vadd.f32 %v4321_v20, %v4320_v5 }
 0x5d8   : > { %v4323_v36 = vpop.f32.mrb[14].mxu1  ;;  %v3967_v33 = vadd.f32 %v4322_v55, %v3665_v37 }
 0x5d9   : > { %v4324_v60 = vpop.f32.mrb[15].mxu1 }
 0x5da   : > { %v4325_v10 = vadd.f32 %v4324_v60, %v4323_v36 }
 0x5dc   : > { %v3972_v43 = vadd.f32 %v4325_v10, %v3665_v37 }
 0x5f4   : > { %v4358_v38 = vpop.f32.mrb[16].mxu1 }
 0x5f5   : > { %v4359_v39 = vpop.f32.mrb[17].mxu1 }
 0x5f6   : > { %v4360_v40 = vadd.f32 %v4359_v39, %v4358_v38 }
 0x5f8   : > { %v4361_v45 = vpop.f32.mrb[18].mxu1  ;;  %v4042_v42 = vadd.f32 %v4360_v40, %v3967_v33 }
 0x5f9   : > { %v4362_v13 = vpop.f32.mrb[19].mxu1 }
 0x5fa   : > { %v4363_v46 = vadd.f32 %v4362_v13, %v4361_v45 }
 0x5fc   : > { %v4047_v48 = vadd.f32 %v4363_v46, %v3972_v43 }
 0x614   : > { %v4416_v54 = vpop.f32.mrb[20].mxu1 }
 0x615   : > { %v4122_v49 = vadd.f32 %v4416_v54, %v4047_v48  ;;  %v4116_v57 = vpop.f32.mrb[21].mxu1 }
 0x616   : > { %v4117_v58 = vadd.f32 %v4116_v57, %v4042_v42 }
 0x617   : > { %4130 = vst [vmem:[%s6981_s14 + $0x28] sm:$0xff] %v4122_v49 }
 0x618   : > { %4127 = vst [vmem:[%s6981_s14 + $0x10] sm:$0xff] %v4117_v58 }
 0x619   : > { %6358 = shalt.err (!%p6355_p8)
}
 0x61a   : > { %s6359_s20 = scalar_lea.hbm %s6995_s29, 768  ;;  %s6363_s28 = scalar_lea.hbm %s7047_s6, 1536 }
 0x61b   : > { %p6360_p6 = scmp.ne.s32.totalorder %s6995_s29, %s6359_s20  ;;  %p6364_p3 = scmp.lt.u32.totalorder %s6995_s29, %s7047_s6 }
 0x61c   : > { %p6365_p5 = scmp.lt.u32.totalorder %s6363_s28, %s6359_s20  ;;  %p6367_p7 = scmp.lt.u32.totalorder %s6359_s20, %s6995_s29 }
 0x61d   : > { %p6361_p10 = pnand %p6360_p6, %p7066_p4 }
 0x61e   : > { %p6366_p9 = por %p6365_p5, %p6364_p3 }
 0x61f   : > { %p6362_p11 = pneg %p6361_p10 }
 0x620   : > { %p6368_p12 = por %p6367_p7, %p6366_p9 }
 0x622   : > { %p6369_p1 = pnand %p6368_p12, %p6362_p11 }
 0x624   : > { %6372 = shalt.err (!%p6369_p1)
}
 0x625   : > { %s6439_s9 = smov 384   ;;  %s6440_s11 = smov 24  }
 0x626   : > { %6049 = dma.vmem_to_hbm [thread:$0]  (%p7066_p4), %s6990_s8, 768, %s6995_s29, %s4132_s17, %s6439_s9, %s6439_s9, %s6440_s11  }
 0x627 PF: > { %s4160_s12 = sand.u32 1, %s6411_s21   ;;  %p7067_p13 = scmp.ne.s32.totalorder %s7057_s18, 0 }
 0x628   : > { %p7068_p0 = scmp.ge.s32.totalorder %s6423_s24, 2  ;;  %s4161_s27 = scalar_lea.sflag [#allocation4], %s4160_s12 }
 0x62a   : > { %p6072_p2 = pnand %p7068_p0, %p7067_p13 }
 0x62c   : > { %6406 = dma.done.wait (!%p6072_p2), %s4161_s27, 768  }
 0x62d   : > { %6408 = vsyncadd (!%p6072_p2), %s4161_s27, 4294966528  ;;  %p22_p8 = scmp.ge.s32.totalorder %s6636_s7, 4   ;;  %s7069_s21 = smov %s6415_s22 }
 0x62e   : > { %s7070_s22 = smov %s6419_s23  ;;  %s7071_s23 = smov %s6648_s13 }
 0x62f   : > { %s7072_s24 = smov %s6636_s7  ;;  %24 = sbr.rel (!%p22_p8) target bundleno = 8 (0x8), region = 109 }
 0x636   :  { %4166 = vsyncpa [#allocation3], 1 }
 0x637   :  { %4168 = vsyncpa [#allocation3 + $0x1], 1 }
 0x638   :  { %4169 = vsyncpa [#allocation6], 1 }
 0x639   :  { %4170 = vsyncpa [#allocation9], 1 }
 0x63a   :  { %4171 = vsyncpa [#allocation12], 1 }
 0x63b   :  { %4172 = vsyncpa [#allocation4], 1 }
 0x63c   :  { %4174 = vsyncpa [#allocation4 + $0x1], 1 }

</bundles_post_ra>
